<compile_context>
chip_gen: v7x
topology: tpu7x:2x2x1
jax: 0.10.0
libtpu: 0.0.40
codegen_flags: <defaults>
</compile_context>

<pallas_src>
import functools

import jax
import jax.numpy as jnp
from jax.experimental import pallas as pl
from jax.experimental.pallas import tpu as pltpu


def _round_up(x, m):
    return (x + m - 1) // m * m


def _cdiv(a, b):
    return -(-a // b)


# ----------------------------- Pallas kernels ------------------------------

def _mm_kernel(a_ref, b_ref, o_ref, acc_ref):
    """Grouped matmul: grid = (G, Mt, Nt, Kt), K innermost (accumulator)."""
    @pl.when(pl.program_id(3) == 0)
    def _():
        acc_ref[...] = jnp.zeros_like(acc_ref)

    acc_ref[...] += jnp.dot(a_ref[...], b_ref[...],
                            preferred_element_type=jnp.float32)

    @pl.when(pl.program_id(3) == pl.num_programs(3) - 1)
    def _():
        o_ref[...] = acc_ref[...].astype(o_ref.dtype)


def batched_matmul(a, b):
    """a: (G, M, K), b: (G, K, N) -> (G, M, N) float32.

    Operands are cast to bf16 (MXU native) with f32 accumulation.  Tile sizes
    are chosen per call; K padding only up to the next 128 multiple.
    """
    G, M, K = a.shape
    _, _, N = b.shape

    # --- per-layer K tiling: avoid padding small K up to a big fixed tk ------
    Kp0 = _round_up(K, 128)
    ksteps = _cdiv(Kp0, 2048)                 # cap tk at 2048 (bf16, VMEM-safe)
    tk = _round_up(_cdiv(Kp0, ksteps), 128)
    Kp = tk * ksteps

    # --- per-layer M tiling: big tiles for large-M / small-K layers ----------
    tm_cap = 1024 if Kp <= 1024 else 512
    tm = min(tm_cap, _round_up(M, 8))
    Mp = _round_up(M, tm)

    tn = 128
    Np = _round_up(N, tn)

    def _pad_to(x, shape):
        pads = [(0, t - s) for s, t in zip(x.shape, shape)]
        return jnp.pad(x, pads) if any(p[1] for p in pads) else x

    a_p = _pad_to(a.astype(jnp.bfloat16), (G, Mp, Kp))
    b_p = _pad_to(b.astype(jnp.bfloat16), (G, Kp, Np))

    out = pl.pallas_call(
        _mm_kernel,
        out_shape=jax.ShapeDtypeStruct((G, Mp, Np), jnp.float32),
        grid_spec=pltpu.PrefetchScalarGridSpec(
            num_scalar_prefetch=0,
            grid=(G, Mp // tm, Np // tn, Kp // tk),
            in_specs=[pl.BlockSpec((None, tm, tk), lambda g, i, j, k: (g, i, k)),
                      pl.BlockSpec((None, tk, tn), lambda g, i, j, k: (g, k, j))],
            out_specs=pl.BlockSpec((None, tm, tn), lambda g, i, j, k: (g, i, j)),
            scratch_shapes=[pltpu.VMEM((tm, tn), jnp.float32)]),
        compiler_params=pltpu.CompilerParams(
            dimension_semantics=("parallel", "parallel", "parallel", "arbitrary"),
            vmem_limit_bytes=32 * 1024 * 1024),   # safe on v5e/v6e/v7x
    )(a_p, b_p)
    return out[:, :M, :N]


def _affine_act_kernel(x_ref, s_ref, b_ref, o_ref, *, act):
    y = x_ref[...] * s_ref[...] + b_ref[...]
    if act == "relu":
        y = jnp.maximum(y, 0.0)
    elif act == "sigmoid":
        y = 1.0 / (1.0 + jnp.exp(-y))
    o_ref[...] = y


def affine_act(y2d, scale, bias, act):
    """act(y * scale[c] + bias[c]) on a channel-last (M, C) array.

    When C divides 128 the data is viewed as a lane-dense (rows, 128) slab with
    a lane-tiled scale/bias row, so no channel padding / wasted HBM traffic.
    """
    M, C = y2d.shape
    scale = scale.astype(jnp.float32)
    bias = bias.astype(jnp.float32)
    kern = functools.partial(_affine_act_kernel, act=act)

    if 128 % C == 0:
        rep = 128 // C
        s_row = jnp.tile(scale, rep).reshape(1, 128)
        b_row = jnp.tile(bias, rep).reshape(1, 128)
        total = M * C
        rows = _cdiv(total, 128)
        tr = min(1024, _round_up(rows, 8))
        rows_p = _round_up(rows, tr)
        flat = y2d.reshape(-1)
        if rows_p * 128 != total:
            flat = jnp.pad(flat, (0, rows_p * 128 - total))
        x2 = flat.reshape(rows_p, 128)
        out = pl.pallas_call(
            kern,
            out_shape=jax.ShapeDtypeStruct((rows_p, 128), jnp.float32),
            grid=(rows_p // tr,),
            in_specs=[pl.BlockSpec((tr, 128), lambda i: (i, 0)),
                      pl.BlockSpec((1, 128), lambda i: (0, 0)),
                      pl.BlockSpec((1, 128), lambda i: (0, 0))],
            out_specs=pl.BlockSpec((tr, 128), lambda i: (i, 0)),
        )(x2, s_row, b_row)
        return out.reshape(-1)[:total].reshape(M, C)

    # Fallback (not hit by this module): full-channel blocks.
    tr = min(1024, _round_up(M, 8))
    Mp = _round_up(M, tr)
    xp = y2d if Mp == M else jnp.pad(y2d, ((0, Mp - M), (0, 0)))
    out = pl.pallas_call(
        kern,
        out_shape=jax.ShapeDtypeStruct((Mp, C), jnp.float32),
        grid=(Mp // tr,),
        in_specs=[pl.BlockSpec((tr, C), lambda i: (i, 0)),
                  pl.BlockSpec((1, C), lambda i: (0, 0)),
                  pl.BlockSpec((1, C), lambda i: (0, 0))],
        out_specs=pl.BlockSpec((tr, C), lambda i: (i, 0)),
    )(xp, scale.reshape(1, C), bias.reshape(1, C))
    return out[:M]


# ------------------------- conv-transpose layers ---------------------------

def conv_transpose3d_s2k4p1(x_cl, w):
    """ConvTranspose3d(kernel=4, stride=2, padding=1) on channel-last input.

    Decomposed into 8 stride-parity sub-convolutions (2x2x2 taps each) that run
    as one grouped Pallas matmul; results are interleaved back channel-last.
    Weight layout is PyTorch's (Cin, Cout, 4, 4, 4).  (Bias handled by caller.)
    """
    N, D, H, W, Cin = x_cl.shape
    Cout = w.shape[1]
    xe = jnp.pad(x_cl, ((0, 0), (1, 1), (1, 1), (1, 1), (0, 0)))

    groups, mats = [], []
    for pd in (0, 1):
        for ph in (0, 1):
            for pw in (0, 1):
                taps, tapw = [], []
                for td in (0, 1):
                    for th in (0, 1):
                        for tw in (0, 1):
                            taps.append(
                                xe[:, pd + td:pd + td + D,
                                      ph + th:ph + th + H,
                                      pw + tw:pw + tw + W, :])
                            tapw.append(
                                w[:, :, 3 - 2 * td - pd,
                                         3 - 2 * th - ph,
                                         3 - 2 * tw - pw])
                groups.append(jnp.concatenate(taps, axis=-1)
                              .reshape(N * D * H * W, 8 * Cin))
                mats.append(jnp.concatenate(tapw, axis=0))      # (8*Cin, Cout)

    A8 = jnp.stack(groups, 0)                                   # (8, M, 8*Cin)
    B8 = jnp.stack(mats, 0)                                     # (8, 8*Cin, Cout)
    Y = batched_matmul(A8, B8)                                  # (8, M, Cout)

    Y = Y.reshape(2, 2, 2, N, D, H, W, Cout)
    Y = jnp.transpose(Y, (3, 4, 0, 5, 1, 6, 2, 7))
    return Y.reshape(N, 2 * D, 2 * H, 2 * W, Cout)


def conv_transpose3d_s1(x_cl, w, padding):
    """Stride-1 ConvTranspose3d on channel-last input (= conv w/ flipped kernel)."""
    Cin, Cout, Kd, Kh, Kw = w.shape
    pd_, ph_, pw_ = padding
    ad, ah, aw = Kd - 1 - pd_, Kh - 1 - ph_, Kw - 1 - pw_
    xe = jnp.pad(x_cl, ((0, 0), (ad, ad), (ah, ah), (aw, aw), (0, 0)))
    N, De, He, We, _ = xe.shape
    OD, OH, OW = De - Kd + 1, He - Kh + 1, We - Kw + 1

    taps = []
    for td in range(Kd):
        for th in range(Kh):
            for tw in range(Kw):
                taps.append(xe[:, td:td + OD, th:th + OH, tw:tw + OW, :])
    A = jnp.concatenate(taps, axis=-1).reshape(N * OD * OH * OW, Kd * Kh * Kw * Cin)

    wc = jnp.flip(w, axis=(2, 3, 4))                            # (Cin,Cout,Kd,Kh,Kw)
    B = jnp.transpose(wc, (2, 3, 4, 0, 1)).reshape(Kd * Kh * Kw * Cin, Cout)

    Y = batched_matmul(A[None], B[None])[0]                     # (M, Cout)
    return Y.reshape(N, OD, OH, OW, Cout)


def batchnorm_relu_cl(h, gamma, beta, eps=1e-5):
    """Train-mode BatchNorm3d + ReLU on a channel-last tensor.

    Per-channel batch stats are a tiny fused XLA reduction over the already
    channel-last (M, C) conv output; the affine+ReLU runs in a lane-dense
    Pallas kernel (no NCDHW transpose, no channel padding).
    """
    shp = h.shape
    C = shp[-1]
    y = h.reshape(-1, C)
    n = y.shape[0]
    s1 = jnp.sum(y, axis=0)
    s2 = jnp.sum(y * y, axis=0)
    mean = s1 / n
    var = jnp.maximum(s2 / n - mean * mean, 0.0)
    scale = gamma * jax.lax.rsqrt(var + eps)
    bias = beta - mean * scale
    return affine_act(y, scale, bias, "relu").reshape(shp)


# ------------------------------ interpolation -------------------------------

def _linear_interp_1d(x, axis, out_size):
    in_size = x.shape[axis]
    o = jnp.arange(out_size, dtype=jnp.float32)
    src = (o + 0.5) * (in_size / out_size) - 0.5
    src = jnp.maximum(src, 0.0)                 # PyTorch align_corners=False clamp
    i0 = jnp.floor(src).astype(jnp.int32)
    w = src - i0.astype(jnp.float32)
    i0 = jnp.clip(i0, 0, in_size - 1)
    i1 = jnp.clip(i0 + 1, 0, in_size - 1)
    x0 = jnp.take(x, i0, axis=axis)
    x1 = jnp.take(x, i1, axis=axis)
    shape = [1] * x.ndim
    shape[axis] = out_size
    w = w.reshape(shape)
    return x0 * (1.0 - w) + x1 * w


def trilinear_resize_cl(x, size):
    # TODO(synk): F.interpolate(mode='trilinear', align_corners=False) kept as
    # separable plain-JAX gathers + lerps (pure data-movement glue, tiny tensors).
    for axis, s in zip((1, 2, 3), size):
        x = _linear_interp_1d(x, axis, int(s))
    return x


# ------------------------------- the module --------------------------------

def init_params(key, expansion=1):
    ks = iter(jax.random.split(key, 40))

    def conv(cin, cout, kd, kh, kw):
        fan_in = cin * kd * kh * kw
        w = jax.random.normal(next(ks), (cin, cout, kd, kh, kw),
                              jnp.float32) / jnp.sqrt(float(fan_in))
        b = 0.01 * jax.random.normal(next(ks), (cout,), jnp.float32)
        return w, b

    def bn(c):
        gamma = 1.0 + 0.1 * jax.random.normal(next(ks), (c,), jnp.float32)
        beta = 0.1 * jax.random.normal(next(ks), (c,), jnp.float32)
        return gamma, beta

    p = {}
    p["d1c1"] = conv(512 * expansion, 64, 4, 4, 4)
    p["d1bn1"] = bn(64)
    p["d1c2"] = conv(64, 64, 1, 3, 3)
    p["d1bn2"] = bn(64)
    p["d2c1"] = conv(256 * expansion + 64, 32, 4, 4, 4)
    p["d2bn1"] = bn(32)
    p["d2c2"] = conv(32, 32, 1, 3, 3)
    p["d2bn2"] = bn(32)
    p["d3c1"] = conv(128 * expansion + 32, 8, 4, 4, 4)
    p["d3bn1"] = bn(8)
    p["d3c2"] = conv(8, 8, 1, 3, 3)
    p["d3bn2"] = bn(8)
    p["outc"] = conv(8, 1, 3, 3, 3)
    return p


def forward(params, c1, c2, c3, c4, x):
    del c1  # unused by the PyTorch forward as well
    to_cl = lambda t: jnp.transpose(t, (0, 2, 3, 4, 1))
    c2l, c3l, c4l = to_cl(c2), to_cl(c3), to_cl(c4)

    # NOTE: conv biases of BN-followed layers are omitted: train-mode BatchNorm
    # subtracts the batch mean of the same tensor, so the bias cancels exactly.

    # deconv1
    h = conv_transpose3d_s2k4p1(c4l, params["d1c1"][0])
    h = batchnorm_relu_cl(h, *params["d1bn1"])
    h = conv_transpose3d_s1(h, params["d1c2"][0], (0, 1, 1))
    h = batchnorm_relu_cl(h, *params["d1bn2"])

    cat = jnp.concatenate([c3l, h], axis=-1)
    cat = trilinear_resize_cl(cat, (x.shape[2] // 8, x.shape[3] // 8, x.shape[4] // 8))

    # deconv2
    h = conv_transpose3d_s2k4p1(cat, params["d2c1"][0])
    h = batchnorm_relu_cl(h, *params["d2bn1"])
    h = conv_transpose3d_s1(h, params["d2c2"][0], (0, 1, 1))
    h = batchnorm_relu_cl(h, *params["d2bn2"])

    _c2 = trilinear_resize_cl(c2l, h.shape[1:4])
    cat = jnp.concatenate([_c2, h], axis=-1)

    # deconv3
    h = conv_transpose3d_s2k4p1(cat, params["d3c1"][0])
    h = batchnorm_relu_cl(h, *params["d3bn1"])
    h = conv_transpose3d_s1(h, params["d3c2"][0], (0, 1, 1))
    h = batchnorm_relu_cl(h, *params["d3bn2"])

    # upsample to x spatial size, final conv + (bias + sigmoid) fused kernel
    h = trilinear_resize_cl(h, x.shape[2:])
    y = conv_transpose3d_s1(h, params["outc"][0], (1, 1, 1))    # (N,D,H,W,1)
    shp = y.shape
    out = affine_act(y.reshape(-1, shp[-1]),
                     jnp.ones((shp[-1],), jnp.float32),
                     params["outc"][1], "sigmoid").reshape(shp)
    return jnp.transpose(out, (0, 4, 1, 2, 3))                  # back to NCDHW


if __name__ == "__main__":
    key = jax.random.PRNGKey(0)
    kp, k1, k2, k3, k4, kx = jax.random.split(key, 6)
    expansion = 1
    params = init_params(kp, expansion)

    B = 2
    c1 = jax.random.normal(k1, (B, 64, 8, 8, 8), jnp.float32)               # unused
    c2 = jax.random.normal(k2, (B, 128 * expansion, 8, 8, 8), jnp.float32)
    c3 = jax.random.normal(k3, (B, 256 * expansion, 4, 4, 4), jnp.float32)
    c4 = jax.random.normal(k4, (B, 512 * expansion, 2, 2, 2), jnp.float32)
    x = jax.random.normal(kx, (B, 1, 16, 16, 16), jnp.float32)

    out = jax.jit(functools.partial(forward, params))(c1, c2, c3, c4, x)
    out = jax.block_until_ready(out)
    assert out.shape == (B, 1, 16, 16, 16), out.shape
    assert bool(jnp.all(jnp.isfinite(out)))
    assert bool(jnp.all((out >= 0.0) & (out <= 1.0)))
    print("KERNEL_OK")
</pallas_src>

<mosaic_0001>
module attributes {stable_mosaic.version = 11 : i64} {
  func.func @_mm_kernel(%arg0: i32, %arg1: i32, %arg2: i32, %arg3: i32, %arg4: memref<1x16x2048xbf16, #tpu.memory_space<vmem>>, %arg5: memref<1x2048x128xbf16, #tpu.memory_space<vmem>>, %arg6: memref<1x16x128xf32, #tpu.memory_space<vmem>>, %arg7: memref<16x128xf32, #tpu.memory_space<vmem>>) attributes {dimension_semantics = [#tpu.dimension_semantics<parallel>, #tpu.dimension_semantics<parallel>, #tpu.dimension_semantics<parallel>, #tpu.dimension_semantics<arbitrary>], iteration_bounds = array<i64: 8, 1, 1, 2>, scalar_prefetch = 0 : i64, scratch_operands = 1 : i64, tpu.core_type = #tpu.core_type<tc>, window_params = [{transform_indices = @transform_0, window_bounds = array<i64: 1, 16, 2048>}, {transform_indices = @transform_1, window_bounds = array<i64: 1, 2048, 128>}, {transform_indices = @transform_2, window_bounds = array<i64: 1, 16, 128>}]} {
    %c0_i32 = arith.constant 0 : i32
    %0 = arith.cmpi eq, %arg3, %c0_i32 : i32
    %1 = arith.extui %0 : i1 to i32
    %c0_i32_0 = arith.constant 0 : i32
    %2 = arith.cmpi ne, %1, %c0_i32_0 : i32
    scf.if %2 {
      %cst_11 = arith.constant 0.000000e+00 : f32
      %14 = vector.broadcast %cst_11 : f32 to vector<16x128xf32>
      %c0_12 = arith.constant 0 : index
      %c0_13 = arith.constant 0 : index
      %15 = vector.load %arg7[%c0_12, %c0_13] : memref<16x128xf32, #tpu.memory_space<vmem>>, vector<16x128xf32>
      tpu.vector_store %arg7[%c0_12, %c0_13], %14 {strides = array<i32>} : memref<16x128xf32, #tpu.memory_space<vmem>>, vector<16x128xf32>,
    } else {
    }
    %c0 = arith.constant 0 : index
    %c0_1 = arith.constant 0 : index
    %3 = vector.load %arg7[%c0, %c0_1] : memref<16x128xf32, #tpu.memory_space<vmem>>, vector<16x128xf32>
    %c0_2 = arith.constant 0 : index
    %c0_3 = arith.constant 0 : index
    %c0_4 = arith.constant 0 : index
    %4 = vector.load %arg4[%c0_2, %c0_3, %c0_4] : memref<1x16x2048xbf16, #tpu.memory_space<vmem>>, vector<1x16x2048xbf16>
    %5 = vector.shape_cast %4 : vector<1x16x2048xbf16> to vector<16x2048xbf16>
    %c0_5 = arith.constant 0 : index
    %c0_6 = arith.constant 0 : index
    %c0_7 = arith.constant 0 : index
    %6 = vector.load %arg5[%c0_5, %c0_6, %c0_7] : memref<1x2048x128xbf16, #tpu.memory_space<vmem>>, vector<1x2048x128xbf16>
    %7 = vector.shape_cast %6 : vector<1x2048x128xbf16> to vector<2048x128xbf16>
    %cst = arith.constant dense<0.000000e+00> : vector<16x128xf32>
    %8 = tpu.matmul %5, %7, %cst {dimension_numbers = #tpu.dot_dimension_numbers<[1], [0], [0], [1], [0, 0, 1, 1], [], []>} : vector<16x2048xbf16>, vector<2048x128xbf16>, vector<16x128xf32> -> vector<16x128xf32>
    %9 = arith.addf %3, %8 : vector<16x128xf32>
    %c0_8 = arith.constant 0 : index
    %c0_9 = arith.constant 0 : index
    %10 = vector.load %arg7[%c0_8, %c0_9] : memref<16x128xf32, #tpu.memory_space<vmem>>, vector<16x128xf32>
    tpu.vector_store %arg7[%c0_8, %c0_9], %9 {strides = array<i32>} : memref<16x128xf32, #tpu.memory_space<vmem>>, vector<16x128xf32>,
    %c1_i32 = arith.constant 1 : i32
    %11 = arith.cmpi eq, %arg3, %c1_i32 : i32
    %12 = arith.extui %11 : i1 to i32
    %c0_i32_10 = arith.constant 0 : i32
    %13 = arith.cmpi ne, %12, %c0_i32_10 : i32
    scf.if %13 {
      %c0_11 = arith.constant 0 : index
      %c0_12 = arith.constant 0 : index
      %14 = vector.load %arg7[%c0_11, %c0_12] : memref<16x128xf32, #tpu.memory_space<vmem>>, vector<16x128xf32>
      %c0_13 = arith.constant 0 : index
      %c0_14 = arith.constant 0 : index
      %c0_15 = arith.constant 0 : index
      %15 = vector.load %arg6[%c0_13, %c0_14, %c0_15] : memref<1x16x128xf32, #tpu.memory_space<vmem>>, vector<1x16x128xf32>
      %16 = vector.shape_cast %15 : vector<1x16x128xf32> to vector<16x128xf32>
      %17 = vector.shape_cast %14 : vector<16x128xf32> to vector<1x16x128xf32>
      tpu.vector_store %arg6[%c0_13, %c0_14, %c0_15], %17 {strides = array<i32>} : memref<1x16x128xf32, #tpu.memory_space<vmem>>, vector<1x16x128xf32>,
    } else {
    }
    return
  }
  func.func @transform_0(%arg0: i32, %arg1: i32, %arg2: i32, %arg3: i32) -> (i32, i32, i32) {
    %c0_i32 = arith.constant 0 : i32
    return %arg0, %arg1, %arg3 : i32, i32, i32
  }
  func.func @transform_1(%arg0: i32, %arg1: i32, %arg2: i32, %arg3: i32) -> (i32, i32, i32) {
    %c0_i32 = arith.constant 0 : i32
    return %arg0, %arg3, %arg2 : i32, i32, i32
  }
  func.func @transform_2(%arg0: i32, %arg1: i32, %arg2: i32, %arg3: i32) -> (i32, i32, i32) {
    %c0_i32 = arith.constant 0 : i32
    return %arg0, %arg1, %arg2 : i32, i32, i32
  }
}

module attributes {stable_mosaic.version = 11 : i64} {
  func.func @_affine_act_kernel(%arg0: i32, %arg1: memref<64x128xf32, #tpu.memory_space<vmem>>, %arg2: memref<1x128xf32, #tpu.memory_space<vmem>>, %arg3: memref<1x128xf32, #tpu.memory_space<vmem>>, %arg4: memref<64x128xf32, #tpu.memory_space<vmem>>) attributes {dimension_semantics = [#tpu.dimension_semantics<arbitrary>], iteration_bounds = array<i64: 1>, scalar_prefetch = 0 : i64, scratch_operands = 0 : i64, tpu.core_type = #tpu.core_type<tc>, window_params = [{transform_indices = @transform_0, window_bounds = array<i64: 64, 128>}, {pipeline_mode = #tpu.pipeline_mode<synchronous>, transform_indices = @transform_1, window_bounds = array<i64: 1, 128>}, {pipeline_mode = #tpu.pipeline_mode<synchronous>, transform_indices = @transform_2, window_bounds = array<i64: 1, 128>}, {transform_indices = @transform_3, window_bounds = array<i64: 64, 128>}]} {
    %c0 = arith.constant 0 : index
    %c0_0 = arith.constant 0 : index
    %0 = vector.load %arg1[%c0, %c0_0] : memref<64x128xf32, #tpu.memory_space<vmem>>, vector<64x128xf32>
    %c0_1 = arith.constant 0 : index
    %c0_2 = arith.constant 0 : index
    %1 = vector.load %arg2[%c0_1, %c0_2] : memref<1x128xf32, #tpu.memory_space<vmem>>, vector<1x128xf32>
    %2 = vector.broadcast %1 : vector<1x128xf32> to vector<64x128xf32>
    %3 = arith.mulf %0, %2 : vector<64x128xf32>
    %c0_3 = arith.constant 0 : index
    %c0_4 = arith.constant 0 : index
    %4 = vector.load %arg3[%c0_3, %c0_4] : memref<1x128xf32, #tpu.memory_space<vmem>>, vector<1x128xf32>
    %5 = vector.broadcast %4 : vector<1x128xf32> to vector<64x128xf32>
    %6 = arith.addf %3, %5 : vector<64x128xf32>
    %cst = arith.constant 0.000000e+00 : f32
    %7 = vector.broadcast %cst : f32 to vector<64x128xf32>
    %8 = arith.maximumf %6, %7 : vector<64x128xf32>
    %c0_5 = arith.constant 0 : index
    %c0_6 = arith.constant 0 : index
    %9 = vector.load %arg4[%c0_5, %c0_6] : memref<64x128xf32, #tpu.memory_space<vmem>>, vector<64x128xf32>
    tpu.vector_store %arg4[%c0_5, %c0_6], %8 {strides = array<i32>} : memref<64x128xf32, #tpu.memory_space<vmem>>, vector<64x128xf32>,
    return
  }
  func.func @transform_0(%arg0: i32) -> (i32, i32) {
    %c0_i32 = arith.constant 0 : i32
    %c0_i32_0 = arith.constant 0 : i32
    return %arg0, %c0_i32 : i32, i32
  }
  func.func @transform_1(%arg0: i32) -> (i32, i32) {
    %c0_i32 = arith.constant 0 : i32
    %c0_i32_0 = arith.constant 0 : i32
    %c0_i32_1 = arith.constant 0 : i32
    return %c0_i32, %c0_i32_0 : i32, i32
  }
  func.func @transform_2(%arg0: i32) -> (i32, i32) {
    %c0_i32 = arith.constant 0 : i32
    %c0_i32_0 = arith.constant 0 : i32
    %c0_i32_1 = arith.constant 0 : i32
    return %c0_i32, %c0_i32_0 : i32, i32
  }
  func.func @transform_3(%arg0: i32) -> (i32, i32) {
    %c0_i32 = arith.constant 0 : i32
    %c0_i32_0 = arith.constant 0 : i32
    return %arg0, %c0_i32 : i32, i32
  }
}

module attributes {stable_mosaic.version = 11 : i64} {
  func.func @_mm_kernel(%arg0: i32, %arg1: i32, %arg2: i32, %arg3: i32, %arg4: memref<1x128x640xbf16, #tpu.memory_space<vmem>>, %arg5: memref<1x640x128xbf16, #tpu.memory_space<vmem>>, %arg6: memref<1x128x128xf32, #tpu.memory_space<vmem>>, %arg7: memref<128x128xf32, #tpu.memory_space<vmem>>) attributes {dimension_semantics = [#tpu.dimension_semantics<parallel>, #tpu.dimension_semantics<parallel>, #tpu.dimension_semantics<parallel>, #tpu.dimension_semantics<arbitrary>], iteration_bounds = array<i64: 1, 1, 1, 1>, scalar_prefetch = 0 : i64, scratch_operands = 1 : i64, tpu.core_type = #tpu.core_type<tc>, window_params = [{transform_indices = @transform_0, window_bounds = array<i64: 1, 128, 640>}, {transform_indices = @transform_1, window_bounds = array<i64: 1, 640, 128>}, {transform_indices = @transform_2, window_bounds = array<i64: 1, 128, 128>}]} {
    %c0_i32 = arith.constant 0 : i32
    %0 = arith.cmpi eq, %arg3, %c0_i32 : i32
    %1 = arith.extui %0 : i1 to i32
    %c0_i32_0 = arith.constant 0 : i32
    %2 = arith.cmpi ne, %1, %c0_i32_0 : i32
    scf.if %2 {
      %cst_12 = arith.constant 0.000000e+00 : f32
      %14 = vector.broadcast %cst_12 : f32 to vector<128x128xf32>
      %c0_13 = arith.constant 0 : index
      %c0_14 = arith.constant 0 : index
      %15 = vector.load %arg7[%c0_13, %c0_14] : memref<128x128xf32, #tpu.memory_space<vmem>>, vector<128x128xf32>
      tpu.vector_store %arg7[%c0_13, %c0_14], %14 {strides = array<i32>} : memref<128x128xf32, #tpu.memory_space<vmem>>, vector<128x128xf32>,
    } else {
    }
    %c0 = arith.constant 0 : index
    %c0_1 = arith.constant 0 : index
    %3 = vector.load %arg7[%c0, %c0_1] : memref<128x128xf32, #tpu.memory_space<vmem>>, vector<128x128xf32>
    %c0_2 = arith.constant 0 : index
    %c0_3 = arith.constant 0 : index
    %c0_4 = arith.constant 0 : index
    %4 = vector.load %arg4[%c0_2, %c0_3, %c0_4] : memref<1x128x640xbf16, #tpu.memory_space<vmem>>, vector<1x128x640xbf16>
    %5 = vector.shape_cast %4 : vector<1x128x640xbf16> to vector<128x640xbf16>
    %c0_5 = arith.constant 0 : index
    %c0_6 = arith.constant 0 : index
    %c0_7 = arith.constant 0 : index
    %6 = vector.load %arg5[%c0_5, %c0_6, %c0_7] : memref<1x640x128xbf16, #tpu.memory_space<vmem>>, vector<1x640x128xbf16>
    %7 = vector.shape_cast %6 : vector<1x640x128xbf16> to vector<640x128xbf16>
    %cst = arith.constant dense<0.000000e+00> : vector<128x128xf32>
    %8 = tpu.matmul %5, %7, %cst {dimension_numbers = #tpu.dot_dimension_numbers<[1], [0], [0], [1], [0, 0, 1, 1], [], []>} : vector<128x640xbf16>, vector<640x128xbf16>, vector<128x128xf32> -> vector<128x128xf32>
    %9 = arith.addf %3, %8 : vector<128x128xf32>
    %c0_8 = arith.constant 0 : index
    %c0_9 = arith.constant 0 : index
    %10 = vector.load %arg7[%c0_8, %c0_9] : memref<128x128xf32, #tpu.memory_space<vmem>>, vector<128x128xf32>
    tpu.vector_store %arg7[%c0_8, %c0_9], %9 {strides = array<i32>} : memref<128x128xf32, #tpu.memory_space<vmem>>, vector<128x128xf32>,
    %c0_i32_10 = arith.constant 0 : i32
    %11 = arith.cmpi eq, %arg3, %c0_i32_10 : i32
    %12 = arith.extui %11 : i1 to i32
    %c0_i32_11 = arith.constant 0 : i32
    %13 = arith.cmpi ne, %12, %c0_i32_11 : i32
    scf.if %13 {
      %c0_12 = arith.constant 0 : index
      %c0_13 = arith.constant 0 : index
      %14 = vector.load %arg7[%c0_12, %c0_13] : memref<128x128xf32, #tpu.memory_space<vmem>>, vector<128x128xf32>
      %c0_14 = arith.constant 0 : index
      %c0_15 = arith.constant 0 : index
      %c0_16 = arith.constant 0 : index
      %15 = vector.load %arg6[%c0_14, %c0_15, %c0_16] : memref<1x128x128xf32, #tpu.memory_space<vmem>>, vector<1x128x128xf32>
      %16 = vector.shape_cast %15 : vector<1x128x128xf32> to vector<128x128xf32>
      %17 = vector.shape_cast %14 : vector<128x128xf32> to vector<1x128x128xf32>
      tpu.vector_store %arg6[%c0_14, %c0_15, %c0_16], %17 {strides = array<i32>} : memref<1x128x128xf32, #tpu.memory_space<vmem>>, vector<1x128x128xf32>,
    } else {
    }
    return
  }
  func.func @transform_0(%arg0: i32, %arg1: i32, %arg2: i32, %arg3: i32) -> (i32, i32, i32) {
    %c0_i32 = arith.constant 0 : i32
    return %arg0, %arg1, %arg3 : i32, i32, i32
  }
  func.func @transform_1(%arg0: i32, %arg1: i32, %arg2: i32, %arg3: i32) -> (i32, i32, i32) {
    %c0_i32 = arith.constant 0 : i32
    return %arg0, %arg3, %arg2 : i32, i32, i32
  }
  func.func @transform_2(%arg0: i32, %arg1: i32, %arg2: i32, %arg3: i32) -> (i32, i32, i32) {
    %c0_i32 = arith.constant 0 : i32
    return %arg0, %arg1, %arg2 : i32, i32, i32
  }
}

module attributes {stable_mosaic.version = 11 : i64} {
  func.func @_mm_kernel(%arg0: i32, %arg1: i32, %arg2: i32, %arg3: i32, %arg4: memref<1x16x1280xbf16, #tpu.memory_space<vmem>>, %arg5: memref<1x1280x128xbf16, #tpu.memory_space<vmem>>, %arg6: memref<1x16x128xf32, #tpu.memory_space<vmem>>, %arg7: memref<16x128xf32, #tpu.memory_space<vmem>>) attributes {dimension_semantics = [#tpu.dimension_semantics<parallel>, #tpu.dimension_semantics<parallel>, #tpu.dimension_semantics<parallel>, #tpu.dimension_semantics<arbitrary>], iteration_bounds = array<i64: 8, 1, 1, 2>, scalar_prefetch = 0 : i64, scratch_operands = 1 : i64, tpu.core_type = #tpu.core_type<tc>, window_params = [{transform_indices = @transform_0, window_bounds = array<i64: 1, 16, 1280>}, {transform_indices = @transform_1, window_bounds = array<i64: 1, 1280, 128>}, {transform_indices = @transform_2, window_bounds = array<i64: 1, 16, 128>}]} {
    %c0_i32 = arith.constant 0 : i32
    %0 = arith.cmpi eq, %arg3, %c0_i32 : i32
    %1 = arith.extui %0 : i1 to i32
    %c0_i32_0 = arith.constant 0 : i32
    %2 = arith.cmpi ne, %1, %c0_i32_0 : i32
    scf.if %2 {
      %cst_11 = arith.constant 0.000000e+00 : f32
      %14 = vector.broadcast %cst_11 : f32 to vector<16x128xf32>
      %c0_12 = arith.constant 0 : index
      %c0_13 = arith.constant 0 : index
      %15 = vector.load %arg7[%c0_12, %c0_13] : memref<16x128xf32, #tpu.memory_space<vmem>>, vector<16x128xf32>
      tpu.vector_store %arg7[%c0_12, %c0_13], %14 {strides = array<i32>} : memref<16x128xf32, #tpu.memory_space<vmem>>, vector<16x128xf32>,
    } else {
    }
    %c0 = arith.constant 0 : index
    %c0_1 = arith.constant 0 : index
    %3 = vector.load %arg7[%c0, %c0_1] : memref<16x128xf32, #tpu.memory_space<vmem>>, vector<16x128xf32>
    %c0_2 = arith.constant 0 : index
    %c0_3 = arith.constant 0 : index
    %c0_4 = arith.constant 0 : index
    %4 = vector.load %arg4[%c0_2, %c0_3, %c0_4] : memref<1x16x1280xbf16, #tpu.memory_space<vmem>>, vector<1x16x1280xbf16>
    %5 = vector.shape_cast %4 : vector<1x16x1280xbf16> to vector<16x1280xbf16>
    %c0_5 = arith.constant 0 : index
    %c0_6 = arith.constant 0 : index
    %c0_7 = arith.constant 0 : index
    %6 = vector.load %arg5[%c0_5, %c0_6, %c0_7] : memref<1x1280x128xbf16, #tpu.memory_space<vmem>>, vector<1x1280x128xbf16>
    %7 = vector.shape_cast %6 : vector<1x1280x128xbf16> to vector<1280x128xbf16>
    %cst = arith.constant dense<0.000000e+00> : vector<16x128xf32>
    %8 = tpu.matmul %5, %7, %cst {dimension_numbers = #tpu.dot_dimension_numbers<[1], [0], [0], [1], [0, 0, 1, 1], [], []>} : vector<16x1280xbf16>, vector<1280x128xbf16>, vector<16x128xf32> -> vector<16x128xf32>
    %9 = arith.addf %3, %8 : vector<16x128xf32>
    %c0_8 = arith.constant 0 : index
    %c0_9 = arith.constant 0 : index
    %10 = vector.load %arg7[%c0_8, %c0_9] : memref<16x128xf32, #tpu.memory_space<vmem>>, vector<16x128xf32>
    tpu.vector_store %arg7[%c0_8, %c0_9], %9 {strides = array<i32>} : memref<16x128xf32, #tpu.memory_space<vmem>>, vector<16x128xf32>,
    %c1_i32 = arith.constant 1 : i32
    %11 = arith.cmpi eq, %arg3, %c1_i32 : i32
    %12 = arith.extui %11 : i1 to i32
    %c0_i32_10 = arith.constant 0 : i32
    %13 = arith.cmpi ne, %12, %c0_i32_10 : i32
    scf.if %13 {
      %c0_11 = arith.constant 0 : index
      %c0_12 = arith.constant 0 : index
      %14 = vector.load %arg7[%c0_11, %c0_12] : memref<16x128xf32, #tpu.memory_space<vmem>>, vector<16x128xf32>
      %c0_13 = arith.constant 0 : index
      %c0_14 = arith.constant 0 : index
      %c0_15 = arith.constant 0 : index
      %15 = vector.load %arg6[%c0_13, %c0_14, %c0_15] : memref<1x16x128xf32, #tpu.memory_space<vmem>>, vector<1x16x128xf32>
      %16 = vector.shape_cast %15 : vector<1x16x128xf32> to vector<16x128xf32>
      %17 = vector.shape_cast %14 : vector<16x128xf32> to vector<1x16x128xf32>
      tpu.vector_store %arg6[%c0_13, %c0_14, %c0_15], %17 {strides = array<i32>} : memref<1x16x128xf32, #tpu.memory_space<vmem>>, vector<1x16x128xf32>,
    } else {
    }
    return
  }
  func.func @transform_0(%arg0: i32, %arg1: i32, %arg2: i32, %arg3: i32) -> (i32, i32, i32) {
    %c0_i32 = arith.constant 0 : i32
    return %arg0, %arg1, %arg3 : i32, i32, i32
  }
  func.func @transform_1(%arg0: i32, %arg1: i32, %arg2: i32, %arg3: i32) -> (i32, i32, i32) {
    %c0_i32 = arith.constant 0 : i32
    return %arg0, %arg3, %arg2 : i32, i32, i32
  }
  func.func @transform_2(%arg0: i32, %arg1: i32, %arg2: i32, %arg3: i32) -> (i32, i32, i32) {
    %c0_i32 = arith.constant 0 : i32
    return %arg0, %arg1, %arg2 : i32, i32, i32
  }
}

module attributes {stable_mosaic.version = 11 : i64} {
  func.func @_affine_act_kernel(%arg0: i32, %arg1: memref<32x128xf32, #tpu.memory_space<vmem>>, %arg2: memref<1x128xf32, #tpu.memory_space<vmem>>, %arg3: memref<1x128xf32, #tpu.memory_space<vmem>>, %arg4: memref<32x128xf32, #tpu.memory_space<vmem>>) attributes {dimension_semantics = [#tpu.dimension_semantics<arbitrary>], iteration_bounds = array<i64: 1>, scalar_prefetch = 0 : i64, scratch_operands = 0 : i64, tpu.core_type = #tpu.core_type<tc>, window_params = [{transform_indices = @transform_0, window_bounds = array<i64: 32, 128>}, {pipeline_mode = #tpu.pipeline_mode<synchronous>, transform_indices = @transform_1, window_bounds = array<i64: 1, 128>}, {pipeline_mode = #tpu.pipeline_mode<synchronous>, transform_indices = @transform_2, window_bounds = array<i64: 1, 128>}, {transform_indices = @transform_3, window_bounds = array<i64: 32, 128>}]} {
    %c0 = arith.constant 0 : index
    %c0_0 = arith.constant 0 : index
    %0 = vector.load %arg1[%c0, %c0_0] : memref<32x128xf32, #tpu.memory_space<vmem>>, vector<32x128xf32>
    %c0_1 = arith.constant 0 : index
    %c0_2 = arith.constant 0 : index
    %1 = vector.load %arg2[%c0_1, %c0_2] : memref<1x128xf32, #tpu.memory_space<vmem>>, vector<1x128xf32>
    %2 = vector.broadcast %1 : vector<1x128xf32> to vector<32x128xf32>
    %3 = arith.mulf %0, %2 : vector<32x128xf32>
    %c0_3 = arith.constant 0 : index
    %c0_4 = arith.constant 0 : index
    %4 = vector.load %arg3[%c0_3, %c0_4] : memref<1x128xf32, #tpu.memory_space<vmem>>, vector<1x128xf32>
    %5 = vector.broadcast %4 : vector<1x128xf32> to vector<32x128xf32>
    %6 = arith.addf %3, %5 : vector<32x128xf32>
    %cst = arith.constant 0.000000e+00 : f32
    %7 = vector.broadcast %cst : f32 to vector<32x128xf32>
    %8 = arith.maximumf %6, %7 : vector<32x128xf32>
    %c0_5 = arith.constant 0 : index
    %c0_6 = arith.constant 0 : index
    %9 = vector.load %arg4[%c0_5, %c0_6] : memref<32x128xf32, #tpu.memory_space<vmem>>, vector<32x128xf32>
    tpu.vector_store %arg4[%c0_5, %c0_6], %8 {strides = array<i32>} : memref<32x128xf32, #tpu.memory_space<vmem>>, vector<32x128xf32>,
    return
  }
  func.func @transform_0(%arg0: i32) -> (i32, i32) {
    %c0_i32 = arith.constant 0 : i32
    %c0_i32_0 = arith.constant 0 : i32
    return %arg0, %c0_i32 : i32, i32
  }
  func.func @transform_1(%arg0: i32) -> (i32, i32) {
    %c0_i32 = arith.constant 0 : i32
    %c0_i32_0 = arith.constant 0 : i32
    %c0_i32_1 = arith.constant 0 : i32
    return %c0_i32, %c0_i32_0 : i32, i32
  }
  func.func @transform_2(%arg0: i32) -> (i32, i32) {
    %c0_i32 = arith.constant 0 : i32
    %c0_i32_0 = arith.constant 0 : i32
    %c0_i32_1 = arith.constant 0 : i32
    return %c0_i32, %c0_i32_0 : i32, i32
  }
  func.func @transform_3(%arg0: i32) -> (i32, i32) {
    %c0_i32 = arith.constant 0 : i32
    %c0_i32_0 = arith.constant 0 : i32
    return %arg0, %c0_i32 : i32, i32
  }
}

module attributes {stable_mosaic.version = 11 : i64} {
  func.func @_mm_kernel(%arg0: i32, %arg1: i32, %arg2: i32, %arg3: i32, %arg4: memref<1x128x384xbf16, #tpu.memory_space<vmem>>, %arg5: memref<1x384x128xbf16, #tpu.memory_space<vmem>>, %arg6: memref<1x128x128xf32, #tpu.memory_space<vmem>>, %arg7: memref<128x128xf32, #tpu.memory_space<vmem>>) attributes {dimension_semantics = [#tpu.dimension_semantics<parallel>, #tpu.dimension_semantics<parallel>, #tpu.dimension_semantics<parallel>, #tpu.dimension_semantics<arbitrary>], iteration_bounds = array<i64: 1, 1, 1, 1>, scalar_prefetch = 0 : i64, scratch_operands = 1 : i64, tpu.core_type = #tpu.core_type<tc>, window_params = [{transform_indices = @transform_0, window_bounds = array<i64: 1, 128, 384>}, {transform_indices = @transform_1, window_bounds = array<i64: 1, 384, 128>}, {transform_indices = @transform_2, window_bounds = array<i64: 1, 128, 128>}]} {
    %c0_i32 = arith.constant 0 : i32
    %0 = arith.cmpi eq, %arg3, %c0_i32 : i32
    %1 = arith.extui %0 : i1 to i32
    %c0_i32_0 = arith.constant 0 : i32
    %2 = arith.cmpi ne, %1, %c0_i32_0 : i32
    scf.if %2 {
      %cst_12 = arith.constant 0.000000e+00 : f32
      %14 = vector.broadcast %cst_12 : f32 to vector<128x128xf32>
      %c0_13 = arith.constant 0 : index
      %c0_14 = arith.constant 0 : index
      %15 = vector.load %arg7[%c0_13, %c0_14] : memref<128x128xf32, #tpu.memory_space<vmem>>, vector<128x128xf32>
      tpu.vector_store %arg7[%c0_13, %c0_14], %14 {strides = array<i32>} : memref<128x128xf32, #tpu.memory_space<vmem>>, vector<128x128xf32>,
    } else {
    }
    %c0 = arith.constant 0 : index
    %c0_1 = arith.constant 0 : index
    %3 = vector.load %arg7[%c0, %c0_1] : memref<128x128xf32, #tpu.memory_space<vmem>>, vector<128x128xf32>
    %c0_2 = arith.constant 0 : index
    %c0_3 = arith.constant 0 : index
    %c0_4 = arith.constant 0 : index
    %4 = vector.load %arg4[%c0_2, %c0_3, %c0_4] : memref<1x128x384xbf16, #tpu.memory_space<vmem>>, vector<1x128x384xbf16>
    %5 = vector.shape_cast %4 : vector<1x128x384xbf16> to vector<128x384xbf16>
    %c0_5 = arith.constant 0 : index
    %c0_6 = arith.constant 0 : index
    %c0_7 = arith.constant 0 : index
    %6 = vector.load %arg5[%c0_5, %c0_6, %c0_7] : memref<1x384x128xbf16, #tpu.memory_space<vmem>>, vector<1x384x128xbf16>
    %7 = vector.shape_cast %6 : vector<1x384x128xbf16> to vector<384x128xbf16>
    %cst = arith.constant dense<0.000000e+00> : vector<128x128xf32>
    %8 = tpu.matmul %5, %7, %cst {dimension_numbers = #tpu.dot_dimension_numbers<[1], [0], [0], [1], [0, 0, 1, 1], [], []>} : vector<128x384xbf16>, vector<384x128xbf16>, vector<128x128xf32> -> vector<128x128xf32>
    %9 = arith.addf %3, %8 : vector<128x128xf32>
    %c0_8 = arith.constant 0 : index
    %c0_9 = arith.constant 0 : index
    %10 = vector.load %arg7[%c0_8, %c0_9] : memref<128x128xf32, #tpu.memory_space<vmem>>, vector<128x128xf32>
    tpu.vector_store %arg7[%c0_8, %c0_9], %9 {strides = array<i32>} : memref<128x128xf32, #tpu.memory_space<vmem>>, vector<128x128xf32>,
    %c0_i32_10 = arith.constant 0 : i32
    %11 = arith.cmpi eq, %arg3, %c0_i32_10 : i32
    %12 = arith.extui %11 : i1 to i32
    %c0_i32_11 = arith.constant 0 : i32
    %13 = arith.cmpi ne, %12, %c0_i32_11 : i32
    scf.if %13 {
      %c0_12 = arith.constant 0 : index
      %c0_13 = arith.constant 0 : index
      %14 = vector.load %arg7[%c0_12, %c0_13] : memref<128x128xf32, #tpu.memory_space<vmem>>, vector<128x128xf32>
      %c0_14 = arith.constant 0 : index
      %c0_15 = arith.constant 0 : index
      %c0_16 = arith.constant 0 : index
      %15 = vector.load %arg6[%c0_14, %c0_15, %c0_16] : memref<1x128x128xf32, #tpu.memory_space<vmem>>, vector<1x128x128xf32>
      %16 = vector.shape_cast %15 : vector<1x128x128xf32> to vector<128x128xf32>
      %17 = vector.shape_cast %14 : vector<128x128xf32> to vector<1x128x128xf32>
      tpu.vector_store %arg6[%c0_14, %c0_15, %c0_16], %17 {strides = array<i32>} : memref<1x128x128xf32, #tpu.memory_space<vmem>>, vector<1x128x128xf32>,
    } else {
    }
    return
  }
  func.func @transform_0(%arg0: i32, %arg1: i32, %arg2: i32, %arg3: i32) -> (i32, i32, i32) {
    %c0_i32 = arith.constant 0 : i32
    return %arg0, %arg1, %arg3 : i32, i32, i32
  }
  func.func @transform_1(%arg0: i32, %arg1: i32, %arg2: i32, %arg3: i32) -> (i32, i32, i32) {
    %c0_i32 = arith.constant 0 : i32
    return %arg0, %arg3, %arg2 : i32, i32, i32
  }
  func.func @transform_2(%arg0: i32, %arg1: i32, %arg2: i32, %arg3: i32) -> (i32, i32, i32) {
    %c0_i32 = arith.constant 0 : i32
    return %arg0, %arg1, %arg2 : i32, i32, i32
  }
}

module attributes {stable_mosaic.version = 11 : i64} {
  func.func @_mm_kernel(%arg0: i32, %arg1: i32, %arg2: i32, %arg3: i32, %arg4: memref<1x128x1280xbf16, #tpu.memory_space<vmem>>, %arg5: memref<1x1280x128xbf16, #tpu.memory_space<vmem>>, %arg6: memref<1x128x128xf32, #tpu.memory_space<vmem>>, %arg7: memref<128x128xf32, #tpu.memory_space<vmem>>) attributes {dimension_semantics = [#tpu.dimension_semantics<parallel>, #tpu.dimension_semantics<parallel>, #tpu.dimension_semantics<parallel>, #tpu.dimension_semantics<arbitrary>], iteration_bounds = array<i64: 8, 1, 1, 1>, scalar_prefetch = 0 : i64, scratch_operands = 1 : i64, tpu.core_type = #tpu.core_type<tc>, window_params = [{transform_indices = @transform_0, window_bounds = array<i64: 1, 128, 1280>}, {transform_indices = @transform_1, window_bounds = array<i64: 1, 1280, 128>}, {transform_indices = @transform_2, window_bounds = array<i64: 1, 128, 128>}]} {
    %c0_i32 = arith.constant 0 : i32
    %0 = arith.cmpi eq, %arg3, %c0_i32 : i32
    %1 = arith.extui %0 : i1 to i32
    %c0_i32_0 = arith.constant 0 : i32
    %2 = arith.cmpi ne, %1, %c0_i32_0 : i32
    scf.if %2 {
      %cst_12 = arith.constant 0.000000e+00 : f32
      %14 = vector.broadcast %cst_12 : f32 to vector<128x128xf32>
      %c0_13 = arith.constant 0 : index
      %c0_14 = arith.constant 0 : index
      %15 = vector.load %arg7[%c0_13, %c0_14] : memref<128x128xf32, #tpu.memory_space<vmem>>, vector<128x128xf32>
      tpu.vector_store %arg7[%c0_13, %c0_14], %14 {strides = array<i32>} : memref<128x128xf32, #tpu.memory_space<vmem>>, vector<128x128xf32>,
    } else {
    }
    %c0 = arith.constant 0 : index
    %c0_1 = arith.constant 0 : index
    %3 = vector.load %arg7[%c0, %c0_1] : memref<128x128xf32, #tpu.memory_space<vmem>>, vector<128x128xf32>
    %c0_2 = arith.constant 0 : index
    %c0_3 = arith.constant 0 : index
    %c0_4 = arith.constant 0 : index
    %4 = vector.load %arg4[%c0_2, %c0_3, %c0_4] : memref<1x128x1280xbf16, #tpu.memory_space<vmem>>, vector<1x128x1280xbf16>
    %5 = vector.shape_cast %4 : vector<1x128x1280xbf16> to vector<128x1280xbf16>
    %c0_5 = arith.constant 0 : index
    %c0_6 = arith.constant 0 : index
    %c0_7 = arith.constant 0 : index
    %6 = vector.load %arg5[%c0_5, %c0_6, %c0_7] : memref<1x1280x128xbf16, #tpu.memory_space<vmem>>, vector<1x1280x128xbf16>
    %7 = vector.shape_cast %6 : vector<1x1280x128xbf16> to vector<1280x128xbf16>
    %cst = arith.constant dense<0.000000e+00> : vector<128x128xf32>
    %8 = tpu.matmul %5, %7, %cst {dimension_numbers = #tpu.dot_dimension_numbers<[1], [0], [0], [1], [0, 0, 1, 1], [], []>} : vector<128x1280xbf16>, vector<1280x128xbf16>, vector<128x128xf32> -> vector<128x128xf32>
    %9 = arith.addf %3, %8 : vector<128x128xf32>
    %c0_8 = arith.constant 0 : index
    %c0_9 = arith.constant 0 : index
    %10 = vector.load %arg7[%c0_8, %c0_9] : memref<128x128xf32, #tpu.memory_space<vmem>>, vector<128x128xf32>
    tpu.vector_store %arg7[%c0_8, %c0_9], %9 {strides = array<i32>} : memref<128x128xf32, #tpu.memory_space<vmem>>, vector<128x128xf32>,
    %c0_i32_10 = arith.constant 0 : i32
    %11 = arith.cmpi eq, %arg3, %c0_i32_10 : i32
    %12 = arith.extui %11 : i1 to i32
    %c0_i32_11 = arith.constant 0 : i32
    %13 = arith.cmpi ne, %12, %c0_i32_11 : i32
    scf.if %13 {
      %c0_12 = arith.constant 0 : index
      %c0_13 = arith.constant 0 : index
      %14 = vector.load %arg7[%c0_12, %c0_13] : memref<128x128xf32, #tpu.memory_space<vmem>>, vector<128x128xf32>
      %c0_14 = arith.constant 0 : index
      %c0_15 = arith.constant 0 : index
      %c0_16 = arith.constant 0 : index
      %15 = vector.load %arg6[%c0_14, %c0_15, %c0_16] : memref<1x128x128xf32, #tpu.memory_space<vmem>>, vector<1x128x128xf32>
      %16 = vector.shape_cast %15 : vector<1x128x128xf32> to vector<128x128xf32>
      %17 = vector.shape_cast %14 : vector<128x128xf32> to vector<1x128x128xf32>
      tpu.vector_store %arg6[%c0_14, %c0_15, %c0_16], %17 {strides = array<i32>} : memref<1x128x128xf32, #tpu.memory_space<vmem>>, vector<1x128x128xf32>,
    } else {
    }
    return
  }
  func.func @transform_0(%arg0: i32, %arg1: i32, %arg2: i32, %arg3: i32) -> (i32, i32, i32) {
    %c0_i32 = arith.constant 0 : i32
    return %arg0, %arg1, %arg3 : i32, i32, i32
  }
  func.func @transform_1(%arg0: i32, %arg1: i32, %arg2: i32, %arg3: i32) -> (i32, i32, i32) {
    %c0_i32 = arith.constant 0 : i32
    return %arg0, %arg3, %arg2 : i32, i32, i32
  }
  func.func @transform_2(%arg0: i32, %arg1: i32, %arg2: i32, %arg3: i32) -> (i32, i32, i32) {
    %c0_i32 = arith.constant 0 : i32
    return %arg0, %arg1, %arg2 : i32, i32, i32
  }
}

module attributes {stable_mosaic.version = 11 : i64} {
  func.func @_mm_kernel(%arg0: i32, %arg1: i32, %arg2: i32, %arg3: i32, %arg4: memref<1x1024x128xbf16, #tpu.memory_space<vmem>>, %arg5: memref<1x128x128xbf16, #tpu.memory_space<vmem>>, %arg6: memref<1x1024x128xf32, #tpu.memory_space<vmem>>, %arg7: memref<1024x128xf32, #tpu.memory_space<vmem>>) attributes {dimension_semantics = [#tpu.dimension_semantics<parallel>, #tpu.dimension_semantics<parallel>, #tpu.dimension_semantics<parallel>, #tpu.dimension_semantics<arbitrary>], iteration_bounds = array<i64: 1, 1, 1, 1>, scalar_prefetch = 0 : i64, scratch_operands = 1 : i64, tpu.core_type = #tpu.core_type<tc>, window_params = [{transform_indices = @transform_0, window_bounds = array<i64: 1, 1024, 128>}, {transform_indices = @transform_1, window_bounds = array<i64: 1, 128, 128>}, {transform_indices = @transform_2, window_bounds = array<i64: 1, 1024, 128>}]} {
    %c0_i32 = arith.constant 0 : i32
    %0 = arith.cmpi eq, %arg3, %c0_i32 : i32
    %1 = arith.extui %0 : i1 to i32
    %c0_i32_0 = arith.constant 0 : i32
    %2 = arith.cmpi ne, %1, %c0_i32_0 : i32
    scf.if %2 {
      %cst_12 = arith.constant 0.000000e+00 : f32
      %14 = vector.broadcast %cst_12 : f32 to vector<1024x128xf32>
      %c0_13 = arith.constant 0 : index
      %c0_14 = arith.constant 0 : index
      %15 = vector.load %arg7[%c0_13, %c0_14] : memref<1024x128xf32, #tpu.memory_space<vmem>>, vector<1024x128xf32>
      tpu.vector_store %arg7[%c0_13, %c0_14], %14 {strides = array<i32>} : memref<1024x128xf32, #tpu.memory_space<vmem>>, vector<1024x128xf32>,
    } else {
    }
    %c0 = arith.constant 0 : index
    %c0_1 = arith.constant 0 : index
    %3 = vector.load %arg7[%c0, %c0_1] : memref<1024x128xf32, #tpu.memory_space<vmem>>, vector<1024x128xf32>
    %c0_2 = arith.constant 0 : index
    %c0_3 = arith.constant 0 : index
    %c0_4 = arith.constant 0 : index
    %4 = vector.load %arg4[%c0_2, %c0_3, %c0_4] : memref<1x1024x128xbf16, #tpu.memory_space<vmem>>, vector<1x1024x128xbf16>
    %5 = vector.shape_cast %4 : vector<1x1024x128xbf16> to vector<1024x128xbf16>
    %c0_5 = arith.constant 0 : index
    %c0_6 = arith.constant 0 : index
    %c0_7 = arith.constant 0 : index
    %6 = vector.load %arg5[%c0_5, %c0_6, %c0_7] : memref<1x128x128xbf16, #tpu.memory_space<vmem>>, vector<1x128x128xbf16>
    %7 = vector.shape_cast %6 : vector<1x128x128xbf16> to vector<128x128xbf16>
    %cst = arith.constant dense<0.000000e+00> : vector<1024x128xf32>
    %8 = tpu.matmul %5, %7, %cst {dimension_numbers = #tpu.dot_dimension_numbers<[1], [0], [0], [1], [0, 0, 1, 1], [], []>} : vector<1024x128xbf16>, vector<128x128xbf16>, vector<1024x128xf32> -> vector<1024x128xf32>
    %9 = arith.addf %3, %8 : vector<1024x128xf32>
    %c0_8 = arith.constant 0 : index
    %c0_9 = arith.constant 0 : index
    %10 = vector.load %arg7[%c0_8, %c0_9] : memref<1024x128xf32, #tpu.memory_space<vmem>>, vector<1024x128xf32>
    tpu.vector_store %arg7[%c0_8, %c0_9], %9 {strides = array<i32>} : memref<1024x128xf32, #tpu.memory_space<vmem>>, vector<1024x128xf32>,
    %c0_i32_10 = arith.constant 0 : i32
    %11 = arith.cmpi eq, %arg3, %c0_i32_10 : i32
    %12 = arith.extui %11 : i1 to i32
    %c0_i32_11 = arith.constant 0 : i32
    %13 = arith.cmpi ne, %12, %c0_i32_11 : i32
    scf.if %13 {
      %c0_12 = arith.constant 0 : index
      %c0_13 = arith.constant 0 : index
      %14 = vector.load %arg7[%c0_12, %c0_13] : memref<1024x128xf32, #tpu.memory_space<vmem>>, vector<1024x128xf32>
      %c0_14 = arith.constant 0 : index
      %c0_15 = arith.constant 0 : index
      %c0_16 = arith.constant 0 : index
      %15 = vector.load %arg6[%c0_14, %c0_15, %c0_16] : memref<1x1024x128xf32, #tpu.memory_space<vmem>>, vector<1x1024x128xf32>
      %16 = vector.shape_cast %15 : vector<1x1024x128xf32> to vector<1024x128xf32>
      %17 = vector.shape_cast %14 : vector<1024x128xf32> to vector<1x1024x128xf32>
      tpu.vector_store %arg6[%c0_14, %c0_15, %c0_16], %17 {strides = array<i32>} : memref<1x1024x128xf32, #tpu.memory_space<vmem>>, vector<1x1024x128xf32>,
    } else {
    }
    return
  }
  func.func @transform_0(%arg0: i32, %arg1: i32, %arg2: i32, %arg3: i32) -> (i32, i32, i32) {
    %c0_i32 = arith.constant 0 : i32
    return %arg0, %arg1, %arg3 : i32, i32, i32
  }
  func.func @transform_1(%arg0: i32, %arg1: i32, %arg2: i32, %arg3: i32) -> (i32, i32, i32) {
    %c0_i32 = arith.constant 0 : i32
    return %arg0, %arg3, %arg2 : i32, i32, i32
  }
  func.func @transform_2(%arg0: i32, %arg1: i32, %arg2: i32, %arg3: i32) -> (i32, i32, i32) {
    %c0_i32 = arith.constant 0 : i32
    return %arg0, %arg1, %arg2 : i32, i32, i32
  }
}

module attributes {stable_mosaic.version = 11 : i64} {
  func.func @_mm_kernel(%arg0: i32, %arg1: i32, %arg2: i32, %arg3: i32, %arg4: memref<1x1024x256xbf16, #tpu.memory_space<vmem>>, %arg5: memref<1x256x128xbf16, #tpu.memory_space<vmem>>, %arg6: memref<1x1024x128xf32, #tpu.memory_space<vmem>>, %arg7: memref<1024x128xf32, #tpu.memory_space<vmem>>) attributes {dimension_semantics = [#tpu.dimension_semantics<parallel>, #tpu.dimension_semantics<parallel>, #tpu.dimension_semantics<parallel>, #tpu.dimension_semantics<arbitrary>], iteration_bounds = array<i64: 1, 8, 1, 1>, scalar_prefetch = 0 : i64, scratch_operands = 1 : i64, tpu.core_type = #tpu.core_type<tc>, window_params = [{transform_indices = @transform_0, window_bounds = array<i64: 1, 1024, 256>}, {transform_indices = @transform_1, window_bounds = array<i64: 1, 256, 128>}, {transform_indices = @transform_2, window_bounds = array<i64: 1, 1024, 128>}]} {
    %c0_i32 = arith.constant 0 : i32
    %0 = arith.cmpi eq, %arg3, %c0_i32 : i32
    %1 = arith.extui %0 : i1 to i32
    %c0_i32_0 = arith.constant 0 : i32
    %2 = arith.cmpi ne, %1, %c0_i32_0 : i32
    scf.if %2 {
      %cst_12 = arith.constant 0.000000e+00 : f32
      %14 = vector.broadcast %cst_12 : f32 to vector<1024x128xf32>
      %c0_13 = arith.constant 0 : index
      %c0_14 = arith.constant 0 : index
      %15 = vector.load %arg7[%c0_13, %c0_14] : memref<1024x128xf32, #tpu.memory_space<vmem>>, vector<1024x128xf32>
      tpu.vector_store %arg7[%c0_13, %c0_14], %14 {strides = array<i32>} : memref<1024x128xf32, #tpu.memory_space<vmem>>, vector<1024x128xf32>,
    } else {
    }
    %c0 = arith.constant 0 : index
    %c0_1 = arith.constant 0 : index
    %3 = vector.load %arg7[%c0, %c0_1] : memref<1024x128xf32, #tpu.memory_space<vmem>>, vector<1024x128xf32>
    %c0_2 = arith.constant 0 : index
    %c0_3 = arith.constant 0 : index
    %c0_4 = arith.constant 0 : index
    %4 = vector.load %arg4[%c0_2, %c0_3, %c0_4] : memref<1x1024x256xbf16, #tpu.memory_space<vmem>>, vector<1x1024x256xbf16>
    %5 = vector.shape_cast %4 : vector<1x1024x256xbf16> to vector<1024x256xbf16>
    %c0_5 = arith.constant 0 : index
    %c0_6 = arith.constant 0 : index
    %c0_7 = arith.constant 0 : index
    %6 = vector.load %arg5[%c0_5, %c0_6, %c0_7] : memref<1x256x128xbf16, #tpu.memory_space<vmem>>, vector<1x256x128xbf16>
    %7 = vector.shape_cast %6 : vector<1x256x128xbf16> to vector<256x128xbf16>
    %cst = arith.constant dense<0.000000e+00> : vector<1024x128xf32>
    %8 = tpu.matmul %5, %7, %cst {dimension_numbers = #tpu.dot_dimension_numbers<[1], [0], [0], [1], [0, 0, 1, 1], [], []>} : vector<1024x256xbf16>, vector<256x128xbf16>, vector<1024x128xf32> -> vector<1024x128xf32>
    %9 = arith.addf %3, %8 : vector<1024x128xf32>
    %c0_8 = arith.constant 0 : index
    %c0_9 = arith.constant 0 : index
    %10 = vector.load %arg7[%c0_8, %c0_9] : memref<1024x128xf32, #tpu.memory_space<vmem>>, vector<1024x128xf32>
    tpu.vector_store %arg7[%c0_8, %c0_9], %9 {strides = array<i32>} : memref<1024x128xf32, #tpu.memory_space<vmem>>, vector<1024x128xf32>,
    %c0_i32_10 = arith.constant 0 : i32
    %11 = arith.cmpi eq, %arg3, %c0_i32_10 : i32
    %12 = arith.extui %11 : i1 to i32
    %c0_i32_11 = arith.constant 0 : i32
    %13 = arith.cmpi ne, %12, %c0_i32_11 : i32
    scf.if %13 {
      %c0_12 = arith.constant 0 : index
      %c0_13 = arith.constant 0 : index
      %14 = vector.load %arg7[%c0_12, %c0_13] : memref<1024x128xf32, #tpu.memory_space<vmem>>, vector<1024x128xf32>
      %c0_14 = arith.constant 0 : index
      %c0_15 = arith.constant 0 : index
      %c0_16 = arith.constant 0 : index
      %15 = vector.load %arg6[%c0_14, %c0_15, %c0_16] : memref<1x1024x128xf32, #tpu.memory_space<vmem>>, vector<1x1024x128xf32>
      %16 = vector.shape_cast %15 : vector<1x1024x128xf32> to vector<1024x128xf32>
      %17 = vector.shape_cast %14 : vector<1024x128xf32> to vector<1x1024x128xf32>
      tpu.vector_store %arg6[%c0_14, %c0_15, %c0_16], %17 {strides = array<i32>} : memref<1x1024x128xf32, #tpu.memory_space<vmem>>, vector<1x1024x128xf32>,
    } else {
    }
    return
  }
  func.func @transform_0(%arg0: i32, %arg1: i32, %arg2: i32, %arg3: i32) -> (i32, i32, i32) {
    %c0_i32 = arith.constant 0 : i32
    return %arg0, %arg1, %arg3 : i32, i32, i32
  }
  func.func @transform_1(%arg0: i32, %arg1: i32, %arg2: i32, %arg3: i32) -> (i32, i32, i32) {
    %c0_i32 = arith.constant 0 : i32
    return %arg0, %arg3, %arg2 : i32, i32, i32
  }
  func.func @transform_2(%arg0: i32, %arg1: i32, %arg2: i32, %arg3: i32) -> (i32, i32, i32) {
    %c0_i32 = arith.constant 0 : i32
    return %arg0, %arg1, %arg2 : i32, i32, i32
  }
}

module attributes {stable_mosaic.version = 11 : i64} {
  func.func @_affine_act_kernel(%arg0: i32, %arg1: memref<64x128xf32, #tpu.memory_space<vmem>>, %arg2: memref<1x128xf32, #tpu.memory_space<vmem>>, %arg3: memref<1x128xf32, #tpu.memory_space<vmem>>, %arg4: memref<64x128xf32, #tpu.memory_space<vmem>>) attributes {dimension_semantics = [#tpu.dimension_semantics<arbitrary>], iteration_bounds = array<i64: 1>, scalar_prefetch = 0 : i64, scratch_operands = 0 : i64, tpu.core_type = #tpu.core_type<tc>, window_params = [{transform_indices = @transform_0, window_bounds = array<i64: 64, 128>}, {pipeline_mode = #tpu.pipeline_mode<synchronous>, transform_indices = @transform_1, window_bounds = array<i64: 1, 128>}, {pipeline_mode = #tpu.pipeline_mode<synchronous>, transform_indices = @transform_2, window_bounds = array<i64: 1, 128>}, {transform_indices = @transform_3, window_bounds = array<i64: 64, 128>}]} {
    %c0 = arith.constant 0 : index
    %c0_0 = arith.constant 0 : index
    %0 = vector.load %arg1[%c0, %c0_0] : memref<64x128xf32, #tpu.memory_space<vmem>>, vector<64x128xf32>
    %c0_1 = arith.constant 0 : index
    %c0_2 = arith.constant 0 : index
    %1 = vector.load %arg2[%c0_1, %c0_2] : memref<1x128xf32, #tpu.memory_space<vmem>>, vector<1x128xf32>
    %2 = vector.broadcast %1 : vector<1x128xf32> to vector<64x128xf32>
    %3 = arith.mulf %0, %2 : vector<64x128xf32>
    %c0_3 = arith.constant 0 : index
    %c0_4 = arith.constant 0 : index
    %4 = vector.load %arg3[%c0_3, %c0_4] : memref<1x128xf32, #tpu.memory_space<vmem>>, vector<1x128xf32>
    %5 = vector.broadcast %4 : vector<1x128xf32> to vector<64x128xf32>
    %6 = arith.addf %3, %5 : vector<64x128xf32>
    %cst = arith.constant 0.000000e+00 : f32
    %7 = vector.broadcast %cst : f32 to vector<64x128xf32>
    %8 = arith.subf %7, %6 : vector<64x128xf32>
    %9 = math.exp %8 : vector<64x128xf32>
    %cst_5 = arith.constant 1.000000e+00 : f32
    %10 = vector.broadcast %cst_5 : f32 to vector<64x128xf32>
    %11 = arith.addf %10, %9 : vector<64x128xf32>
    %cst_6 = arith.constant 1.000000e+00 : f32
    %12 = vector.broadcast %cst_6 : f32 to vector<64x128xf32>
    %13 = arith.divf %12, %11 : vector<64x128xf32>
    %c0_7 = arith.constant 0 : index
    %c0_8 = arith.constant 0 : index
    %14 = vector.load %arg4[%c0_7, %c0_8] : memref<64x128xf32, #tpu.memory_space<vmem>>, vector<64x128xf32>
    tpu.vector_store %arg4[%c0_7, %c0_8], %13 {strides = array<i32>} : memref<64x128xf32, #tpu.memory_space<vmem>>, vector<64x128xf32>,
    return
  }
  func.func @transform_0(%arg0: i32) -> (i32, i32) {
    %c0_i32 = arith.constant 0 : i32
    %c0_i32_0 = arith.constant 0 : i32
    return %arg0, %c0_i32 : i32, i32
  }
  func.func @transform_1(%arg0: i32) -> (i32, i32) {
    %c0_i32 = arith.constant 0 : i32
    %c0_i32_0 = arith.constant 0 : i32
    %c0_i32_1 = arith.constant 0 : i32
    return %c0_i32, %c0_i32_0 : i32, i32
  }
  func.func @transform_2(%arg0: i32) -> (i32, i32) {
    %c0_i32 = arith.constant 0 : i32
    %c0_i32_0 = arith.constant 0 : i32
    %c0_i32_1 = arith.constant 0 : i32
    return %c0_i32, %c0_i32_0 : i32, i32
  }
  func.func @transform_3(%arg0: i32) -> (i32, i32) {
    %c0_i32 = arith.constant 0 : i32
    %c0_i32_0 = arith.constant 0 : i32
    return %arg0, %c0_i32 : i32, i32
  }
}

</mosaic_0001>

<bundles_post_ra>
// kernel: tile.67
= control target key start
LH: loop header
LB: loop body
LE: loop exit
PB: predicated region body
PF: predicated region fallthrough
CT: control target
= control target key end

     0   :  { %s22_s0 = inlined_call_operand.vmem [shape: f32[64], index: 0, kind: input, shape index: {}]   ;;  %s23_s1 = inlined_call_operand.vmem [shape: f32[2,64], index: 1, kind: output, shape index: {}]  }
   0x1   :  { %v4_v0 = vld [vmem:[%s22_s0] ss:$0 sm:$0xff] }
   0x2   :  { %5 = vst [vmem:[%s23_s1] sm:$0x3] %v4_v0 }

// kernel: tile.68
= control target key start
LH: loop header
LB: loop body
LE: loop exit
PB: predicated region body
PF: predicated region fallthrough
CT: control target
= control target key end

     0   :  { %vm7_vm0 = vcmask 523264   ;;  %vm13_vm1 = vcmask 1048064   ;;  %s39_s0 = inlined_call_operand.vmem [shape: f32[2,64], index: 0, kind: input, shape index: {}]   ;;  %s40_s1 = inlined_call_operand.vmem [shape: f32[1,128], index: 1, kind: output, shape index: {}]  }
   0x1   :  { %v4_v0 = vld [vmem:[%s39_s0] sm:$0x3]  ;;  %s22_s0 = smov 64  }
   0x2   :  { %5 = vst [vmem:[#allocation1] sm:$0x3] %v4_v0 }
   0x9   :  { %v10_v1 = vld [vmem:[#allocation1 + $0x1] sm:$0x1]   ;;  %v6_v2 = vld [vmem:[#allocation1] sm:$0x1]  }
   0xa   :  { %11 = vrot.lane.b32.xlu0 %v10_v1, %s22_s0  ;;  %8 = vst.msk [vmem:[#allocation0] sm:$0x1] %vm7_vm0, %v6_v2  }
  0x7c   :  { %v12_v3 = vpop.permute.xlu0 %11  }
  0x7d   :  { %14 = vst.msk [vmem:[#allocation0] sm:$0x1] %vm13_vm1, %v12_v3  }
  0x84   :  { %v18_v4 = vld [vmem:[#allocation0] sm:$0x1] }
  0x85   :  { %20 = vst [vmem:[%s40_s1] sm:$0x1] %v18_v4 }

// kernel: forward.15
= control target key start
LH: loop header
LB: loop body
LE: loop exit
PB: predicated region body
PF: predicated region fallthrough
CT: control target
= control target key end

     0   :  { %s148_s0 = inlined_call_operand.vmem [shape: f32[64,128], index: 0, kind: input, shape index: {}]   ;;  %s149_s1 = inlined_call_operand.vmem [shape: f32[1,128], index: 1, kind: input, shape index: {}]   ;;  %s150_s2 = inlined_call_operand.vmem [shape: f32[1,128], index: 2, kind: input, shape index: {}]   ;;  %s151_s3 = inlined_call_operand.vmem [shape: f32[64,128], index: 3, kind: output, shape index: {}]  }
   0x1   :  { %v14_v0 = vld [vmem:[%s148_s0] sm:$0xff]  ;;  %v15_v4 = vld [vmem:[%s148_s0 + $0x8] sm:$0xff]  ;;  %v16_v5 = vld [vmem:[%s148_s0 + $0x10] sm:$0xff] }
   0x2   :  { %v72_v1 = vld [vmem:[%s149_s1] ss:$0 sm:$0xff]  ;;  %v17_v6 = vld [vmem:[%s148_s0 + $0x18] sm:$0xff]  ;;  %v19_v11 = vld [vmem:[%s148_s0 + $0x28] sm:$0xff] }
   0x3   :  { %v73_v2 = vld [vmem:[%s150_s2] ss:$0 sm:$0xff]  ;;  %v29_v3 = vmul.f32 %v72_v1, %v14_v0  ;;  %v30_v7 = vmul.f32 %v72_v1, %v15_v4  ;;  %v31_v8 = vmul.f32 %v72_v1, %v16_v5  ;;  %v32_v9 = vmul.f32 %v72_v1, %v17_v6  ;;  %v20_v12 = vld [vmem:[%s148_s0 + $0x30] sm:$0xff]  ;;  %v21_v17 = vld [vmem:[%s148_s0 + $0x38] sm:$0xff] }
   0x4   :  { %v18_v10 = vld [vmem:[%s148_s0 + $0x20] sm:$0xff]  ;;  %v34_v15 = vmul.f32 %v72_v1, %v19_v11  ;;  %v35_v16 = vmul.f32 %v72_v1, %v20_v12  ;;  %v36_v21 = vmul.f32 %v72_v1, %v21_v17 }
   0x5   :  { %v44_v13 = vadd.f32 %v73_v2, %v29_v3  ;;  %v33_v14 = vmul.f32 %v72_v1, %v18_v10  ;;  %v45_v18 = vadd.f32 %v73_v2, %v30_v7  ;;  %v46_v19 = vadd.f32 %v73_v2, %v31_v8 }
   0x6   :  { %v47_v20 = vadd.f32 %v73_v2, %v32_v9  ;;  %v49_v24 = vadd.f32 %v73_v2, %v34_v15  ;;  %v50_v25 = vadd.f32 %v73_v2, %v35_v16  ;;  %v51_v29 = vadd.f32 %v73_v2, %v36_v21 }
   0x7   :  { %v52_v22 = vmax.f32 %v44_v13, 0.0  ;;  %v48_v23 = vadd.f32 %v73_v2, %v33_v14  ;;  %v53_v26 = vmax.f32 %v45_v18, 0.0  ;;  %v54_v27 = vmax.f32 %v46_v19, 0.0 }
   0x8   :  { %v55_v28 = vmax.f32 %v47_v20, 0.0  ;;  %v57_v31 = vmax.f32 %v49_v24, 0.0  ;;  %v58_v32 = vmax.f32 %v50_v25, 0.0  ;;  %v59_v33 = vmax.f32 %v51_v29, 0.0 }
   0x9   :  { %60 = vst [vmem:[%s151_s3] sm:$0xff] %v52_v22  ;;  %v56_v30 = vmax.f32 %v48_v23, 0.0  ;;  %61 = vst [vmem:[%s151_s3 + $0x8] sm:$0xff] %v53_v26 }
   0xa   :  { %62 = vst [vmem:[%s151_s3 + $0x10] sm:$0xff] %v54_v27  ;;  %63 = vst [vmem:[%s151_s3 + $0x18] sm:$0xff] %v55_v28 }
   0xb   :  { %64 = vst [vmem:[%s151_s3 + $0x20] sm:$0xff] %v56_v30  ;;  %65 = vst [vmem:[%s151_s3 + $0x28] sm:$0xff] %v57_v31 }
   0xc   :  { %66 = vst [vmem:[%s151_s3 + $0x30] sm:$0xff] %v58_v32  ;;  %67 = vst [vmem:[%s151_s3 + $0x38] sm:$0xff] %v59_v33 }

// kernel: forward.14
= control target key start
LH: loop header
LB: loop body
LE: loop exit
PB: predicated region body
PF: predicated region fallthrough
CT: control target
= control target key end

     0   :  { %7 = vsyncpa [#allocation5], 0  ;;  %s2876_s0 = inlined_call_operand.vmem [shape: bf16[8,16,4096], index: 0, kind: input, shape index: {}]   ;;  %s2877_s1 = inlined_call_operand.hbm [shape: bf16[8,4096,128], index: 1, kind: input, shape index: {}]   ;;  %s2878_s2 = inlined_call_operand.vmem [shape: f32[8,16,128], index: 2, kind: output, shape index: {}]  }
   0x1   :  { %9 = vsyncpa [#allocation5 + $0x1], 0  ;;  %s2559_s9 = smov 0   ;;  %s2561_s10 = smov 0  }
   0x2   :  { %s2563_s11 = smov 0   ;;  %s2565_s12 = smov 0  }
   0x3   :  { %s2567_s13 = smov 0   ;;  %s2569_s14 = smov 0  }
   0x4   :  { %s2571_s15 = smov 0   ;;  %s2573_s16 = smov 0  }
   0x5 LB: > { %s30_s17 = sadd.s32 1, %s2530_s14  ;;  %s41_s18 = sadd.s32 1, %s2534_s15  ;;  %s2538_s16 = sphi %s2573_s16, %s15_s16   ;;  %s2534_s15 = sphi %s2571_s15, %s2887_s15   ;;  %s2530_s14 = sphi %s2569_s14, %s2886_s14   ;;  %s2526_s13 = sphi %s2567_s13, %s2885_s13   ;;  %s2522_s12 = sphi %s2565_s12, %s2884_s12   ;;  %s2518_s11 = sphi %s2563_s11, %s2883_s11   ;;  %s2514_s10 = sphi %s2561_s10, %s2882_s10   ;;  %s2510_s9 = sphi %s2559_s9, %s2881_s9  }
   0x6   : > { %p31_p0 = scmp.ge.s32.totalorder %s30_s17, 2  ;;  %s1905_s19 = sadd.s32 4294967295, %s2538_s16  }
   0x7   : > { %p59_p1 = scmp.ne.s32.totalorder %s2518_s11, %s2514_s10  ;;  %p60_p2 = scmp.eq.s32.totalorder %s2538_s16, 0 }
   0x8   : > { %s2889_s17 = smov (%p31_p0, %s30_s17), 0  ;;  %s2891_s18 = smov (!%p31_p0, %s41_s18), %s2534_s15 }
   0x9   : > { %s48_s20 = ssub.s32 %s2530_s14, %s2889_s17  ;;  %p43_p3 = scmp.ge.s32.totalorder %s2891_s18, 8 }
   0xa   : > { %p95_p4 = scmp.ne.s32.totalorder %s2514_s10, %s2510_s9  ;;  %p2609_p5 = por %p60_p2, %p59_p1 }
   0xb   : > { %p96_p6 = scmp.eq.s32.totalorder %s1905_s19, 0  ;;  %s2893_s18 = smov (%p43_p3, %s2891_s18), 0 }
   0xc   : > { %s45_s23 = ssub.s32 %s2534_s15, %s2893_s18  ;;  %s52_s25 = sadd.s32 1, %s2518_s11 }
   0xd   : > { %p2615_p7 = por %p96_p6, %p95_p4  ;;  %s49_s24 = sor.u32 %s48_s20, %s45_s23 }
   0xe   : > { %p50_p8 = scmp.eq.s32.totalorder %s49_s24, 0  ;;  %p1908_p9 = scmp.ge.s32.totalorder %s2538_s16, 16 }
  0x10   : > { %s2623_s26 = scalar_select %p50_p8, %s2518_s11, %s52_s25  }
  0x11   : > { %145 = sbr.rel (%p1908_p9) target bundleno = 67 (0x43), region = 16 }
  0x18   : > { %148 = sbr.rel (!%p2609_p5) target bundleno = 39 (0x27), region = 20  ;;  %s150_s27 = sand.u32 (%p2609_p5), 1, %s2518_s11  }
  0x19   : > { %s1910_s28 = sshll.u32 (%p2609_p5), %s2530_s14, 4  ;;  %s1909_s29 = sshll.u32 (%p2609_p5), %s150_s27, 7 }
  0x1a   : > { %s1911_s30 = sshll.u32 (%p2609_p5), %s2534_s15, 6  ;;  %s152_s8 = scalar_lea.vmem (%p2609_p5), [#allocation3], %s1909_s29 }
  0x1b   : > { %s158_s3 = sadd.s32 (%p2609_p5), %s1911_s30, %s1910_s28 }
  0x1c   : > { %s1912_s4 = sshll.u32 (%p2609_p5), %s158_s3, 2 }
  0x1d   : > { %s2634_s7 = scalar_lea.vmem (%p2609_p5), %s2876_s0, %s1912_s4 }
  0x1e   : > { %v173_v0 = vld [vmem:[%s2634_s7] sm:$0xff] (%p2609_p5)  ;;  %v175_v1 = vld [vmem:[%s2634_s7 + $0x8] sm:$0xff] (%p2609_p5)  ;;  %v177_v2 = vld [vmem:[%s2634_s7 + $0x10] sm:$0xff] (%p2609_p5) }
  0x1f   : > { %174 = vst [vmem:[%s152_s8] sm:$0xff] %v173_v0  ;;  %176 = vst [vmem:[%s152_s8 + $0x8] sm:$0xff] %v175_v1  ;;  %v179_v3 = vld [vmem:[%s2634_s7 + $0x18] sm:$0xff]  ;;  %v181_v4 = vld [vmem:[%s2634_s7 + $0x20] sm:$0xff] }
  0x20   : > { %178 = vst [vmem:[%s152_s8 + $0x10] sm:$0xff] %v177_v2  ;;  %v183_v5 = vld [vmem:[%s2634_s7 + $0x28] sm:$0xff]  ;;  %180 = vst [vmem:[%s152_s8 + $0x18] sm:$0xff] %v179_v3  ;;  %v185_v6 = vld [vmem:[%s2634_s7 + $0x30] sm:$0xff] }
  0x21   : > { %182 = vst [vmem:[%s152_s8 + $0x20] sm:$0xff] %v181_v4  ;;  %184 = vst [vmem:[%s152_s8 + $0x28] sm:$0xff] %v183_v5  ;;  %v187_v7 = vld [vmem:[%s2634_s7 + $0x38] sm:$0xff]  ;;  %v189_v8 = vld [vmem:[%s2634_s7 + $0x80] sm:$0xff] }
  0x22   : > { %186 = vst [vmem:[%s152_s8 + $0x30] sm:$0xff] %v185_v6  ;;  %188 = vst [vmem:[%s152_s8 + $0x38] sm:$0xff] %v187_v7  ;;  %v191_v9 = vld [vmem:[%s2634_s7 + $0x88] sm:$0xff]  ;;  %v193_v10 = vld [vmem:[%s2634_s7 + $0x90] sm:$0xff] }
  0x23   : > { %190 = vst [vmem:[%s152_s8 + $0x40] sm:$0xff] %v189_v8  ;;  %v195_v11 = vld [vmem:[%s2634_s7 + $0x98] sm:$0xff]  ;;  %192 = vst [vmem:[%s152_s8 + $0x48] sm:$0xff] %v191_v9  ;;  %v197_v12 = vld [vmem:[%s2634_s7 + $0xa0] sm:$0xff] }
  0x24   : > { %194 = vst [vmem:[%s152_s8 + $0x50] sm:$0xff] %v193_v10  ;;  %196 = vst [vmem:[%s152_s8 + $0x58] sm:$0xff] %v195_v11  ;;  %v199_v13 = vld [vmem:[%s2634_s7 + $0xa8] sm:$0xff]  ;;  %v201_v14 = vld [vmem:[%s2634_s7 + $0xb0] sm:$0xff] }
  0x25   : > { %198 = vst [vmem:[%s152_s8 + $0x60] sm:$0xff] %v197_v12  ;;  %200 = vst [vmem:[%s152_s8 + $0x68] sm:$0xff] %v199_v13  ;;  %v203_v15 = vld [vmem:[%s2634_s7 + $0xb8] sm:$0xff] }
  0x26   : > { %202 = vst [vmem:[%s152_s8 + $0x70] sm:$0xff] %v201_v14  ;;  %204 = vst [vmem:[%s152_s8 + $0x78] sm:$0xff] %v203_v15 }
  0x27 PF: > { %s211_s9 = sand.u32 1, %s2518_s11   ;;  %s1914_s19 = sshll.u32 %s2530_s14, 8 }
  0x28   : > { %s1913_s20 = sshll.u32 %s211_s9, 10  ;;  %s1915_s23 = sshll.u32 %s2534_s15, 9 }
  0x29   : > { %s222_s24 = sadd.s32 %s1915_s23, %s1914_s19  ;;  %s215_s25 = scalar_lea.vmem [#allocation4], %s1913_s20 }
  0x2a   : > { %s225_s27 = sshll.u32 %s215_s25, 4  ;;  %s1916_s28 = sshll.u32 %s222_s24, 6  ;;  %s2655_s27 = int_to_ptr.vmem [resolvable:$true] %s225_s27 }
  0x2b   : > { %s2660_s3 = scalar_lea.hbm %s2877_s1, %s1916_s28  ;;  %s2662_s4 = scalar_lea.sflag [#allocation5], %s211_s9 }
  0x2c   : > { %s2444_s5 = scalar_lea.hbm %s2660_s3, 16384  ;;  %s2448_s8 = scalar_lea.hbm %s2877_s1, 262144 }
  0x2d   : > { %p2445_p10 = scmp.ne.s32.totalorder %s2660_s3, %s2444_s5  ;;  %p2449_p13 = scmp.lt.u32.totalorder %s2660_s3, %s2877_s1 }
  0x2e   : > { %p2450_p0 = scmp.lt.u32.totalorder %s2448_s8, %s2444_s5  ;;  %p2452_p2 = scmp.lt.u32.totalorder %s2444_s5, %s2660_s3 }
  0x2f   : > { %p2446_p11 = pnand %p2445_p10, %p2609_p5 }
  0x30   : > { %p2451_p1 = por %p2450_p0, %p2449_p13 }
  0x31   : > { %p2447_p12 = pneg %p2446_p11 }
  0x32   : > { %p2453_p3 = por %p2452_p2, %p2451_p1 }
  0x34   : > { %p2454_p4 = pnand %p2453_p3, %p2447_p12 }
  0x36   : > { %2457 = shalt.err (!%p2454_p4)
}
  0x37   : > { %s2458_s9 = scalar_lea.vmem %s2655_s27, 16384  ;;  %s2540_s23 = smov [#allocation4]  }
  0x38   : > { %p2459_p6 = scmp.ne.s32.totalorder %s2655_s27, %s2458_s9  ;;  %s2462_s24 = sshll.u32 %s2540_s23, 4  ;;  %s2463_s24 = int_to_ptr.vmem [resolvable:$false] %s2462_s24 }
  0x39   : > { %s2464_s25 = scalar_lea.vmem %s2463_s24, 32768  ;;  %p2465_p10 = scmp.lt.s32.totalorder %s2655_s27, %s2463_s24 }
  0x3a   : > { %p2460_p8 = pnand %p2459_p6, %p2609_p5  ;;  %p2466_p11 = scmp.lt.s32.totalorder %s2464_s25, %s2458_s9 }
  0x3c   : > { %p2461_p9 = pneg %p2460_p8  ;;  %p2467_p13 = por %p2466_p11, %p2465_p10 }
  0x3e   : > { %p2468_p0 = pnand %p2467_p13, %p2461_p9 }
  0x40   : > { %2471 = shalt.err (!%p2468_p0)
}
  0x41   : > { %s2541_s28 = smov 64   ;;  %s2542_s29 = smov 4  }
  0x42   : > { %2247 = dma.hbm_to_vmem [thread:$0]  (%p2609_p5), %s2660_s3, 16384, %s2655_s27, %s2662_s4, %s2541_s28, %s2541_s28, %s2542_s29  }
  0x43 PF: > { %p1917_p12 = scmp.ge.s32.totalorder %s2538_s16, 1  ;;  %p233_p1 = scmp.lt.s32.totalorder %s2538_s16, 17 }
  0x45   : > { %p234_p2 = pnand %p1917_p12, %p233_p1 }
  0x46   : > { %s240_s30 = sand.u32 (!%p234_p2), 1, %s2514_s10  }
  0x47   : > { %237 = sbr.rel (%p234_p2) target bundleno = 450 (0x1c2), region = 47  ;;  %s1918_s5 = sshll.u32 (!%p234_p2), %s240_s30, 7 }
  0x48   : > { %s1919_s6 = sshll.u32 (!%p234_p2), %s240_s30, 10  ;;  %s2689_s7 = scalar_lea.vmem (!%p234_p2), [#allocation3], %s1918_s5 }
  0x49   : > { %s247_s8 = scalar_lea.sflag (!%p234_p2), [#allocation5], %s240_s30  ;;  %s2691_s19 = scalar_lea.vmem (!%p234_p2), [#allocation4], %s1919_s6 }
  0x4e   : > { %2505 = dma.done.wait (%p2615_p7), %s247_s8, 16384  }
  0x4f   : > { %2507 = vsyncadd (%p2615_p7), %s247_s8, 4294950912  ;;  %p286_p5 = scmp.lt.s32.totalorder %s2526_s13, 7  ;;  %p1922_p3 = scmp.ne.s32.totalorder %s2522_s12, 0 }
  0x50   : > { %v2543_v16 = vmov (!%p1922_p3), 0.0  }
  0x51   : > { %s2895_s13 = smov (!%p286_p5, %s2526_s13), 7  ;;  %302 = sbr.rel (%p1922_p3) target bundleno = 88 (0x58), region = 59 }
  0x52   : > { %s2070_s21 = sshll.u32 %s2895_s13, 4  ;;  %303 = vst [vmem:[#allocation2] sm:$0xff] (!%p1922_p3), %v2543_v16  ;;  %304 = vst [vmem:[#allocation2 + $0x8] sm:$0xff] (!%p1922_p3), %v2543_v16 }
  0x53   : > { %s2702_s4 = scalar_lea.vmem %s2878_s2, %s2070_s21 }
  0x58 PF: > { %v2316_v17 = vld [vmem:[%s2691_s19 + $0x40] sm:$0xff]   ;;  %v2320_v21 = vld [vmem:[%s2691_s19 + $0x48] sm:$0xff]   ;;  %v2324_v25 = vld [vmem:[%s2691_s19 + $0x50] sm:$0xff]   ;;  %p2067_p7 = scmp.ne.s32.totalorder %s2522_s12, 1 }
  0x59   : > { %v2317_v18 = vld [vmem:[%s2691_s19 + $0xc0] sm:$0xff]   ;;  %2071 = vmatprep.subr.bf16.mxu0 %v2316_v17  ;;  %v2321_v22 = vld [vmem:[%s2691_s19 + $0xc8] sm:$0xff]   ;;  %v2325_v26 = vld [vmem:[%s2691_s19 + $0xd0] sm:$0xff]  }
  0x5a   : > { %v2318_v19 = vld [vmem:[%s2691_s19] sm:$0xff]   ;;  %2093 = vmatprep.subr.bf16.mxu1 %v2317_v18  ;;  %v2322_v23 = vld [vmem:[%s2691_s19 + $0x8] sm:$0xff]   ;;  %v2326_v27 = vld [vmem:[%s2691_s19 + $0x10] sm:$0xff]  }
  0x5b   : > { %v2319_v20 = vld [vmem:[%s2691_s19 + $0x80] sm:$0xff]   ;;  %2072 = vmatpush3.bf16.msra.mxu0 %v2318_v19  ;;  %v2323_v24 = vld [vmem:[%s2691_s19 + $0x88] sm:$0xff]   ;;  %v2327_v28 = vld [vmem:[%s2691_s19 + $0x90] sm:$0xff]  }
  0x5c   : > { %2094 = vmatpush3.bf16.msra.mxu1 %v2319_v20  ;;  %2073 = vmatprep.subr.bf16.mxu0 %v2320_v21  ;;  %v2328_v29 = vld [vmem:[%s2691_s19 + $0x58] sm:$0xff]   ;;  %v2332_v33 = vld [vmem:[%s2691_s19 + $0x60] sm:$0xff]   ;;  %v2336_v37 = vld [vmem:[%s2691_s19 + $0x68] sm:$0xff]  }
  0x5d   : > { %2095 = vmatprep.subr.bf16.mxu1 %v2321_v22  ;;  %v2329_v30 = vld [vmem:[%s2691_s19 + $0xd8] sm:$0xff]   ;;  %v2333_v34 = vld [vmem:[%s2691_s19 + $0xe0] sm:$0xff]   ;;  %v2337_v38 = vld [vmem:[%s2691_s19 + $0xe8] sm:$0xff]  }
  0x5e   : > { %v2330_v31 = vld [vmem:[%s2691_s19 + $0x18] sm:$0xff]   ;;  %v2334_v35 = vld [vmem:[%s2691_s19 + $0x20] sm:$0xff]   ;;  %v2338_v39 = vld [vmem:[%s2691_s19 + $0x28] sm:$0xff]  }
  0x5f   : > { %2074 = vmatpush3.bf16.msra.mxu0 %v2322_v23  ;;  %v2331_v32 = vld [vmem:[%s2691_s19 + $0x98] sm:$0xff]   ;;  %v2335_v36 = vld [vmem:[%s2691_s19 + $0xa0] sm:$0xff]   ;;  %v2339_v40 = vld [vmem:[%s2691_s19 + $0xa8] sm:$0xff]  }
  0x60   : > { %2096 = vmatpush3.bf16.msra.mxu1 %v2323_v24  ;;  %2075 = vmatprep.subr.bf16.mxu0 %v2324_v25  ;;  %v2340_v41 = vld [vmem:[%s2691_s19 + $0x70] sm:$0xff]   ;;  %v2344_v45 = vld [vmem:[%s2691_s19 + $0x78] sm:$0xff]   ;;  %v307_v49 = vld [vmem:[%s2689_s7] sm:$0xff] }
  0x61   : > { %2097 = vmatprep.subr.bf16.mxu1 %v2325_v26  ;;  %v2341_v42 = vld [vmem:[%s2691_s19 + $0xf0] sm:$0xff]   ;;  %v2345_v46 = vld [vmem:[%s2691_s19 + $0xf8] sm:$0xff]   ;;  %v315_v50 = vld [vmem:[%s2689_s7 + $0x40] sm:$0xff] }
  0x62   : > { %v2342_v43 = vld [vmem:[%s2691_s19 + $0x30] sm:$0xff]   ;;  %v2346_v47 = vld [vmem:[%s2691_s19 + $0x38] sm:$0xff]   ;;  %v308_v51 = vld [vmem:[%s2689_s7 + $0x8] sm:$0xff]  ;;  %v1923_v52 = vcombine.low %v307_v49, %v315_v50  ;;  %v1924_v53 = vcombine.high %v307_v49, %v315_v50 }
  0x63   : > { %2076 = vmatpush3.bf16.msra.mxu0 %v2326_v27  ;;  %v2343_v44 = vld [vmem:[%s2691_s19 + $0xb0] sm:$0xff]   ;;  %v2347_v48 = vld [vmem:[%s2691_s19 + $0xb8] sm:$0xff]   ;;  %v316_v54 = vld [vmem:[%s2689_s7 + $0x48] sm:$0xff] }
  0x64   : > { %2098 = vmatpush3.bf16.msra.mxu1 %v2327_v28  ;;  %2077 = vmatprep.subr.bf16.mxu0 %v2328_v29  ;;  %v1925_v55 = vcombine.low %v308_v51, %v316_v54  ;;  %v1926_v56 = vcombine.high %v308_v51, %v316_v54  ;;  %v2348_v57 = vld [vmem:[%s2691_s19 + $0x140] sm:$0xff]   ;;  %v2352_v61 = vld [vmem:[%s2691_s19 + $0x148] sm:$0xff]   ;;  %v2356_v1 = vld [vmem:[%s2691_s19 + $0x150] sm:$0xff]  }
  0x65   : > { %2099 = vmatprep.subr.bf16.mxu1 %v2329_v30  ;;  %1459 = vmatprep.mubr.bf16.mxu0 %v1924_v53  ;;  %v2349_v58 = vld [vmem:[%s2691_s19 + $0x1c0] sm:$0xff]   ;;  %v2353_v62 = vld [vmem:[%s2691_s19 + $0x1c8] sm:$0xff]   ;;  %v2357_v2 = vld [vmem:[%s2691_s19 + $0x1d0] sm:$0xff]  }
  0x66   : > { %1500 = vmatprep.mubr.bf16.mxu1 %v1926_v56  ;;  %v2350_v59 = vld [vmem:[%s2691_s19 + $0x100] sm:$0xff]   ;;  %v2354_v63 = vld [vmem:[%s2691_s19 + $0x108] sm:$0xff]   ;;  %v2358_v3 = vld [vmem:[%s2691_s19 + $0x110] sm:$0xff]  }
  0x67   : > { %2078 = vmatpush3.bf16.msra.mxu0 %v2330_v31  ;;  %v2351_v60 = vld [vmem:[%s2691_s19 + $0x180] sm:$0xff]   ;;  %v2355_v0 = vld [vmem:[%s2691_s19 + $0x188] sm:$0xff]   ;;  %v2359_v4 = vld [vmem:[%s2691_s19 + $0x190] sm:$0xff]  }
  0x68   : > { %2100 = vmatpush3.bf16.msra.mxu1 %v2331_v32  ;;  %2079 = vmatprep.subr.bf16.mxu0 %v2332_v33  ;;  %v2360_v5 = vld [vmem:[%s2691_s19 + $0x158] sm:$0xff]   ;;  %v2364_v9 = vld [vmem:[%s2691_s19 + $0x160] sm:$0xff]   ;;  %v2368_v13 = vld [vmem:[%s2691_s19 + $0x168] sm:$0xff]  }
  0x69   : > { %2101 = vmatprep.subr.bf16.mxu1 %v2333_v34  ;;  %v2361_v6 = vld [vmem:[%s2691_s19 + $0x1d8] sm:$0xff]   ;;  %v2365_v10 = vld [vmem:[%s2691_s19 + $0x1e0] sm:$0xff]   ;;  %v2369_v14 = vld [vmem:[%s2691_s19 + $0x1e8] sm:$0xff]  }
  0x6a   : > { %v2362_v7 = vld [vmem:[%s2691_s19 + $0x118] sm:$0xff]   ;;  %v2366_v11 = vld [vmem:[%s2691_s19 + $0x120] sm:$0xff]   ;;  %v2370_v15 = vld [vmem:[%s2691_s19 + $0x128] sm:$0xff]  }
  0x6b   : > { %2080 = vmatpush3.bf16.msra.mxu0 %v2334_v35  ;;  %v2363_v8 = vld [vmem:[%s2691_s19 + $0x198] sm:$0xff]   ;;  %v2367_v12 = vld [vmem:[%s2691_s19 + $0x1a0] sm:$0xff]   ;;  %v2371_v16 = vld [vmem:[%s2691_s19 + $0x1a8] sm:$0xff]  }
  0x6c   : > { %2102 = vmatpush3.bf16.msra.mxu1 %v2335_v36  ;;  %2081 = vmatprep.subr.bf16.mxu0 %v2336_v37  ;;  %v2372_v17 = vld [vmem:[%s2691_s19 + $0x170] sm:$0xff]   ;;  %v2376_v21 = vld [vmem:[%s2691_s19 + $0x178] sm:$0xff]   ;;  %v2380_v33 = vld [vmem:[%s2691_s19 + $0x240] sm:$0xff]  }
  0x6d   : > { %2103 = vmatprep.subr.bf16.mxu1 %v2337_v38  ;;  %v2373_v18 = vld [vmem:[%s2691_s19 + $0x1f0] sm:$0xff]   ;;  %v2377_v22 = vld [vmem:[%s2691_s19 + $0x1f8] sm:$0xff]   ;;  %v2381_v34 = vld [vmem:[%s2691_s19 + $0x2c0] sm:$0xff]  }
  0x6e   : > { %v2374_v19 = vld [vmem:[%s2691_s19 + $0x130] sm:$0xff]   ;;  %v2378_v23 = vld [vmem:[%s2691_s19 + $0x138] sm:$0xff]   ;;  %v2382_v35 = vld [vmem:[%s2691_s19 + $0x200] sm:$0xff]  }
  0x6f   : > { %2082 = vmatpush3.bf16.msra.mxu0 %v2338_v39  ;;  %v2375_v20 = vld [vmem:[%s2691_s19 + $0x1b0] sm:$0xff]   ;;  %v2379_v24 = vld [vmem:[%s2691_s19 + $0x1b8] sm:$0xff]   ;;  %v2383_v36 = vld [vmem:[%s2691_s19 + $0x280] sm:$0xff]  }
  0x70   : > { %2104 = vmatpush3.bf16.msra.mxu1 %v2339_v40  ;;  %2083 = vmatprep.subr.bf16.mxu0 %v2340_v41  ;;  %v309_v25 = vld [vmem:[%s2689_s7 + $0x10] sm:$0xff]  ;;  %v310_v29 = vld [vmem:[%s2689_s7 + $0x18] sm:$0xff]  ;;  %v2384_v37 = vld [vmem:[%s2691_s19 + $0x248] sm:$0xff]  }
  0x71   : > { %2105 = vmatprep.subr.bf16.mxu1 %v2341_v42  ;;  %v317_v26 = vld [vmem:[%s2689_s7 + $0x50] sm:$0xff]  ;;  %v318_v30 = vld [vmem:[%s2689_s7 + $0x58] sm:$0xff]  ;;  %v2385_v38 = vld [vmem:[%s2691_s19 + $0x2c8] sm:$0xff]  }
  0x72   : > { %v1927_v27 = vcombine.low %v309_v25, %v317_v26  ;;  %v1928_v28 = vcombine.high %v309_v25, %v317_v26  ;;  %v1929_v31 = vcombine.low %v310_v29, %v318_v30  ;;  %v1930_v32 = vcombine.high %v310_v29, %v318_v30  ;;  %v2386_v39 = vld [vmem:[%s2691_s19 + $0x208] sm:$0xff]   ;;  %v2388_v41 = vld [vmem:[%s2691_s19 + $0x250] sm:$0xff]   ;;  %v2396_v49 = vld [vmem:[%s2691_s19 + $0x260] sm:$0xff]  }
  0x73   : > { %2084 = vmatpush3.bf16.msra.mxu0 %v2342_v43  ;;  %v2387_v40 = vld [vmem:[%s2691_s19 + $0x288] sm:$0xff]   ;;  %v2389_v42 = vld [vmem:[%s2691_s19 + $0x2d0] sm:$0xff]   ;;  %v2397_v50 = vld [vmem:[%s2691_s19 + $0x2e0] sm:$0xff]  }
  0x74   : > { %2106 = vmatpush3.bf16.msra.mxu1 %v2343_v44  ;;  %2085 = vmatprep.subr.bf16.mxu0 %v2344_v45  ;;  %v2390_v43 = vld [vmem:[%s2691_s19 + $0x210] sm:$0xff]   ;;  %v2392_v45 = vld [vmem:[%s2691_s19 + $0x258] sm:$0xff]   ;;  %v2398_v51 = vld [vmem:[%s2691_s19 + $0x220] sm:$0xff]  }
  0x75   : > { %2107 = vmatprep.subr.bf16.mxu1 %v2345_v46  ;;  %v2391_v44 = vld [vmem:[%s2691_s19 + $0x290] sm:$0xff]   ;;  %v2393_v46 = vld [vmem:[%s2691_s19 + $0x2d8] sm:$0xff]   ;;  %v2400_v53 = vld [vmem:[%s2691_s19 + $0x268] sm:$0xff]  }
  0x76   : > { %v2401_v54 = vld [vmem:[%s2691_s19 + $0x2e8] sm:$0xff]   ;;  %v2428_v25 = vld [vmem:[%s2691_s19 + $0x360] sm:$0xff]  }
  0x77   : > { %2086 = vmatpush3.bf16.msra.mxu0 %v2346_v47  ;;  %v2394_v47 = vld [vmem:[%s2691_s19 + $0x218] sm:$0xff]   ;;  %v2403_v56 = vld [vmem:[%s2691_s19 + $0x2a8] sm:$0xff]   ;;  %v2429_v26 = vld [vmem:[%s2691_s19 + $0x3e0] sm:$0xff]  }
  0x78   : > { %2108 = vmatpush3.bf16.msra.mxu1 %v2347_v48  ;;  %2115 = vmatprep.subr.bf16.mxu0 %v2348_v57  ;;  %v2395_v48 = vld [vmem:[%s2691_s19 + $0x298] sm:$0xff]   ;;  %v2404_v57 = vld [vmem:[%s2691_s19 + $0x270] sm:$0xff]   ;;  %v2432_v29 = vld [vmem:[%s2691_s19 + $0x368] sm:$0xff]  }
  0x79   : > { %2137 = vmatprep.subr.bf16.mxu1 %v2349_v58  ;;  %v2405_v58 = vld [vmem:[%s2691_s19 + $0x2f0] sm:$0xff]   ;;  %v2433_v30 = vld [vmem:[%s2691_s19 + $0x3e8] sm:$0xff]  }
  0x7a   : > { %1460 = vmatmul.mubr.bf16.vlgmr.msra.gmra.mrb[0].mxu0 %v1923_v52  ;;  %v2399_v52 = vld [vmem:[%s2691_s19 + $0x2a0] sm:$0xff]  }
  0x7b   : > { %1501 = vmatmul.mubr.bf16.vlgmr.msra.gmra.mrb[0].mxu1 %v1925_v55  ;;  %2116 = vmatpush3.bf16.msra.mxu0 %v2350_v59  ;;  %v2402_v55 = vld [vmem:[%s2691_s19 + $0x228] sm:$0xff]   ;;  %v2406_v59 = vld [vmem:[%s2691_s19 + $0x230] sm:$0xff]  }
  0x7c   : > { %2138 = vmatpush3.bf16.msra.mxu1 %v2351_v60  ;;  %2117 = vmatprep.subr.bf16.mxu0 %v2352_v61  ;;  %v2407_v60 = vld [vmem:[%s2691_s19 + $0x2b0] sm:$0xff]   ;;  %v2408_v61 = vld [vmem:[%s2691_s19 + $0x278] sm:$0xff]  }
  0x7d   : > { %2139 = vmatprep.subr.bf16.mxu1 %v2353_v62  ;;  %1541 = vmatprep.mubr.bf16.mxu0 %v1928_v28  ;;  %v2409_v62 = vld [vmem:[%s2691_s19 + $0x2f8] sm:$0xff]   ;;  %v2431_v28 = vld [vmem:[%s2691_s19 + $0x3a0] sm:$0xff]  }
  0x7e   : > { %1582 = vmatprep.mubr.bf16.mxu1 %v1930_v32  ;;  %v2435_v32 = vld [vmem:[%s2691_s19 + $0x3a8] sm:$0xff]  }
  0x7f   : > { %2118 = vmatpush3.bf16.msra.mxu0 %v2354_v63  ;;  %v2410_v63 = vld [vmem:[%s2691_s19 + $0x238] sm:$0xff]  }
  0x80   : > { %2140 = vmatpush3.bf16.msra.mxu1 %v2355_v0  ;;  %2119 = vmatprep.subr.bf16.mxu0 %v2356_v1  ;;  %v2411_v0 = vld [vmem:[%s2691_s19 + $0x2b8] sm:$0xff]   ;;  %v311_v1 = vld [vmem:[%s2689_s7 + $0x20] sm:$0xff] }
  0x81   : > { %2141 = vmatprep.subr.bf16.mxu1 %v2357_v2  ;;  %v319_v2 = vld [vmem:[%s2689_s7 + $0x60] sm:$0xff] }
  0x83   : > { %2120 = vmatpush3.bf16.msra.mxu0 %v2358_v3  ;;  %v312_v3 = vld [vmem:[%s2689_s7 + $0x28] sm:$0xff] }
  0x84   : > { %2142 = vmatpush3.bf16.msra.mxu1 %v2359_v4  ;;  %2121 = vmatprep.subr.bf16.mxu0 %v2360_v5  ;;  %v320_v4 = vld [vmem:[%s2689_s7 + $0x68] sm:$0xff]  ;;  %v1931_v5 = vcombine.low %v311_v1, %v319_v2 }
  0x85   : > { %2143 = vmatprep.subr.bf16.mxu1 %v2361_v6  ;;  %v1932_v6 = vcombine.high %v311_v1, %v319_v2 }
  0x87   : > { %2122 = vmatpush3.bf16.msra.mxu0 %v2362_v7  ;;  %v1933_v7 = vcombine.low %v312_v3, %v320_v4 }
  0x88   : > { %2144 = vmatpush3.bf16.msra.mxu1 %v2363_v8  ;;  %2123 = vmatprep.subr.bf16.mxu0 %v2364_v9  ;;  %v1934_v8 = vcombine.high %v312_v3, %v320_v4  ;;  %v2412_v9 = vld [vmem:[%s2691_s19 + $0x340] sm:$0xff]  }
  0x89   : > { %2145 = vmatprep.subr.bf16.mxu1 %v2365_v10  ;;  %v2413_v10 = vld [vmem:[%s2691_s19 + $0x3c0] sm:$0xff]  }
  0x8b   : > { %2124 = vmatpush3.bf16.msra.mxu0 %v2366_v11  ;;  %v2414_v11 = vld [vmem:[%s2691_s19 + $0x300] sm:$0xff]  }
  0x8c   : > { %2146 = vmatpush3.bf16.msra.mxu1 %v2367_v12  ;;  %2125 = vmatprep.subr.bf16.mxu0 %v2368_v13  ;;  %v2415_v12 = vld [vmem:[%s2691_s19 + $0x380] sm:$0xff]   ;;  %v2416_v13 = vld [vmem:[%s2691_s19 + $0x348] sm:$0xff]  }
  0x8d   : > { %2147 = vmatprep.subr.bf16.mxu1 %v2369_v14  ;;  %v2417_v14 = vld [vmem:[%s2691_s19 + $0x3c8] sm:$0xff]  }
  0x8f   : > { %2126 = vmatpush3.bf16.msra.mxu0 %v2370_v15  ;;  %v2418_v15 = vld [vmem:[%s2691_s19 + $0x308] sm:$0xff]  }
  0x90   : > { %2148 = vmatpush3.bf16.msra.mxu1 %v2371_v16  ;;  %2127 = vmatprep.subr.bf16.mxu0 %v2372_v17  ;;  %v2419_v16 = vld [vmem:[%s2691_s19 + $0x388] sm:$0xff]   ;;  %v2420_v17 = vld [vmem:[%s2691_s19 + $0x350] sm:$0xff]  }
  0x91   : > { %2149 = vmatprep.subr.bf16.mxu1 %v2373_v18  ;;  %v2421_v18 = vld [vmem:[%s2691_s19 + $0x3d0] sm:$0xff]  }
  0x93   : > { %2128 = vmatpush3.bf16.msra.mxu0 %v2374_v19  ;;  %v2422_v19 = vld [vmem:[%s2691_s19 + $0x310] sm:$0xff]  }
  0x94   : > { %2150 = vmatpush3.bf16.msra.mxu1 %v2375_v20  ;;  %2129 = vmatprep.subr.bf16.mxu0 %v2376_v21  ;;  %v2423_v20 = vld [vmem:[%s2691_s19 + $0x390] sm:$0xff]   ;;  %v2424_v21 = vld [vmem:[%s2691_s19 + $0x358] sm:$0xff]  }
  0x95   : > { %2151 = vmatprep.subr.bf16.mxu1 %v2377_v22  ;;  %v2425_v22 = vld [vmem:[%s2691_s19 + $0x3d8] sm:$0xff]  }
  0x97   : > { %2130 = vmatpush3.bf16.msra.mxu0 %v2378_v23  ;;  %v2426_v23 = vld [vmem:[%s2691_s19 + $0x318] sm:$0xff]  }
  0x98   : > { %2152 = vmatpush3.bf16.msra.mxu1 %v2379_v24  ;;  %2159 = vmatprep.subr.bf16.mxu0 %v2380_v33  ;;  %v2427_v24 = vld [vmem:[%s2691_s19 + $0x398] sm:$0xff]   ;;  %v2436_v33 = vld [vmem:[%s2691_s19 + $0x370] sm:$0xff]  }
  0x99   : > { %2181 = vmatprep.subr.bf16.mxu1 %v2381_v34  ;;  %v2437_v34 = vld [vmem:[%s2691_s19 + $0x3f0] sm:$0xff]  }
  0x9a   : > { %1542 = vmatmul.mubr.bf16.vlgmr.msra.gmra.mrb[4].mxu0 %v1927_v27  ;;  %v2430_v27 = vld [vmem:[%s2691_s19 + $0x320] sm:$0xff]  }
  0x9b   : > { %1583 = vmatmul.mubr.bf16.vlgmr.msra.gmra.mrb[4].mxu1 %v1929_v31  ;;  %2160 = vmatpush3.bf16.msra.mxu0 %v2382_v35  ;;  %v2434_v31 = vld [vmem:[%s2691_s19 + $0x328] sm:$0xff]   ;;  %v2438_v35 = vld [vmem:[%s2691_s19 + $0x330] sm:$0xff]  }
  0x9c   : > { %2182 = vmatpush3.bf16.msra.mxu1 %v2383_v36  ;;  %2161 = vmatprep.subr.bf16.mxu0 %v2384_v37  ;;  %v2439_v36 = vld [vmem:[%s2691_s19 + $0x3b0] sm:$0xff]   ;;  %v2440_v37 = vld [vmem:[%s2691_s19 + $0x378] sm:$0xff]  }
  0x9d   : > { %2183 = vmatprep.subr.bf16.mxu1 %v2385_v38  ;;  %1623 = vmatprep.mubr.bf16.mxu0 %v1932_v6  ;;  %v2441_v38 = vld [vmem:[%s2691_s19 + $0x3f8] sm:$0xff]  }
  0x9e   : > { %1664 = vmatprep.mubr.bf16.mxu1 %v1934_v8 }
  0x9f   : > { %2162 = vmatpush3.bf16.msra.mxu0 %v2386_v39  ;;  %v2442_v39 = vld [vmem:[%s2691_s19 + $0x338] sm:$0xff]  }
  0xa0   : > { %2184 = vmatpush3.bf16.msra.mxu1 %v2387_v40  ;;  %2163 = vmatprep.subr.bf16.mxu0 %v2388_v41  ;;  %v2443_v40 = vld [vmem:[%s2691_s19 + $0x3b8] sm:$0xff]   ;;  %v313_v41 = vld [vmem:[%s2689_s7 + $0x30] sm:$0xff] }
  0xa1   : > { %2185 = vmatprep.subr.bf16.mxu1 %v2389_v42  ;;  %v321_v42 = vld [vmem:[%s2689_s7 + $0x70] sm:$0xff] }
  0xa3   : > { %2164 = vmatpush3.bf16.msra.mxu0 %v2390_v43  ;;  %v314_v43 = vld [vmem:[%s2689_s7 + $0x38] sm:$0xff] }
  0xa4   : > { %2186 = vmatpush3.bf16.msra.mxu1 %v2391_v44  ;;  %2165 = vmatprep.subr.bf16.mxu0 %v2392_v45  ;;  %v1935_v44 = vcombine.low %v313_v41, %v321_v42  ;;  %v1936_v45 = vcombine.high %v313_v41, %v321_v42 }
  0xa5   : > { %2187 = vmatprep.subr.bf16.mxu1 %v2393_v46  ;;  %v322_v46 = vld [vmem:[%s2689_s7 + $0x78] sm:$0xff] }
  0xa7   : > { %2166 = vmatpush3.bf16.msra.mxu0 %v2394_v47  ;;  %v1937_v47 = vcombine.low %v314_v43, %v322_v46 }
  0xa8   : > { %2188 = vmatpush3.bf16.msra.mxu1 %v2395_v48  ;;  %2167 = vmatprep.subr.bf16.mxu0 %v2396_v49  ;;  %v1938_v48 = vcombine.high %v314_v43, %v322_v46  ;;  %v305_v43 = vld [vmem:[#allocation2] sm:$0xff] }
  0xa9   : > { %2189 = vmatprep.subr.bf16.mxu1 %v2397_v50 }
  0xab   : > { %2168 = vmatpush3.bf16.msra.mxu0 %v2398_v51 }
  0xac   : > { %2190 = vmatpush3.bf16.msra.mxu1 %v2399_v52  ;;  %2169 = vmatprep.subr.bf16.mxu0 %v2400_v53 }
  0xad   : > { %2191 = vmatprep.subr.bf16.mxu1 %v2401_v54 }
  0xaf   : > { %2170 = vmatpush3.bf16.msra.mxu0 %v2402_v55 }
  0xb0   : > { %2192 = vmatpush3.bf16.msra.mxu1 %v2403_v56  ;;  %2171 = vmatprep.subr.bf16.mxu0 %v2404_v57 }
  0xb1   : > { %2193 = vmatprep.subr.bf16.mxu1 %v2405_v58 }
  0xb3   : > { %2172 = vmatpush3.bf16.msra.mxu0 %v2406_v59 }
  0xb4   : > { %2194 = vmatpush3.bf16.msra.mxu1 %v2407_v60  ;;  %2173 = vmatprep.subr.bf16.mxu0 %v2408_v61 }
  0xb5   : > { %2195 = vmatprep.subr.bf16.mxu1 %v2409_v62 }
  0xb7   : > { %2174 = vmatpush3.bf16.msra.mxu0 %v2410_v63 }
  0xb8   : > { %2196 = vmatpush3.bf16.msra.mxu1 %v2411_v0  ;;  %2203 = vmatprep.subr.bf16.mxu0 %v2412_v9 }
  0xb9   : > { %2225 = vmatprep.subr.bf16.mxu1 %v2413_v10 }
  0xba   : > { %1624 = vmatmul.mubr.bf16.vlgmr.msra.gmra.mrb[8].mxu0 %v1931_v5 }
  0xbb   : > { %1665 = vmatmul.mubr.bf16.vlgmr.msra.gmra.mrb[8].mxu1 %v1933_v7  ;;  %2204 = vmatpush3.bf16.msra.mxu0 %v2414_v11 }
  0xbc   : > { %2226 = vmatpush3.bf16.msra.mxu1 %v2415_v12  ;;  %2205 = vmatprep.subr.bf16.mxu0 %v2416_v13 }
  0xbd   : > { %2227 = vmatprep.subr.bf16.mxu1 %v2417_v14  ;;  %1705 = vmatprep.mubr.bf16.mxu0 %v1936_v45 }
  0xbe   : > { %1746 = vmatprep.mubr.bf16.mxu1 %v1938_v48 }
  0xbf   : > { %2206 = vmatpush3.bf16.msra.mxu0 %v2418_v15 }
  0xc0   : > { %2228 = vmatpush3.bf16.msra.mxu1 %v2419_v16  ;;  %2207 = vmatprep.subr.bf16.mxu0 %v2420_v17 }
  0xc1   : > { %2229 = vmatprep.subr.bf16.mxu1 %v2421_v18 }
  0xc3   : > { %2208 = vmatpush3.bf16.msra.mxu0 %v2422_v19 }
  0xc4   : > { %2230 = vmatpush3.bf16.msra.mxu1 %v2423_v20  ;;  %2209 = vmatprep.subr.bf16.mxu0 %v2424_v21 }
  0xc5   : > { %2231 = vmatprep.subr.bf16.mxu1 %v2425_v22 }
  0xc7   : > { %2210 = vmatpush3.bf16.msra.mxu0 %v2426_v23 }
  0xc8   : > { %2232 = vmatpush3.bf16.msra.mxu1 %v2427_v24  ;;  %2211 = vmatprep.subr.bf16.mxu0 %v2428_v25 }
  0xc9   : > { %2233 = vmatprep.subr.bf16.mxu1 %v2429_v26 }
  0xcb   : > { %2212 = vmatpush3.bf16.msra.mxu0 %v2430_v27 }
  0xcc   : > { %2234 = vmatpush3.bf16.msra.mxu1 %v2431_v28  ;;  %2213 = vmatprep.subr.bf16.mxu0 %v2432_v29 }
  0xcd   : > { %2235 = vmatprep.subr.bf16.mxu1 %v2433_v30 }
  0xcf   : > { %2214 = vmatpush3.bf16.msra.mxu0 %v2434_v31 }
  0xd0   : > { %2236 = vmatpush3.bf16.msra.mxu1 %v2435_v32  ;;  %2215 = vmatprep.subr.bf16.mxu0 %v2436_v33 }
  0xd1   : > { %2237 = vmatprep.subr.bf16.mxu1 %v2437_v34 }
  0xd3   : > { %2216 = vmatpush3.bf16.msra.mxu0 %v2438_v35 }
  0xd4   : > { %2238 = vmatpush3.bf16.msra.mxu1 %v2439_v36  ;;  %2217 = vmatprep.subr.bf16.mxu0 %v2440_v37 }
  0xd5   : > { %2239 = vmatprep.subr.bf16.mxu1 %v2441_v38 }
  0xd7   : > { %2218 = vmatpush3.bf16.msra.mxu0 %v2442_v39 }
  0xd8   : > { %2240 = vmatpush3.bf16.msra.mxu1 %v2443_v40 }
  0xda   : > { %1706 = vmatmul.mubr.bf16.vlgmr.msra.gmra.mrb[12].mxu0 %v1935_v44 }
  0xdb   : > { %1747 = vmatmul.mubr.bf16.vlgmr.msra.gmra.mrb[12].mxu1 %v1937_v47  ;;  %v306_v47 = vld [vmem:[#allocation2 + $0x8] sm:$0xff] }
 0x14d   : > { %v2087_v49 = vpop.f32.mrb[0].mxu0 }
 0x14e   : > { %v2109_v50 = vpop.f32.mrb[0].mxu1  ;;  %v2088_v51 = vpop.f32.mrb[1].mxu0 }
 0x14f   : > { %v2089_v52 = vadd.f32 %v2088_v51, %v2087_v49  ;;  %v2110_v53 = vpop.f32.mrb[1].mxu1  ;;  %v2090_v54 = vpop.f32.mrb[2].mxu0 }
 0x150   : > { %v2111_v55 = vadd.f32 %v2110_v53, %v2109_v50  ;;  %v2112_v56 = vpop.f32.mrb[2].mxu1  ;;  %v2091_v57 = vpop.f32.mrb[3].mxu0 }
 0x151   : > { %v2092_v58 = vadd.f32 %v2091_v57, %v2090_v54  ;;  %v2113_v59 = vpop.f32.mrb[3].mxu1 }
 0x152   : > { %v1503_v60 = vadd.f32 %v2111_v55, %v2089_v52  ;;  %v2114_v61 = vadd.f32 %v2113_v59, %v2112_v56 }
 0x154   : > { %v1506_v62 = vadd.f32 %v2114_v61, %v2092_v58 }
 0x16d   : > { %v2131_v63 = vpop.f32.mrb[4].mxu0 }
 0x16e   : > { %v2153_v0 = vpop.f32.mrb[4].mxu1  ;;  %v2132_v1 = vpop.f32.mrb[5].mxu0 }
 0x16f   : > { %v2133_v2 = vadd.f32 %v2132_v1, %v2131_v63  ;;  %v2154_v3 = vpop.f32.mrb[5].mxu1  ;;  %v2134_v4 = vpop.f32.mrb[6].mxu0 }
 0x170   : > { %v2155_v5 = vadd.f32 %v2154_v3, %v2153_v0  ;;  %v2156_v6 = vpop.f32.mrb[6].mxu1  ;;  %v2135_v7 = vpop.f32.mrb[7].mxu0 }
 0x171   : > { %v1544_v8 = vadd.f32 %v2133_v2, %v1503_v60  ;;  %v2136_v9 = vadd.f32 %v2135_v7, %v2134_v4  ;;  %v2157_v10 = vpop.f32.mrb[7].mxu1 }
 0x172   : > { %v2158_v11 = vadd.f32 %v2157_v10, %v2156_v6 }
 0x173   : > { %v1585_v12 = vadd.f32 %v2155_v5, %v1544_v8  ;;  %v1547_v13 = vadd.f32 %v2136_v9, %v1506_v62 }
 0x175   : > { %v1588_v14 = vadd.f32 %v2158_v11, %v1547_v13 }
 0x18d   : > { %v2175_v15 = vpop.f32.mrb[8].mxu0 }
 0x18e   : > { %v2197_v16 = vpop.f32.mrb[8].mxu1  ;;  %v2176_v17 = vpop.f32.mrb[9].mxu0 }
 0x18f   : > { %v2198_v18 = vpop.f32.mrb[9].mxu1  ;;  %v2177_v19 = vadd.f32 %v2176_v17, %v2175_v15  ;;  %v2178_v21 = vpop.f32.mrb[10].mxu0 }
 0x190   : > { %v2199_v20 = vadd.f32 %v2198_v18, %v2197_v16  ;;  %v2200_v22 = vpop.f32.mrb[10].mxu1  ;;  %v2179_v23 = vpop.f32.mrb[11].mxu0 }
 0x191   : > { %v2201_v24 = vpop.f32.mrb[11].mxu1  ;;  %v1626_v25 = vadd.f32 %v2177_v19, %v1585_v12  ;;  %v2180_v26 = vadd.f32 %v2179_v23, %v2178_v21 }
 0x192   : > { %v2202_v27 = vadd.f32 %v2201_v24, %v2200_v22 }
 0x193   : > { %v1667_v28 = vadd.f32 %v2199_v20, %v1626_v25  ;;  %v1629_v29 = vadd.f32 %v2180_v26, %v1588_v14 }
 0x195   : > { %v1670_v30 = vadd.f32 %v2202_v27, %v1629_v29 }
 0x1ad   : > { %v2219_v31 = vpop.f32.mrb[12].mxu0 }
 0x1ae   : > { %v2241_v32 = vpop.f32.mrb[12].mxu1  ;;  %v2220_v33 = vpop.f32.mrb[13].mxu0 }
 0x1af   : > { %v2221_v34 = vadd.f32 %v2220_v33, %v2219_v31  ;;  %v2242_v35 = vpop.f32.mrb[13].mxu1  ;;  %v2222_v36 = vpop.f32.mrb[14].mxu0 }
 0x1b0   : > { %v2243_v37 = vadd.f32 %v2242_v35, %v2241_v32  ;;  %v2244_v38 = vpop.f32.mrb[14].mxu1  ;;  %v2223_v39 = vpop.f32.mrb[15].mxu0 }
 0x1b1   : > { %v1708_v40 = vadd.f32 %v2221_v34, %v1667_v28  ;;  %v2224_v41 = vadd.f32 %v2223_v39, %v2222_v36  ;;  %v2245_v42 = vpop.f32.mrb[15].mxu1 }
 0x1b2   : > { %v2246_v44 = vadd.f32 %v2245_v42, %v2244_v38 }
 0x1b3   : > { %v1749_v45 = vadd.f32 %v2243_v37, %v1708_v40  ;;  %v1711_v46 = vadd.f32 %v2224_v41, %v1670_v30  ;;  %1762 = sbr.rel (%p2067_p7) target bundleno = 450 (0x1c2), region = 63 }
 0x1b5   : > { %v1755_v48 = vadd.f32 %v1749_v45, %v305_v43  ;;  %v1752_v49 = vadd.f32 %v2246_v44, %v1711_v46 }
 0x1b7   : > { %1757 = vst [vmem:[#allocation2] sm:$0xff] %v1755_v48  ;;  %v1756_v50 = vadd.f32 %v1752_v49, %v306_v47 }
 0x1b9   : > { %1758 = vst [vmem:[#allocation2 + $0x8] sm:$0xff] %v1756_v50 }
 0x1be   : > { %v1763_v51 = vld [vmem:[#allocation2] sm:$0xff] }
 0x1bf   : > { %1765 = vst [vmem:[%s2702_s4] sm:$0xff] %v1763_v51 }
 0x1c0   : > { %v1764_v52 = vld [vmem:[#allocation2 + $0x8] sm:$0xff] }
 0x1c1   : > { %1766 = vst [vmem:[%s2702_s4 + $0x8] sm:$0xff] %v1764_v52 }
 0x1c2 PF: > { %s15_s16 = sadd.s32 1, %s2538_s16   ;;  %s2881_s9 = smov %s2514_s10 }
 0x1c3   : > { %p12_p4 = scmp.ge.s32.totalorder %s15_s16, 18   ;;  %s2882_s10 = smov %s2518_s11 }
 0x1c4   : > { %s2883_s11 = smov %s2623_s26  ;;  %s2884_s12 = smov %s2530_s14 }
 0x1c5   : > { %s2885_s13 = smov %s2534_s15  ;;  %s2886_s14 = smov %s2889_s17 }
 0x1c6   : > { %s2887_s15 = smov %s2893_s18  ;;  %14 = sbr.rel (!%p12_p4) target bundleno = 5 (0x5), region = 107 }
 0x1cd   :  { %1803 = vsyncpa [#allocation5], 1 }
 0x1ce   :  { %1805 = vsyncpa [#allocation5 + $0x1], 1 }

// kernel: squeeze.8
= control target key start
LH: loop header
LB: loop body
LE: loop exit
PB: predicated region body
PF: predicated region fallthrough
CT: control target
= control target key end

     0   :  { %s125_s10 = smov 64   ;;  %vm3_vm0 = vcmask 523264   ;;  %vm44_vm1 = vcmask 1048064   ;;  %s256_s0 = inlined_call_operand.vmem [shape: f32[1,128,64], index: 0, kind: input, shape index: {}]   ;;  %s257_s1 = inlined_call_operand.vmem [shape: f32[64,128], index: 1, kind: output, shape index: {}]  }
   0x1   :  { %v112_v0 = vld [vmem:[%s256_s0 + $0x11] ss:$2 sm:$0xff]   ;;  %v109_v1 = vld [vmem:[%s256_s0 + $0x1] ss:$2 sm:$0xff]   ;;  %v95_v4 = vld [vmem:[%s256_s0 + $0x10] ss:$2 sm:$0xff]  }
   0x2   :  { %55 = vrot.lane.b32.xlu1 %v112_v0, %s125_s10  ;;  %42 = vrot.lane.b32.xlu0 %v109_v1, %s125_s10  ;;  %v114_v2 = vld [vmem:[%s256_s0 + $0x51] ss:$2 sm:$0xff]   ;;  %v110_v3 = vld [vmem:[%s256_s0 + $0x41] ss:$2 sm:$0xff]  }
   0x3   :  { %v2_v5 = vld [vmem:[%s256_s0] ss:$2 sm:$0xff]   ;;  %v103_v6 = vld [vmem:[%s256_s0 + $0x50] ss:$2 sm:$0xff]   ;;  %96 = vst.msk [vmem:[%s257_s1 + $0x8] sm:$0xff] %vm3_vm0, %v95_v4  }
   0x4   :  { %4 = vst.msk [vmem:[%s257_s1] sm:$0xff] %vm3_vm0, %v2_v5   ;;  %104 = vst.msk [vmem:[%s257_s1 + $0x28] sm:$0xff] %vm3_vm0, %v103_v6   ;;  %v101_v7 = vld [vmem:[%s256_s0 + $0x40] ss:$2 sm:$0xff]   ;;  %v107_v10 = vld [vmem:[%s256_s0 + $0x70] ss:$2 sm:$0xff]  }
   0x5   :  { %v105_v8 = vld [vmem:[%s256_s0 + $0x60] ss:$2 sm:$0xff]   ;;  %102 = vst.msk [vmem:[%s257_s1 + $0x20] sm:$0xff] %vm3_vm0, %v101_v7   ;;  %v99_v11 = vld [vmem:[%s256_s0 + $0x30] ss:$2 sm:$0xff]   ;;  %108 = vst.msk [vmem:[%s257_s1 + $0x38] sm:$0xff] %vm3_vm0, %v107_v10  }
   0x6   :  { %v97_v9 = vld [vmem:[%s256_s0 + $0x20] ss:$2 sm:$0xff]   ;;  %62 = vrot.lane.b32.xlu1 %v114_v2, %s125_s10  ;;  %48 = vrot.lane.b32.xlu0 %v110_v3, %s125_s10  ;;  %106 = vst.msk [vmem:[%s257_s1 + $0x30] sm:$0xff] %vm3_vm0, %v105_v8  }
   0x7   :  { %98 = vst.msk [vmem:[%s257_s1 + $0x10] sm:$0xff] %vm3_vm0, %v97_v9   ;;  %v118_v12 = vld [vmem:[%s256_s0 + $0x61] ss:$2 sm:$0xff]   ;;  %100 = vst.msk [vmem:[%s257_s1 + $0x18] sm:$0xff] %vm3_vm0, %v99_v11   ;;  %v122_v14 = vld [vmem:[%s256_s0 + $0x71] ss:$2 sm:$0xff]  }
   0x8   :  { %v116_v13 = vld [vmem:[%s256_s0 + $0x21] ss:$2 sm:$0xff]   ;;  %v120_v15 = vld [vmem:[%s256_s0 + $0x31] ss:$2 sm:$0xff]  }
   0xa   :  { %76 = vrot.lane.b32.xlu1 %v118_v12, %s125_s10  ;;  %69 = vrot.lane.b32.xlu0 %v116_v13, %s125_s10 }
   0xe   :  { %90 = vrot.lane.b32.xlu1 %v122_v14, %s125_s10  ;;  %83 = vrot.lane.b32.xlu0 %v120_v15, %s125_s10 }
  0x74   :  { %v56_v16 = vpop.permute.xlu1 %55   ;;  %v43_v17 = vpop.permute.xlu0 %42  }
  0x75   :  { %113 = vst.msk [vmem:[%s257_s1 + $0x8] sm:$0xff] %vm44_vm1, %v56_v16   ;;  %45 = vst.msk [vmem:[%s257_s1] sm:$0xff] %vm44_vm1, %v43_v17  }
  0x78   :  { %v63_v18 = vpop.permute.xlu1 %62   ;;  %v49_v19 = vpop.permute.xlu0 %48  }
  0x79   :  { %115 = vst.msk [vmem:[%s257_s1 + $0x28] sm:$0xff] %vm44_vm1, %v63_v18   ;;  %111 = vst.msk [vmem:[%s257_s1 + $0x20] sm:$0xff] %vm44_vm1, %v49_v19  }
  0x7c   :  { %v77_v20 = vpop.permute.xlu1 %76   ;;  %v70_v21 = vpop.permute.xlu0 %69  }
  0x7d   :  { %119 = vst.msk [vmem:[%s257_s1 + $0x30] sm:$0xff] %vm44_vm1, %v77_v20   ;;  %117 = vst.msk [vmem:[%s257_s1 + $0x10] sm:$0xff] %vm44_vm1, %v70_v21  }
  0x80   :  { %v91_v22 = vpop.permute.xlu1 %90   ;;  %v84_v23 = vpop.permute.xlu0 %83  }
  0x81   :  { %123 = vst.msk [vmem:[%s257_s1 + $0x38] sm:$0xff] %vm44_vm1, %v91_v22   ;;  %121 = vst.msk [vmem:[%s257_s1 + $0x18] sm:$0xff] %vm44_vm1, %v84_v23  }

// kernel: forward.16
= control target key start
LH: loop header
LB: loop body
LE: loop exit
PB: predicated region body
PF: predicated region fallthrough
CT: control target
= control target key end

     0   :  { %s1684_s1 = inlined_call_operand.vmem [shape: bf16[1,640,128], index: 1, kind: input, shape index: {}]   ;;  %s1685_s0 = inlined_call_operand.vmem [shape: bf16[1,128,640], index: 0, kind: input, shape index: {}]   ;;  %s1686_s2 = inlined_call_operand.vmem [shape: f32[1,128,128], index: 2, kind: output, shape index: {}]  }
   0x1   :  { %v1258_v0 = vld [vmem:[%s1684_s1 + $0x40] sm:$0xff]   ;;  %v1262_v4 = vld [vmem:[%s1684_s1 + $0x48] sm:$0xff]   ;;  %v1266_v8 = vld [vmem:[%s1684_s1 + $0x50] sm:$0xff]  }
   0x2   :  { %v1259_v1 = vld [vmem:[%s1684_s1 + $0xc0] sm:$0xff]   ;;  %1066 = vmatprep.subr.bf16.mxu0 %v1258_v0  ;;  %v1263_v5 = vld [vmem:[%s1684_s1 + $0xc8] sm:$0xff]   ;;  %v1267_v9 = vld [vmem:[%s1684_s1 + $0xd0] sm:$0xff]  }
   0x3   :  { %v1260_v2 = vld [vmem:[%s1684_s1] sm:$0xff]   ;;  %1130 = vmatprep.subr.bf16.mxu1 %v1259_v1  ;;  %v1264_v6 = vld [vmem:[%s1684_s1 + $0x8] sm:$0xff]   ;;  %v1268_v10 = vld [vmem:[%s1684_s1 + $0x10] sm:$0xff]  }
   0x4   :  { %v1261_v3 = vld [vmem:[%s1684_s1 + $0x80] sm:$0xff]   ;;  %1067 = vmatpush3.bf16.msra.mxu0 %v1260_v2  ;;  %v1265_v7 = vld [vmem:[%s1684_s1 + $0x88] sm:$0xff]   ;;  %v1269_v11 = vld [vmem:[%s1684_s1 + $0x90] sm:$0xff]  }
   0x5   :  { %1131 = vmatpush3.bf16.msra.mxu1 %v1261_v3  ;;  %1068 = vmatprep.subr.bf16.mxu0 %v1262_v4  ;;  %v1270_v12 = vld [vmem:[%s1684_s1 + $0x58] sm:$0xff]   ;;  %v1274_v16 = vld [vmem:[%s1684_s1 + $0x60] sm:$0xff]   ;;  %v1278_v20 = vld [vmem:[%s1684_s1 + $0x68] sm:$0xff]  }
   0x6   :  { %1132 = vmatprep.subr.bf16.mxu1 %v1263_v5  ;;  %v1271_v13 = vld [vmem:[%s1684_s1 + $0xd8] sm:$0xff]   ;;  %v1275_v17 = vld [vmem:[%s1684_s1 + $0xe0] sm:$0xff]   ;;  %v1279_v21 = vld [vmem:[%s1684_s1 + $0xe8] sm:$0xff]  }
   0x7   :  { %v1272_v14 = vld [vmem:[%s1684_s1 + $0x18] sm:$0xff]   ;;  %v1276_v18 = vld [vmem:[%s1684_s1 + $0x20] sm:$0xff]   ;;  %v1280_v22 = vld [vmem:[%s1684_s1 + $0x28] sm:$0xff]  }
   0x8   :  { %1069 = vmatpush3.bf16.msra.mxu0 %v1264_v6  ;;  %v1273_v15 = vld [vmem:[%s1684_s1 + $0x98] sm:$0xff]   ;;  %v1277_v19 = vld [vmem:[%s1684_s1 + $0xa0] sm:$0xff]   ;;  %v1281_v23 = vld [vmem:[%s1684_s1 + $0xa8] sm:$0xff]  }
   0x9   :  { %1133 = vmatpush3.bf16.msra.mxu1 %v1265_v7  ;;  %1070 = vmatprep.subr.bf16.mxu0 %v1266_v8  ;;  %v1282_v24 = vld [vmem:[%s1684_s1 + $0x70] sm:$0xff]   ;;  %v1286_v28 = vld [vmem:[%s1684_s1 + $0x78] sm:$0xff]   ;;  %v1295_v35 = vld [vmem:[%s1685_s0 + $0xc] ss:$20 sps:$4 sm:$0xff]  }
   0xa   :  { %1134 = vmatprep.subr.bf16.mxu1 %v1267_v9  ;;  %v1283_v25 = vld [vmem:[%s1684_s1 + $0xf0] sm:$0xff]   ;;  %v1287_v29 = vld [vmem:[%s1684_s1 + $0xf8] sm:$0xff]   ;;  %v1296_v36 = vld [vmem:[%s1684_s1 + $0x100] sm:$0xff]   ;;  %753 = vmatprep.mubr.bf16.mxu1 %v1295_v35 }
   0xb   :  { %v1284_v26 = vld [vmem:[%s1684_s1 + $0x30] sm:$0xff]   ;;  %v1288_v30 = vld [vmem:[%s1684_s1 + $0x38] sm:$0xff]   ;;  %v1297_v37 = vld [vmem:[%s1685_s0 + $0x2c] ss:$20 sps:$4 sm:$0xff]  }
   0xc   :  { %1071 = vmatpush3.bf16.msra.mxu0 %v1268_v10  ;;  %v1285_v27 = vld [vmem:[%s1684_s1 + $0xb0] sm:$0xff]   ;;  %v1289_v31 = vld [vmem:[%s1684_s1 + $0xb8] sm:$0xff]   ;;  %v1303_v39 = vld [vmem:[%s1684_s1 + $0x108] sm:$0xff]  }
   0xd   :  { %1135 = vmatpush3.bf16.msra.mxu1 %v1269_v11  ;;  %1072 = vmatprep.subr.bf16.mxu0 %v1270_v12  ;;  %v1290_v32 = vld [vmem:[%s1685_s0] ss:$20 sps:$4 sm:$0xff]   ;;  %v1292_v33 = vld [vmem:[%s1685_s0 + $0x4] ss:$20 sps:$4 sm:$0xff]   ;;  %v1293_v34 = vld [vmem:[%s1685_s0 + $0x8] ss:$20 sps:$4 sm:$0xff]  }
   0xe   :  { %1136 = vmatprep.subr.bf16.mxu1 %v1271_v13  ;;  %656 = vmatprep.mubr.bf16.mxu0 %v1292_v33  ;;  %v1299_v38 = vld [vmem:[%s1685_s0 + $0x34] ss:$20 sps:$4 sm:$0xff]   ;;  %v1302_v41 = vld [vmem:[%s1685_s0 + $0x30] ss:$20 sps:$4 sm:$0xff]   ;;  %v1317_v45 = vld [vmem:[%s1684_s1 + $0x118] sm:$0xff]  }
   0xf   :  { %v1301_v40 = vld [vmem:[%s1685_s0 + $0x28] ss:$20 sps:$4 sm:$0xff]   ;;  %v1310_v44 = vld [vmem:[%s1684_s1 + $0x110] sm:$0xff]   ;;  %v1309_v47 = vld [vmem:[%s1685_s0 + $0x58] ss:$20 sps:$4 sm:$0xff]  }
  0x10   :  { %1073 = vmatpush3.bf16.msra.mxu0 %v1272_v14  ;;  %v1304_v42 = vld [vmem:[%s1685_s0 + $0x54] ss:$20 sps:$4 sm:$0xff]   ;;  %v1306_v43 = vld [vmem:[%s1685_s0 + $0x5c] ss:$20 sps:$4 sm:$0xff]   ;;  %v1313_v49 = vld [vmem:[%s1685_s0 + $0x84] ss:$20 sps:$4 sm:$0xff]  }
  0x11   :  { %1137 = vmatpush3.bf16.msra.mxu1 %v1273_v15  ;;  %1074 = vmatprep.subr.bf16.mxu0 %v1274_v16  ;;  %v1308_v46 = vld [vmem:[%s1685_s0 + $0x50] ss:$20 sps:$4 sm:$0xff]   ;;  %v1331_v51 = vld [vmem:[%s1684_s1 + $0x128] sm:$0xff]   ;;  %v1316_v53 = vld [vmem:[%s1685_s0 + $0x80] ss:$20 sps:$4 sm:$0xff]  }
  0x12   :  { %1138 = vmatprep.subr.bf16.mxu1 %v1275_v17  ;;  %v1311_v48 = vld [vmem:[%s1685_s0 + $0x7c] ss:$20 sps:$4 sm:$0xff]   ;;  %v1324_v50 = vld [vmem:[%s1684_s1 + $0x120] sm:$0xff]   ;;  %v1315_v52 = vld [vmem:[%s1685_s0 + $0x78] ss:$20 sps:$4 sm:$0xff]  }
  0x13   :  { %v1318_v54 = vld [vmem:[%s1685_s0 + $0xa4] ss:$20 sps:$4 sm:$0xff]   ;;  %v1338_v55 = vld [vmem:[%s1684_s1 + $0x130] sm:$0xff]   ;;  %v1320_v56 = vld [vmem:[%s1685_s0 + $0xac] ss:$20 sps:$4 sm:$0xff]  }
  0x14   :  { %1075 = vmatpush3.bf16.msra.mxu0 %v1276_v18  ;;  %v1345_v57 = vld [vmem:[%s1684_s1 + $0x138] sm:$0xff]   ;;  %v1322_v58 = vld [vmem:[%s1685_s0 + $0xa0] ss:$20 sps:$4 sm:$0xff]   ;;  %v1330_v63 = vld [vmem:[%s1685_s0 + $0xd0] ss:$20 sps:$4 sm:$0xff]  }
  0x15   :  { %1139 = vmatpush3.bf16.msra.mxu1 %v1277_v19  ;;  %1076 = vmatprep.subr.bf16.mxu0 %v1278_v20  ;;  %v1323_v59 = vld [vmem:[%s1685_s0 + $0xa8] ss:$20 sps:$4 sm:$0xff]   ;;  %v1325_v60 = vld [vmem:[%s1685_s0 + $0xcc] ss:$20 sps:$4 sm:$0xff]   ;;  %v1336_v2 = vld [vmem:[%s1685_s0 + $0xf0] ss:$20 sps:$4 sm:$0xff]  }
  0x16   :  { %1140 = vmatprep.subr.bf16.mxu1 %v1279_v21  ;;  %v1327_v61 = vld [vmem:[%s1685_s0 + $0xd4] ss:$20 sps:$4 sm:$0xff]   ;;  %v1334_v1 = vld [vmem:[%s1685_s0 + $0xfc] ss:$20 sps:$4 sm:$0xff]   ;;  %v1337_v3 = vld [vmem:[%s1685_s0 + $0xf8] ss:$20 sps:$4 sm:$0xff]  }
  0x17   :  { %v1329_v62 = vld [vmem:[%s1685_s0 + $0xc8] ss:$20 sps:$4 sm:$0xff]   ;;  %v1341_v5 = vld [vmem:[%s1685_s0 + $0x124] ss:$20 sps:$4 sm:$0xff]   ;;  %v1344_v7 = vld [vmem:[%s1685_s0 + $0x120] ss:$20 sps:$4 sm:$0xff]  }
  0x18   :  { %1077 = vmatpush3.bf16.msra.mxu0 %v1280_v22  ;;  %v1332_v0 = vld [vmem:[%s1685_s0 + $0xf4] ss:$20 sps:$4 sm:$0xff]   ;;  %v1339_v4 = vld [vmem:[%s1685_s0 + $0x11c] ss:$20 sps:$4 sm:$0xff]   ;;  %v1343_v6 = vld [vmem:[%s1685_s0 + $0x118] ss:$20 sps:$4 sm:$0xff]  }
  0x19   :  { %1141 = vmatpush3.bf16.msra.mxu1 %v1281_v23  ;;  %1078 = vmatprep.subr.bf16.mxu0 %v1282_v24  ;;  %v1346_v8 = vld [vmem:[%s1685_s0 + $0x10] ss:$20 sps:$4 sm:$0xff]   ;;  %v1348_v10 = vld [vmem:[%s1685_s0 + $0x38] ss:$20 sps:$4 sm:$0xff]   ;;  %v1350_v12 = vld [vmem:[%s1685_s0 + $0x60] ss:$20 sps:$4 sm:$0xff]  }
  0x1a   :  { %1142 = vmatprep.subr.bf16.mxu1 %v1283_v25  ;;  %v1347_v9 = vld [vmem:[%s1685_s0 + $0xb0] ss:$20 sps:$4 sm:$0xff]   ;;  %v1349_v11 = vld [vmem:[%s1685_s0 + $0xd8] ss:$20 sps:$4 sm:$0xff]   ;;  %v1351_v13 = vld [vmem:[%s1685_s0 + $0x100] ss:$20 sps:$4 sm:$0xff]  }
  0x1b   :  { %v1352_v14 = vld [vmem:[%s1685_s0 + $0x88] ss:$20 sps:$4 sm:$0xff]  }
  0x1c   :  { %1079 = vmatpush3.bf16.msra.mxu0 %v1284_v26  ;;  %v1353_v15 = vld [vmem:[%s1685_s0 + $0x128] ss:$20 sps:$4 sm:$0xff]  }
  0x1d   :  { %1143 = vmatpush3.bf16.msra.mxu1 %v1285_v27  ;;  %1080 = vmatprep.subr.bf16.mxu0 %v1286_v28 }
  0x1e   :  { %1144 = vmatprep.subr.bf16.mxu1 %v1287_v29 }
  0x20   :  { %1081 = vmatpush3.bf16.msra.mxu0 %v1288_v30 }
  0x21   :  { %1145 = vmatpush3.bf16.msra.mxu1 %v1289_v31  ;;  %1210 = vmatprep.subr.bf16.mxu0 %v1296_v36 }
  0x22   :  { %1242 = vmatprep.subr.bf16.mxu1 %v1296_v36 }
  0x23   :  { %657 = vmatmul.mubr.bf16.vlgmr.msra.gmra.mrb[0].mxu0 %v1290_v32 }
  0x24   :  { %754 = vmatmul.mubr.bf16.vlgmr.msra.gmra.mrb[0].mxu1 %v1293_v34  ;;  %1211 = vmatpush3.bf16.msra.mxu0 %v1296_v36 }
  0x25   :  { %1250 = vmatpush3.bf16.msra.mxu1 %v1296_v36  ;;  %664 = vmatprep.mubr.bf16.mxu0 %v1297_v37 }
  0x26   :  { %761 = vmatprep.mubr.bf16.mxu1 %v1299_v38  ;;  %1212 = vmatprep.subr.bf16.mxu0 %v1303_v39 }
  0x27   :  { %1243 = vmatprep.subr.bf16.mxu1 %v1303_v39 }
  0x28   :  { %1213 = vmatpush3.bf16.msra.mxu0 %v1303_v39 }
  0x29   :  { %1251 = vmatpush3.bf16.msra.mxu1 %v1303_v39  ;;  %1214 = vmatprep.subr.bf16.mxu0 %v1310_v44 }
  0x2a   :  { %1244 = vmatprep.subr.bf16.mxu1 %v1310_v44 }
  0x2b   :  { %665 = vmatmul.mubr.bf16.gmra.mrb[4].mxu0 %v1301_v40 }
  0x2c   :  { %762 = vmatmul.mubr.bf16.gmra.mrb[4].mxu1 %v1302_v41  ;;  %672 = vmatprep.mubr.bf16.mxu0 %v1304_v42 }
  0x2d   :  { %769 = vmatprep.mubr.bf16.mxu1 %v1306_v43  ;;  %1215 = vmatpush3.bf16.msra.mxu0 %v1310_v44 }
  0x2e   :  { %1252 = vmatpush3.bf16.msra.mxu1 %v1310_v44  ;;  %1216 = vmatprep.subr.bf16.mxu0 %v1317_v45 }
  0x2f   :  { %1245 = vmatprep.subr.bf16.mxu1 %v1317_v45 }
  0x31   :  { %1217 = vmatpush3.bf16.msra.mxu0 %v1317_v45 }
  0x32   :  { %1253 = vmatpush3.bf16.msra.mxu1 %v1317_v45  ;;  %1218 = vmatprep.subr.bf16.mxu0 %v1324_v50 }
  0x33   :  { %673 = vmatmul.mubr.bf16.gmra.mrb[8].mxu0 %v1308_v46  ;;  %1246 = vmatprep.subr.bf16.mxu1 %v1324_v50 }
  0x34   :  { %770 = vmatmul.mubr.bf16.gmra.mrb[8].mxu1 %v1309_v47  ;;  %680 = vmatprep.mubr.bf16.mxu0 %v1311_v48 }
  0x35   :  { %777 = vmatprep.mubr.bf16.mxu1 %v1313_v49  ;;  %1219 = vmatpush3.bf16.msra.mxu0 %v1324_v50 }
  0x36   :  { %1254 = vmatpush3.bf16.msra.mxu1 %v1324_v50  ;;  %1220 = vmatprep.subr.bf16.mxu0 %v1331_v51 }
  0x37   :  { %1247 = vmatprep.subr.bf16.mxu1 %v1331_v51 }
  0x39   :  { %1221 = vmatpush3.bf16.msra.mxu0 %v1331_v51 }
  0x3a   :  { %1255 = vmatpush3.bf16.msra.mxu1 %v1331_v51  ;;  %1222 = vmatprep.subr.bf16.mxu0 %v1338_v55 }
  0x3b   :  { %681 = vmatmul.mubr.bf16.gmra.mrb[12].mxu0 %v1315_v52  ;;  %1248 = vmatprep.subr.bf16.mxu1 %v1338_v55 }
  0x3c   :  { %778 = vmatmul.mubr.bf16.gmra.mrb[12].mxu1 %v1316_v53  ;;  %688 = vmatprep.mubr.bf16.mxu0 %v1318_v54 }
  0x3d   :  { %785 = vmatprep.mubr.bf16.mxu1 %v1320_v56  ;;  %1223 = vmatpush3.bf16.msra.mxu0 %v1338_v55 }
  0x3e   :  { %1256 = vmatpush3.bf16.msra.mxu1 %v1338_v55  ;;  %1224 = vmatprep.subr.bf16.mxu0 %v1345_v57 }
  0x3f   :  { %1249 = vmatprep.subr.bf16.mxu1 %v1345_v57 }
  0x41   :  { %1225 = vmatpush3.bf16.msra.mxu0 %v1345_v57 }
  0x42   :  { %1257 = vmatpush3.bf16.msra.mxu1 %v1345_v57 }
  0x43   :  { %689 = vmatmul.mubr.bf16.gmra.mrb[16].mxu0 %v1322_v58 }
  0x44   :  { %786 = vmatmul.mubr.bf16.gmra.mrb[16].mxu1 %v1323_v59  ;;  %696 = vmatprep.mubr.bf16.mxu0 %v1325_v60 }
  0x45   :  { %793 = vmatprep.mubr.bf16.mxu1 %v1327_v61 }
  0x4b   :  { %697 = vmatmul.mubr.bf16.gmra.mrb[20].mxu0 %v1329_v62 }
  0x4c   :  { %794 = vmatmul.mubr.bf16.gmra.mrb[20].mxu1 %v1330_v63  ;;  %704 = vmatprep.mubr.bf16.mxu0 %v1332_v0 }
  0x4d   :  { %801 = vmatprep.mubr.bf16.mxu1 %v1334_v1 }
  0x53   :  { %705 = vmatmul.mubr.bf16.gmra.mrb[24].mxu0 %v1336_v2 }
  0x54   :  { %802 = vmatmul.mubr.bf16.gmra.mrb[24].mxu1 %v1337_v3  ;;  %712 = vmatprep.mubr.bf16.mxu0 %v1339_v4 }
  0x55   :  { %809 = vmatprep.mubr.bf16.mxu1 %v1341_v5 }
  0x5b   :  { %713 = vmatmul.mubr.bf16.gmra.mrb[28].mxu0 %v1343_v6 }
  0x5c   :  { %810 = vmatmul.mubr.bf16.gmra.mrb[28].mxu1 %v1344_v7  ;;  %1226 = vmatprep.mubr.bf16.mxu0 %v1346_v8 }
  0x5d   :  { %1234 = vmatprep.mubr.bf16.mxu1 %v1347_v9 }
  0x63   :  { %1227 = vmatmul.mubr.bf16.vlgmr.msra.gmra.mrb[32].mxu0 %v1348_v10 }
  0x64   :  { %1235 = vmatmul.mubr.bf16.vlgmr.msra.gmra.mrb[32].mxu1 %v1349_v11  ;;  %1230 = vmatprep.mubr.bf16.mxu0 %v1350_v12 }
  0x65   :  { %1238 = vmatprep.mubr.bf16.mxu1 %v1351_v13 }
  0x6b   :  { %1231 = vmatmul.mubr.bf16.gmra.mrb[36].mxu0 %v1352_v14 }
  0x6c   :  { %1239 = vmatmul.mubr.bf16.gmra.mrb[36].mxu1 %v1353_v15 }
  0xf6   :  { %v1082_v16 = vpop.f32.mrb[0].mxu0 }
  0xf7   :  { %v1146_v17 = vpop.f32.mrb[0].mxu1  ;;  %v1083_v18 = vpop.f32.mrb[1].mxu0 }
  0xf8   :  { %v1084_v19 = vadd.f32 %v1083_v18, %v1082_v16  ;;  %v1147_v20 = vpop.f32.mrb[1].mxu1  ;;  %v1085_v21 = vpop.f32.mrb[2].mxu0 }
  0xf9   :  { %v1148_v22 = vadd.f32 %v1147_v20, %v1146_v17  ;;  %v1149_v23 = vpop.f32.mrb[2].mxu1  ;;  %v1086_v24 = vpop.f32.mrb[3].mxu0 }
  0xfa   :  { %v1087_v25 = vadd.f32 %v1086_v24, %v1085_v21  ;;  %v1150_v26 = vpop.f32.mrb[3].mxu1 }
  0xfb   :  { %v1151_v27 = vadd.f32 %v1150_v26, %v1149_v23  ;;  %v1609_v28 = vadd.f32 %v1148_v22, %v1084_v19 }
  0xfd   :  { %v1611_v29 = vadd.f32 %v1151_v27, %v1087_v25 }
  0xfe   :  { %v1088_v30 = vpop.f32.mrb[4].mxu0 }
  0xff   :  { %v1152_v31 = vpop.f32.mrb[4].mxu1  ;;  %v1089_v32 = vpop.f32.mrb[5].mxu0 }
 0x100   :  { %v1090_v33 = vadd.f32 %v1089_v32, %v1088_v30  ;;  %v1153_v34 = vpop.f32.mrb[5].mxu1  ;;  %v1091_v35 = vpop.f32.mrb[6].mxu0 }
 0x101   :  { %v1154_v36 = vadd.f32 %v1153_v34, %v1152_v31  ;;  %v1155_v37 = vpop.f32.mrb[6].mxu1  ;;  %v1092_v38 = vpop.f32.mrb[7].mxu0 }
 0x102   :  { %v1093_v39 = vadd.f32 %v1092_v38, %v1091_v35  ;;  %v1156_v40 = vpop.f32.mrb[7].mxu1 }
 0x103   :  { %v1157_v41 = vadd.f32 %v1156_v40, %v1155_v37  ;;  %v1613_v42 = vadd.f32 %v1154_v36, %v1090_v33 }
 0x105   :  { %v1615_v43 = vadd.f32 %v1157_v41, %v1093_v39 }
 0x106   :  { %v1094_v44 = vpop.f32.mrb[8].mxu0 }
 0x107   :  { %v1158_v45 = vpop.f32.mrb[8].mxu1  ;;  %v1095_v46 = vpop.f32.mrb[9].mxu0 }
 0x108   :  { %v1096_v47 = vadd.f32 %v1095_v46, %v1094_v44  ;;  %v1159_v48 = vpop.f32.mrb[9].mxu1  ;;  %v1097_v49 = vpop.f32.mrb[10].mxu0 }
 0x109   :  { %v1160_v50 = vadd.f32 %v1159_v48, %v1158_v45  ;;  %v1161_v51 = vpop.f32.mrb[10].mxu1  ;;  %v1098_v52 = vpop.f32.mrb[11].mxu0 }
 0x10a   :  { %v1099_v53 = vadd.f32 %v1098_v52, %v1097_v49  ;;  %v1162_v54 = vpop.f32.mrb[11].mxu1 }
 0x10b   :  { %v1163_v55 = vadd.f32 %v1162_v54, %v1161_v51  ;;  %v1617_v56 = vadd.f32 %v1160_v50, %v1096_v47 }
 0x10d   :  { %v1619_v57 = vadd.f32 %v1163_v55, %v1099_v53 }
 0x10e   :  { %v1100_v58 = vpop.f32.mrb[12].mxu0 }
 0x10f   :  { %v1164_v59 = vpop.f32.mrb[12].mxu1  ;;  %v1101_v60 = vpop.f32.mrb[13].mxu0 }
 0x110   :  { %v1102_v61 = vadd.f32 %v1101_v60, %v1100_v58  ;;  %v1165_v62 = vpop.f32.mrb[13].mxu1  ;;  %v1103_v63 = vpop.f32.mrb[14].mxu0 }
 0x111   :  { %v1166_v0 = vadd.f32 %v1165_v62, %v1164_v59  ;;  %v1167_v1 = vpop.f32.mrb[14].mxu1  ;;  %v1104_v2 = vpop.f32.mrb[15].mxu0 }
 0x112   :  { %v1105_v3 = vadd.f32 %v1104_v2, %v1103_v63  ;;  %v1168_v4 = vpop.f32.mrb[15].mxu1 }
 0x113   :  { %v1169_v5 = vadd.f32 %v1168_v4, %v1167_v1  ;;  %v1621_v6 = vadd.f32 %v1166_v0, %v1102_v61 }
 0x115   :  { %v1623_v7 = vadd.f32 %v1169_v5, %v1105_v3 }
 0x116   :  { %v1106_v8 = vpop.f32.mrb[16].mxu0 }
 0x117   :  { %v1170_v9 = vpop.f32.mrb[16].mxu1  ;;  %v1107_v10 = vpop.f32.mrb[17].mxu0 }
 0x118   :  { %v1108_v11 = vadd.f32 %v1107_v10, %v1106_v8  ;;  %v1171_v12 = vpop.f32.mrb[17].mxu1  ;;  %v1109_v13 = vpop.f32.mrb[18].mxu0 }
 0x119   :  { %v1172_v14 = vadd.f32 %v1171_v12, %v1170_v9  ;;  %v1173_v15 = vpop.f32.mrb[18].mxu1  ;;  %v1110_v16 = vpop.f32.mrb[19].mxu0 }
 0x11a   :  { %v1111_v17 = vadd.f32 %v1110_v16, %v1109_v13  ;;  %v1174_v18 = vpop.f32.mrb[19].mxu1 }
 0x11b   :  { %v1175_v19 = vadd.f32 %v1174_v18, %v1173_v15  ;;  %v788_v20 = vadd.f32 %v1172_v14, %v1108_v11 }
 0x11d   :  { %v1625_v21 = vadd.f32 %v1175_v19, %v1111_v17 }
 0x11e   :  { %v1112_v22 = vpop.f32.mrb[20].mxu0 }
 0x11f   :  { %v1176_v23 = vpop.f32.mrb[20].mxu1  ;;  %v1113_v24 = vpop.f32.mrb[21].mxu0 }
 0x120   :  { %v1114_v25 = vadd.f32 %v1113_v24, %v1112_v22  ;;  %v1177_v26 = vpop.f32.mrb[21].mxu1  ;;  %v1115_v27 = vpop.f32.mrb[22].mxu0 }
 0x121   :  { %v1178_v30 = vadd.f32 %v1177_v26, %v1176_v23  ;;  %v1179_v31 = vpop.f32.mrb[22].mxu1  ;;  %v1116_v32 = vpop.f32.mrb[23].mxu0 }
 0x122   :  { %v1117_v33 = vadd.f32 %v1116_v32, %v1115_v27  ;;  %v1180_v34 = vpop.f32.mrb[23].mxu1 }
 0x123   :  { %v1181_v35 = vadd.f32 %v1180_v34, %v1179_v31  ;;  %v796_v36 = vadd.f32 %v1178_v30, %v1114_v25 }
 0x125   :  { %v799_v37 = vadd.f32 %v1181_v35, %v1117_v33 }
 0x126   :  { %v1118_v38 = vpop.f32.mrb[24].mxu0 }
 0x127   :  { %v1182_v39 = vpop.f32.mrb[24].mxu1  ;;  %v1119_v40 = vpop.f32.mrb[25].mxu0 }
 0x128   :  { %v1120_v41 = vadd.f32 %v1119_v40, %v1118_v38  ;;  %v1183_v44 = vpop.f32.mrb[25].mxu1  ;;  %v1121_v45 = vpop.f32.mrb[26].mxu0 }
 0x129   :  { %v1184_v46 = vadd.f32 %v1183_v44, %v1182_v39  ;;  %v1185_v47 = vpop.f32.mrb[26].mxu1  ;;  %v1122_v48 = vpop.f32.mrb[27].mxu0 }
 0x12a   :  { %v1123_v49 = vadd.f32 %v1122_v48, %v1121_v45  ;;  %v1186_v50 = vpop.f32.mrb[27].mxu1 }
 0x12b   :  { %v1187_v51 = vadd.f32 %v1186_v50, %v1185_v47  ;;  %v804_v52 = vadd.f32 %v1184_v46, %v1120_v41 }
 0x12d   :  { %v807_v53 = vadd.f32 %v1187_v51, %v1123_v49 }
 0x12e   :  { %v1124_v54 = vpop.f32.mrb[28].mxu0 }
 0x12f   :  { %v1188_v55 = vpop.f32.mrb[28].mxu1  ;;  %v1125_v58 = vpop.f32.mrb[29].mxu0 }
 0x130   :  { %v1126_v59 = vadd.f32 %v1125_v58, %v1124_v54  ;;  %v1189_v60 = vpop.f32.mrb[29].mxu1  ;;  %v1127_v61 = vpop.f32.mrb[30].mxu0 }
 0x131   :  { %v1190_v62 = vadd.f32 %v1189_v60, %v1188_v55  ;;  %v1191_v63 = vpop.f32.mrb[30].mxu1  ;;  %v1128_v0 = vpop.f32.mrb[31].mxu0 }
 0x132   :  { %v1129_v1 = vadd.f32 %v1128_v0, %v1127_v61  ;;  %v1192_v2 = vpop.f32.mrb[31].mxu1 }
 0x133   :  { %v1193_v3 = vadd.f32 %v1192_v2, %v1191_v63  ;;  %v812_v4 = vadd.f32 %v1190_v62, %v1126_v59 }
 0x135   :  { %v815_v5 = vadd.f32 %v1193_v3, %v1129_v1 }
 0x136   :  { %v1228_v8 = vpop.f32.mrb[32].mxu0 }
 0x137   :  { %v861_v9 = vadd.f32 %v1228_v8, %v1613_v42  ;;  %v1236_v10 = vpop.f32.mrb[32].mxu1  ;;  %v852_v11 = vpop.f32.mrb[33].mxu0 }
 0x138   :  { %v893_v12 = vadd.f32 %v1236_v10, %v796_v36  ;;  %v853_v13 = vadd.f32 %v852_v11, %v1609_v28  ;;  %v884_v14 = vpop.f32.mrb[33].mxu1  ;;  %v1229_v15 = vpop.f32.mrb[34].mxu0 }
 0x139   :  { %968 = vst [vmem:[%s1686_s2 + $0x10] sm:$0xff] %v861_v9  ;;  %v885_v16 = vadd.f32 %v884_v14, %v788_v20  ;;  %v864_v17 = vadd.f32 %v1229_v15, %v1615_v43  ;;  %v1237_v18 = vpop.f32.mrb[34].mxu1  ;;  %v855_v19 = vpop.f32.mrb[35].mxu0 }
 0x13a   :  { %976 = vst [vmem:[%s1686_s2 + $0x50] sm:$0xff] %v893_v12  ;;  %966 = vst [vmem:[%s1686_s2] sm:$0xff] %v853_v13  ;;  %v896_v28 = vadd.f32 %v1237_v18, %v799_v37  ;;  %v856_v42 = vadd.f32 %v855_v19, %v1611_v29  ;;  %v887_v22 = vpop.f32.mrb[35].mxu1 }
 0x13b   :  { %974 = vst [vmem:[%s1686_s2 + $0x40] sm:$0xff] %v885_v16  ;;  %969 = vst [vmem:[%s1686_s2 + $0x18] sm:$0xff] %v864_v17  ;;  %v888_v43 = vadd.f32 %v887_v22, %v1625_v21 }
 0x13c   :  { %977 = vst [vmem:[%s1686_s2 + $0x58] sm:$0xff] %v896_v28  ;;  %967 = vst [vmem:[%s1686_s2 + $0x8] sm:$0xff] %v856_v42 }
 0x13d   :  { %975 = vst [vmem:[%s1686_s2 + $0x48] sm:$0xff] %v888_v43 }
 0x13e   :  { %v1232_v29 = vpop.f32.mrb[36].mxu0 }
 0x13f   :  { %v877_v20 = vadd.f32 %v1232_v29, %v1621_v6  ;;  %v1240_v23 = vpop.f32.mrb[36].mxu1  ;;  %v868_v24 = vpop.f32.mrb[37].mxu0 }
 0x140   :  { %v909_v25 = vadd.f32 %v1240_v23, %v812_v4  ;;  %v869_v21 = vadd.f32 %v868_v24, %v1617_v56  ;;  %v900_v26 = vpop.f32.mrb[37].mxu1  ;;  %v1233_v27 = vpop.f32.mrb[38].mxu0 }
 0x141   :  { %972 = vst [vmem:[%s1686_s2 + $0x30] sm:$0xff] %v877_v20  ;;  %v901_v30 = vadd.f32 %v900_v26, %v804_v52  ;;  %v880_v31 = vadd.f32 %v1233_v27, %v1623_v7  ;;  %v1241_v32 = vpop.f32.mrb[38].mxu1  ;;  %v871_v33 = vpop.f32.mrb[39].mxu0 }
 0x142   :  { %980 = vst [vmem:[%s1686_s2 + $0x70] sm:$0xff] %v909_v25  ;;  %970 = vst [vmem:[%s1686_s2 + $0x20] sm:$0xff] %v869_v21  ;;  %v912_v56 = vadd.f32 %v1241_v32, %v815_v5  ;;  %v872_v6 = vadd.f32 %v871_v33, %v1619_v57  ;;  %v903_v34 = vpop.f32.mrb[39].mxu1 }
 0x143   :  { %978 = vst [vmem:[%s1686_s2 + $0x60] sm:$0xff] %v901_v30  ;;  %973 = vst [vmem:[%s1686_s2 + $0x38] sm:$0xff] %v880_v31  ;;  %v904_v7 = vadd.f32 %v903_v34, %v807_v53 }
 0x144   :  { %981 = vst [vmem:[%s1686_s2 + $0x78] sm:$0xff] %v912_v56  ;;  %971 = vst [vmem:[%s1686_s2 + $0x28] sm:$0xff] %v872_v6 }
 0x145   :  { %979 = vst [vmem:[%s1686_s2 + $0x68] sm:$0xff] %v904_v7 }

// kernel: tile.87
= control target key start
LH: loop header
LB: loop body
LE: loop exit
PB: predicated region body
PF: predicated region fallthrough
CT: control target
= control target key end

     0   :  { %s22_s0 = inlined_call_operand.vmem [shape: f32[32], index: 0, kind: input, shape index: {}]   ;;  %s23_s1 = inlined_call_operand.vmem [shape: f32[4,32], index: 1, kind: output, shape index: {}]  }
   0x1   :  { %v4_v0 = vld [vmem:[%s22_s0] ss:$0 sm:$0xff] }
   0x2   :  { %5 = vst [vmem:[%s23_s1] sm:$0xf] %v4_v0 }

// kernel: tile.88
= control target key start
LH: loop header
LB: loop body
LE: loop exit
PB: predicated region body
PF: predicated region fallthrough
CT: control target
= control target key end

     0   :  { %vm7_vm0 = vcmask 261120   ;;  %s37_s8 = smov 32   ;;  %s38_s9 = smov 64   ;;  %vm13_vm1 = vcmask 1048320   ;;  %vm19_vm2 = vcmask 785920   ;;  %vm25_vm3 = vcmask 523520   ;;  %s55_s0 = inlined_call_operand.vmem [shape: f32[4,32], index: 0, kind: input, shape index: {}]   ;;  %s56_s1 = inlined_call_operand.vmem [shape: f32[1,128], index: 1, kind: output, shape index: {}]  }
   0x1   :  { %v4_v0 = vld [vmem:[%s55_s0] sm:$0xf]  ;;  %s36_s0 = smov 96  }
   0x2   :  { %5 = vst [vmem:[#allocation1] sm:$0xf] %v4_v0 }
   0x9   :  { %v10_v1 = vld [vmem:[#allocation1 + $0x3] sm:$0x1]   ;;  %v22_v2 = vld [vmem:[#allocation1 + $0x1] sm:$0x1]   ;;  %v6_v3 = vld [vmem:[#allocation1] sm:$0x1]  }
   0xa   :  { %11 = vrot.lane.b32.xlu0 %v10_v1, %s36_s0  ;;  %23 = vrot.lane.b32.xlu1 %v22_v2, %s37_s8  ;;  %v16_v4 = vld [vmem:[#allocation1 + $0x2] sm:$0x1]   ;;  %8 = vst.msk [vmem:[#allocation0] sm:$0x1] %vm7_vm0, %v6_v3  }
   0xe   :  { %17 = vrot.lane.b32.xlu0 %v16_v4, %s38_s9 }
  0x7c   :  { %v12_v5 = vpop.permute.xlu0 %11   ;;  %v24_v6 = vpop.permute.xlu1 %23  }
  0x7d   :  { %14 = vst.msk [vmem:[#allocation0] sm:$0x1] %vm13_vm1, %v12_v5  }
  0x80   :  { %v18_v7 = vpop.permute.xlu0 %17  }
  0x81   :  { %20 = vst.msk [vmem:[#allocation0] sm:$0x1] %vm19_vm2, %v18_v7  }
  0x82   :  { %26 = vst.msk [vmem:[#allocation0] sm:$0x1] %vm25_vm3, %v24_v6  }
  0x89   :  { %v30_v8 = vld [vmem:[#allocation0] sm:$0x1] }
  0x8a   :  { %32 = vst [vmem:[%s56_s1] sm:$0x1] %v30_v8 }

// kernel: forward.18
= control target key start
LH: loop header
LB: loop body
LE: loop exit
PB: predicated region body
PF: predicated region fallthrough
CT: control target
= control target key end

     0   :  { %s1785_s9 = smov 0   ;;  %s1787_s10 = smov 0   ;;  %s1978_s0 = inlined_call_operand.vmem [shape: bf16[8,16,2560], index: 0, kind: input, shape index: {}]   ;;  %s1979_s1 = inlined_call_operand.vmem [shape: bf16[8,2560,128], index: 1, kind: input, shape index: {}]   ;;  %s1980_s2 = inlined_call_operand.vmem [shape: f32[8,16,128], index: 2, kind: output, shape index: {}]  }
   0x1   :  { %s1789_s11 = smov 0   ;;  %s1791_s12 = smov 0  }
   0x2   :  { %s1793_s13 = smov 0   ;;  %s1795_s14 = smov 0  }
   0x3   :  { %s1797_s15 = smov 0  }
   0x4 LB: > { %s27_s16 = sadd.s32 1, %s1759_s13  ;;  %s38_s17 = sadd.s32 1, %s1763_s14  ;;  %s1767_s15 = sphi %s1797_s15, %s12_s15   ;;  %s1763_s14 = sphi %s1795_s14, %s1986_s14   ;;  %s1759_s13 = sphi %s1793_s13, %s1985_s13   ;;  %s1755_s12 = sphi %s1791_s12, %s1984_s12   ;;  %s1751_s11 = sphi %s1789_s11, %s1983_s11   ;;  %s1747_s10 = sphi %s1787_s10, %s1982_s10   ;;  %s1743_s9 = sphi %s1785_s9, %s1981_s9  }
   0x5   : > { %p28_p0 = scmp.ge.s32.totalorder %s27_s16, 2  ;;  %p56_p1 = scmp.ne.s32.totalorder %s1747_s10, %s1743_s9 }
   0x6   : > { %p57_p2 = scmp.eq.s32.totalorder %s1767_s15, 0  ;;  %s49_s21 = sadd.s32 1, %s1747_s10 }
   0x7   : > { %s1988_s16 = smov (%p28_p0, %s27_s16), 0  ;;  %s1990_s17 = smov (!%p28_p0, %s38_s17), %s1763_s14 }
   0x8   : > { %p58_p3 = por %p57_p2, %p56_p1  ;;  %p40_p4 = scmp.ge.s32.totalorder %s1990_s17, 8 }
   0x9   : > { %s45_s18 = ssub.s32 %s1759_s13, %s1988_s16  ;;  %p1346_p6 = scmp.ge.s32.totalorder %s1767_s15, 16 }
   0xa   : > { %s1992_s17 = smov (%p40_p4, %s1990_s17), 0 }
   0xb   : > { %s42_s19 = ssub.s32 %s1763_s14, %s1992_s17  ;;  %142 = sbr.rel (%p1346_p6) target bundleno = 32 (0x20), region = 16 }
   0xc   : > { %s46_s20 = sor.u32 %s45_s18, %s42_s19 }
   0xd   : > { %p47_p5 = scmp.eq.s32.totalorder %s46_s20, 0 }
   0xf   : > { %s1836_s22 = scalar_select %p47_p5, %s1747_s10, %s49_s21  }
  0x12   : > { %145 = sbr.rel (!%p58_p3) target bundleno = 32 (0x20), region = 20  ;;  %s147_s23 = sand.u32 (%p58_p3), 1, %s1747_s10  }
  0x13   : > { %s151_s24 = smul.u32 (%p58_p3), 10, %s1759_s13 }
  0x14   : > { %s1557_s25 = smul.u32 (%p58_p3), 80, %s147_s23 }
  0x15   : > { %s1558_s26 = smul.u32 (%p58_p3), 40, %s1763_s14 }
  0x16   : > { %s149_s4 = scalar_lea.vmem (%p58_p3), [#allocation3], %s1557_s25 }
  0x17   : > { %s155_s27 = sadd.s32 (%p58_p3), %s1558_s26, %s151_s24 }
  0x18   : > { %s1347_s28 = sshll.u32 (%p58_p3), %s155_s27, 2 }
  0x19   : > { %s157_s3 = scalar_lea.vmem %s1978_s0, %s1347_s28 }
  0x1a   : > { %v170_v0 = vld [vmem:[%s157_s3] sm:$0xff]  ;;  %v172_v1 = vld [vmem:[%s157_s3 + $0x8] sm:$0xff]  ;;  %v174_v2 = vld [vmem:[%s157_s3 + $0x10] sm:$0xff] }
  0x1b   : > { %171 = vst [vmem:[%s149_s4] sm:$0xff] %v170_v0  ;;  %173 = vst [vmem:[%s149_s4 + $0x8] sm:$0xff] %v172_v1  ;;  %v176_v3 = vld [vmem:[%s157_s3 + $0x18] sm:$0xff]  ;;  %v178_v4 = vld [vmem:[%s157_s3 + $0x20] sm:$0xff] }
  0x1c   : > { %175 = vst [vmem:[%s149_s4 + $0x10] sm:$0xff] %v174_v2  ;;  %v180_v5 = vld [vmem:[%s157_s3 + $0x50] sm:$0xff]  ;;  %177 = vst [vmem:[%s149_s4 + $0x18] sm:$0xff] %v176_v3  ;;  %v182_v6 = vld [vmem:[%s157_s3 + $0x58] sm:$0xff] }
  0x1d   : > { %179 = vst [vmem:[%s149_s4 + $0x20] sm:$0xff] %v178_v4  ;;  %181 = vst [vmem:[%s149_s4 + $0x28] sm:$0xff] %v180_v5  ;;  %v184_v7 = vld [vmem:[%s157_s3 + $0x60] sm:$0xff]  ;;  %v186_v8 = vld [vmem:[%s157_s3 + $0x68] sm:$0xff] }
  0x1e   : > { %183 = vst [vmem:[%s149_s4 + $0x30] sm:$0xff] %v182_v6  ;;  %185 = vst [vmem:[%s149_s4 + $0x38] sm:$0xff] %v184_v7  ;;  %v188_v9 = vld [vmem:[%s157_s3 + $0x70] sm:$0xff] }
  0x1f   : > { %187 = vst [vmem:[%s149_s4 + $0x40] sm:$0xff] %v186_v8  ;;  %189 = vst [vmem:[%s149_s4 + $0x48] sm:$0xff] %v188_v9 }
  0x20 PF: > { %p1348_p7 = scmp.ge.s32.totalorder %s1767_s15, 1  ;;  %p210_p8 = scmp.lt.s32.totalorder %s1767_s15, 17 }
  0x22   : > { %p211_p9 = pnand %p1348_p7, %p210_p8 }
  0x23   : > { %s217_s5 = sand.u32 (!%p211_p9), 1, %s1743_s9   ;;  %s259_s6 = smul.u32 (!%p211_p9), 160, %s1751_s11 }
  0x24   : > { %214 = sbr.rel (%p211_p9) target bundleno = 380 (0x17c), region = 47  ;;  %p260_p10 = scmp.lt.s32.totalorder (!%p211_p9), %s1755_s12, 7 }
  0x25   : > { %s1559_s7 = smul.u32 (!%p211_p9), 80, %s217_s5  ;;  %p262_p11 = scmp.lt.s32.totalorder (!%p211_p9), %s259_s6, 319 }
  0x26   : > { %p1352_p12 = scmp.ne.s32.totalorder (!%p211_p9), %s1751_s11, 0 }
  0x27   : > { %s1861_s9 = scalar_lea.vmem (!%p211_p9), [#allocation3], %s1559_s7 }
  0x2b   : > { %s1994_s12 = smov (!%p260_p10, %s1755_s12), 7  ;;  %s1996_s6 = smov (!%p262_p11, %s259_s6), 319 }
  0x2c   : > { %s1560_s8 = smul.u32 320, %s1994_s12  ;;  %s1446_s18 = sshll.u32 %s1994_s12, 4  ;;  %v1769_v10 = vmov (!%p1352_p12), 0.0  }
  0x2d   : > { %s1854_s21 = scalar_lea.vmem %s1980_s2, %s1446_s18  ;;  %289 = sbr.rel (%p1352_p12) target bundleno = 52 (0x34), region = 55  ;;  %290 = vst [vmem:[#allocation2] sm:$0xff] (!%p1352_p12), %v1769_v10  ;;  %291 = vst [vmem:[#allocation2 + $0x8] sm:$0xff] (!%p1352_p12), %v1769_v10 }
  0x2e   : > { %s268_s23 = sadd.s32 %s1560_s8, %s1996_s6 }
  0x2f   : > { %s1349_s24 = sshll.u32 %s268_s23, 2 }
  0x30   : > { %s1859_s27 = scalar_lea.vmem %s1979_s1, %s1349_s24 }
  0x34 PF: > { %v1618_v11 = vld [vmem:[%s1859_s27 + $0x40] sm:$0xff]   ;;  %v1622_v15 = vld [vmem:[%s1859_s27 + $0x48] sm:$0xff]   ;;  %v1626_v19 = vld [vmem:[%s1859_s27 + $0x50] sm:$0xff]   ;;  %p1443_p13 = scmp.ne.s32.totalorder %s1751_s11, 1 }
  0x35   : > { %v1619_v12 = vld [vmem:[%s1859_s27 + $0xc0] sm:$0xff]   ;;  %1447 = vmatprep.subr.bf16.mxu0 %v1618_v11  ;;  %v1623_v16 = vld [vmem:[%s1859_s27 + $0xc8] sm:$0xff]   ;;  %v1627_v20 = vld [vmem:[%s1859_s27 + $0xd0] sm:$0xff]  }
  0x36   : > { %v1620_v13 = vld [vmem:[%s1859_s27] sm:$0xff]   ;;  %1469 = vmatprep.subr.bf16.mxu1 %v1619_v12  ;;  %v1624_v17 = vld [vmem:[%s1859_s27 + $0x8] sm:$0xff]   ;;  %v1628_v21 = vld [vmem:[%s1859_s27 + $0x10] sm:$0xff]  }
  0x37   : > { %v1621_v14 = vld [vmem:[%s1859_s27 + $0x80] sm:$0xff]   ;;  %1448 = vmatpush3.bf16.msra.mxu0 %v1620_v13  ;;  %v1625_v18 = vld [vmem:[%s1859_s27 + $0x88] sm:$0xff]   ;;  %v1629_v22 = vld [vmem:[%s1859_s27 + $0x90] sm:$0xff]  }
  0x38   : > { %1470 = vmatpush3.bf16.msra.mxu1 %v1621_v14  ;;  %1449 = vmatprep.subr.bf16.mxu0 %v1622_v15  ;;  %v1630_v23 = vld [vmem:[%s1859_s27 + $0x58] sm:$0xff]   ;;  %v1634_v27 = vld [vmem:[%s1859_s27 + $0x60] sm:$0xff]   ;;  %v1638_v31 = vld [vmem:[%s1859_s27 + $0x68] sm:$0xff]  }
  0x39   : > { %1471 = vmatprep.subr.bf16.mxu1 %v1623_v16  ;;  %v1631_v24 = vld [vmem:[%s1859_s27 + $0xd8] sm:$0xff]   ;;  %v1635_v28 = vld [vmem:[%s1859_s27 + $0xe0] sm:$0xff]   ;;  %v1639_v32 = vld [vmem:[%s1859_s27 + $0xe8] sm:$0xff]  }
  0x3a   : > { %v1632_v25 = vld [vmem:[%s1859_s27 + $0x18] sm:$0xff]   ;;  %v1636_v29 = vld [vmem:[%s1859_s27 + $0x20] sm:$0xff]   ;;  %v1640_v33 = vld [vmem:[%s1859_s27 + $0x28] sm:$0xff]  }
  0x3b   : > { %1450 = vmatpush3.bf16.msra.mxu0 %v1624_v17  ;;  %v1633_v26 = vld [vmem:[%s1859_s27 + $0x98] sm:$0xff]   ;;  %v1637_v30 = vld [vmem:[%s1859_s27 + $0xa0] sm:$0xff]   ;;  %v1641_v34 = vld [vmem:[%s1859_s27 + $0xa8] sm:$0xff]  }
  0x3c   : > { %1472 = vmatpush3.bf16.msra.mxu1 %v1625_v18  ;;  %1451 = vmatprep.subr.bf16.mxu0 %v1626_v19  ;;  %v1642_v35 = vld [vmem:[%s1859_s27 + $0x70] sm:$0xff]   ;;  %v1646_v39 = vld [vmem:[%s1859_s27 + $0x78] sm:$0xff]   ;;  %v1656_v47 = vld [vmem:[%s1859_s27 + $0x140] sm:$0xff]  }
  0x3d   : > { %1473 = vmatprep.subr.bf16.mxu1 %v1627_v20  ;;  %v1643_v36 = vld [vmem:[%s1859_s27 + $0xf0] sm:$0xff]   ;;  %v1647_v40 = vld [vmem:[%s1859_s27 + $0xf8] sm:$0xff]   ;;  %v1657_v48 = vld [vmem:[%s1859_s27 + $0x100] sm:$0xff]  }
  0x3e   : > { %v1644_v37 = vld [vmem:[%s1859_s27 + $0x30] sm:$0xff]   ;;  %v1648_v41 = vld [vmem:[%s1859_s27 + $0x38] sm:$0xff]   ;;  %v1658_v49 = vld [vmem:[%s1859_s27 + $0x1c0] sm:$0xff]  }
  0x3f   : > { %1452 = vmatpush3.bf16.msra.mxu0 %v1628_v21  ;;  %v1645_v38 = vld [vmem:[%s1859_s27 + $0xb0] sm:$0xff]   ;;  %v1649_v42 = vld [vmem:[%s1859_s27 + $0xb8] sm:$0xff]   ;;  %v1659_v50 = vld [vmem:[%s1859_s27 + $0x180] sm:$0xff]  }
  0x40   : > { %1474 = vmatpush3.bf16.msra.mxu1 %v1629_v22  ;;  %1453 = vmatprep.subr.bf16.mxu0 %v1630_v23  ;;  %v1650_v43 = vld [vmem:[%s1861_s9] ss:$40 sps:$4 sm:$0xff]   ;;  %v1652_v44 = vld [vmem:[%s1861_s9 + $0x4] ss:$40 sps:$4 sm:$0xff]   ;;  %v1687_v14 = vld [vmem:[%s1861_s9 + $0x10] ss:$40 sps:$4 sm:$0xff]  }
  0x41   : > { %1475 = vmatprep.subr.bf16.mxu1 %v1631_v24  ;;  %v1653_v45 = vld [vmem:[%s1861_s9 + $0x8] ss:$40 sps:$4 sm:$0xff]   ;;  %v1655_v46 = vld [vmem:[%s1861_s9 + $0xc] ss:$40 sps:$4 sm:$0xff]   ;;  %1026 = vmatprep.mubr.bf16.mxu0 %v1652_v44  ;;  %v1692_v18 = vld [vmem:[%s1861_s9 + $0x18] ss:$40 sps:$4 sm:$0xff]  }
  0x42   : > { %1067 = vmatprep.mubr.bf16.mxu1 %v1655_v46  ;;  %v1660_v51 = vld [vmem:[%s1859_s27 + $0x148] sm:$0xff]   ;;  %v1664_v55 = vld [vmem:[%s1859_s27 + $0x150] sm:$0xff]   ;;  %v1668_v59 = vld [vmem:[%s1859_s27 + $0x158] sm:$0xff]  }
  0x43   : > { %1454 = vmatpush3.bf16.msra.mxu0 %v1632_v25  ;;  %v1661_v52 = vld [vmem:[%s1859_s27 + $0x108] sm:$0xff]   ;;  %v1665_v56 = vld [vmem:[%s1859_s27 + $0x110] sm:$0xff]   ;;  %v1669_v60 = vld [vmem:[%s1859_s27 + $0x118] sm:$0xff]  }
  0x44   : > { %1476 = vmatpush3.bf16.msra.mxu1 %v1633_v26  ;;  %1455 = vmatprep.subr.bf16.mxu0 %v1634_v27  ;;  %v1662_v53 = vld [vmem:[%s1859_s27 + $0x1c8] sm:$0xff]   ;;  %v1666_v57 = vld [vmem:[%s1859_s27 + $0x1d0] sm:$0xff]   ;;  %v1670_v61 = vld [vmem:[%s1859_s27 + $0x1d8] sm:$0xff]  }
  0x45   : > { %1477 = vmatprep.subr.bf16.mxu1 %v1635_v28  ;;  %v1663_v54 = vld [vmem:[%s1859_s27 + $0x188] sm:$0xff]   ;;  %v1667_v58 = vld [vmem:[%s1859_s27 + $0x190] sm:$0xff]   ;;  %v1671_v62 = vld [vmem:[%s1859_s27 + $0x198] sm:$0xff]  }
  0x46   : > { %v1672_v63 = vld [vmem:[%s1859_s27 + $0x160] sm:$0xff]   ;;  %v1676_v3 = vld [vmem:[%s1859_s27 + $0x168] sm:$0xff]   ;;  %v1680_v7 = vld [vmem:[%s1859_s27 + $0x170] sm:$0xff]  }
  0x47   : > { %1456 = vmatpush3.bf16.msra.mxu0 %v1636_v29  ;;  %v1673_v0 = vld [vmem:[%s1859_s27 + $0x120] sm:$0xff]   ;;  %v1677_v4 = vld [vmem:[%s1859_s27 + $0x128] sm:$0xff]   ;;  %v1681_v8 = vld [vmem:[%s1859_s27 + $0x130] sm:$0xff]  }
  0x48   : > { %1478 = vmatpush3.bf16.msra.mxu1 %v1637_v30  ;;  %1457 = vmatprep.subr.bf16.mxu0 %v1638_v31  ;;  %v1674_v1 = vld [vmem:[%s1859_s27 + $0x1e0] sm:$0xff]   ;;  %v1678_v5 = vld [vmem:[%s1859_s27 + $0x1e8] sm:$0xff]   ;;  %v1682_v9 = vld [vmem:[%s1859_s27 + $0x1f0] sm:$0xff]  }
  0x49   : > { %1479 = vmatprep.subr.bf16.mxu1 %v1639_v32  ;;  %v1675_v2 = vld [vmem:[%s1859_s27 + $0x1a0] sm:$0xff]   ;;  %v1679_v6 = vld [vmem:[%s1859_s27 + $0x1a8] sm:$0xff]   ;;  %v1683_v10 = vld [vmem:[%s1859_s27 + $0x1b0] sm:$0xff]  }
  0x4a   : > { %v1684_v11 = vld [vmem:[%s1859_s27 + $0x178] sm:$0xff]   ;;  %v1691_v17 = vld [vmem:[%s1859_s27 + $0x240] sm:$0xff]   ;;  %v1696_v21 = vld [vmem:[%s1859_s27 + $0x248] sm:$0xff]  }
  0x4b   : > { %1458 = vmatpush3.bf16.msra.mxu0 %v1640_v33  ;;  %v1685_v12 = vld [vmem:[%s1859_s27 + $0x138] sm:$0xff]   ;;  %v1695_v20 = vld [vmem:[%s1859_s27 + $0x200] sm:$0xff]   ;;  %v1697_v22 = vld [vmem:[%s1859_s27 + $0x208] sm:$0xff]  }
  0x4c   : > { %1480 = vmatpush3.bf16.msra.mxu1 %v1641_v34  ;;  %1459 = vmatprep.subr.bf16.mxu0 %v1642_v35  ;;  %v1686_v13 = vld [vmem:[%s1859_s27 + $0x1f8] sm:$0xff]   ;;  %v1698_v23 = vld [vmem:[%s1859_s27 + $0x250] sm:$0xff]   ;;  %v1702_v27 = vld [vmem:[%s1859_s27 + $0x260] sm:$0xff]  }
  0x4d   : > { %1481 = vmatprep.subr.bf16.mxu1 %v1643_v36  ;;  %v1689_v15 = vld [vmem:[%s1861_s9 + $0x14] ss:$40 sps:$4 sm:$0xff]   ;;  %v1712_v30 = vld [vmem:[%s1861_s9 + $0x24] ss:$40 sps:$4 sm:$0xff]   ;;  %v1710_v36 = vld [vmem:[%s1861_s9 + $0x20] ss:$40 sps:$4 sm:$0xff]  }
  0x4e   : > { %v1690_v16 = vld [vmem:[%s1859_s27 + $0x1b8] sm:$0xff]   ;;  %v1699_v24 = vld [vmem:[%s1859_s27 + $0x210] sm:$0xff]   ;;  %v1703_v28 = vld [vmem:[%s1859_s27 + $0x220] sm:$0xff]  }
  0x4f   : > { %1460 = vmatpush3.bf16.msra.mxu0 %v1644_v37  ;;  %v1694_v19 = vld [vmem:[%s1861_s9 + $0x1c] ss:$40 sps:$4 sm:$0xff]  }
  0x50   : > { %1482 = vmatpush3.bf16.msra.mxu1 %v1645_v38  ;;  %1461 = vmatprep.subr.bf16.mxu0 %v1646_v39  ;;  %v1700_v25 = vld [vmem:[%s1859_s27 + $0x258] sm:$0xff]   ;;  %v1704_v29 = vld [vmem:[%s1859_s27 + $0x268] sm:$0xff]   ;;  %v1706_v32 = vld [vmem:[%s1859_s27 + $0x270] sm:$0xff]  }
  0x51   : > { %1483 = vmatprep.subr.bf16.mxu1 %v1647_v40  ;;  %v1701_v26 = vld [vmem:[%s1859_s27 + $0x218] sm:$0xff]   ;;  %v1705_v31 = vld [vmem:[%s1859_s27 + $0x228] sm:$0xff]   ;;  %v1707_v33 = vld [vmem:[%s1859_s27 + $0x230] sm:$0xff]  }
  0x52   : > { %v1708_v34 = vld [vmem:[%s1859_s27 + $0x278] sm:$0xff]  }
  0x53   : > { %1462 = vmatpush3.bf16.msra.mxu0 %v1648_v41  ;;  %v1709_v35 = vld [vmem:[%s1859_s27 + $0x238] sm:$0xff]  }
  0x54   : > { %1484 = vmatpush3.bf16.msra.mxu1 %v1649_v42  ;;  %1491 = vmatprep.subr.bf16.mxu0 %v1656_v47 }
  0x55   : > { %1513 = vmatprep.subr.bf16.mxu1 %v1658_v49 }
  0x56   : > { %1027 = vmatmul.mubr.bf16.vlgmr.msra.gmra.mrb[0].mxu0 %v1650_v43 }
  0x57   : > { %1068 = vmatmul.mubr.bf16.vlgmr.msra.gmra.mrb[0].mxu1 %v1653_v45  ;;  %1492 = vmatpush3.bf16.msra.mxu0 %v1657_v48 }
  0x58   : > { %1514 = vmatpush3.bf16.msra.mxu1 %v1659_v50  ;;  %1493 = vmatprep.subr.bf16.mxu0 %v1660_v51 }
  0x59   : > { %1515 = vmatprep.subr.bf16.mxu1 %v1662_v53  ;;  %1108 = vmatprep.mubr.bf16.mxu0 %v1689_v15 }
  0x5a   : > { %1149 = vmatprep.mubr.bf16.mxu1 %v1694_v19 }
  0x5b   : > { %1494 = vmatpush3.bf16.msra.mxu0 %v1661_v52 }
  0x5c   : > { %1516 = vmatpush3.bf16.msra.mxu1 %v1663_v54  ;;  %1495 = vmatprep.subr.bf16.mxu0 %v1664_v55 }
  0x5d   : > { %1517 = vmatprep.subr.bf16.mxu1 %v1666_v57 }
  0x5f   : > { %1496 = vmatpush3.bf16.msra.mxu0 %v1665_v56 }
  0x60   : > { %1518 = vmatpush3.bf16.msra.mxu1 %v1667_v58  ;;  %1497 = vmatprep.subr.bf16.mxu0 %v1668_v59 }
  0x61   : > { %1519 = vmatprep.subr.bf16.mxu1 %v1670_v61 }
  0x63   : > { %1498 = vmatpush3.bf16.msra.mxu0 %v1669_v60 }
  0x64   : > { %1520 = vmatpush3.bf16.msra.mxu1 %v1671_v62  ;;  %1499 = vmatprep.subr.bf16.mxu0 %v1672_v63 }
  0x65   : > { %1521 = vmatprep.subr.bf16.mxu1 %v1674_v1 }
  0x67   : > { %1500 = vmatpush3.bf16.msra.mxu0 %v1673_v0 }
  0x68   : > { %1522 = vmatpush3.bf16.msra.mxu1 %v1675_v2  ;;  %1501 = vmatprep.subr.bf16.mxu0 %v1676_v3 }
  0x69   : > { %1523 = vmatprep.subr.bf16.mxu1 %v1678_v5 }
  0x6b   : > { %1502 = vmatpush3.bf16.msra.mxu0 %v1677_v4 }
  0x6c   : > { %1524 = vmatpush3.bf16.msra.mxu1 %v1679_v6  ;;  %1503 = vmatprep.subr.bf16.mxu0 %v1680_v7  ;;  %v292_v7 = vld [vmem:[#allocation2] sm:$0xff] }
  0x6d   : > { %1525 = vmatprep.subr.bf16.mxu1 %v1682_v9 }
  0x6f   : > { %1504 = vmatpush3.bf16.msra.mxu0 %v1681_v8 }
  0x70   : > { %1526 = vmatpush3.bf16.msra.mxu1 %v1683_v10  ;;  %1505 = vmatprep.subr.bf16.mxu0 %v1684_v11  ;;  %v293_v11 = vld [vmem:[#allocation2 + $0x8] sm:$0xff] }
  0x71   : > { %1527 = vmatprep.subr.bf16.mxu1 %v1686_v13 }
  0x73   : > { %1506 = vmatpush3.bf16.msra.mxu0 %v1685_v12 }
  0x74   : > { %1528 = vmatpush3.bf16.msra.mxu1 %v1690_v16  ;;  %1535 = vmatprep.subr.bf16.mxu0 %v1691_v17 }
  0x76   : > { %1109 = vmatmul.mubr.bf16.vlgmr.msra.gmra.mrb[4].mxu0 %v1687_v14 }
  0x77   : > { %1536 = vmatpush3.bf16.msra.mxu0 %v1695_v20  ;;  %1150 = vmatmul.mubr.bf16.vlgmr.msra.gmra.mrb[4].mxu1 %v1692_v18 }
  0x78   : > { %1537 = vmatprep.subr.bf16.mxu0 %v1696_v21  ;;  %1190 = vmatprep.mubr.bf16.mxu0 %v1712_v30 }
  0x7b   : > { %1538 = vmatpush3.bf16.msra.mxu0 %v1697_v22 }
  0x7c   : > { %1539 = vmatprep.subr.bf16.mxu0 %v1698_v23 }
  0x7f   : > { %1540 = vmatpush3.bf16.msra.mxu0 %v1699_v24 }
  0x80   : > { %1541 = vmatprep.subr.bf16.mxu0 %v1700_v25 }
  0x83   : > { %1542 = vmatpush3.bf16.msra.mxu0 %v1701_v26 }
  0x84   : > { %1543 = vmatprep.subr.bf16.mxu0 %v1702_v27 }
  0x87   : > { %1544 = vmatpush3.bf16.msra.mxu0 %v1703_v28 }
  0x88   : > { %1545 = vmatprep.subr.bf16.mxu0 %v1704_v29 }
  0x8b   : > { %1546 = vmatpush3.bf16.msra.mxu0 %v1705_v31 }
  0x8c   : > { %1547 = vmatprep.subr.bf16.mxu0 %v1706_v32 }
  0x8f   : > { %1548 = vmatpush3.bf16.msra.mxu0 %v1707_v33 }
  0x90   : > { %1549 = vmatprep.subr.bf16.mxu0 %v1708_v34 }
  0x93   : > { %1550 = vmatpush3.bf16.msra.mxu0 %v1709_v35 }
  0x96   : > { %1191 = vmatmul.mubr.bf16.vlgmr.msra.gmra.mrb[8].mxu0 %v1710_v36 }
 0x129   : > { %v1463_v37 = vpop.f32.mrb[0].mxu0 }
 0x12a   : > { %v1485_v38 = vpop.f32.mrb[0].mxu1  ;;  %v1464_v39 = vpop.f32.mrb[1].mxu0 }
 0x12b   : > { %v1465_v40 = vadd.f32 %v1464_v39, %v1463_v37  ;;  %v1486_v41 = vpop.f32.mrb[1].mxu1  ;;  %v1466_v42 = vpop.f32.mrb[2].mxu0 }
 0x12c   : > { %v1487_v43 = vadd.f32 %v1486_v41, %v1485_v38  ;;  %v1488_v44 = vpop.f32.mrb[2].mxu1  ;;  %v1467_v45 = vpop.f32.mrb[3].mxu0 }
 0x12d   : > { %v1468_v46 = vadd.f32 %v1467_v45, %v1466_v42  ;;  %v1489_v47 = vpop.f32.mrb[3].mxu1 }
 0x12e   : > { %v1070_v48 = vadd.f32 %v1487_v43, %v1465_v40  ;;  %v1490_v49 = vadd.f32 %v1489_v47, %v1488_v44 }
 0x130   : > { %v1073_v50 = vadd.f32 %v1490_v49, %v1468_v46 }
 0x149   : > { %v1507_v51 = vpop.f32.mrb[4].mxu0 }
 0x14a   : > { %v1508_v52 = vpop.f32.mrb[5].mxu0  ;;  %v1529_v57 = vpop.f32.mrb[4].mxu1 }
 0x14b   : > { %v1509_v53 = vadd.f32 %v1508_v52, %v1507_v51  ;;  %v1510_v54 = vpop.f32.mrb[6].mxu0  ;;  %v1530_v59 = vpop.f32.mrb[5].mxu1 }
 0x14c   : > { %v1511_v55 = vpop.f32.mrb[7].mxu0  ;;  %v1531_v61 = vadd.f32 %v1530_v59, %v1529_v57  ;;  %v1532_v62 = vpop.f32.mrb[6].mxu1 }
 0x14d   : > { %v1111_v56 = vadd.f32 %v1509_v53, %v1070_v48  ;;  %v1512_v58 = vadd.f32 %v1511_v55, %v1510_v54  ;;  %v1533_v63 = vpop.f32.mrb[7].mxu1 }
 0x14e   : > { %v1534_v1 = vadd.f32 %v1533_v63, %v1532_v62 }
 0x14f   : > { %v1114_v60 = vadd.f32 %v1512_v58, %v1073_v50  ;;  %v1152_v0 = vadd.f32 %v1531_v61, %v1111_v56 }
 0x151   : > { %v1155_v2 = vadd.f32 %v1534_v1, %v1114_v60 }
 0x169   : > { %v1551_v3 = vpop.f32.mrb[8].mxu0 }
 0x16a   : > { %v1552_v4 = vpop.f32.mrb[9].mxu0 }
 0x16b   : > { %v1553_v5 = vadd.f32 %v1552_v4, %v1551_v3  ;;  %v1554_v6 = vpop.f32.mrb[10].mxu0 }
 0x16c   : > { %v1555_v8 = vpop.f32.mrb[11].mxu0 }
 0x16d   : > { %v1193_v9 = vadd.f32 %v1553_v5, %v1152_v0  ;;  %v1556_v10 = vadd.f32 %v1555_v8, %v1554_v6  ;;  %1206 = sbr.rel (%p1443_p13) target bundleno = 380 (0x17c), region = 59 }
 0x16f   : > { %v1199_v12 = vadd.f32 %v1193_v9, %v292_v7  ;;  %v1196_v13 = vadd.f32 %v1556_v10, %v1155_v2 }
 0x171   : > { %1201 = vst [vmem:[#allocation2] sm:$0xff] %v1199_v12  ;;  %v1200_v14 = vadd.f32 %v1196_v13, %v293_v11 }
 0x173   : > { %1202 = vst [vmem:[#allocation2 + $0x8] sm:$0xff] %v1200_v14 }
 0x178   : > { %v1207_v15 = vld [vmem:[#allocation2] sm:$0xff] }
 0x179   : > { %1209 = vst [vmem:[%s1854_s21] sm:$0xff] %v1207_v15 }
 0x17a   : > { %v1208_v16 = vld [vmem:[#allocation2 + $0x8] sm:$0xff] }
 0x17b   : > { %1210 = vst [vmem:[%s1854_s21 + $0x8] sm:$0xff] %v1208_v16 }
 0x17c PF: > { %s12_s15 = sadd.s32 1, %s1767_s15   ;;  %s1981_s9 = smov %s1747_s10 }
 0x17d   : > { %p9_p0 = scmp.ge.s32.totalorder %s12_s15, 18   ;;  %s1982_s10 = smov %s1836_s22 }
 0x17e   : > { %s1983_s11 = smov %s1759_s13  ;;  %s1984_s12 = smov %s1763_s14 }
 0x17f   : > { %s1985_s13 = smov %s1988_s16  ;;  %s1986_s14 = smov %s1992_s17 }
 0x180   :  { %11 = sbr.rel (!%p9_p0) target bundleno = 4 (0x4), region = 97 }

// kernel: forward.19
= control target key start
LH: loop header
LB: loop body
LE: loop exit
PB: predicated region body
PF: predicated region fallthrough
CT: control target
= control target key end

     0   :  { %s104_s0 = inlined_call_operand.vmem [shape: f32[32,128], index: 0, kind: input, shape index: {}]   ;;  %s105_s1 = inlined_call_operand.vmem [shape: f32[1,128], index: 1, kind: input, shape index: {}]   ;;  %s106_s2 = inlined_call_operand.vmem [shape: f32[1,128], index: 2, kind: input, shape index: {}]   ;;  %s107_s3 = inlined_call_operand.vmem [shape: f32[32,128], index: 3, kind: output, shape index: {}]  }
   0x1   :  { %v14_v0 = vld [vmem:[%s104_s0] sm:$0xff]  ;;  %v15_v4 = vld [vmem:[%s104_s0 + $0x8] sm:$0xff]  ;;  %v16_v5 = vld [vmem:[%s104_s0 + $0x10] sm:$0xff] }
   0x2   :  { %v52_v1 = vld [vmem:[%s105_s1] ss:$0 sm:$0xff]  ;;  %v17_v6 = vld [vmem:[%s104_s0 + $0x18] sm:$0xff] }
   0x3   :  { %v53_v2 = vld [vmem:[%s106_s2] ss:$0 sm:$0xff]  ;;  %v25_v3 = vmul.f32 %v52_v1, %v14_v0  ;;  %v26_v7 = vmul.f32 %v52_v1, %v15_v4  ;;  %v27_v8 = vmul.f32 %v52_v1, %v16_v5  ;;  %v28_v9 = vmul.f32 %v52_v1, %v17_v6 }
   0x5   :  { %v36_v10 = vadd.f32 %v53_v2, %v25_v3  ;;  %v37_v11 = vadd.f32 %v53_v2, %v26_v7  ;;  %v38_v12 = vadd.f32 %v53_v2, %v27_v8  ;;  %v39_v13 = vadd.f32 %v53_v2, %v28_v9 }
   0x7   :  { %v40_v14 = vmax.f32 %v36_v10, 0.0  ;;  %v41_v15 = vmax.f32 %v37_v11, 0.0  ;;  %v42_v16 = vmax.f32 %v38_v12, 0.0  ;;  %v43_v17 = vmax.f32 %v39_v13, 0.0 }
   0x9   :  { %44 = vst [vmem:[%s107_s3] sm:$0xff] %v40_v14  ;;  %45 = vst [vmem:[%s107_s3 + $0x8] sm:$0xff] %v41_v15 }
   0xa   :  { %46 = vst [vmem:[%s107_s3 + $0x10] sm:$0xff] %v42_v16  ;;  %47 = vst [vmem:[%s107_s3 + $0x18] sm:$0xff] %v43_v17 }

// kernel: squeeze.10
= control target key start
LH: loop header
LB: loop body
LE: loop exit
PB: predicated region body
PF: predicated region fallthrough
CT: control target
= control target key end

     0   :  { %s131_s10 = smov 96   ;;  %vm3_vm0 = vcmask 261120   ;;  %s132_s6 = smov 64   ;;  %vm24_vm1 = vcmask 1048320   ;;  %vm51_vm2 = vcmask 785920   ;;  %vm78_vm3 = vcmask 523520   ;;  %s240_s0 = inlined_call_operand.vmem [shape: f32[1,128,32], index: 0, kind: input, shape index: {}]   ;;  %s241_s1 = inlined_call_operand.vmem [shape: f32[32,128], index: 1, kind: output, shape index: {}]  }
   0x1   :  { %v110_v0 = vld [vmem:[%s240_s0 + $0x43] ss:$4 sm:$0xff]   ;;  %v103_v4 = vld [vmem:[%s240_s0 + $0x40] ss:$4 sm:$0xff]   ;;  %v115_v8 = vld [vmem:[%s240_s0 + $0x22] ss:$4 sm:$0xff]  }
   0x2   :  { %v107_v1 = vld [vmem:[%s240_s0 + $0x3] ss:$4 sm:$0xff]   ;;  %35 = vrot.lane.b32.xlu1 %v110_v0, %s131_s10  ;;  %v2_v5 = vld [vmem:[%s240_s0] ss:$4 sm:$0xff]   ;;  %104 = vst.msk [vmem:[%s241_s1 + $0x10] sm:$0xff] %vm3_vm0, %v103_v4   ;;  %s133_s15 = smov 32  }
   0x3   :  { %22 = vrot.lane.b32.xlu0 %v107_v1, %s131_s10  ;;  %v112_v2 = vld [vmem:[%s240_s0 + $0x63] ss:$4 sm:$0xff]   ;;  %4 = vst.msk [vmem:[%s241_s1] sm:$0xff] %vm3_vm0, %v2_v5   ;;  %v105_v6 = vld [vmem:[%s240_s0 + $0x60] ss:$4 sm:$0xff]  }
   0x4   :  { %v108_v3 = vld [vmem:[%s240_s0 + $0x23] ss:$4 sm:$0xff]   ;;  %v101_v7 = vld [vmem:[%s240_s0 + $0x20] ss:$4 sm:$0xff]   ;;  %v114_v9 = vld [vmem:[%s240_s0 + $0x2] ss:$4 sm:$0xff]  }
   0x5   :  { %106 = vst.msk [vmem:[%s241_s1 + $0x18] sm:$0xff] %vm3_vm0, %v105_v6   ;;  %102 = vst.msk [vmem:[%s241_s1 + $0x8] sm:$0xff] %vm3_vm0, %v101_v7   ;;  %v119_v10 = vld [vmem:[%s240_s0 + $0x62] ss:$4 sm:$0xff]   ;;  %v122_v12 = vld [vmem:[%s240_s0 + $0x21] ss:$4 sm:$0xff]  }
   0x6   :  { %42 = vrot.lane.b32.xlu1 %v112_v2, %s131_s10  ;;  %v117_v11 = vld [vmem:[%s240_s0 + $0x42] ss:$4 sm:$0xff]   ;;  %v121_v13 = vld [vmem:[%s240_s0 + $0x1] ss:$4 sm:$0xff]  }
   0x7   :  { %28 = vrot.lane.b32.xlu0 %v108_v3, %s131_s10  ;;  %v126_v14 = vld [vmem:[%s240_s0 + $0x61] ss:$4 sm:$0xff]  }
   0x8   :  { %v124_v15 = vld [vmem:[%s240_s0 + $0x41] ss:$4 sm:$0xff]  }
   0xa   :  { %55 = vrot.lane.b32.xlu1 %v115_v8, %s132_s6 }
   0xb   :  { %49 = vrot.lane.b32.xlu0 %v114_v9, %s132_s6 }
   0xe   :  { %69 = vrot.lane.b32.xlu1 %v119_v10, %s132_s6 }
   0xf   :  { %62 = vrot.lane.b32.xlu0 %v117_v11, %s132_s6 }
  0x12   :  { %82 = vrot.lane.b32.xlu1 %v122_v12, %s133_s15 }
  0x13   :  { %76 = vrot.lane.b32.xlu0 %v121_v13, %s133_s15 }
  0x16   :  { %96 = vrot.lane.b32.xlu1 %v126_v14, %s133_s15 }
  0x17   :  { %89 = vrot.lane.b32.xlu0 %v124_v15, %s133_s15 }
  0x74   :  { %v36_v16 = vpop.permute.xlu1 %35  }
  0x75   :  { %v23_v17 = vpop.permute.xlu0 %22   ;;  %111 = vst.msk [vmem:[%s241_s1 + $0x10] sm:$0xff] %vm24_vm1, %v36_v16  }
  0x76   :  { %25 = vst.msk [vmem:[%s241_s1] sm:$0xff] %vm24_vm1, %v23_v17  }
  0x78   :  { %v43_v18 = vpop.permute.xlu1 %42  }
  0x79   :  { %v29_v19 = vpop.permute.xlu0 %28   ;;  %113 = vst.msk [vmem:[%s241_s1 + $0x18] sm:$0xff] %vm24_vm1, %v43_v18  }
  0x7a   :  { %109 = vst.msk [vmem:[%s241_s1 + $0x8] sm:$0xff] %vm24_vm1, %v29_v19  }
  0x7c   :  { %v56_v20 = vpop.permute.xlu1 %55  }
  0x7d   :  { %v50_v21 = vpop.permute.xlu0 %49   ;;  %116 = vst.msk [vmem:[%s241_s1 + $0x8] sm:$0xff] %vm51_vm2, %v56_v20  }
  0x7e   :  { %52 = vst.msk [vmem:[%s241_s1] sm:$0xff] %vm51_vm2, %v50_v21  }
  0x80   :  { %v70_v22 = vpop.permute.xlu1 %69  }
  0x81   :  { %v63_v23 = vpop.permute.xlu0 %62   ;;  %120 = vst.msk [vmem:[%s241_s1 + $0x18] sm:$0xff] %vm51_vm2, %v70_v22  }
  0x82   :  { %118 = vst.msk [vmem:[%s241_s1 + $0x10] sm:$0xff] %vm51_vm2, %v63_v23  }
  0x84   :  { %v83_v24 = vpop.permute.xlu1 %82  }
  0x85   :  { %v77_v25 = vpop.permute.xlu0 %76   ;;  %123 = vst.msk [vmem:[%s241_s1 + $0x8] sm:$0xff] %vm78_vm3, %v83_v24  }
  0x86   :  { %79 = vst.msk [vmem:[%s241_s1] sm:$0xff] %vm78_vm3, %v77_v25  }
  0x88   :  { %v97_v26 = vpop.permute.xlu1 %96  }
  0x89   :  { %v90_v27 = vpop.permute.xlu0 %89   ;;  %127 = vst.msk [vmem:[%s241_s1 + $0x18] sm:$0xff] %vm78_vm3, %v97_v26  }
  0x8a   :  { %125 = vst.msk [vmem:[%s241_s1 + $0x10] sm:$0xff] %vm78_vm3, %v90_v27  }

// kernel: forward.20
= control target key start
LH: loop header
LB: loop body
LE: loop exit
PB: predicated region body
PF: predicated region fallthrough
CT: control target
= control target key end

     0   :  { %s1088_s1 = inlined_call_operand.vmem [shape: bf16[1,384,128], index: 1, kind: input, shape index: {}]   ;;  %s1089_s0 = inlined_call_operand.vmem [shape: bf16[1,128,384], index: 0, kind: input, shape index: {}]   ;;  %s1090_s2 = inlined_call_operand.vmem [shape: f32[1,128,128], index: 2, kind: output, shape index: {}]  }
   0x1   :  { %v825_v0 = vld [vmem:[%s1088_s1 + $0x40] sm:$0xff]   ;;  %v828_v3 = vld [vmem:[%s1088_s1 + $0x48] sm:$0xff]   ;;  %v831_v6 = vld [vmem:[%s1088_s1 + $0x50] sm:$0xff]  }
   0x2   :  { %v826_v1 = vld [vmem:[%s1088_s1] sm:$0xff]   ;;  %713 = vmatprep.subr.bf16.mxu0 %v825_v0  ;;  %v829_v4 = vld [vmem:[%s1088_s1 + $0x8] sm:$0xff]   ;;  %v832_v7 = vld [vmem:[%s1088_s1 + $0x10] sm:$0xff]  }
   0x3   :  { %v827_v2 = vld [vmem:[%s1088_s1 + $0x80] sm:$0xff]   ;;  %714 = vmatpush3.bf16.msra.mxu0 %v826_v1  ;;  %v830_v5 = vld [vmem:[%s1088_s1 + $0x88] sm:$0xff]   ;;  %v833_v8 = vld [vmem:[%s1088_s1 + $0x90] sm:$0xff]  }
   0x4   :  { %793 = vmatprep.subr.bf16.mxu1 %v827_v2  ;;  %715 = vmatprep.subr.bf16.mxu0 %v828_v3  ;;  %v834_v9 = vld [vmem:[%s1088_s1 + $0x58] sm:$0xff]   ;;  %v837_v12 = vld [vmem:[%s1088_s1 + $0x60] sm:$0xff]   ;;  %v840_v15 = vld [vmem:[%s1088_s1 + $0x68] sm:$0xff]  }
   0x5   :  { %794 = vmatpush3.bf16.msra.mxu1 %v827_v2  ;;  %v835_v10 = vld [vmem:[%s1088_s1 + $0x18] sm:$0xff]   ;;  %v839_v13 = vld [vmem:[%s1088_s1 + $0xa0] sm:$0xff]   ;;  %v842_v16 = vld [vmem:[%s1088_s1 + $0xa8] sm:$0xff]  }
   0x6   :  { %795 = vmatprep.subr.bf16.mxu1 %v830_v5  ;;  %v836_v11 = vld [vmem:[%s1088_s1 + $0x98] sm:$0xff]   ;;  %v838_v14 = vld [vmem:[%s1088_s1 + $0x20] sm:$0xff]   ;;  %v841_v17 = vld [vmem:[%s1088_s1 + $0x28] sm:$0xff]  }
   0x7   :  { %716 = vmatpush3.bf16.msra.mxu0 %v829_v4  ;;  %v843_v18 = vld [vmem:[%s1088_s1 + $0x70] sm:$0xff]   ;;  %v846_v21 = vld [vmem:[%s1088_s1 + $0x78] sm:$0xff]   ;;  %v849_v26 = vld [vmem:[%s1089_s0] ss:$12 sps:$4 sm:$0xff]  }
   0x8   :  { %717 = vmatprep.subr.bf16.mxu0 %v831_v6  ;;  %v844_v19 = vld [vmem:[%s1088_s1 + $0x30] sm:$0xff]   ;;  %v848_v22 = vld [vmem:[%s1088_s1 + $0xb8] sm:$0xff]   ;;  %v853_v28 = vld [vmem:[%s1089_s0 + $0x20] ss:$12 sps:$4 sm:$0xff]  }
   0x9   :  { %796 = vmatpush3.bf16.msra.mxu1 %v830_v5  ;;  %v845_v20 = vld [vmem:[%s1088_s1 + $0xb0] sm:$0xff]   ;;  %v847_v25 = vld [vmem:[%s1088_s1 + $0x38] sm:$0xff]   ;;  %v869_v36 = vld [vmem:[%s1089_s0 + $0x80] ss:$12 sps:$4 sm:$0xff]  }
   0xa   :  { %797 = vmatprep.subr.bf16.mxu1 %v833_v8  ;;  %v851_v23 = vld [vmem:[%s1089_s0 + $0x4] ss:$12 sps:$4 sm:$0xff]   ;;  %v852_v24 = vld [vmem:[%s1089_s0 + $0x8] ss:$12 sps:$4 sm:$0xff]   ;;  %v862_v35 = vld [vmem:[%s1089_s0 + $0x4c] ss:$12 sps:$4 sm:$0xff]  }
   0xb   :  { %718 = vmatpush3.bf16.msra.mxu0 %v832_v7  ;;  %432 = vmatprep.mubr.bf16.mxu0 %v851_v23  ;;  %v854_v27 = vld [vmem:[%s1089_s0 + $0x1c] ss:$12 sps:$4 sm:$0xff]   ;;  %v860_v29 = vld [vmem:[%s1089_s0 + $0x38] ss:$12 sps:$4 sm:$0xff]   ;;  %v857_v31 = vld [vmem:[%s1089_s0 + $0x34] ss:$12 sps:$4 sm:$0xff]  }
   0xc   :  { %719 = vmatprep.subr.bf16.mxu0 %v834_v9  ;;  %809 = vmatprep.mubr.bf16.mxu1 %v852_v24  ;;  %v856_v30 = vld [vmem:[%s1089_s0 + $0x18] ss:$12 sps:$4 sm:$0xff]   ;;  %v861_v32 = vld [vmem:[%s1089_s0 + $0x50] ss:$12 sps:$4 sm:$0xff]   ;;  %v868_v33 = vld [vmem:[%s1089_s0 + $0x68] ss:$12 sps:$4 sm:$0xff]  }
   0xd   :  { %798 = vmatpush3.bf16.msra.mxu1 %v833_v8  ;;  %v859_v34 = vld [vmem:[%s1089_s0 + $0x30] ss:$12 sps:$4 sm:$0xff]   ;;  %v876_v37 = vld [vmem:[%s1089_s0 + $0x98] ss:$12 sps:$4 sm:$0xff]   ;;  %v864_v38 = vld [vmem:[%s1089_s0 + $0x48] ss:$12 sps:$4 sm:$0xff]  }
   0xe   :  { %799 = vmatprep.subr.bf16.mxu1 %v836_v11  ;;  %v865_v39 = vld [vmem:[%s1089_s0 + $0x64] ss:$12 sps:$4 sm:$0xff]   ;;  %v867_v41 = vld [vmem:[%s1089_s0 + $0x60] ss:$12 sps:$4 sm:$0xff]   ;;  %v870_v42 = vld [vmem:[%s1089_s0 + $0x7c] ss:$12 sps:$4 sm:$0xff]  }
   0xf   :  { %720 = vmatpush3.bf16.msra.mxu0 %v835_v10  ;;  %v877_v40 = vld [vmem:[%s1089_s0 + $0xb0] ss:$12 sps:$4 sm:$0xff]   ;;  %v872_v43 = vld [vmem:[%s1089_s0 + $0x78] ss:$12 sps:$4 sm:$0xff]   ;;  %v873_v44 = vld [vmem:[%s1089_s0 + $0x94] ss:$12 sps:$4 sm:$0xff]  }
  0x10   :  { %721 = vmatprep.subr.bf16.mxu0 %v837_v12  ;;  %v875_v45 = vld [vmem:[%s1089_s0 + $0x90] ss:$12 sps:$4 sm:$0xff]   ;;  %v878_v46 = vld [vmem:[%s1089_s0 + $0xac] ss:$12 sps:$4 sm:$0xff]   ;;  %v880_v47 = vld [vmem:[%s1089_s0 + $0xa8] ss:$12 sps:$4 sm:$0xff]  }
  0x11   :  { %800 = vmatpush3.bf16.msra.mxu1 %v836_v11 }
  0x12   :  { %801 = vmatprep.subr.bf16.mxu1 %v839_v13 }
  0x13   :  { %722 = vmatpush3.bf16.msra.mxu0 %v838_v14 }
  0x14   :  { %723 = vmatprep.subr.bf16.mxu0 %v840_v15 }
  0x15   :  { %802 = vmatpush3.bf16.msra.mxu1 %v839_v13 }
  0x16   :  { %803 = vmatprep.subr.bf16.mxu1 %v842_v16 }
  0x17   :  { %724 = vmatpush3.bf16.msra.mxu0 %v841_v17 }
  0x18   :  { %725 = vmatprep.subr.bf16.mxu0 %v843_v18 }
  0x19   :  { %804 = vmatpush3.bf16.msra.mxu1 %v842_v16 }
  0x1a   :  { %805 = vmatprep.subr.bf16.mxu1 %v845_v20 }
  0x1b   :  { %726 = vmatpush3.bf16.msra.mxu0 %v844_v19 }
  0x1c   :  { %727 = vmatprep.subr.bf16.mxu0 %v846_v21 }
  0x1d   :  { %806 = vmatpush3.bf16.msra.mxu1 %v845_v20 }
  0x1e   :  { %807 = vmatprep.subr.bf16.mxu1 %v848_v22 }
  0x1f   :  { %728 = vmatpush3.bf16.msra.mxu0 %v847_v25 }
  0x21   :  { %808 = vmatpush3.bf16.msra.mxu1 %v848_v22 }
  0x22   :  { %433 = vmatmul.mubr.bf16.vlgmr.msra.gmra.mrb[0].mxu0 %v849_v26 }
  0x23   :  { %440 = vmatprep.mubr.bf16.mxu0 %v854_v27 }
  0x24   :  { %810 = vmatmul.mubr.bf16.vlgmr.msra.gmra.mrb[0].mxu1 %v853_v28 }
  0x25   :  { %813 = vmatprep.mubr.bf16.mxu1 %v860_v29 }
  0x2a   :  { %441 = vmatmul.mubr.bf16.gmra.mrb[4].mxu0 %v856_v30 }
  0x2b   :  { %448 = vmatprep.mubr.bf16.mxu0 %v857_v31 }
  0x2c   :  { %814 = vmatmul.mubr.bf16.gmra.mrb[4].mxu1 %v861_v32 }
  0x2d   :  { %817 = vmatprep.mubr.bf16.mxu1 %v868_v33 }
  0x32   :  { %449 = vmatmul.mubr.bf16.gmra.mrb[8].mxu0 %v859_v34 }
  0x33   :  { %456 = vmatprep.mubr.bf16.mxu0 %v862_v35 }
  0x34   :  { %818 = vmatmul.mubr.bf16.gmra.mrb[8].mxu1 %v869_v36 }
  0x35   :  { %821 = vmatprep.mubr.bf16.mxu1 %v876_v37 }
  0x3a   :  { %457 = vmatmul.mubr.bf16.gmra.mrb[12].mxu0 %v864_v38 }
  0x3b   :  { %464 = vmatprep.mubr.bf16.mxu0 %v865_v39 }
  0x3c   :  { %822 = vmatmul.mubr.bf16.gmra.mrb[12].mxu1 %v877_v40 }
  0x42   :  { %465 = vmatmul.mubr.bf16.gmra.mrb[16].mxu0 %v867_v41 }
  0x43   :  { %472 = vmatprep.mubr.bf16.mxu0 %v870_v42 }
  0x4a   :  { %473 = vmatmul.mubr.bf16.gmra.mrb[20].mxu0 %v872_v43 }
  0x4b   :  { %480 = vmatprep.mubr.bf16.mxu0 %v873_v44 }
  0x52   :  { %481 = vmatmul.mubr.bf16.gmra.mrb[24].mxu0 %v875_v45 }
  0x53   :  { %488 = vmatprep.mubr.bf16.mxu0 %v878_v46 }
  0x5a   :  { %489 = vmatmul.mubr.bf16.gmra.mrb[28].mxu0 %v880_v47 }
  0xf5   :  { %v729_v48 = vpop.f32.mrb[0].mxu0 }
  0xf6   :  { %v730_v49 = vpop.f32.mrb[1].mxu0 }
  0xf7   :  { %v731_v50 = vadd.f32 %v730_v49, %v729_v48  ;;  %v732_v51 = vpop.f32.mrb[2].mxu0  ;;  %v811_v52 = vpop.f32.mrb[0].mxu1 }
  0xf8   :  { %v733_v53 = vpop.f32.mrb[3].mxu0  ;;  %v531_v54 = vpop.f32.mrb[1].mxu1 }
  0xf9   :  { %v734_v55 = vadd.f32 %v733_v53, %v732_v51  ;;  %v532_v56 = vadd.f32 %v731_v50, %v531_v54  ;;  %v812_v57 = vpop.f32.mrb[2].mxu1 }
  0xfa   :  { %v534_v58 = vpop.f32.mrb[3].mxu1 }
  0xfb   :  { %645 = vst [vmem:[%s1090_s2] sm:$0xff] %v532_v56  ;;  %v535_v59 = vadd.f32 %v734_v55, %v534_v58 }
  0xfd   :  { %646 = vst [vmem:[%s1090_s2 + $0x8] sm:$0xff] %v535_v59  ;;  %v735_v60 = vpop.f32.mrb[4].mxu0 }
  0xfe   :  { %v736_v61 = vpop.f32.mrb[5].mxu0 }
  0xff   :  { %v737_v62 = vadd.f32 %v736_v61, %v735_v60  ;;  %v738_v63 = vpop.f32.mrb[6].mxu0  ;;  %v815_v0 = vpop.f32.mrb[4].mxu1 }
 0x100   :  { %v739_v1 = vpop.f32.mrb[7].mxu0  ;;  %v547_v2 = vpop.f32.mrb[5].mxu1 }
 0x101   :  { %v540_v3 = vadd.f32 %v811_v52, %v737_v62  ;;  %v740_v4 = vadd.f32 %v739_v1, %v738_v63  ;;  %v816_v5 = vpop.f32.mrb[6].mxu1 }
 0x102   :  { %v550_v6 = vpop.f32.mrb[7].mxu1 }
 0x103   :  { %647 = vst [vmem:[%s1090_s2 + $0x10] sm:$0xff] %v540_v3  ;;  %v543_v7 = vadd.f32 %v812_v57, %v740_v4 }
 0x105   :  { %648 = vst [vmem:[%s1090_s2 + $0x18] sm:$0xff] %v543_v7  ;;  %v741_v8 = vpop.f32.mrb[8].mxu0 }
 0x106   :  { %v742_v9 = vpop.f32.mrb[9].mxu0 }
 0x107   :  { %v743_v10 = vadd.f32 %v742_v9, %v741_v8  ;;  %v744_v11 = vpop.f32.mrb[10].mxu0  ;;  %v819_v12 = vpop.f32.mrb[8].mxu1 }
 0x108   :  { %v745_v13 = vpop.f32.mrb[11].mxu0  ;;  %v563_v14 = vpop.f32.mrb[9].mxu1 }
 0x109   :  { %v746_v15 = vadd.f32 %v745_v13, %v744_v11  ;;  %v548_v16 = vadd.f32 %v743_v10, %v547_v2  ;;  %v820_v17 = vpop.f32.mrb[10].mxu1 }
 0x10a   :  { %v566_v18 = vpop.f32.mrb[11].mxu1 }
 0x10b   :  { %649 = vst [vmem:[%s1090_s2 + $0x20] sm:$0xff] %v548_v16  ;;  %v551_v19 = vadd.f32 %v746_v15, %v550_v6 }
 0x10d   :  { %650 = vst [vmem:[%s1090_s2 + $0x28] sm:$0xff] %v551_v19  ;;  %v747_v20 = vpop.f32.mrb[12].mxu0 }
 0x10e   :  { %v748_v21 = vpop.f32.mrb[13].mxu0 }
 0x10f   :  { %v749_v22 = vadd.f32 %v748_v21, %v747_v20  ;;  %v750_v23 = vpop.f32.mrb[14].mxu0  ;;  %v823_v24 = vpop.f32.mrb[12].mxu1 }
 0x110   :  { %v751_v25 = vpop.f32.mrb[15].mxu0  ;;  %v579_v26 = vpop.f32.mrb[13].mxu1 }
 0x111   :  { %v556_v27 = vadd.f32 %v815_v0, %v749_v22  ;;  %v752_v28 = vadd.f32 %v751_v25, %v750_v23  ;;  %v824_v29 = vpop.f32.mrb[14].mxu1 }
 0x112   :  { %v582_v30 = vpop.f32.mrb[15].mxu1 }
 0x113   :  { %651 = vst [vmem:[%s1090_s2 + $0x30] sm:$0xff] %v556_v27  ;;  %v559_v31 = vadd.f32 %v816_v5, %v752_v28 }
 0x115   :  { %652 = vst [vmem:[%s1090_s2 + $0x38] sm:$0xff] %v559_v31  ;;  %v753_v32 = vpop.f32.mrb[16].mxu0 }
 0x116   :  { %v754_v33 = vpop.f32.mrb[17].mxu0 }
 0x117   :  { %v755_v34 = vadd.f32 %v754_v33, %v753_v32  ;;  %v756_v35 = vpop.f32.mrb[18].mxu0 }
 0x118   :  { %v757_v36 = vpop.f32.mrb[19].mxu0 }
 0x119   :  { %v758_v37 = vadd.f32 %v757_v36, %v756_v35  ;;  %v564_v38 = vadd.f32 %v755_v34, %v563_v14 }
 0x11b   :  { %653 = vst [vmem:[%s1090_s2 + $0x40] sm:$0xff] %v564_v38  ;;  %v567_v39 = vadd.f32 %v758_v37, %v566_v18 }
 0x11d   :  { %654 = vst [vmem:[%s1090_s2 + $0x48] sm:$0xff] %v567_v39  ;;  %v759_v40 = vpop.f32.mrb[20].mxu0 }
 0x11e   :  { %v760_v41 = vpop.f32.mrb[21].mxu0 }
 0x11f   :  { %v761_v42 = vadd.f32 %v760_v41, %v759_v40  ;;  %v762_v43 = vpop.f32.mrb[22].mxu0 }
 0x120   :  { %v763_v44 = vpop.f32.mrb[23].mxu0 }
 0x121   :  { %v572_v45 = vadd.f32 %v819_v12, %v761_v42  ;;  %v764_v46 = vadd.f32 %v763_v44, %v762_v43 }
 0x123   :  { %655 = vst [vmem:[%s1090_s2 + $0x50] sm:$0xff] %v572_v45  ;;  %v575_v47 = vadd.f32 %v820_v17, %v764_v46 }
 0x125   :  { %656 = vst [vmem:[%s1090_s2 + $0x58] sm:$0xff] %v575_v47  ;;  %v765_v48 = vpop.f32.mrb[24].mxu0 }
 0x126   :  { %v766_v49 = vpop.f32.mrb[25].mxu0 }
 0x127   :  { %v767_v50 = vadd.f32 %v766_v49, %v765_v48  ;;  %v768_v51 = vpop.f32.mrb[26].mxu0 }
 0x128   :  { %v769_v52 = vpop.f32.mrb[27].mxu0 }
 0x129   :  { %v770_v53 = vadd.f32 %v769_v52, %v768_v51  ;;  %v580_v54 = vadd.f32 %v767_v50, %v579_v26 }
 0x12b   :  { %657 = vst [vmem:[%s1090_s2 + $0x60] sm:$0xff] %v580_v54  ;;  %v583_v55 = vadd.f32 %v770_v53, %v582_v30 }
 0x12d   :  { %658 = vst [vmem:[%s1090_s2 + $0x68] sm:$0xff] %v583_v55  ;;  %v771_v56 = vpop.f32.mrb[28].mxu0 }
 0x12e   :  { %v772_v57 = vpop.f32.mrb[29].mxu0 }
 0x12f   :  { %v773_v58 = vadd.f32 %v772_v57, %v771_v56  ;;  %v774_v59 = vpop.f32.mrb[30].mxu0 }
 0x130   :  { %v775_v60 = vpop.f32.mrb[31].mxu0 }
 0x131   :  { %v588_v61 = vadd.f32 %v823_v24, %v773_v58  ;;  %v776_v62 = vadd.f32 %v775_v60, %v774_v59 }
 0x133   :  { %659 = vst [vmem:[%s1090_s2 + $0x70] sm:$0xff] %v588_v61  ;;  %v591_v63 = vadd.f32 %v824_v29, %v776_v62 }
 0x135   :  { %660 = vst [vmem:[%s1090_s2 + $0x78] sm:$0xff] %v591_v63 }

// kernel: tile.107
= control target key start
LH: loop header
LB: loop body
LE: loop exit
PB: predicated region body
PF: predicated region fallthrough
CT: control target
= control target key end

     0   :  { %s28_s0 = inlined_call_operand.vmem [shape: f32[8], index: 0, kind: input, shape index: {}]   ;;  %s29_s1 = inlined_call_operand.vmem [shape: f32[16,8], index: 1, kind: output, shape index: {}]  }
   0x1   :  { %v4_v0 = vld [vmem:[%s28_s0] ss:$0 sm:$0xff] }
   0x2   :  { %5 = vst [vmem:[%s29_s1] sm:$0xff] %v4_v0  ;;  %8 = vst [vmem:[%s29_s1 + $0x8] sm:$0xff] %v4_v0 }

// kernel: tile.108
= control target key start
LH: loop header
LB: loop body
LE: loop exit
PB: predicated region body
PF: predicated region fallthrough
CT: control target
= control target key end

     0   :  { %s131_s10 = smov 120   ;;  %s132_s11 = smov 104   ;;  %vm3_vm0 = vcmask 64512   ;;  %vm9_vm1 = vcmask 1048512   ;;  %vm15_vm2 = vcmask 982912   ;;  %vm21_vm3 = vcmask 917312   ;;  %s207_s0 = inlined_call_operand.vmem [shape: f32[16,8], index: 0, kind: input, shape index: {}]   ;;  %s208_s1 = inlined_call_operand.vmem [shape: f32[1,128], index: 1, kind: output, shape index: {}]  }
   0x1   :  { %v101_v0 = vld [vmem:[%s207_s0 + $0xf] sm:$0x1]   ;;  %v103_v1 = vld [vmem:[%s207_s0 + $0xd] sm:$0x1]   ;;  %v102_v2 = vld [vmem:[%s207_s0 + $0xe] sm:$0x1]  }
   0x2   :  { %7 = vrot.lane.b32.xlu0 %v101_v0, %s131_s10  ;;  %19 = vrot.lane.b32.xlu1 %v103_v1, %s132_s11  ;;  %v104_v3 = vld [vmem:[%s207_s0 + $0xc] sm:$0x1]   ;;  %s133_s16 = smov 112   ;;  %s134_s17 = smov 96   ;;  %v105_v4 = vld [vmem:[%s207_s0 + $0xb] sm:$0x1]  }
   0x3   :  { %v106_v5 = vld [vmem:[%s207_s0 + $0xa] sm:$0x1]   ;;  %v2_v6 = vld [vmem:[%s207_s0] sm:$0x1]   ;;  %s135_s24 = smov 88   ;;  %s136_s25 = smov 80  }
   0x4   :  { %4 = vst.msk [vmem:[#allocation0] sm:$0x1] %vm3_vm0, %v2_v6   ;;  %v107_v7 = vld [vmem:[%s207_s0 + $0x9] sm:$0x1]   ;;  %v108_v8 = vld [vmem:[%s207_s0 + $0x8] sm:$0x1]  }
   0x5   :  { %s137_s30 = smov 72   ;;  %s138_s2 = smov 64   ;;  %v109_v9 = vld [vmem:[%s207_s0 + $0x7] sm:$0x1]   ;;  %v110_v10 = vld [vmem:[%s207_s0 + $0x6] sm:$0x1]  }
   0x6   :  { %13 = vrot.lane.b32.xlu0 %v102_v2, %s133_s16  ;;  %25 = vrot.lane.b32.xlu1 %v104_v3, %s134_s17  ;;  %s139_s7 = smov 56   ;;  %s140_s8 = smov 48   ;;  %v111_v11 = vld [vmem:[%s207_s0 + $0x5] sm:$0x1]   ;;  %v112_v12 = vld [vmem:[%s207_s0 + $0x4] sm:$0x1]  }
   0x7   :  { %s141_s13 = smov 40   ;;  %s142_s14 = smov 32   ;;  %v113_v13 = vld [vmem:[%s207_s0 + $0x3] sm:$0x1]   ;;  %v114_v14 = vld [vmem:[%s207_s0 + $0x2] sm:$0x1]  }
   0x8   :  { %s143_s19 = smov 24   ;;  %s144_s20 = smov 16   ;;  %v115_v15 = vld [vmem:[%s207_s0 + $0x1] sm:$0x1]   ;;  %vm27_vm4 = vcmask 851712   ;;  %vm33_vm5 = vcmask 786112  }
   0x9   :  { %s145_s0 = smov 8   ;;  %vm39_vm6 = vcmask 720512   ;;  %vm45_vm7 = vcmask 654912   ;;  %vm51_vm8 = vcmask 589312   ;;  %vm57_vm9 = vcmask 523712  }
   0xa   :  { %31 = vrot.lane.b32.xlu0 %v105_v4, %s135_s24  ;;  %37 = vrot.lane.b32.xlu1 %v106_v5, %s136_s25  ;;  %vm63_vm10 = vcmask 458112   ;;  %vm69_vm11 = vcmask 392512   ;;  %vm75_vm12 = vcmask 326912   ;;  %vm81_vm13 = vcmask 261312  }
   0xb   :  { %vm87_vm14 = vcmask 195712   ;;  %vm93_vm15 = vcmask 130112  }
   0xe   :  { %43 = vrot.lane.b32.xlu0 %v107_v7, %s137_s30  ;;  %49 = vrot.lane.b32.xlu1 %v108_v8, %s138_s2 }
  0x12   :  { %55 = vrot.lane.b32.xlu0 %v109_v9, %s139_s7  ;;  %61 = vrot.lane.b32.xlu1 %v110_v10, %s140_s8 }
  0x16   :  { %67 = vrot.lane.b32.xlu0 %v111_v11, %s141_s13  ;;  %73 = vrot.lane.b32.xlu1 %v112_v12, %s142_s14 }
  0x1a   :  { %79 = vrot.lane.b32.xlu0 %v113_v13, %s143_s19  ;;  %85 = vrot.lane.b32.xlu1 %v114_v14, %s144_s20 }
  0x1e   :  { %91 = vrot.lane.b32.xlu0 %v115_v15, %s145_s0 }
  0x74   :  { %v8_v16 = vpop.permute.xlu0 %7   ;;  %v20_v17 = vpop.permute.xlu1 %19  }
  0x75   :  { %10 = vst.msk [vmem:[#allocation0] sm:$0x1] %vm9_vm1, %v8_v16  }
  0x78   :  { %v14_v18 = vpop.permute.xlu0 %13   ;;  %v26_v19 = vpop.permute.xlu1 %25  }
  0x79   :  { %16 = vst.msk [vmem:[#allocation0] sm:$0x1] %vm15_vm2, %v14_v18  }
  0x7a   :  { %22 = vst.msk [vmem:[#allocation0] sm:$0x1] %vm21_vm3, %v20_v17  }
  0x7b   :  { %28 = vst.msk [vmem:[#allocation0] sm:$0x1] %vm27_vm4, %v26_v19  }
  0x7c   :  { %v32_v20 = vpop.permute.xlu0 %31   ;;  %v38_v21 = vpop.permute.xlu1 %37  }
  0x7d   :  { %34 = vst.msk [vmem:[#allocation0] sm:$0x1] %vm33_vm5, %v32_v20  }
  0x7e   :  { %40 = vst.msk [vmem:[#allocation0] sm:$0x1] %vm39_vm6, %v38_v21  }
  0x80   :  { %v44_v22 = vpop.permute.xlu0 %43   ;;  %v50_v23 = vpop.permute.xlu1 %49  }
  0x81   :  { %46 = vst.msk [vmem:[#allocation0] sm:$0x1] %vm45_vm7, %v44_v22  }
  0x82   :  { %52 = vst.msk [vmem:[#allocation0] sm:$0x1] %vm51_vm8, %v50_v23  }
  0x84   :  { %v56_v24 = vpop.permute.xlu0 %55   ;;  %v62_v25 = vpop.permute.xlu1 %61  }
  0x85   :  { %58 = vst.msk [vmem:[#allocation0] sm:$0x1] %vm57_vm9, %v56_v24  }
  0x86   :  { %64 = vst.msk [vmem:[#allocation0] sm:$0x1] %vm63_vm10, %v62_v25  }
  0x88   :  { %v68_v26 = vpop.permute.xlu0 %67   ;;  %v74_v27 = vpop.permute.xlu1 %73  }
  0x89   :  { %70 = vst.msk [vmem:[#allocation0] sm:$0x1] %vm69_vm11, %v68_v26  }
  0x8a   :  { %76 = vst.msk [vmem:[#allocation0] sm:$0x1] %vm75_vm12, %v74_v27  }
  0x8c   :  { %v80_v28 = vpop.permute.xlu0 %79   ;;  %v86_v29 = vpop.permute.xlu1 %85  }
  0x8d   :  { %82 = vst.msk [vmem:[#allocation0] sm:$0x1] %vm81_vm13, %v80_v28  }
  0x8e   :  { %88 = vst.msk [vmem:[#allocation0] sm:$0x1] %vm87_vm14, %v86_v29  }
  0x90   :  { %v92_v30 = vpop.permute.xlu0 %91  }
  0x91   :  { %94 = vst.msk [vmem:[#allocation0] sm:$0x1] %vm93_vm15, %v92_v30  }
  0x98   :  { %v98_v31 = vld [vmem:[#allocation0] sm:$0x1] }
  0x99   :  { %100 = vst [vmem:[%s208_s1] sm:$0x1] %v98_v31 }

// kernel: forward.22
= control target key start
LH: loop header
LB: loop body
LE: loop exit
PB: predicated region body
PF: predicated region fallthrough
CT: control target
= control target key end

     0   :  { %s2882_s9 = smov 0   ;;  %s2884_s10 = smov 0   ;;  %s3182_s0 = inlined_call_operand.vmem [shape: bf16[8,128,1280], index: 0, kind: input, shape index: {}]   ;;  %s3183_s1 = inlined_call_operand.vmem [shape: bf16[8,1280,128], index: 1, kind: input, shape index: {}]   ;;  %s3184_s2 = inlined_call_operand.vmem [shape: f32[8,128,128], index: 2, kind: output, shape index: {}]  }
   0x1   :  { %s2886_s11 = smov 0  }
   0x2 LB: > { %s38_s12 = sadd.s32 1, %s2861_s10  ;;  %p2114_p0 = scmp.ge.s32.totalorder %s2865_s11, 1  ;;  %s2865_s11 = sphi %s2886_s11, %s12_s11   ;;  %s2861_s10 = sphi %s2884_s10, %s3186_s10   ;;  %s2857_s9 = sphi %s2882_s9, %s3185_s9  }
   0x3   : > { %p40_p1 = scmp.ge.s32.totalorder %s38_s12, 8  ;;  %p179_p2 = scmp.lt.s32.totalorder %s2865_s11, 9 }
   0x5   : > { %s3188_s12 = smov (%p40_p1, %s38_s12), 0  ;;  %p180_p3 = pnand %p2114_p0, %p179_p2 }
   0x6   : > { %p231_p4 = scmp.lt.s32.totalorder (!%p180_p3), %s2857_s9, 7 }
   0x7   : > { %183 = sbr.rel (%p180_p3) target bundleno = 425 (0x1a9), region = 28 }
   0xe   : > { %s3190_s9 = smov (!%p231_p4, %s2857_s9), 7 }
   0xf   : > { %s2618_s13 = smul.u32 640, %s3190_s9  ;;  %s2281_s20 = sshll.u32 %s3190_s9, 7 }
  0x10   : > { %s3140_s23 = scalar_lea.vmem %s3184_s2, %s2281_s20 }
  0x11   : > { %s2906_s16 = scalar_lea.vmem %s3183_s1, %s2618_s13  ;;  %s2920_s19 = scalar_lea.vmem %s3182_s0, %s2618_s13 }
  0x12   : > { %v2643_v0 = vld [vmem:[%s2906_s16 + $0x40] sm:$0xff]   ;;  %v2645_v2 = vld [vmem:[%s2906_s16 + $0x48] sm:$0xff]   ;;  %v2647_v4 = vld [vmem:[%s2906_s16 + $0x50] sm:$0xff]  }
  0x13   : > { %v2644_v1 = vld [vmem:[%s2906_s16] sm:$0xff]   ;;  %2282 = vmatprep.subr.bf16.mxu0 %v2643_v0  ;;  %2602 = vmatprep.subr.bf16.mxu1 %v2643_v0  ;;  %v2646_v3 = vld [vmem:[%s2906_s16 + $0x8] sm:$0xff]   ;;  %v2648_v5 = vld [vmem:[%s2906_s16 + $0x10] sm:$0xff]  }
  0x14   : > { %2283 = vmatpush3.bf16.msra.mxu0 %v2644_v1  ;;  %2610 = vmatpush3.bf16.msra.mxu1 %v2644_v1  ;;  %v2649_v6 = vld [vmem:[%s2906_s16 + $0x58] sm:$0xff]   ;;  %v2651_v8 = vld [vmem:[%s2906_s16 + $0x60] sm:$0xff]   ;;  %v2653_v10 = vld [vmem:[%s2906_s16 + $0x68] sm:$0xff]  }
  0x15   : > { %2284 = vmatprep.subr.bf16.mxu0 %v2645_v2  ;;  %2603 = vmatprep.subr.bf16.mxu1 %v2645_v2  ;;  %v2650_v7 = vld [vmem:[%s2906_s16 + $0x18] sm:$0xff]   ;;  %v2652_v9 = vld [vmem:[%s2906_s16 + $0x20] sm:$0xff]   ;;  %v2654_v13 = vld [vmem:[%s2906_s16 + $0x28] sm:$0xff]  }
  0x16   : > { %v2661_v11 = vld [vmem:[%s2920_s19 + $0x4] ss:$40 sps:$4 sm:$0xff]   ;;  %v2655_v14 = vld [vmem:[%s2906_s16 + $0x70] sm:$0xff]   ;;  %v2657_v16 = vld [vmem:[%s2906_s16 + $0x78] sm:$0xff]  }
  0x17   : > { %v2664_v12 = vld [vmem:[%s2920_s19 + $0x144] ss:$40 sps:$4 sm:$0xff]   ;;  %1460 = vmatprep.mubr.bf16.mxu0 %v2661_v11  ;;  %v2656_v15 = vld [vmem:[%s2906_s16 + $0x30] sm:$0xff]   ;;  %v2658_v17 = vld [vmem:[%s2906_s16 + $0x38] sm:$0xff]  }
  0x18   : > { %2285 = vmatpush3.bf16.msra.mxu0 %v2646_v3  ;;  %2611 = vmatpush3.bf16.msra.mxu1 %v2646_v3  ;;  %v2659_v18 = vld [vmem:[%s2920_s19] ss:$40 sps:$4 sm:$0xff]   ;;  %v2673_v26 = vld [vmem:[%s2920_s19 + $0x54] ss:$40 sps:$4 sm:$0xff]   ;;  %v2677_v31 = vld [vmem:[%s2920_s19 + $0x50] ss:$40 sps:$4 sm:$0xff]  }
  0x19   : > { %2286 = vmatprep.subr.bf16.mxu0 %v2647_v4  ;;  %2604 = vmatprep.subr.bf16.mxu1 %v2647_v4  ;;  %v2662_v19 = vld [vmem:[%s2920_s19 + $0x140] ss:$40 sps:$4 sm:$0xff]   ;;  %v2675_v28 = vld [vmem:[%s2920_s19 + $0x194] ss:$40 sps:$4 sm:$0xff]   ;;  %v2678_v33 = vld [vmem:[%s2920_s19 + $0x190] ss:$40 sps:$4 sm:$0xff]  }
  0x1a   : > { %1492 = vmatprep.mubr.bf16.mxu1 %v2664_v12  ;;  %v2665_v20 = vld [vmem:[%s2906_s16 + $0xc0] sm:$0xff]   ;;  %v2669_v24 = vld [vmem:[%s2906_s16 + $0xc8] sm:$0xff]   ;;  %v2679_v30 = vld [vmem:[%s2906_s16 + $0xd0] sm:$0xff]  }
  0x1b   : > { %v2666_v21 = vld [vmem:[%s2906_s16 + $0x140] sm:$0xff]   ;;  %v2670_v25 = vld [vmem:[%s2906_s16 + $0x148] sm:$0xff]   ;;  %v2680_v32 = vld [vmem:[%s2906_s16 + $0x150] sm:$0xff]  }
  0x1c   : > { %2287 = vmatpush3.bf16.msra.mxu0 %v2648_v5  ;;  %2612 = vmatpush3.bf16.msra.mxu1 %v2648_v5  ;;  %v2667_v22 = vld [vmem:[%s2906_s16 + $0x80] sm:$0xff]   ;;  %v2671_v27 = vld [vmem:[%s2906_s16 + $0x88] sm:$0xff]   ;;  %v2681_v34 = vld [vmem:[%s2906_s16 + $0x90] sm:$0xff]  }
  0x1d   : > { %2288 = vmatprep.subr.bf16.mxu0 %v2649_v6  ;;  %2605 = vmatprep.subr.bf16.mxu1 %v2649_v6  ;;  %v2668_v23 = vld [vmem:[%s2906_s16 + $0x100] sm:$0xff]   ;;  %v2672_v29 = vld [vmem:[%s2906_s16 + $0x108] sm:$0xff]   ;;  %v2682_v35 = vld [vmem:[%s2906_s16 + $0x110] sm:$0xff]  }
  0x1e   : > { %v2683_v36 = vld [vmem:[%s2906_s16 + $0xd8] sm:$0xff]   ;;  %v2687_v38 = vld [vmem:[%s2920_s19 + $0xa4] ss:$40 sps:$4 sm:$0xff]   ;;  %v2691_v43 = vld [vmem:[%s2920_s19 + $0xa0] ss:$40 sps:$4 sm:$0xff]  }
  0x1f   : > { %v2684_v37 = vld [vmem:[%s2906_s16 + $0x158] sm:$0xff]   ;;  %v2689_v40 = vld [vmem:[%s2920_s19 + $0x1e4] ss:$40 sps:$4 sm:$0xff]   ;;  %v2692_v44 = vld [vmem:[%s2920_s19 + $0x1e0] ss:$40 sps:$4 sm:$0xff]  }
  0x20   : > { %2289 = vmatpush3.bf16.msra.mxu0 %v2650_v7  ;;  %2613 = vmatpush3.bf16.msra.mxu1 %v2650_v7  ;;  %v2685_v39 = vld [vmem:[%s2906_s16 + $0x98] sm:$0xff]   ;;  %v2693_v42 = vld [vmem:[%s2906_s16 + $0xe0] sm:$0xff]   ;;  %v2697_v48 = vld [vmem:[%s2906_s16 + $0xe8] sm:$0xff]  }
  0x21   : > { %2290 = vmatprep.subr.bf16.mxu0 %v2651_v8  ;;  %2606 = vmatprep.subr.bf16.mxu1 %v2651_v8  ;;  %v2686_v41 = vld [vmem:[%s2906_s16 + $0x118] sm:$0xff]   ;;  %v2694_v45 = vld [vmem:[%s2906_s16 + $0x160] sm:$0xff]   ;;  %v2698_v49 = vld [vmem:[%s2906_s16 + $0x168] sm:$0xff]  }
  0x22   : > { %v2695_v46 = vld [vmem:[%s2906_s16 + $0xa0] sm:$0xff]   ;;  %v2701_v50 = vld [vmem:[%s2920_s19 + $0xf4] ss:$40 sps:$4 sm:$0xff]   ;;  %v2699_v52 = vld [vmem:[%s2906_s16 + $0xa8] sm:$0xff]  }
  0x23   : > { %v2696_v47 = vld [vmem:[%s2906_s16 + $0x120] sm:$0xff]   ;;  %v2703_v51 = vld [vmem:[%s2920_s19 + $0x234] ss:$40 sps:$4 sm:$0xff]   ;;  %v2700_v53 = vld [vmem:[%s2906_s16 + $0x128] sm:$0xff]  }
  0x24   : > { %2291 = vmatpush3.bf16.msra.mxu0 %v2652_v9  ;;  %2614 = vmatpush3.bf16.msra.mxu1 %v2652_v9  ;;  %v2707_v54 = vld [vmem:[%s2906_s16 + $0xf0] sm:$0xff]   ;;  %v2711_v60 = vld [vmem:[%s2906_s16 + $0xf8] sm:$0xff]   ;;  %v2721_v4 = vld [vmem:[%s2906_s16 + $0x1c0] sm:$0xff]  }
  0x25   : > { %2292 = vmatprep.subr.bf16.mxu0 %v2653_v10  ;;  %2607 = vmatprep.subr.bf16.mxu1 %v2653_v10  ;;  %v2705_v55 = vld [vmem:[%s2920_s19 + $0xf0] ss:$40 sps:$4 sm:$0xff]   ;;  %v2717_v0 = vld [vmem:[%s2920_s19 + $0xc] ss:$40 sps:$4 sm:$0xff]   ;;  %v2722_v5 = vld [vmem:[%s2906_s16 + $0x180] sm:$0xff]  }
  0x26   : > { %v2706_v56 = vld [vmem:[%s2920_s19 + $0x230] ss:$40 sps:$4 sm:$0xff]   ;;  %v2720_v3 = vld [vmem:[%s2920_s19 + $0x14] ss:$40 sps:$4 sm:$0xff]   ;;  %v2723_v6 = vld [vmem:[%s2906_s16 + $0x240] sm:$0xff]  }
  0x27   : > { %v2708_v57 = vld [vmem:[%s2906_s16 + $0x170] sm:$0xff]   ;;  %v2712_v61 = vld [vmem:[%s2906_s16 + $0x178] sm:$0xff]   ;;  %v2724_v7 = vld [vmem:[%s2906_s16 + $0x200] sm:$0xff]  }
  0x28   : > { %2293 = vmatpush3.bf16.msra.mxu0 %v2654_v13  ;;  %2615 = vmatpush3.bf16.msra.mxu1 %v2654_v13  ;;  %v2709_v58 = vld [vmem:[%s2906_s16 + $0xb0] sm:$0xff]   ;;  %v2713_v62 = vld [vmem:[%s2906_s16 + $0xb8] sm:$0xff]   ;;  %v2727_v9 = vld [vmem:[%s2920_s19 + $0x64] ss:$40 sps:$4 sm:$0xff]  }
  0x29   : > { %2294 = vmatprep.subr.bf16.mxu0 %v2655_v14  ;;  %2608 = vmatprep.subr.bf16.mxu1 %v2655_v14  ;;  %v2710_v59 = vld [vmem:[%s2906_s16 + $0x130] sm:$0xff]   ;;  %v2714_v63 = vld [vmem:[%s2906_s16 + $0x138] sm:$0xff]   ;;  %v2730_v11 = vld [vmem:[%s2920_s19 + $0x60] ss:$40 sps:$4 sm:$0xff]  }
  0x2a   : > { %v2715_v1 = vld [vmem:[%s2920_s19 + $0x8] ss:$40 sps:$4 sm:$0xff]   ;;  %v2725_v8 = vld [vmem:[%s2920_s19 + $0x5c] ss:$40 sps:$4 sm:$0xff]   ;;  %v2729_v10 = vld [vmem:[%s2920_s19 + $0x58] ss:$40 sps:$4 sm:$0xff]  }
  0x2b   : > { %v2718_v2 = vld [vmem:[%s2920_s19 + $0x10] ss:$40 sps:$4 sm:$0xff]   ;;  %v2731_v12 = vld [vmem:[%s2906_s16 + $0x1c8] sm:$0xff]  }
  0x2c   : > { %2295 = vmatpush3.bf16.msra.mxu0 %v2656_v15  ;;  %2616 = vmatpush3.bf16.msra.mxu1 %v2656_v15  ;;  %v2732_v13 = vld [vmem:[%s2906_s16 + $0x188] sm:$0xff]  }
  0x2d   : > { %2296 = vmatprep.subr.bf16.mxu0 %v2657_v16  ;;  %2609 = vmatprep.subr.bf16.mxu1 %v2657_v16  ;;  %v2733_v14 = vld [vmem:[%s2906_s16 + $0x248] sm:$0xff]  }
  0x2e   : > { %v2734_v15 = vld [vmem:[%s2906_s16 + $0x208] sm:$0xff]  }
  0x2f   : > { %v2735_v16 = vld [vmem:[%s2920_s19 + $0xac] ss:$40 sps:$4 sm:$0xff]  }
  0x30   : > { %2297 = vmatpush3.bf16.msra.mxu0 %v2658_v17  ;;  %2617 = vmatpush3.bf16.msra.mxu1 %v2658_v17  ;;  %v2737_v17 = vld [vmem:[%s2920_s19 + $0xb4] ss:$40 sps:$4 sm:$0xff]  }
  0x31   : > { %2346 = vmatprep.subr.bf16.mxu1 %v2665_v20  ;;  %2410 = vmatprep.subr.bf16.mxu0 %v2666_v21  ;;  %v2740_v20 = vld [vmem:[%s2920_s19 + $0xb0] ss:$40 sps:$4 sm:$0xff]  }
  0x32   : > { %v2742_v21 = vld [vmem:[%s2906_s16 + $0x190] sm:$0xff]  }
  0x33   : > { %1461 = vmatmul.mubr.bf16.vlgmr.msra.gmra.mrb[0].mxu0 %v2659_v18  ;;  %1493 = vmatmul.mubr.bf16.vlgmr.msra.gmra.mrb[0].mxu1 %v2662_v19  ;;  %v2741_v18 = vld [vmem:[%s2906_s16 + $0x1d0] sm:$0xff]  }
  0x34   : > { %2347 = vmatpush3.bf16.msra.mxu1 %v2667_v22  ;;  %2411 = vmatpush3.bf16.msra.mxu0 %v2668_v23  ;;  %v2739_v19 = vld [vmem:[%s2920_s19 + $0xa8] ss:$40 sps:$4 sm:$0xff]  }
  0x35   : > { %2348 = vmatprep.subr.bf16.mxu1 %v2669_v24  ;;  %2412 = vmatprep.subr.bf16.mxu0 %v2670_v25  ;;  %v2743_v22 = vld [vmem:[%s2906_s16 + $0x250] sm:$0xff]   ;;  %v2745_v24 = vld [vmem:[%s2920_s19 + $0xfc] ss:$40 sps:$4 sm:$0xff]  }
  0x36   : > { %1468 = vmatprep.mubr.bf16.mxu0 %v2673_v26  ;;  %1500 = vmatprep.mubr.bf16.mxu1 %v2675_v28  ;;  %v2744_v23 = vld [vmem:[%s2906_s16 + $0x210] sm:$0xff]   ;;  %v2747_v25 = vld [vmem:[%s2920_s19 + $0x104] ss:$40 sps:$4 sm:$0xff]   ;;  %v2751_v26 = vld [vmem:[%s2906_s16 + $0x1d8] sm:$0xff]  }
  0x37   : > { %v2749_v28 = vld [vmem:[%s2920_s19 + $0xf8] ss:$40 sps:$4 sm:$0xff]  }
  0x38   : > { %2349 = vmatpush3.bf16.msra.mxu1 %v2671_v27  ;;  %2413 = vmatpush3.bf16.msra.mxu0 %v2672_v29  ;;  %v2752_v27 = vld [vmem:[%s2906_s16 + $0x198] sm:$0xff]  }
  0x39   : > { %2350 = vmatprep.subr.bf16.mxu1 %v2679_v30  ;;  %2414 = vmatprep.subr.bf16.mxu0 %v2680_v32  ;;  %v2753_v29 = vld [vmem:[%s2906_s16 + $0x258] sm:$0xff]   ;;  %v2755_v32 = vld [vmem:[%s2920_s19 + $0x14c] ss:$40 sps:$4 sm:$0xff]  }
  0x3a   : > { %v2754_v30 = vld [vmem:[%s2906_s16 + $0x218] sm:$0xff]  }
  0x3b   : > { %1469 = vmatmul.mubr.bf16.gmra.mrb[4].mxu0 %v2677_v31  ;;  %1501 = vmatmul.mubr.bf16.gmra.mrb[4].mxu1 %v2678_v33  ;;  %v2750_v31 = vld [vmem:[%s2920_s19 + $0x100] ss:$40 sps:$4 sm:$0xff]   ;;  %v2757_v33 = vld [vmem:[%s2920_s19 + $0x154] ss:$40 sps:$4 sm:$0xff]  }
  0x3c   : > { %2351 = vmatpush3.bf16.msra.mxu1 %v2681_v34  ;;  %2415 = vmatpush3.bf16.msra.mxu0 %v2682_v35  ;;  %v2761_v34 = vld [vmem:[%s2906_s16 + $0x1e0] sm:$0xff]  }
  0x3d   : > { %2352 = vmatprep.subr.bf16.mxu1 %v2683_v36  ;;  %2416 = vmatprep.subr.bf16.mxu0 %v2684_v37  ;;  %v2762_v35 = vld [vmem:[%s2906_s16 + $0x1a0] sm:$0xff]  }
  0x3e   : > { %1476 = vmatprep.mubr.bf16.mxu0 %v2687_v38  ;;  %1508 = vmatprep.mubr.bf16.mxu1 %v2689_v40  ;;  %v2763_v36 = vld [vmem:[%s2906_s16 + $0x260] sm:$0xff]   ;;  %v2759_v38 = vld [vmem:[%s2920_s19 + $0x148] ss:$40 sps:$4 sm:$0xff]  }
  0x3f   : > { %v2764_v37 = vld [vmem:[%s2906_s16 + $0x220] sm:$0xff]  }
  0x40   : > { %2353 = vmatpush3.bf16.msra.mxu1 %v2685_v39  ;;  %2417 = vmatpush3.bf16.msra.mxu0 %v2686_v41  ;;  %v2760_v39 = vld [vmem:[%s2920_s19 + $0x150] ss:$40 sps:$4 sm:$0xff]   ;;  %v2765_v40 = vld [vmem:[%s2920_s19 + $0x19c] ss:$40 sps:$4 sm:$0xff]  }
  0x41   : > { %2354 = vmatprep.subr.bf16.mxu1 %v2693_v42  ;;  %2418 = vmatprep.subr.bf16.mxu0 %v2694_v45  ;;  %v2767_v41 = vld [vmem:[%s2920_s19 + $0x1a4] ss:$40 sps:$4 sm:$0xff]  }
  0x42   : > { %v2771_v42 = vld [vmem:[%s2906_s16 + $0x1e8] sm:$0xff]  }
  0x43   : > { %1477 = vmatmul.mubr.bf16.gmra.mrb[8].mxu0 %v2691_v43  ;;  %1509 = vmatmul.mubr.bf16.gmra.mrb[8].mxu1 %v2692_v44  ;;  %v2772_v43 = vld [vmem:[%s2906_s16 + $0x1a8] sm:$0xff]  }
  0x44   : > { %2355 = vmatpush3.bf16.msra.mxu1 %v2695_v46  ;;  %2419 = vmatpush3.bf16.msra.mxu0 %v2696_v47  ;;  %v2773_v44 = vld [vmem:[%s2906_s16 + $0x268] sm:$0xff]   ;;  %v2769_v46 = vld [vmem:[%s2920_s19 + $0x198] ss:$40 sps:$4 sm:$0xff]  }
  0x45   : > { %2356 = vmatprep.subr.bf16.mxu1 %v2697_v48  ;;  %2420 = vmatprep.subr.bf16.mxu0 %v2698_v49  ;;  %v2774_v45 = vld [vmem:[%s2906_s16 + $0x228] sm:$0xff]   ;;  %v2777_v49 = vld [vmem:[%s2920_s19 + $0x1f4] ss:$40 sps:$4 sm:$0xff]  }
  0x46   : > { %1484 = vmatprep.mubr.bf16.mxu0 %v2701_v50  ;;  %1516 = vmatprep.mubr.bf16.mxu1 %v2703_v51  ;;  %v2770_v47 = vld [vmem:[%s2920_s19 + $0x1a0] ss:$40 sps:$4 sm:$0xff]   ;;  %v2775_v48 = vld [vmem:[%s2920_s19 + $0x1ec] ss:$40 sps:$4 sm:$0xff]  }
  0x47   : > { %v2781_v50 = vld [vmem:[%s2906_s16 + $0x1f0] sm:$0xff]  }
  0x48   : > { %2357 = vmatpush3.bf16.msra.mxu1 %v2699_v52  ;;  %2421 = vmatpush3.bf16.msra.mxu0 %v2700_v53  ;;  %v2782_v51 = vld [vmem:[%s2906_s16 + $0x1b0] sm:$0xff]  }
  0x49   : > { %2358 = vmatprep.subr.bf16.mxu1 %v2707_v54  ;;  %2422 = vmatprep.subr.bf16.mxu0 %v2708_v57  ;;  %v2783_v52 = vld [vmem:[%s2906_s16 + $0x270] sm:$0xff]   ;;  %v2785_v57 = vld [vmem:[%s2920_s19 + $0x23c] ss:$40 sps:$4 sm:$0xff]  }
  0x4a   : > { %v2784_v53 = vld [vmem:[%s2906_s16 + $0x230] sm:$0xff]  }
  0x4b   : > { %1485 = vmatmul.mubr.bf16.gmra.mrb[12].mxu0 %v2705_v55  ;;  %1517 = vmatmul.mubr.bf16.gmra.mrb[12].mxu1 %v2706_v56  ;;  %v2779_v54 = vld [vmem:[%s2920_s19 + $0x1e8] ss:$40 sps:$4 sm:$0xff]   ;;  %v2791_v56 = vld [vmem:[%s2906_s16 + $0x1f8] sm:$0xff]  }
  0x4c   : > { %2359 = vmatpush3.bf16.msra.mxu1 %v2709_v58  ;;  %2423 = vmatpush3.bf16.msra.mxu0 %v2710_v59  ;;  %v2780_v55 = vld [vmem:[%s2920_s19 + $0x1f0] ss:$40 sps:$4 sm:$0xff]   ;;  %v2787_v58 = vld [vmem:[%s2920_s19 + $0x244] ss:$40 sps:$4 sm:$0xff]  }
  0x4d   : > { %2360 = vmatprep.subr.bf16.mxu1 %v2711_v60  ;;  %2424 = vmatprep.subr.bf16.mxu0 %v2712_v61  ;;  %v2792_v59 = vld [vmem:[%s2906_s16 + $0x1b8] sm:$0xff]  }
  0x4e   : > { %1557 = vmatprep.mubr.bf16.mxu1 %v2717_v0  ;;  %1654 = vmatprep.mubr.bf16.mxu0 %v2720_v3  ;;  %v2793_v60 = vld [vmem:[%s2906_s16 + $0x278] sm:$0xff]   ;;  %v2798_v3 = vld [vmem:[%s2920_s19 + $0x20] ss:$40 sps:$4 sm:$0xff]  }
  0x4f   : > { %v2794_v61 = vld [vmem:[%s2906_s16 + $0x238] sm:$0xff]  }
  0x50   : > { %2361 = vmatpush3.bf16.msra.mxu1 %v2713_v62  ;;  %2425 = vmatpush3.bf16.msra.mxu0 %v2714_v63  ;;  %v2789_v62 = vld [vmem:[%s2920_s19 + $0x238] ss:$40 sps:$4 sm:$0xff]   ;;  %v2797_v0 = vld [vmem:[%s2920_s19 + $0x1c] ss:$40 sps:$4 sm:$0xff]  }
  0x51   : > { %2474 = vmatprep.subr.bf16.mxu1 %v2721_v4  ;;  %2538 = vmatprep.subr.bf16.mxu0 %v2723_v6  ;;  %v2790_v63 = vld [vmem:[%s2920_s19 + $0x240] ss:$40 sps:$4 sm:$0xff]   ;;  %v2801_v4 = vld [vmem:[%s2920_s19 + $0x6c] ss:$40 sps:$4 sm:$0xff]  }
  0x52   : > { %v2805_v6 = vld [vmem:[%s2920_s19 + $0x68] ss:$40 sps:$4 sm:$0xff]  }
  0x53   : > { %1558 = vmatmul.mubr.bf16.vlgmr.msra.gmra.mrb[16].mxu1 %v2715_v1  ;;  %1655 = vmatmul.mubr.bf16.vlgmr.msra.gmra.mrb[16].mxu0 %v2718_v2  ;;  %v2800_v1 = vld [vmem:[%s2920_s19 + $0x24] ss:$40 sps:$4 sm:$0xff]   ;;  %v2795_v2 = vld [vmem:[%s2920_s19 + $0x18] ss:$40 sps:$4 sm:$0xff]  }
  0x54   : > { %2475 = vmatpush3.bf16.msra.mxu1 %v2722_v5  ;;  %2539 = vmatpush3.bf16.msra.mxu0 %v2724_v7  ;;  %v2803_v5 = vld [vmem:[%s2920_s19 + $0x74] ss:$40 sps:$4 sm:$0xff]   ;;  %v2806_v7 = vld [vmem:[%s2920_s19 + $0x70] ss:$40 sps:$4 sm:$0xff]  }
  0x55   : > { %1565 = vmatprep.mubr.bf16.mxu1 %v2725_v8  ;;  %1662 = vmatprep.mubr.bf16.mxu0 %v2727_v9  ;;  %v2807_v8 = vld [vmem:[%s2920_s19 + $0xbc] ss:$40 sps:$4 sm:$0xff]  }
  0x56   : > { %2476 = vmatprep.subr.bf16.mxu1 %v2731_v12  ;;  %2540 = vmatprep.subr.bf16.mxu0 %v2733_v14  ;;  %v2809_v9 = vld [vmem:[%s2920_s19 + $0xc4] ss:$40 sps:$4 sm:$0xff]   ;;  %v2817_v14 = vld [vmem:[%s2920_s19 + $0x108] ss:$40 sps:$4 sm:$0xff]  }
  0x57   : > { %v2813_v12 = vld [vmem:[%s2920_s19 + $0x10c] ss:$40 sps:$4 sm:$0xff]  }
  0x58   : > { %2477 = vmatpush3.bf16.msra.mxu1 %v2732_v13  ;;  %2541 = vmatpush3.bf16.msra.mxu0 %v2734_v15  ;;  %v2815_v13 = vld [vmem:[%s2920_s19 + $0x114] ss:$40 sps:$4 sm:$0xff]   ;;  %v2818_v15 = vld [vmem:[%s2920_s19 + $0x110] ss:$40 sps:$4 sm:$0xff]  }
  0x59   : > { %2478 = vmatprep.subr.bf16.mxu1 %v2741_v18  ;;  %2542 = vmatprep.subr.bf16.mxu0 %v2743_v22  ;;  %v2823_v18 = vld [vmem:[%s2920_s19 + $0x158] ss:$40 sps:$4 sm:$0xff]   ;;  %v2829_v22 = vld [vmem:[%s2920_s19 + $0x1a8] ss:$40 sps:$4 sm:$0xff]  }
  0x5b   : > { %1566 = vmatmul.mubr.bf16.gmra.mrb[20].mxu1 %v2729_v10  ;;  %1663 = vmatmul.mubr.bf16.gmra.mrb[20].mxu0 %v2730_v11  ;;  %v2811_v10 = vld [vmem:[%s2920_s19 + $0xb8] ss:$40 sps:$4 sm:$0xff]  }
  0x5c   : > { %1573 = vmatprep.mubr.bf16.mxu1 %v2735_v16  ;;  %1670 = vmatprep.mubr.bf16.mxu0 %v2737_v17  ;;  %v2812_v11 = vld [vmem:[%s2920_s19 + $0xc0] ss:$40 sps:$4 sm:$0xff]   ;;  %v2819_v16 = vld [vmem:[%s2920_s19 + $0x15c] ss:$40 sps:$4 sm:$0xff]  }
  0x5d   : > { %2479 = vmatpush3.bf16.msra.mxu1 %v2742_v21  ;;  %2543 = vmatpush3.bf16.msra.mxu0 %v2744_v23  ;;  %v2821_v17 = vld [vmem:[%s2920_s19 + $0x164] ss:$40 sps:$4 sm:$0xff]   ;;  %v2827_v21 = vld [vmem:[%s2920_s19 + $0x1b4] ss:$40 sps:$4 sm:$0xff]   ;;  %v2830_v23 = vld [vmem:[%s2920_s19 + $0x1b0] ss:$40 sps:$4 sm:$0xff]  }
  0x5e   : > { %2480 = vmatprep.subr.bf16.mxu1 %v2751_v26  ;;  %2544 = vmatprep.subr.bf16.mxu0 %v2753_v29  ;;  %v2835_v26 = vld [vmem:[%s2920_s19 + $0x1f8] ss:$40 sps:$4 sm:$0xff]   ;;  %v2839_v29 = vld [vmem:[%s2920_s19 + $0x254] ss:$40 sps:$4 sm:$0xff]  }
  0x61   : > { %2481 = vmatpush3.bf16.msra.mxu1 %v2752_v27  ;;  %2545 = vmatpush3.bf16.msra.mxu0 %v2754_v30  ;;  %v2836_v27 = vld [vmem:[%s2920_s19 + $0x200] ss:$40 sps:$4 sm:$0xff]  }
  0x62   : > { %2482 = vmatprep.subr.bf16.mxu1 %v2761_v34  ;;  %2546 = vmatprep.subr.bf16.mxu0 %v2763_v36  ;;  %v2841_v30 = vld [vmem:[%s2920_s19 + $0x248] ss:$40 sps:$4 sm:$0xff]  }
  0x63   : > { %1574 = vmatmul.mubr.bf16.gmra.mrb[24].mxu1 %v2739_v19  ;;  %1671 = vmatmul.mubr.bf16.gmra.mrb[24].mxu0 %v2740_v20  ;;  %v2824_v19 = vld [vmem:[%s2920_s19 + $0x160] ss:$40 sps:$4 sm:$0xff]   ;;  %v2825_v20 = vld [vmem:[%s2920_s19 + $0x1ac] ss:$40 sps:$4 sm:$0xff]  }
  0x64   : > { %1581 = vmatprep.mubr.bf16.mxu1 %v2745_v24  ;;  %1678 = vmatprep.mubr.bf16.mxu0 %v2747_v25  ;;  %v2831_v24 = vld [vmem:[%s2920_s19 + $0x1fc] ss:$40 sps:$4 sm:$0xff]  }
  0x65   : > { %2483 = vmatpush3.bf16.msra.mxu1 %v2762_v35  ;;  %2547 = vmatpush3.bf16.msra.mxu0 %v2764_v37  ;;  %v2833_v25 = vld [vmem:[%s2920_s19 + $0x204] ss:$40 sps:$4 sm:$0xff]  }
  0x66   : > { %2484 = vmatprep.subr.bf16.mxu1 %v2771_v42  ;;  %2548 = vmatprep.subr.bf16.mxu0 %v2773_v44 }
  0x69   : > { %2485 = vmatpush3.bf16.msra.mxu1 %v2772_v43  ;;  %2549 = vmatpush3.bf16.msra.mxu0 %v2774_v45 }
  0x6a   : > { %2486 = vmatprep.subr.bf16.mxu1 %v2781_v50  ;;  %2550 = vmatprep.subr.bf16.mxu0 %v2783_v52 }
  0x6b   : > { %1582 = vmatmul.mubr.bf16.gmra.mrb[28].mxu1 %v2749_v28  ;;  %1679 = vmatmul.mubr.bf16.gmra.mrb[28].mxu0 %v2750_v31  ;;  %v2837_v28 = vld [vmem:[%s2920_s19 + $0x24c] ss:$40 sps:$4 sm:$0xff]   ;;  %v2842_v31 = vld [vmem:[%s2920_s19 + $0x250] ss:$40 sps:$4 sm:$0xff]  }
  0x6c   : > { %1589 = vmatprep.mubr.bf16.mxu1 %v2755_v32  ;;  %1686 = vmatprep.mubr.bf16.mxu0 %v2757_v33 }
  0x6d   : > { %2487 = vmatpush3.bf16.msra.mxu1 %v2782_v51  ;;  %2551 = vmatpush3.bf16.msra.mxu0 %v2784_v53 }
  0x6e   : > { %2488 = vmatprep.subr.bf16.mxu1 %v2791_v56  ;;  %2552 = vmatprep.subr.bf16.mxu0 %v2793_v60 }
  0x71   : > { %2489 = vmatpush3.bf16.msra.mxu1 %v2792_v59  ;;  %2553 = vmatpush3.bf16.msra.mxu0 %v2794_v61 }
  0x73   : > { %1590 = vmatmul.mubr.bf16.gmra.mrb[32].mxu1 %v2759_v38  ;;  %1687 = vmatmul.mubr.bf16.gmra.mrb[32].mxu0 %v2760_v39 }
  0x74   : > { %1597 = vmatprep.mubr.bf16.mxu1 %v2765_v40  ;;  %1694 = vmatprep.mubr.bf16.mxu0 %v2767_v41 }
  0x7b   : > { %1598 = vmatmul.mubr.bf16.gmra.mrb[36].mxu1 %v2769_v46  ;;  %1695 = vmatmul.mubr.bf16.gmra.mrb[36].mxu0 %v2770_v47 }
  0x7c   : > { %1605 = vmatprep.mubr.bf16.mxu1 %v2775_v48  ;;  %1702 = vmatprep.mubr.bf16.mxu0 %v2777_v49 }
  0x83   : > { %1606 = vmatmul.mubr.bf16.gmra.mrb[40].mxu1 %v2779_v54  ;;  %1703 = vmatmul.mubr.bf16.gmra.mrb[40].mxu0 %v2780_v55 }
  0x84   : > { %1613 = vmatprep.mubr.bf16.mxu1 %v2785_v57  ;;  %1710 = vmatprep.mubr.bf16.mxu0 %v2787_v58 }
  0x8b   : > { %1614 = vmatmul.mubr.bf16.gmra.mrb[44].mxu1 %v2789_v62  ;;  %1711 = vmatmul.mubr.bf16.gmra.mrb[44].mxu0 %v2790_v63 }
  0x8c   : > { %1751 = vmatprep.mubr.bf16.mxu1 %v2797_v0  ;;  %1848 = vmatprep.mubr.bf16.mxu0 %v2800_v1 }
  0x93   : > { %1752 = vmatmul.mubr.bf16.vlgmr.msra.gmra.mrb[48].mxu1 %v2795_v2  ;;  %1849 = vmatmul.mubr.bf16.vlgmr.msra.gmra.mrb[48].mxu0 %v2798_v3 }
  0x94   : > { %1759 = vmatprep.mubr.bf16.mxu1 %v2801_v4  ;;  %1856 = vmatprep.mubr.bf16.mxu0 %v2803_v5 }
  0x9b   : > { %1760 = vmatmul.mubr.bf16.gmra.mrb[52].mxu1 %v2805_v6  ;;  %1857 = vmatmul.mubr.bf16.gmra.mrb[52].mxu0 %v2806_v7 }
  0x9c   : > { %1767 = vmatprep.mubr.bf16.mxu1 %v2807_v8  ;;  %1864 = vmatprep.mubr.bf16.mxu0 %v2809_v9 }
  0xa3   : > { %1768 = vmatmul.mubr.bf16.gmra.mrb[56].mxu1 %v2811_v10  ;;  %1865 = vmatmul.mubr.bf16.gmra.mrb[56].mxu0 %v2812_v11 }
  0xa4   : > { %1775 = vmatprep.mubr.bf16.mxu1 %v2813_v12  ;;  %1872 = vmatprep.mubr.bf16.mxu0 %v2815_v13 }
  0xab   : > { %1776 = vmatmul.mubr.bf16.gmra.mrb[60].mxu1 %v2817_v14  ;;  %1873 = vmatmul.mubr.bf16.gmra.mrb[60].mxu0 %v2818_v15 }
  0xac   : > { %1783 = vmatprep.mubr.bf16.mxu1 %v2819_v16  ;;  %1880 = vmatprep.mubr.bf16.mxu0 %v2821_v17 }
  0xb3   : > { %1784 = vmatmul.mubr.bf16.gmra.mrb[64].mxu1 %v2823_v18  ;;  %1881 = vmatmul.mubr.bf16.gmra.mrb[64].mxu0 %v2824_v19 }
  0xb4   : > { %1791 = vmatprep.mubr.bf16.mxu1 %v2825_v20  ;;  %1888 = vmatprep.mubr.bf16.mxu0 %v2827_v21 }
  0xbb   : > { %1792 = vmatmul.mubr.bf16.gmra.mrb[68].mxu1 %v2829_v22  ;;  %1889 = vmatmul.mubr.bf16.gmra.mrb[68].mxu0 %v2830_v23 }
  0xbc   : > { %1799 = vmatprep.mubr.bf16.mxu1 %v2831_v24  ;;  %1896 = vmatprep.mubr.bf16.mxu0 %v2833_v25 }
  0xc3   : > { %1800 = vmatmul.mubr.bf16.gmra.mrb[72].mxu1 %v2835_v26  ;;  %1897 = vmatmul.mubr.bf16.gmra.mrb[72].mxu0 %v2836_v27 }
  0xc4   : > { %1807 = vmatprep.mubr.bf16.mxu1 %v2837_v28  ;;  %1904 = vmatprep.mubr.bf16.mxu0 %v2839_v29 }
  0xcb   : > { %1808 = vmatmul.mubr.bf16.gmra.mrb[76].mxu1 %v2841_v30  ;;  %1905 = vmatmul.mubr.bf16.gmra.mrb[76].mxu0 %v2842_v31 }
 0x106   : > { %v2298_v32 = vpop.f32.mrb[0].mxu0  ;;  %v2322_v33 = vpop.f32.mrb[0].mxu1 }
 0x107   : > { %v2299_v34 = vpop.f32.mrb[1].mxu0  ;;  %v2323_v35 = vpop.f32.mrb[1].mxu1 }
 0x108   : > { %v2300_v36 = vadd.f32 %v2299_v34, %v2298_v32  ;;  %v3073_v37 = vadd.f32 %v2323_v35, %v2322_v33  ;;  %v2301_v38 = vpop.f32.mrb[2].mxu0  ;;  %v2325_v39 = vpop.f32.mrb[2].mxu1 }
 0x109   : > { %v2302_v40 = vpop.f32.mrb[3].mxu0  ;;  %v2326_v41 = vpop.f32.mrb[3].mxu1 }
 0x10a   : > { %v2303_v42 = vadd.f32 %v2302_v40, %v2301_v38  ;;  %v3075_v43 = vadd.f32 %v2326_v41, %v2325_v39 }
 0x10e   : > { %v2304_v44 = vpop.f32.mrb[4].mxu0  ;;  %v2328_v45 = vpop.f32.mrb[4].mxu1 }
 0x10f   : > { %v2305_v46 = vpop.f32.mrb[5].mxu0  ;;  %v2329_v47 = vpop.f32.mrb[5].mxu1 }
 0x110   : > { %v2306_v48 = vadd.f32 %v2305_v46, %v2304_v44  ;;  %v3077_v49 = vadd.f32 %v2329_v47, %v2328_v45  ;;  %v2307_v50 = vpop.f32.mrb[6].mxu0  ;;  %v2331_v51 = vpop.f32.mrb[6].mxu1 }
 0x111   : > { %v2308_v52 = vpop.f32.mrb[7].mxu0  ;;  %v2332_v53 = vpop.f32.mrb[7].mxu1 }
 0x112   : > { %v2309_v54 = vadd.f32 %v2308_v52, %v2307_v50  ;;  %v3079_v55 = vadd.f32 %v2332_v53, %v2331_v51 }
 0x116   : > { %v2310_v56 = vpop.f32.mrb[8].mxu0  ;;  %v2334_v57 = vpop.f32.mrb[8].mxu1 }
 0x117   : > { %v2311_v58 = vpop.f32.mrb[9].mxu0  ;;  %v2335_v59 = vpop.f32.mrb[9].mxu1 }
 0x118   : > { %v2312_v60 = vadd.f32 %v2311_v58, %v2310_v56  ;;  %v3081_v61 = vadd.f32 %v2335_v59, %v2334_v57  ;;  %v2313_v62 = vpop.f32.mrb[10].mxu0  ;;  %v2337_v63 = vpop.f32.mrb[10].mxu1 }
 0x119   : > { %v2314_v0 = vpop.f32.mrb[11].mxu0  ;;  %v2338_v1 = vpop.f32.mrb[11].mxu1 }
 0x11a   : > { %v2315_v2 = vadd.f32 %v2314_v0, %v2313_v62  ;;  %v3083_v3 = vadd.f32 %v2338_v1, %v2337_v63 }
 0x11e   : > { %v2316_v4 = vpop.f32.mrb[12].mxu0  ;;  %v2340_v5 = vpop.f32.mrb[12].mxu1 }
 0x11f   : > { %v2317_v6 = vpop.f32.mrb[13].mxu0  ;;  %v2341_v7 = vpop.f32.mrb[13].mxu1 }
 0x120   : > { %v3085_v8 = vadd.f32 %v2317_v6, %v2316_v4  ;;  %v3087_v9 = vadd.f32 %v2341_v7, %v2340_v5  ;;  %v2319_v10 = vpop.f32.mrb[14].mxu0  ;;  %v2343_v11 = vpop.f32.mrb[14].mxu1 }
 0x121   : > { %v2320_v12 = vpop.f32.mrb[15].mxu0  ;;  %v2344_v13 = vpop.f32.mrb[15].mxu1 }
 0x122   : > { %v3089_v14 = vadd.f32 %v2320_v12, %v2319_v10  ;;  %v3091_v15 = vadd.f32 %v2344_v13, %v2343_v11 }
 0x126   : > { %v2362_v16 = vpop.f32.mrb[16].mxu1  ;;  %v2426_v17 = vpop.f32.mrb[16].mxu0 }
 0x127   : > { %v2363_v18 = vpop.f32.mrb[17].mxu1  ;;  %v2427_v19 = vpop.f32.mrb[17].mxu0 }
 0x128   : > { %v2364_v20 = vadd.f32 %v2363_v18, %v2362_v16  ;;  %v2428_v21 = vadd.f32 %v2427_v19, %v2426_v17  ;;  %v2365_v22 = vpop.f32.mrb[18].mxu1  ;;  %v2429_v23 = vpop.f32.mrb[18].mxu0 }
 0x129   : > { %v2366_v24 = vpop.f32.mrb[19].mxu1  ;;  %v2430_v25 = vpop.f32.mrb[19].mxu0 }
 0x12a   : > { %v1560_v26 = vadd.f32 %v2364_v20, %v2300_v36  ;;  %v2367_v27 = vadd.f32 %v2366_v24, %v2365_v22  ;;  %v2431_v28 = vadd.f32 %v2430_v25, %v2429_v23 }
 0x12c   : > { %v3093_v29 = vadd.f32 %v2428_v21, %v1560_v26  ;;  %v1563_v30 = vadd.f32 %v2367_v27, %v2303_v42 }
 0x12e   : > { %v3095_v31 = vadd.f32 %v2431_v28, %v1563_v30  ;;  %v2368_v32 = vpop.f32.mrb[20].mxu1  ;;  %v2432_v33 = vpop.f32.mrb[20].mxu0 }
 0x12f   : > { %v2369_v34 = vpop.f32.mrb[21].mxu1  ;;  %v2433_v35 = vpop.f32.mrb[21].mxu0 }
 0x130   : > { %v2370_v38 = vadd.f32 %v2369_v34, %v2368_v32  ;;  %v2434_v39 = vadd.f32 %v2433_v35, %v2432_v33  ;;  %v2371_v40 = vpop.f32.mrb[22].mxu1  ;;  %v2435_v41 = vpop.f32.mrb[22].mxu0 }
 0x131   : > { %v2372_v44 = vpop.f32.mrb[23].mxu1  ;;  %v2436_v45 = vpop.f32.mrb[23].mxu0 }
 0x132   : > { %v1568_v46 = vadd.f32 %v2370_v38, %v2306_v48  ;;  %v2373_v47 = vadd.f32 %v2372_v44, %v2371_v40  ;;  %v2437_v36 = vadd.f32 %v2436_v45, %v2435_v41 }
 0x134   : > { %v3097_v50 = vadd.f32 %v2434_v39, %v1568_v46  ;;  %v1571_v51 = vadd.f32 %v2373_v47, %v2309_v54 }
 0x136   : > { %v3099_v52 = vadd.f32 %v2437_v36, %v1571_v51  ;;  %v2374_v42 = vpop.f32.mrb[24].mxu1  ;;  %v2438_v53 = vpop.f32.mrb[24].mxu0 }
 0x137   : > { %v2375_v56 = vpop.f32.mrb[25].mxu1  ;;  %v2439_v57 = vpop.f32.mrb[25].mxu0 }
 0x138   : > { %v2376_v58 = vadd.f32 %v2375_v56, %v2374_v42  ;;  %v2440_v59 = vadd.f32 %v2439_v57, %v2438_v53  ;;  %v2377_v62 = vpop.f32.mrb[26].mxu1  ;;  %v2441_v63 = vpop.f32.mrb[26].mxu0 }
 0x139   : > { %v2378_v0 = vpop.f32.mrb[27].mxu1  ;;  %v2442_v1 = vpop.f32.mrb[27].mxu0 }
 0x13a   : > { %v1576_v4 = vadd.f32 %v2376_v58, %v2312_v60  ;;  %v2379_v5 = vadd.f32 %v2378_v0, %v2377_v62  ;;  %v2443_v48 = vadd.f32 %v2442_v1, %v2441_v63 }
 0x13c   : > { %v3101_v6 = vadd.f32 %v2440_v59, %v1576_v4  ;;  %v1579_v7 = vadd.f32 %v2379_v5, %v2315_v2 }
 0x13e   : > { %v3103_v10 = vadd.f32 %v2443_v48, %v1579_v7  ;;  %v2380_v54 = vpop.f32.mrb[28].mxu1  ;;  %v2444_v11 = vpop.f32.mrb[28].mxu0 }
 0x13f   : > { %v2381_v12 = vpop.f32.mrb[29].mxu1  ;;  %v2445_v13 = vpop.f32.mrb[29].mxu0 }
 0x140   : > { %v2382_v16 = vadd.f32 %v2381_v12, %v2380_v54  ;;  %v2446_v17 = vadd.f32 %v2445_v13, %v2444_v11  ;;  %v2383_v18 = vpop.f32.mrb[30].mxu1  ;;  %v2447_v19 = vpop.f32.mrb[30].mxu0 }
 0x141   : > { %v2384_v20 = vpop.f32.mrb[31].mxu1  ;;  %v2448_v21 = vpop.f32.mrb[31].mxu0 }
 0x142   : > { %v1584_v22 = vadd.f32 %v2382_v16, %v3085_v8  ;;  %v2385_v60 = vadd.f32 %v2384_v20, %v2383_v18  ;;  %v2449_v23 = vadd.f32 %v2448_v21, %v2447_v19 }
 0x144   : > { %v3106_v24 = vadd.f32 %v2446_v17, %v1584_v22  ;;  %v1587_v2 = vadd.f32 %v2385_v60, %v3089_v14 }
 0x146   : > { %v3109_v25 = vadd.f32 %v2449_v23, %v1587_v2  ;;  %v2386_v26 = vpop.f32.mrb[32].mxu1  ;;  %v2450_v27 = vpop.f32.mrb[32].mxu0 }
 0x147   : > { %v2387_v28 = vpop.f32.mrb[33].mxu1  ;;  %v2451_v30 = vpop.f32.mrb[33].mxu0 }
 0x148   : > { %v2388_v32 = vadd.f32 %v2387_v28, %v2386_v26  ;;  %v2452_v33 = vadd.f32 %v2451_v30, %v2450_v27  ;;  %v2389_v34 = vpop.f32.mrb[34].mxu1  ;;  %v2453_v35 = vpop.f32.mrb[34].mxu0 }
 0x149   : > { %v2390_v38 = vpop.f32.mrb[35].mxu1  ;;  %v2454_v39 = vpop.f32.mrb[35].mxu0 }
 0x14a   : > { %v1592_v8 = vadd.f32 %v2388_v32, %v3073_v37  ;;  %v2391_v40 = vadd.f32 %v2390_v38, %v2389_v34  ;;  %v2455_v41 = vadd.f32 %v2454_v39, %v2453_v35 }
 0x14c   : > { %v3112_v44 = vadd.f32 %v2452_v33, %v1592_v8  ;;  %v1595_v14 = vadd.f32 %v2391_v40, %v3075_v43 }
 0x14e   : > { %v3115_v45 = vadd.f32 %v2455_v41, %v1595_v14  ;;  %v2392_v46 = vpop.f32.mrb[36].mxu1  ;;  %v2456_v47 = vpop.f32.mrb[36].mxu0 }
 0x14f   : > { %v2393_v36 = vpop.f32.mrb[37].mxu1  ;;  %v2457_v51 = vpop.f32.mrb[37].mxu0 }
 0x150   : > { %v2394_v42 = vadd.f32 %v2393_v36, %v2392_v46  ;;  %v2458_v53 = vadd.f32 %v2457_v51, %v2456_v47  ;;  %v2395_v56 = vpop.f32.mrb[38].mxu1  ;;  %v2459_v57 = vpop.f32.mrb[38].mxu0 }
 0x151   : > { %v2396_v58 = vpop.f32.mrb[39].mxu1  ;;  %v2460_v59 = vpop.f32.mrb[39].mxu0 }
 0x152   : > { %v1600_v37 = vadd.f32 %v2394_v42, %v3077_v49  ;;  %v2397_v62 = vadd.f32 %v2396_v58, %v2395_v56  ;;  %v2461_v63 = vadd.f32 %v2460_v59, %v2459_v57 }
 0x154   : > { %v3118_v0 = vadd.f32 %v2458_v53, %v1600_v37  ;;  %v1603_v43 = vadd.f32 %v2397_v62, %v3079_v55 }
 0x156   : > { %v3121_v1 = vadd.f32 %v2461_v63, %v1603_v43  ;;  %v2398_v4 = vpop.f32.mrb[40].mxu1  ;;  %v2462_v5 = vpop.f32.mrb[40].mxu0 }
 0x157   : > { %v2399_v48 = vpop.f32.mrb[41].mxu1  ;;  %v2463_v7 = vpop.f32.mrb[41].mxu0 }
 0x158   : > { %v2400_v54 = vadd.f32 %v2399_v48, %v2398_v4  ;;  %v2464_v11 = vadd.f32 %v2463_v7, %v2462_v5  ;;  %v2401_v12 = vpop.f32.mrb[42].mxu1  ;;  %v2465_v13 = vpop.f32.mrb[42].mxu0 }
 0x159   : > { %v2402_v16 = vpop.f32.mrb[43].mxu1  ;;  %v2466_v17 = vpop.f32.mrb[43].mxu0 }
 0x15a   : > { %v1608_v49 = vadd.f32 %v2400_v54, %v3081_v61  ;;  %v2403_v18 = vadd.f32 %v2402_v16, %v2401_v12  ;;  %v2467_v19 = vadd.f32 %v2466_v17, %v2465_v13 }
 0x15c   : > { %v3124_v20 = vadd.f32 %v2464_v11, %v1608_v49  ;;  %v1611_v55 = vadd.f32 %v2403_v18, %v3083_v3 }
 0x15e   : > { %v3127_v21 = vadd.f32 %v2467_v19, %v1611_v55  ;;  %v2404_v22 = vpop.f32.mrb[44].mxu1  ;;  %v2468_v60 = vpop.f32.mrb[44].mxu0 }
 0x15f   : > { %v2405_v23 = vpop.f32.mrb[45].mxu1  ;;  %v2469_v2 = vpop.f32.mrb[45].mxu0 }
 0x160   : > { %v2406_v26 = vadd.f32 %v2405_v23, %v2404_v22  ;;  %v2470_v27 = vadd.f32 %v2469_v2, %v2468_v60  ;;  %v2407_v28 = vpop.f32.mrb[46].mxu1  ;;  %v2471_v30 = vpop.f32.mrb[46].mxu0 }
 0x161   : > { %v2408_v32 = vpop.f32.mrb[47].mxu1  ;;  %v2472_v33 = vpop.f32.mrb[47].mxu0 }
 0x162   : > { %v1616_v61 = vadd.f32 %v2406_v26, %v3087_v9  ;;  %v2409_v34 = vadd.f32 %v2408_v32, %v2407_v28  ;;  %v2473_v35 = vadd.f32 %v2472_v33, %v2471_v30 }
 0x164   : > { %v3130_v38 = vadd.f32 %v2470_v27, %v1616_v61  ;;  %v1619_v3 = vadd.f32 %v2409_v34, %v3091_v15 }
 0x166   : > { %v3133_v39 = vadd.f32 %v2473_v35, %v1619_v3  ;;  %v2490_v8 = vpop.f32.mrb[48].mxu1  ;;  %v2554_v40 = vpop.f32.mrb[48].mxu0 }
 0x167   : > { %v2491_v41 = vpop.f32.mrb[49].mxu1  ;;  %v2555_v14 = vpop.f32.mrb[49].mxu0 }
 0x168   : > { %v2492_v46 = vadd.f32 %v2491_v41, %v2490_v8  ;;  %v2556_v47 = vadd.f32 %v2555_v14, %v2554_v40  ;;  %v2493_v36 = vpop.f32.mrb[50].mxu1  ;;  %v2557_v51 = vpop.f32.mrb[50].mxu0 }
 0x169   : > { %v2494_v42 = vpop.f32.mrb[51].mxu1  ;;  %v2558_v53 = vpop.f32.mrb[51].mxu0 }
 0x16a   : > { %v1754_v9 = vadd.f32 %v2492_v46, %v3093_v29  ;;  %v2495_v56 = vadd.f32 %v2494_v42, %v2493_v36  ;;  %v2559_v57 = vadd.f32 %v2558_v53, %v2557_v51 }
 0x16c   : > { %v1851_v15 = vadd.f32 %v2556_v47, %v1754_v9  ;;  %v1757_v58 = vadd.f32 %v2495_v56, %v3095_v31 }
 0x16e   : > { %1964 = vst [vmem:[%s3140_s23] sm:$0xff] %v1851_v15  ;;  %v1854_v59 = vadd.f32 %v2559_v57, %v1757_v58  ;;  %v2496_v37 = vpop.f32.mrb[52].mxu1  ;;  %v2560_v62 = vpop.f32.mrb[52].mxu0 }
 0x16f   : > { %v2497_v63 = vpop.f32.mrb[53].mxu1  ;;  %v2561_v43 = vpop.f32.mrb[53].mxu0 }
 0x170   : > { %1965 = vst [vmem:[%s3140_s23 + $0x8] sm:$0xff] %v1854_v59  ;;  %v2498_v29 = vadd.f32 %v2497_v63, %v2496_v37  ;;  %v2562_v4 = vadd.f32 %v2561_v43, %v2560_v62  ;;  %v2499_v5 = vpop.f32.mrb[54].mxu1  ;;  %v2563_v48 = vpop.f32.mrb[54].mxu0 }
 0x171   : > { %v2500_v7 = vpop.f32.mrb[55].mxu1  ;;  %v2564_v54 = vpop.f32.mrb[55].mxu0 }
 0x172   : > { %v1762_v11 = vadd.f32 %v2498_v29, %v3097_v50  ;;  %v2501_v12 = vadd.f32 %v2500_v7, %v2499_v5  ;;  %v2565_v13 = vadd.f32 %v2564_v54, %v2563_v48 }
 0x174   : > { %v1859_v31 = vadd.f32 %v2562_v4, %v1762_v11  ;;  %v1765_v16 = vadd.f32 %v2501_v12, %v3099_v52 }
 0x176   : > { %1966 = vst [vmem:[%s3140_s23 + $0x10] sm:$0xff] %v1859_v31  ;;  %v1862_v17 = vadd.f32 %v2565_v13, %v1765_v16  ;;  %v2502_v49 = vpop.f32.mrb[56].mxu1  ;;  %v2566_v18 = vpop.f32.mrb[56].mxu0 }
 0x177   : > { %v2503_v19 = vpop.f32.mrb[57].mxu1  ;;  %v2567_v55 = vpop.f32.mrb[57].mxu0 }
 0x178   : > { %1967 = vst [vmem:[%s3140_s23 + $0x18] sm:$0xff] %v1862_v17  ;;  %v2504_v22 = vadd.f32 %v2503_v19, %v2502_v49  ;;  %v2568_v60 = vadd.f32 %v2567_v55, %v2566_v18  ;;  %v2505_v23 = vpop.f32.mrb[58].mxu1  ;;  %v2569_v2 = vpop.f32.mrb[58].mxu0 }
 0x179   : > { %v2506_v26 = vpop.f32.mrb[59].mxu1  ;;  %v2570_v50 = vpop.f32.mrb[59].mxu0 }
 0x17a   : > { %v1770_v27 = vadd.f32 %v2504_v22, %v3101_v6  ;;  %v2507_v28 = vadd.f32 %v2506_v26, %v2505_v23  ;;  %v2571_v30 = vadd.f32 %v2570_v50, %v2569_v2 }
 0x17c   : > { %v1867_v52 = vadd.f32 %v2568_v60, %v1770_v27  ;;  %v1773_v32 = vadd.f32 %v2507_v28, %v3103_v10 }
 0x17e   : > { %1968 = vst [vmem:[%s3140_s23 + $0x20] sm:$0xff] %v1867_v52  ;;  %v1870_v33 = vadd.f32 %v2571_v30, %v1773_v32  ;;  %v2508_v61 = vpop.f32.mrb[60].mxu1  ;;  %v2572_v34 = vpop.f32.mrb[60].mxu0 }
 0x17f   : > { %v2509_v35 = vpop.f32.mrb[61].mxu1  ;;  %v2573_v3 = vpop.f32.mrb[61].mxu0 }
 0x180   : > { %1969 = vst [vmem:[%s3140_s23 + $0x28] sm:$0xff] %v1870_v33  ;;  %v2510_v8 = vadd.f32 %v2509_v35, %v2508_v61  ;;  %v2574_v40 = vadd.f32 %v2573_v3, %v2572_v34  ;;  %v2511_v41 = vpop.f32.mrb[62].mxu1  ;;  %v2575_v14 = vpop.f32.mrb[62].mxu0 }
 0x181   : > { %v2512_v46 = vpop.f32.mrb[63].mxu1  ;;  %v2576_v6 = vpop.f32.mrb[63].mxu0 }
 0x182   : > { %v1778_v47 = vadd.f32 %v2510_v8, %v3106_v24  ;;  %v2513_v36 = vadd.f32 %v2512_v46, %v2511_v41  ;;  %v2577_v51 = vadd.f32 %v2576_v6, %v2575_v14 }
 0x184   : > { %v1875_v10 = vadd.f32 %v2574_v40, %v1778_v47  ;;  %v1781_v42 = vadd.f32 %v2513_v36, %v3109_v25 }
 0x186   : > { %1970 = vst [vmem:[%s3140_s23 + $0x30] sm:$0xff] %v1875_v10  ;;  %v1878_v53 = vadd.f32 %v2577_v51, %v1781_v42  ;;  %v2514_v9 = vpop.f32.mrb[64].mxu1  ;;  %v2578_v56 = vpop.f32.mrb[64].mxu0 }
 0x187   : > { %v2515_v57 = vpop.f32.mrb[65].mxu1  ;;  %v2579_v15 = vpop.f32.mrb[65].mxu0 }
 0x188   : > { %1971 = vst [vmem:[%s3140_s23 + $0x38] sm:$0xff] %v1878_v53  ;;  %v2516_v58 = vadd.f32 %v2515_v57, %v2514_v9  ;;  %v2580_v59 = vadd.f32 %v2579_v15, %v2578_v56  ;;  %v2517_v37 = vpop.f32.mrb[66].mxu1  ;;  %v2581_v62 = vpop.f32.mrb[66].mxu0 }
 0x189   : > { %v2518_v63 = vpop.f32.mrb[67].mxu1  ;;  %v2582_v24 = vpop.f32.mrb[67].mxu0 }
 0x18a   : > { %v1786_v43 = vadd.f32 %v2516_v58, %v3112_v44  ;;  %v2519_v29 = vadd.f32 %v2518_v63, %v2517_v37  ;;  %v2583_v4 = vadd.f32 %v2582_v24, %v2581_v62 }
 0x18c   : > { %v1883_v25 = vadd.f32 %v2580_v59, %v1786_v43  ;;  %v1789_v5 = vadd.f32 %v2519_v29, %v3115_v45 }
 0x18e   : > { %1972 = vst [vmem:[%s3140_s23 + $0x40] sm:$0xff] %v1883_v25  ;;  %v1886_v48 = vadd.f32 %v2583_v4, %v1789_v5  ;;  %v2520_v7 = vpop.f32.mrb[68].mxu1  ;;  %v2584_v54 = vpop.f32.mrb[68].mxu0 }
 0x18f   : > { %v2521_v11 = vpop.f32.mrb[69].mxu1  ;;  %v2585_v12 = vpop.f32.mrb[69].mxu0 }
 0x190   : > { %1973 = vst [vmem:[%s3140_s23 + $0x48] sm:$0xff] %v1886_v48  ;;  %v2522_v13 = vadd.f32 %v2521_v11, %v2520_v7  ;;  %v2586_v31 = vadd.f32 %v2585_v12, %v2584_v54  ;;  %v2523_v16 = vpop.f32.mrb[70].mxu1  ;;  %v2587_v17 = vpop.f32.mrb[70].mxu0 }
 0x191   : > { %v2524_v49 = vpop.f32.mrb[71].mxu1  ;;  %v2588_v44 = vpop.f32.mrb[71].mxu0 }
 0x192   : > { %v1794_v18 = vadd.f32 %v2522_v13, %v3118_v0  ;;  %v2525_v19 = vadd.f32 %v2524_v49, %v2523_v16  ;;  %v2589_v55 = vadd.f32 %v2588_v44, %v2587_v17 }
 0x194   : > { %v1891_v45 = vadd.f32 %v2586_v31, %v1794_v18  ;;  %v1797_v22 = vadd.f32 %v2525_v19, %v3121_v1 }
 0x196   : > { %1974 = vst [vmem:[%s3140_s23 + $0x50] sm:$0xff] %v1891_v45  ;;  %v1894_v60 = vadd.f32 %v2589_v55, %v1797_v22  ;;  %v2526_v23 = vpop.f32.mrb[72].mxu1  ;;  %v2590_v2 = vpop.f32.mrb[72].mxu0 }
 0x197   : > { %v2527_v26 = vpop.f32.mrb[73].mxu1  ;;  %v2591_v50 = vpop.f32.mrb[73].mxu0 }
 0x198   : > { %1975 = vst [vmem:[%s3140_s23 + $0x58] sm:$0xff] %v1894_v60  ;;  %v2528_v27 = vadd.f32 %v2527_v26, %v2526_v23  ;;  %v2592_v28 = vadd.f32 %v2591_v50, %v2590_v2  ;;  %v2529_v30 = vpop.f32.mrb[74].mxu1  ;;  %v2593_v52 = vpop.f32.mrb[74].mxu0 }
 0x199   : > { %v2530_v32 = vpop.f32.mrb[75].mxu1  ;;  %v2594_v0 = vpop.f32.mrb[75].mxu0 }
 0x19a   : > { %v1802_v33 = vadd.f32 %v2528_v27, %v3124_v20  ;;  %v2531_v61 = vadd.f32 %v2530_v32, %v2529_v30  ;;  %v2595_v34 = vadd.f32 %v2594_v0, %v2593_v52 }
 0x19c   : > { %v1899_v1 = vadd.f32 %v2592_v28, %v1802_v33  ;;  %v1805_v35 = vadd.f32 %v2531_v61, %v3127_v21 }
 0x19e   : > { %1976 = vst [vmem:[%s3140_s23 + $0x60] sm:$0xff] %v1899_v1  ;;  %v1902_v3 = vadd.f32 %v2595_v34, %v1805_v35  ;;  %v2532_v8 = vpop.f32.mrb[76].mxu1  ;;  %v2596_v40 = vpop.f32.mrb[76].mxu0 }
 0x19f   : > { %v2533_v41 = vpop.f32.mrb[77].mxu1  ;;  %v2597_v14 = vpop.f32.mrb[77].mxu0 }
 0x1a0   : > { %1977 = vst [vmem:[%s3140_s23 + $0x68] sm:$0xff] %v1902_v3  ;;  %v2534_v46 = vadd.f32 %v2533_v41, %v2532_v8  ;;  %v2598_v6 = vadd.f32 %v2597_v14, %v2596_v40  ;;  %v2535_v47 = vpop.f32.mrb[78].mxu1  ;;  %v2599_v36 = vpop.f32.mrb[78].mxu0 }
 0x1a1   : > { %v2536_v51 = vpop.f32.mrb[79].mxu1  ;;  %v2600_v20 = vpop.f32.mrb[79].mxu0 }
 0x1a2   : > { %v1810_v10 = vadd.f32 %v2534_v46, %v3130_v38  ;;  %v2537_v42 = vadd.f32 %v2536_v51, %v2535_v47  ;;  %v2601_v53 = vadd.f32 %v2600_v20, %v2599_v36 }
 0x1a4   : > { %v1907_v21 = vadd.f32 %v2598_v6, %v1810_v10  ;;  %v1813_v9 = vadd.f32 %v2537_v42, %v3133_v39 }
 0x1a6   : > { %1978 = vst [vmem:[%s3140_s23 + $0x70] sm:$0xff] %v1907_v21  ;;  %v1910_v56 = vadd.f32 %v2601_v53, %v1813_v9 }
 0x1a8   : > { %1979 = vst [vmem:[%s3140_s23 + $0x78] sm:$0xff] %v1910_v56 }
 0x1a9 PF: > { %s12_s11 = sadd.s32 1, %s2865_s11   ;;  %s3185_s9 = smov %s2861_s10 }
 0x1aa   : > { %p9_p5 = scmp.ge.s32.totalorder %s12_s11, 10   ;;  %s3186_s10 = smov %s3188_s12 }
 0x1ac   :  { %11 = sbr.rel (!%p9_p5) target bundleno = 2 (0x2), region = 69 }

// kernel: forward.24
= control target key start
LH: loop header
LB: loop body
LE: loop exit
PB: predicated region body
PF: predicated region fallthrough
CT: control target
= control target key end

     0   :  { %s2903_s1 = inlined_call_operand.vmem [shape: bf16[1,128,128], index: 1, kind: input, shape index: {}]   ;;  %s2904_s0 = inlined_call_operand.vmem [shape: bf16[1,1024,128], index: 0, kind: input, shape index: {}]   ;;  %s2905_s2 = inlined_call_operand.vmem [shape: f32[1,1024,128], index: 2, kind: output, shape index: {}]  }
   0x1   :  { %v2216_v0 = vld [vmem:[%s2903_s1] sm:$0xff]   ;;  %v2217_v1 = vld [vmem:[%s2903_s1 + $0x8] sm:$0xff]   ;;  %v2218_v2 = vld [vmem:[%s2903_s1 + $0x10] sm:$0xff]  }
   0x2   :  { %2056 = vmatprep.subr.bf16.mxu0 %v2216_v0  ;;  %2200 = vmatprep.subr.bf16.mxu1 %v2216_v0  ;;  %v2219_v3 = vld [vmem:[%s2903_s1 + $0x18] sm:$0xff]   ;;  %v2224_v4 = vld [vmem:[%s2904_s0] sm:$0xff]   ;;  %v2221_v7 = vld [vmem:[%s2903_s1 + $0x28] sm:$0xff]  }
   0x3   :  { %2057 = vmatpush3.bf16.msra.mxu0 %v2216_v0  ;;  %2208 = vmatpush3.bf16.msra.mxu1 %v2216_v0  ;;  %v2225_v5 = vld [vmem:[%s2904_s0 + $0x100] sm:$0xff]   ;;  %v2222_v8 = vld [vmem:[%s2903_s1 + $0x30] sm:$0xff]   ;;  %v2223_v9 = vld [vmem:[%s2903_s1 + $0x38] sm:$0xff]  }
   0x4   :  { %2058 = vmatprep.subr.bf16.mxu0 %v2217_v1  ;;  %2201 = vmatprep.subr.bf16.mxu1 %v2217_v1  ;;  %v2220_v6 = vld [vmem:[%s2903_s1 + $0x20] sm:$0xff]   ;;  %v2226_v10 = vld [vmem:[%s2904_s0 + $0x8] sm:$0xff]   ;;  %v2228_v12 = vld [vmem:[%s2904_s0 + $0x10] sm:$0xff]  }
   0x5   :  { %2072 = vmatprep.mubr.bf16.mxu0 %v2224_v4  ;;  %2136 = vmatprep.mubr.bf16.mxu1 %v2225_v5  ;;  %v2227_v11 = vld [vmem:[%s2904_s0 + $0x108] sm:$0xff]   ;;  %v2229_v13 = vld [vmem:[%s2904_s0 + $0x110] sm:$0xff]   ;;  %v2230_v14 = vld [vmem:[%s2904_s0 + $0x18] sm:$0xff]  }
   0x6   :  { %v2231_v15 = vld [vmem:[%s2904_s0 + $0x118] sm:$0xff]   ;;  %v2232_v16 = vld [vmem:[%s2904_s0 + $0x20] sm:$0xff]   ;;  %v2234_v18 = vld [vmem:[%s2904_s0 + $0x28] sm:$0xff]  }
   0x7   :  { %2059 = vmatpush3.bf16.msra.mxu0 %v2217_v1  ;;  %2209 = vmatpush3.bf16.msra.mxu1 %v2217_v1  ;;  %v2233_v17 = vld [vmem:[%s2904_s0 + $0x120] sm:$0xff]   ;;  %v2235_v19 = vld [vmem:[%s2904_s0 + $0x128] sm:$0xff]   ;;  %v2236_v20 = vld [vmem:[%s2904_s0 + $0x30] sm:$0xff]  }
   0x8   :  { %2060 = vmatprep.subr.bf16.mxu0 %v2218_v2  ;;  %2202 = vmatprep.subr.bf16.mxu1 %v2218_v2  ;;  %v2237_v21 = vld [vmem:[%s2904_s0 + $0x130] sm:$0xff]   ;;  %v2238_v22 = vld [vmem:[%s2904_s0 + $0x38] sm:$0xff]   ;;  %v2240_v24 = vld [vmem:[%s2904_s0 + $0x40] sm:$0xff]  }
   0x9   :  { %v2239_v23 = vld [vmem:[%s2904_s0 + $0x138] sm:$0xff]   ;;  %v2241_v25 = vld [vmem:[%s2904_s0 + $0x140] sm:$0xff]   ;;  %v2242_v26 = vld [vmem:[%s2904_s0 + $0x48] sm:$0xff]  }
   0xa   :  { %v2243_v27 = vld [vmem:[%s2904_s0 + $0x148] sm:$0xff]   ;;  %v2244_v28 = vld [vmem:[%s2904_s0 + $0x50] sm:$0xff]   ;;  %v2246_v30 = vld [vmem:[%s2904_s0 + $0x58] sm:$0xff]  }
   0xb   :  { %2061 = vmatpush3.bf16.msra.mxu0 %v2218_v2  ;;  %2210 = vmatpush3.bf16.msra.mxu1 %v2218_v2  ;;  %v2245_v29 = vld [vmem:[%s2904_s0 + $0x150] sm:$0xff]   ;;  %v2247_v31 = vld [vmem:[%s2904_s0 + $0x158] sm:$0xff]   ;;  %v2248_v32 = vld [vmem:[%s2904_s0 + $0x60] sm:$0xff]  }
   0xc   :  { %2062 = vmatprep.subr.bf16.mxu0 %v2219_v3  ;;  %2203 = vmatprep.subr.bf16.mxu1 %v2219_v3  ;;  %v2249_v33 = vld [vmem:[%s2904_s0 + $0x160] sm:$0xff]   ;;  %v2250_v34 = vld [vmem:[%s2904_s0 + $0x68] sm:$0xff]   ;;  %v2252_v36 = vld [vmem:[%s2904_s0 + $0x70] sm:$0xff]  }
   0xd   :  { %v2251_v35 = vld [vmem:[%s2904_s0 + $0x168] sm:$0xff]   ;;  %v2253_v37 = vld [vmem:[%s2904_s0 + $0x170] sm:$0xff]   ;;  %v2254_v38 = vld [vmem:[%s2904_s0 + $0x78] sm:$0xff]  }
   0xe   :  { %v2255_v39 = vld [vmem:[%s2904_s0 + $0x178] sm:$0xff]   ;;  %v2256_v40 = vld [vmem:[%s2904_s0 + $0x80] sm:$0xff]   ;;  %v2258_v42 = vld [vmem:[%s2904_s0 + $0x88] sm:$0xff]  }
   0xf   :  { %2063 = vmatpush3.bf16.msra.mxu0 %v2219_v3  ;;  %2211 = vmatpush3.bf16.msra.mxu1 %v2219_v3  ;;  %v2257_v41 = vld [vmem:[%s2904_s0 + $0x180] sm:$0xff]   ;;  %v2259_v43 = vld [vmem:[%s2904_s0 + $0x188] sm:$0xff]   ;;  %v2260_v44 = vld [vmem:[%s2904_s0 + $0x90] sm:$0xff]  }
  0x10   :  { %2064 = vmatprep.subr.bf16.mxu0 %v2220_v6  ;;  %2204 = vmatprep.subr.bf16.mxu1 %v2220_v6  ;;  %v2261_v45 = vld [vmem:[%s2904_s0 + $0x190] sm:$0xff]   ;;  %v2262_v46 = vld [vmem:[%s2904_s0 + $0x98] sm:$0xff]   ;;  %v2264_v48 = vld [vmem:[%s2904_s0 + $0xa0] sm:$0xff]  }
  0x11   :  { %v2263_v47 = vld [vmem:[%s2904_s0 + $0x198] sm:$0xff]   ;;  %v2265_v49 = vld [vmem:[%s2904_s0 + $0x1a0] sm:$0xff]   ;;  %v2266_v50 = vld [vmem:[%s2904_s0 + $0xa8] sm:$0xff]  }
  0x12   :  { %v2267_v51 = vld [vmem:[%s2904_s0 + $0x1a8] sm:$0xff]   ;;  %v2268_v52 = vld [vmem:[%s2904_s0 + $0xb0] sm:$0xff]   ;;  %v2270_v54 = vld [vmem:[%s2904_s0 + $0xb8] sm:$0xff]  }
  0x13   :  { %2065 = vmatpush3.bf16.msra.mxu0 %v2220_v6  ;;  %2212 = vmatpush3.bf16.msra.mxu1 %v2220_v6  ;;  %v2269_v53 = vld [vmem:[%s2904_s0 + $0x1b0] sm:$0xff]   ;;  %v2271_v55 = vld [vmem:[%s2904_s0 + $0x1b8] sm:$0xff]   ;;  %v2272_v56 = vld [vmem:[%s2904_s0 + $0xc0] sm:$0xff]  }
  0x14   :  { %2066 = vmatprep.subr.bf16.mxu0 %v2221_v7  ;;  %2205 = vmatprep.subr.bf16.mxu1 %v2221_v7  ;;  %v2273_v57 = vld [vmem:[%s2904_s0 + $0x1c0] sm:$0xff]   ;;  %v2274_v58 = vld [vmem:[%s2904_s0 + $0xc8] sm:$0xff]   ;;  %v2276_v60 = vld [vmem:[%s2904_s0 + $0xd0] sm:$0xff]  }
  0x15   :  { %v2275_v59 = vld [vmem:[%s2904_s0 + $0x1c8] sm:$0xff]   ;;  %v2277_v61 = vld [vmem:[%s2904_s0 + $0x1d0] sm:$0xff]   ;;  %v2278_v62 = vld [vmem:[%s2904_s0 + $0xd8] sm:$0xff]  }
  0x16   :  { %v2279_v63 = vld [vmem:[%s2904_s0 + $0x1d8] sm:$0xff]   ;;  %v2280_v0 = vld [vmem:[%s2904_s0 + $0xe0] sm:$0xff]   ;;  %v2282_v2 = vld [vmem:[%s2904_s0 + $0xe8] sm:$0xff]  }
  0x17   :  { %2067 = vmatpush3.bf16.msra.mxu0 %v2221_v7  ;;  %2213 = vmatpush3.bf16.msra.mxu1 %v2221_v7  ;;  %v2281_v1 = vld [vmem:[%s2904_s0 + $0x1e0] sm:$0xff]   ;;  %v2283_v3 = vld [vmem:[%s2904_s0 + $0x1e8] sm:$0xff]   ;;  %v2284_v4 = vld [vmem:[%s2904_s0 + $0xf0] sm:$0xff]  }
  0x18   :  { %2068 = vmatprep.subr.bf16.mxu0 %v2222_v8  ;;  %2206 = vmatprep.subr.bf16.mxu1 %v2222_v8  ;;  %v2285_v5 = vld [vmem:[%s2904_s0 + $0x1f0] sm:$0xff]   ;;  %v2286_v6 = vld [vmem:[%s2904_s0 + $0xf8] sm:$0xff]  }
  0x19   :  { %v2287_v7 = vld [vmem:[%s2904_s0 + $0x1f8] sm:$0xff]  }
  0x1b   :  { %2069 = vmatpush3.bf16.msra.mxu0 %v2222_v8  ;;  %2214 = vmatpush3.bf16.msra.mxu1 %v2222_v8 }
  0x1c   :  { %2070 = vmatprep.subr.bf16.mxu0 %v2223_v9  ;;  %2207 = vmatprep.subr.bf16.mxu1 %v2223_v9 }
  0x1f   :  { %2071 = vmatpush3.bf16.msra.mxu0 %v2223_v9  ;;  %2215 = vmatpush3.bf16.msra.mxu1 %v2223_v9 }
  0x22   :  { %2073 = vmatmul.mubr.bf16.vlgmr.msra.gmra.mrb[0].mxu0 %v2226_v10  ;;  %2137 = vmatmul.mubr.bf16.vlgmr.msra.gmra.mrb[0].mxu1 %v2227_v11 }
  0x23   :  { %2076 = vmatprep.mubr.bf16.mxu0 %v2228_v12  ;;  %2140 = vmatprep.mubr.bf16.mxu1 %v2229_v13 }
  0x2a   :  { %2077 = vmatmul.mubr.bf16.gmra.mrb[4].mxu0 %v2230_v14  ;;  %2141 = vmatmul.mubr.bf16.gmra.mrb[4].mxu1 %v2231_v15 }
  0x2b   :  { %2080 = vmatprep.mubr.bf16.mxu0 %v2232_v16  ;;  %2144 = vmatprep.mubr.bf16.mxu1 %v2233_v17 }
  0x32   :  { %2081 = vmatmul.mubr.bf16.gmra.mrb[8].mxu0 %v2234_v18  ;;  %2145 = vmatmul.mubr.bf16.gmra.mrb[8].mxu1 %v2235_v19 }
  0x33   :  { %2084 = vmatprep.mubr.bf16.mxu0 %v2236_v20  ;;  %2148 = vmatprep.mubr.bf16.mxu1 %v2237_v21 }
  0x3a   :  { %2085 = vmatmul.mubr.bf16.gmra.mrb[12].mxu0 %v2238_v22  ;;  %2149 = vmatmul.mubr.bf16.gmra.mrb[12].mxu1 %v2239_v23 }
  0x3b   :  { %2088 = vmatprep.mubr.bf16.mxu0 %v2240_v24  ;;  %2152 = vmatprep.mubr.bf16.mxu1 %v2241_v25 }
  0x42   :  { %2089 = vmatmul.mubr.bf16.gmra.mrb[16].mxu0 %v2242_v26  ;;  %2153 = vmatmul.mubr.bf16.gmra.mrb[16].mxu1 %v2243_v27 }
  0x43   :  { %2092 = vmatprep.mubr.bf16.mxu0 %v2244_v28  ;;  %2156 = vmatprep.mubr.bf16.mxu1 %v2245_v29 }
  0x4a   :  { %2093 = vmatmul.mubr.bf16.gmra.mrb[20].mxu0 %v2246_v30  ;;  %2157 = vmatmul.mubr.bf16.gmra.mrb[20].mxu1 %v2247_v31 }
  0x4b   :  { %2096 = vmatprep.mubr.bf16.mxu0 %v2248_v32  ;;  %2160 = vmatprep.mubr.bf16.mxu1 %v2249_v33 }
  0x52   :  { %2097 = vmatmul.mubr.bf16.gmra.mrb[24].mxu0 %v2250_v34  ;;  %2161 = vmatmul.mubr.bf16.gmra.mrb[24].mxu1 %v2251_v35 }
  0x53   :  { %2100 = vmatprep.mubr.bf16.mxu0 %v2252_v36  ;;  %2164 = vmatprep.mubr.bf16.mxu1 %v2253_v37 }
  0x5a   :  { %2101 = vmatmul.mubr.bf16.gmra.mrb[28].mxu0 %v2254_v38  ;;  %2165 = vmatmul.mubr.bf16.gmra.mrb[28].mxu1 %v2255_v39 }
  0x5b   :  { %2104 = vmatprep.mubr.bf16.mxu0 %v2256_v40  ;;  %2168 = vmatprep.mubr.bf16.mxu1 %v2257_v41 }
  0x62   :  { %2105 = vmatmul.mubr.bf16.gmra.mrb[32].mxu0 %v2258_v42  ;;  %2169 = vmatmul.mubr.bf16.gmra.mrb[32].mxu1 %v2259_v43 }
  0x63   :  { %2108 = vmatprep.mubr.bf16.mxu0 %v2260_v44  ;;  %2172 = vmatprep.mubr.bf16.mxu1 %v2261_v45 }
  0x6a   :  { %2109 = vmatmul.mubr.bf16.gmra.mrb[36].mxu0 %v2262_v46  ;;  %2173 = vmatmul.mubr.bf16.gmra.mrb[36].mxu1 %v2263_v47 }
  0x6b   :  { %2112 = vmatprep.mubr.bf16.mxu0 %v2264_v48  ;;  %2176 = vmatprep.mubr.bf16.mxu1 %v2265_v49 }
  0x72   :  { %2113 = vmatmul.mubr.bf16.gmra.mrb[40].mxu0 %v2266_v50  ;;  %2177 = vmatmul.mubr.bf16.gmra.mrb[40].mxu1 %v2267_v51 }
  0x73   :  { %2116 = vmatprep.mubr.bf16.mxu0 %v2268_v52  ;;  %2180 = vmatprep.mubr.bf16.mxu1 %v2269_v53 }
  0x7a   :  { %2117 = vmatmul.mubr.bf16.gmra.mrb[44].mxu0 %v2270_v54  ;;  %2181 = vmatmul.mubr.bf16.gmra.mrb[44].mxu1 %v2271_v55 }
  0x7b   :  { %2120 = vmatprep.mubr.bf16.mxu0 %v2272_v56  ;;  %2184 = vmatprep.mubr.bf16.mxu1 %v2273_v57 }
  0x82   :  { %2121 = vmatmul.mubr.bf16.gmra.mrb[48].mxu0 %v2274_v58  ;;  %2185 = vmatmul.mubr.bf16.gmra.mrb[48].mxu1 %v2275_v59 }
  0x83   :  { %2124 = vmatprep.mubr.bf16.mxu0 %v2276_v60  ;;  %2188 = vmatprep.mubr.bf16.mxu1 %v2277_v61 }
  0x8a   :  { %2125 = vmatmul.mubr.bf16.gmra.mrb[52].mxu0 %v2278_v62  ;;  %2189 = vmatmul.mubr.bf16.gmra.mrb[52].mxu1 %v2279_v63 }
  0x8b   :  { %2128 = vmatprep.mubr.bf16.mxu0 %v2280_v0  ;;  %2192 = vmatprep.mubr.bf16.mxu1 %v2281_v1 }
  0x92   :  { %2129 = vmatmul.mubr.bf16.gmra.mrb[56].mxu0 %v2282_v2  ;;  %2193 = vmatmul.mubr.bf16.gmra.mrb[56].mxu1 %v2283_v3 }
  0x93   :  { %2132 = vmatprep.mubr.bf16.mxu0 %v2284_v4  ;;  %2196 = vmatprep.mubr.bf16.mxu1 %v2285_v5 }
  0x9a   :  { %2133 = vmatmul.mubr.bf16.gmra.mrb[60].mxu0 %v2286_v6  ;;  %2197 = vmatmul.mubr.bf16.gmra.mrb[60].mxu1 %v2287_v7 }
  0xf5   :  { %v2074_v8 = vpop.f32.mrb[0].mxu0  ;;  %v2138_v9 = vpop.f32.mrb[0].mxu1 }
  0xf6   :  { %1782 = vst [vmem:[%s2905_s2 + $0x10] sm:$0xff] %v2074_v8  ;;  %1846 = vst [vmem:[%s2905_s2 + $0x210] sm:$0xff] %v2138_v9  ;;  %v882_v10 = vpop.f32.mrb[1].mxu0  ;;  %v1138_v11 = vpop.f32.mrb[1].mxu1 }
  0xf7   :  { %1780 = vst [vmem:[%s2905_s2] sm:$0xff] %v882_v10  ;;  %1844 = vst [vmem:[%s2905_s2 + $0x200] sm:$0xff] %v1138_v11  ;;  %v2075_v12 = vpop.f32.mrb[2].mxu0  ;;  %v2139_v13 = vpop.f32.mrb[2].mxu1 }
  0xf8   :  { %1783 = vst [vmem:[%s2905_s2 + $0x18] sm:$0xff] %v2075_v12  ;;  %1847 = vst [vmem:[%s2905_s2 + $0x218] sm:$0xff] %v2139_v13  ;;  %v885_v14 = vpop.f32.mrb[3].mxu0  ;;  %v1141_v15 = vpop.f32.mrb[3].mxu1 }
  0xf9   :  { %1781 = vst [vmem:[%s2905_s2 + $0x8] sm:$0xff] %v885_v14  ;;  %1845 = vst [vmem:[%s2905_s2 + $0x208] sm:$0xff] %v1141_v15 }
  0xfd   :  { %v2078_v16 = vpop.f32.mrb[4].mxu0  ;;  %v2142_v17 = vpop.f32.mrb[4].mxu1 }
  0xfe   :  { %1786 = vst [vmem:[%s2905_s2 + $0x30] sm:$0xff] %v2078_v16  ;;  %1850 = vst [vmem:[%s2905_s2 + $0x230] sm:$0xff] %v2142_v17  ;;  %v898_v18 = vpop.f32.mrb[5].mxu0  ;;  %v1154_v19 = vpop.f32.mrb[5].mxu1 }
  0xff   :  { %1784 = vst [vmem:[%s2905_s2 + $0x20] sm:$0xff] %v898_v18  ;;  %1848 = vst [vmem:[%s2905_s2 + $0x220] sm:$0xff] %v1154_v19  ;;  %v2079_v20 = vpop.f32.mrb[6].mxu0  ;;  %v2143_v21 = vpop.f32.mrb[6].mxu1 }
 0x100   :  { %1787 = vst [vmem:[%s2905_s2 + $0x38] sm:$0xff] %v2079_v20  ;;  %1851 = vst [vmem:[%s2905_s2 + $0x238] sm:$0xff] %v2143_v21  ;;  %v901_v22 = vpop.f32.mrb[7].mxu0  ;;  %v1157_v23 = vpop.f32.mrb[7].mxu1 }
 0x101   :  { %1785 = vst [vmem:[%s2905_s2 + $0x28] sm:$0xff] %v901_v22  ;;  %1849 = vst [vmem:[%s2905_s2 + $0x228] sm:$0xff] %v1157_v23 }
 0x105   :  { %v2082_v24 = vpop.f32.mrb[8].mxu0  ;;  %v2146_v25 = vpop.f32.mrb[8].mxu1 }
 0x106   :  { %1790 = vst [vmem:[%s2905_s2 + $0x50] sm:$0xff] %v2082_v24  ;;  %1854 = vst [vmem:[%s2905_s2 + $0x250] sm:$0xff] %v2146_v25  ;;  %v914_v26 = vpop.f32.mrb[9].mxu0  ;;  %v1170_v27 = vpop.f32.mrb[9].mxu1 }
 0x107   :  { %1788 = vst [vmem:[%s2905_s2 + $0x40] sm:$0xff] %v914_v26  ;;  %1852 = vst [vmem:[%s2905_s2 + $0x240] sm:$0xff] %v1170_v27  ;;  %v2083_v28 = vpop.f32.mrb[10].mxu0  ;;  %v2147_v29 = vpop.f32.mrb[10].mxu1 }
 0x108   :  { %1791 = vst [vmem:[%s2905_s2 + $0x58] sm:$0xff] %v2083_v28  ;;  %1855 = vst [vmem:[%s2905_s2 + $0x258] sm:$0xff] %v2147_v29  ;;  %v917_v30 = vpop.f32.mrb[11].mxu0  ;;  %v1173_v31 = vpop.f32.mrb[11].mxu1 }
 0x109   :  { %1789 = vst [vmem:[%s2905_s2 + $0x48] sm:$0xff] %v917_v30  ;;  %1853 = vst [vmem:[%s2905_s2 + $0x248] sm:$0xff] %v1173_v31 }
 0x10d   :  { %v2086_v32 = vpop.f32.mrb[12].mxu0  ;;  %v2150_v33 = vpop.f32.mrb[12].mxu1 }
 0x10e   :  { %1794 = vst [vmem:[%s2905_s2 + $0x70] sm:$0xff] %v2086_v32  ;;  %1858 = vst [vmem:[%s2905_s2 + $0x270] sm:$0xff] %v2150_v33  ;;  %v930_v34 = vpop.f32.mrb[13].mxu0  ;;  %v1186_v35 = vpop.f32.mrb[13].mxu1 }
 0x10f   :  { %1792 = vst [vmem:[%s2905_s2 + $0x60] sm:$0xff] %v930_v34  ;;  %1856 = vst [vmem:[%s2905_s2 + $0x260] sm:$0xff] %v1186_v35  ;;  %v2087_v36 = vpop.f32.mrb[14].mxu0  ;;  %v2151_v37 = vpop.f32.mrb[14].mxu1 }
 0x110   :  { %1795 = vst [vmem:[%s2905_s2 + $0x78] sm:$0xff] %v2087_v36  ;;  %1859 = vst [vmem:[%s2905_s2 + $0x278] sm:$0xff] %v2151_v37  ;;  %v933_v38 = vpop.f32.mrb[15].mxu0  ;;  %v1189_v39 = vpop.f32.mrb[15].mxu1 }
 0x111   :  { %1793 = vst [vmem:[%s2905_s2 + $0x68] sm:$0xff] %v933_v38  ;;  %1857 = vst [vmem:[%s2905_s2 + $0x268] sm:$0xff] %v1189_v39 }
 0x115   :  { %v2090_v40 = vpop.f32.mrb[16].mxu0  ;;  %v2154_v41 = vpop.f32.mrb[16].mxu1 }
 0x116   :  { %1798 = vst [vmem:[%s2905_s2 + $0x90] sm:$0xff] %v2090_v40  ;;  %1862 = vst [vmem:[%s2905_s2 + $0x290] sm:$0xff] %v2154_v41  ;;  %v946_v42 = vpop.f32.mrb[17].mxu0  ;;  %v1202_v43 = vpop.f32.mrb[17].mxu1 }
 0x117   :  { %1796 = vst [vmem:[%s2905_s2 + $0x80] sm:$0xff] %v946_v42  ;;  %1860 = vst [vmem:[%s2905_s2 + $0x280] sm:$0xff] %v1202_v43  ;;  %v2091_v44 = vpop.f32.mrb[18].mxu0  ;;  %v2155_v45 = vpop.f32.mrb[18].mxu1 }
 0x118   :  { %1799 = vst [vmem:[%s2905_s2 + $0x98] sm:$0xff] %v2091_v44  ;;  %1863 = vst [vmem:[%s2905_s2 + $0x298] sm:$0xff] %v2155_v45  ;;  %v949_v46 = vpop.f32.mrb[19].mxu0  ;;  %v1205_v47 = vpop.f32.mrb[19].mxu1 }
 0x119   :  { %1797 = vst [vmem:[%s2905_s2 + $0x88] sm:$0xff] %v949_v46  ;;  %1861 = vst [vmem:[%s2905_s2 + $0x288] sm:$0xff] %v1205_v47 }
 0x11d   :  { %v2094_v48 = vpop.f32.mrb[20].mxu0  ;;  %v2158_v49 = vpop.f32.mrb[20].mxu1 }
 0x11e   :  { %1802 = vst [vmem:[%s2905_s2 + $0xb0] sm:$0xff] %v2094_v48  ;;  %1866 = vst [vmem:[%s2905_s2 + $0x2b0] sm:$0xff] %v2158_v49  ;;  %v962_v50 = vpop.f32.mrb[21].mxu0  ;;  %v1218_v51 = vpop.f32.mrb[21].mxu1 }
 0x11f   :  { %1800 = vst [vmem:[%s2905_s2 + $0xa0] sm:$0xff] %v962_v50  ;;  %1864 = vst [vmem:[%s2905_s2 + $0x2a0] sm:$0xff] %v1218_v51  ;;  %v2095_v52 = vpop.f32.mrb[22].mxu0  ;;  %v2159_v53 = vpop.f32.mrb[22].mxu1 }
 0x120   :  { %1803 = vst [vmem:[%s2905_s2 + $0xb8] sm:$0xff] %v2095_v52  ;;  %1867 = vst [vmem:[%s2905_s2 + $0x2b8] sm:$0xff] %v2159_v53  ;;  %v965_v54 = vpop.f32.mrb[23].mxu0  ;;  %v1221_v55 = vpop.f32.mrb[23].mxu1 }
 0x121   :  { %1801 = vst [vmem:[%s2905_s2 + $0xa8] sm:$0xff] %v965_v54  ;;  %1865 = vst [vmem:[%s2905_s2 + $0x2a8] sm:$0xff] %v1221_v55 }
 0x125   :  { %v2098_v56 = vpop.f32.mrb[24].mxu0  ;;  %v2162_v57 = vpop.f32.mrb[24].mxu1 }
 0x126   :  { %1806 = vst [vmem:[%s2905_s2 + $0xd0] sm:$0xff] %v2098_v56  ;;  %1870 = vst [vmem:[%s2905_s2 + $0x2d0] sm:$0xff] %v2162_v57  ;;  %v978_v58 = vpop.f32.mrb[25].mxu0  ;;  %v1234_v59 = vpop.f32.mrb[25].mxu1 }
 0x127   :  { %1804 = vst [vmem:[%s2905_s2 + $0xc0] sm:$0xff] %v978_v58  ;;  %1868 = vst [vmem:[%s2905_s2 + $0x2c0] sm:$0xff] %v1234_v59  ;;  %v2099_v60 = vpop.f32.mrb[26].mxu0  ;;  %v2163_v61 = vpop.f32.mrb[26].mxu1 }
 0x128   :  { %1807 = vst [vmem:[%s2905_s2 + $0xd8] sm:$0xff] %v2099_v60  ;;  %1871 = vst [vmem:[%s2905_s2 + $0x2d8] sm:$0xff] %v2163_v61  ;;  %v981_v62 = vpop.f32.mrb[27].mxu0  ;;  %v1237_v63 = vpop.f32.mrb[27].mxu1 }
 0x129   :  { %1805 = vst [vmem:[%s2905_s2 + $0xc8] sm:$0xff] %v981_v62  ;;  %1869 = vst [vmem:[%s2905_s2 + $0x2c8] sm:$0xff] %v1237_v63 }
 0x12d   :  { %v2102_v0 = vpop.f32.mrb[28].mxu0  ;;  %v2166_v1 = vpop.f32.mrb[28].mxu1 }
 0x12e   :  { %1810 = vst [vmem:[%s2905_s2 + $0xf0] sm:$0xff] %v2102_v0  ;;  %1874 = vst [vmem:[%s2905_s2 + $0x2f0] sm:$0xff] %v2166_v1  ;;  %v994_v2 = vpop.f32.mrb[29].mxu0  ;;  %v1250_v3 = vpop.f32.mrb[29].mxu1 }
 0x12f   :  { %1808 = vst [vmem:[%s2905_s2 + $0xe0] sm:$0xff] %v994_v2  ;;  %1872 = vst [vmem:[%s2905_s2 + $0x2e0] sm:$0xff] %v1250_v3  ;;  %v2103_v4 = vpop.f32.mrb[30].mxu0  ;;  %v2167_v5 = vpop.f32.mrb[30].mxu1 }
 0x130   :  { %1811 = vst [vmem:[%s2905_s2 + $0xf8] sm:$0xff] %v2103_v4  ;;  %1875 = vst [vmem:[%s2905_s2 + $0x2f8] sm:$0xff] %v2167_v5  ;;  %v997_v6 = vpop.f32.mrb[31].mxu0  ;;  %v1253_v7 = vpop.f32.mrb[31].mxu1 }
 0x131   :  { %1809 = vst [vmem:[%s2905_s2 + $0xe8] sm:$0xff] %v997_v6  ;;  %1873 = vst [vmem:[%s2905_s2 + $0x2e8] sm:$0xff] %v1253_v7 }
 0x135   :  { %v2106_v8 = vpop.f32.mrb[32].mxu0  ;;  %v2170_v9 = vpop.f32.mrb[32].mxu1 }
 0x136   :  { %1814 = vst [vmem:[%s2905_s2 + $0x110] sm:$0xff] %v2106_v8  ;;  %1878 = vst [vmem:[%s2905_s2 + $0x310] sm:$0xff] %v2170_v9  ;;  %v1010_v10 = vpop.f32.mrb[33].mxu0  ;;  %v1266_v11 = vpop.f32.mrb[33].mxu1 }
 0x137   :  { %1812 = vst [vmem:[%s2905_s2 + $0x100] sm:$0xff] %v1010_v10  ;;  %1876 = vst [vmem:[%s2905_s2 + $0x300] sm:$0xff] %v1266_v11  ;;  %v2107_v12 = vpop.f32.mrb[34].mxu0  ;;  %v2171_v13 = vpop.f32.mrb[34].mxu1 }
 0x138   :  { %1815 = vst [vmem:[%s2905_s2 + $0x118] sm:$0xff] %v2107_v12  ;;  %1879 = vst [vmem:[%s2905_s2 + $0x318] sm:$0xff] %v2171_v13  ;;  %v1013_v14 = vpop.f32.mrb[35].mxu0  ;;  %v1269_v15 = vpop.f32.mrb[35].mxu1 }
 0x139   :  { %1813 = vst [vmem:[%s2905_s2 + $0x108] sm:$0xff] %v1013_v14  ;;  %1877 = vst [vmem:[%s2905_s2 + $0x308] sm:$0xff] %v1269_v15 }
 0x13d   :  { %v2110_v16 = vpop.f32.mrb[36].mxu0  ;;  %v2174_v17 = vpop.f32.mrb[36].mxu1 }
 0x13e   :  { %1818 = vst [vmem:[%s2905_s2 + $0x130] sm:$0xff] %v2110_v16  ;;  %1882 = vst [vmem:[%s2905_s2 + $0x330] sm:$0xff] %v2174_v17  ;;  %v1026_v18 = vpop.f32.mrb[37].mxu0  ;;  %v1282_v19 = vpop.f32.mrb[37].mxu1 }
 0x13f   :  { %1816 = vst [vmem:[%s2905_s2 + $0x120] sm:$0xff] %v1026_v18  ;;  %1880 = vst [vmem:[%s2905_s2 + $0x320] sm:$0xff] %v1282_v19  ;;  %v2111_v20 = vpop.f32.mrb[38].mxu0  ;;  %v2175_v21 = vpop.f32.mrb[38].mxu1 }
 0x140   :  { %1819 = vst [vmem:[%s2905_s2 + $0x138] sm:$0xff] %v2111_v20  ;;  %1883 = vst [vmem:[%s2905_s2 + $0x338] sm:$0xff] %v2175_v21  ;;  %v1029_v22 = vpop.f32.mrb[39].mxu0  ;;  %v1285_v23 = vpop.f32.mrb[39].mxu1 }
 0x141   :  { %1817 = vst [vmem:[%s2905_s2 + $0x128] sm:$0xff] %v1029_v22  ;;  %1881 = vst [vmem:[%s2905_s2 + $0x328] sm:$0xff] %v1285_v23 }
 0x145   :  { %v2114_v24 = vpop.f32.mrb[40].mxu0  ;;  %v2178_v25 = vpop.f32.mrb[40].mxu1 }
 0x146   :  { %1822 = vst [vmem:[%s2905_s2 + $0x150] sm:$0xff] %v2114_v24  ;;  %1886 = vst [vmem:[%s2905_s2 + $0x350] sm:$0xff] %v2178_v25  ;;  %v1042_v26 = vpop.f32.mrb[41].mxu0  ;;  %v1298_v27 = vpop.f32.mrb[41].mxu1 }
 0x147   :  { %1820 = vst [vmem:[%s2905_s2 + $0x140] sm:$0xff] %v1042_v26  ;;  %1884 = vst [vmem:[%s2905_s2 + $0x340] sm:$0xff] %v1298_v27  ;;  %v2115_v28 = vpop.f32.mrb[42].mxu0  ;;  %v2179_v29 = vpop.f32.mrb[42].mxu1 }
 0x148   :  { %1823 = vst [vmem:[%s2905_s2 + $0x158] sm:$0xff] %v2115_v28  ;;  %1887 = vst [vmem:[%s2905_s2 + $0x358] sm:$0xff] %v2179_v29  ;;  %v1045_v30 = vpop.f32.mrb[43].mxu0  ;;  %v1301_v31 = vpop.f32.mrb[43].mxu1 }
 0x149   :  { %1821 = vst [vmem:[%s2905_s2 + $0x148] sm:$0xff] %v1045_v30  ;;  %1885 = vst [vmem:[%s2905_s2 + $0x348] sm:$0xff] %v1301_v31 }
 0x14d   :  { %v2118_v32 = vpop.f32.mrb[44].mxu0  ;;  %v2182_v33 = vpop.f32.mrb[44].mxu1 }
 0x14e   :  { %1826 = vst [vmem:[%s2905_s2 + $0x170] sm:$0xff] %v2118_v32  ;;  %1890 = vst [vmem:[%s2905_s2 + $0x370] sm:$0xff] %v2182_v33  ;;  %v1058_v34 = vpop.f32.mrb[45].mxu0  ;;  %v1314_v35 = vpop.f32.mrb[45].mxu1 }
 0x14f   :  { %1824 = vst [vmem:[%s2905_s2 + $0x160] sm:$0xff] %v1058_v34  ;;  %1888 = vst [vmem:[%s2905_s2 + $0x360] sm:$0xff] %v1314_v35  ;;  %v2119_v36 = vpop.f32.mrb[46].mxu0  ;;  %v2183_v37 = vpop.f32.mrb[46].mxu1 }
 0x150   :  { %1827 = vst [vmem:[%s2905_s2 + $0x178] sm:$0xff] %v2119_v36  ;;  %1891 = vst [vmem:[%s2905_s2 + $0x378] sm:$0xff] %v2183_v37  ;;  %v1061_v38 = vpop.f32.mrb[47].mxu0  ;;  %v1317_v39 = vpop.f32.mrb[47].mxu1 }
 0x151   :  { %1825 = vst [vmem:[%s2905_s2 + $0x168] sm:$0xff] %v1061_v38  ;;  %1889 = vst [vmem:[%s2905_s2 + $0x368] sm:$0xff] %v1317_v39 }
 0x155   :  { %v2122_v40 = vpop.f32.mrb[48].mxu0  ;;  %v2186_v41 = vpop.f32.mrb[48].mxu1 }
 0x156   :  { %1830 = vst [vmem:[%s2905_s2 + $0x190] sm:$0xff] %v2122_v40  ;;  %1894 = vst [vmem:[%s2905_s2 + $0x390] sm:$0xff] %v2186_v41  ;;  %v1074_v42 = vpop.f32.mrb[49].mxu0  ;;  %v1330_v43 = vpop.f32.mrb[49].mxu1 }
 0x157   :  { %1828 = vst [vmem:[%s2905_s2 + $0x180] sm:$0xff] %v1074_v42  ;;  %1892 = vst [vmem:[%s2905_s2 + $0x380] sm:$0xff] %v1330_v43  ;;  %v2123_v44 = vpop.f32.mrb[50].mxu0  ;;  %v2187_v45 = vpop.f32.mrb[50].mxu1 }
 0x158   :  { %1831 = vst [vmem:[%s2905_s2 + $0x198] sm:$0xff] %v2123_v44  ;;  %1895 = vst [vmem:[%s2905_s2 + $0x398] sm:$0xff] %v2187_v45  ;;  %v1077_v46 = vpop.f32.mrb[51].mxu0  ;;  %v1333_v47 = vpop.f32.mrb[51].mxu1 }
 0x159   :  { %1829 = vst [vmem:[%s2905_s2 + $0x188] sm:$0xff] %v1077_v46  ;;  %1893 = vst [vmem:[%s2905_s2 + $0x388] sm:$0xff] %v1333_v47 }
 0x15d   :  { %v2126_v48 = vpop.f32.mrb[52].mxu0  ;;  %v2190_v49 = vpop.f32.mrb[52].mxu1 }
 0x15e   :  { %1834 = vst [vmem:[%s2905_s2 + $0x1b0] sm:$0xff] %v2126_v48  ;;  %1898 = vst [vmem:[%s2905_s2 + $0x3b0] sm:$0xff] %v2190_v49  ;;  %v1090_v50 = vpop.f32.mrb[53].mxu0  ;;  %v1346_v51 = vpop.f32.mrb[53].mxu1 }
 0x15f   :  { %1832 = vst [vmem:[%s2905_s2 + $0x1a0] sm:$0xff] %v1090_v50  ;;  %1896 = vst [vmem:[%s2905_s2 + $0x3a0] sm:$0xff] %v1346_v51  ;;  %v2127_v52 = vpop.f32.mrb[54].mxu0  ;;  %v2191_v53 = vpop.f32.mrb[54].mxu1 }
 0x160   :  { %1835 = vst [vmem:[%s2905_s2 + $0x1b8] sm:$0xff] %v2127_v52  ;;  %1899 = vst [vmem:[%s2905_s2 + $0x3b8] sm:$0xff] %v2191_v53  ;;  %v1093_v54 = vpop.f32.mrb[55].mxu0  ;;  %v1349_v55 = vpop.f32.mrb[55].mxu1 }
 0x161   :  { %1833 = vst [vmem:[%s2905_s2 + $0x1a8] sm:$0xff] %v1093_v54  ;;  %1897 = vst [vmem:[%s2905_s2 + $0x3a8] sm:$0xff] %v1349_v55 }
 0x165   :  { %v2130_v56 = vpop.f32.mrb[56].mxu0  ;;  %v2194_v57 = vpop.f32.mrb[56].mxu1 }
 0x166   :  { %1838 = vst [vmem:[%s2905_s2 + $0x1d0] sm:$0xff] %v2130_v56  ;;  %1902 = vst [vmem:[%s2905_s2 + $0x3d0] sm:$0xff] %v2194_v57  ;;  %v1106_v58 = vpop.f32.mrb[57].mxu0  ;;  %v1362_v59 = vpop.f32.mrb[57].mxu1 }
 0x167   :  { %1836 = vst [vmem:[%s2905_s2 + $0x1c0] sm:$0xff] %v1106_v58  ;;  %1900 = vst [vmem:[%s2905_s2 + $0x3c0] sm:$0xff] %v1362_v59  ;;  %v2131_v60 = vpop.f32.mrb[58].mxu0  ;;  %v2195_v61 = vpop.f32.mrb[58].mxu1 }
 0x168   :  { %1839 = vst [vmem:[%s2905_s2 + $0x1d8] sm:$0xff] %v2131_v60  ;;  %1903 = vst [vmem:[%s2905_s2 + $0x3d8] sm:$0xff] %v2195_v61  ;;  %v1109_v62 = vpop.f32.mrb[59].mxu0  ;;  %v1365_v63 = vpop.f32.mrb[59].mxu1 }
 0x169   :  { %1837 = vst [vmem:[%s2905_s2 + $0x1c8] sm:$0xff] %v1109_v62  ;;  %1901 = vst [vmem:[%s2905_s2 + $0x3c8] sm:$0xff] %v1365_v63 }
 0x16d   :  { %v2134_v0 = vpop.f32.mrb[60].mxu0  ;;  %v2198_v1 = vpop.f32.mrb[60].mxu1 }
 0x16e   :  { %1842 = vst [vmem:[%s2905_s2 + $0x1f0] sm:$0xff] %v2134_v0  ;;  %1906 = vst [vmem:[%s2905_s2 + $0x3f0] sm:$0xff] %v2198_v1  ;;  %v1122_v2 = vpop.f32.mrb[61].mxu0  ;;  %v1378_v3 = vpop.f32.mrb[61].mxu1 }
 0x16f   :  { %1840 = vst [vmem:[%s2905_s2 + $0x1e0] sm:$0xff] %v1122_v2  ;;  %1904 = vst [vmem:[%s2905_s2 + $0x3e0] sm:$0xff] %v1378_v3  ;;  %v2135_v4 = vpop.f32.mrb[62].mxu0  ;;  %v2199_v5 = vpop.f32.mrb[62].mxu1 }
 0x170   :  { %1843 = vst [vmem:[%s2905_s2 + $0x1f8] sm:$0xff] %v2135_v4  ;;  %1907 = vst [vmem:[%s2905_s2 + $0x3f8] sm:$0xff] %v2199_v5  ;;  %v1125_v6 = vpop.f32.mrb[63].mxu0  ;;  %v1381_v7 = vpop.f32.mrb[63].mxu1 }
 0x171   :  { %1841 = vst [vmem:[%s2905_s2 + $0x1e8] sm:$0xff] %v1125_v6  ;;  %1905 = vst [vmem:[%s2905_s2 + $0x3e8] sm:$0xff] %v1381_v7 }

// kernel: squeeze.12
= control target key start
LH: loop header
LB: loop body
LE: loop exit
PB: predicated region body
PF: predicated region fallthrough
CT: control target
= control target key end

     0   :  { %vm6_vm0 = vcmask 1043458   ;;  %s211_s6 = smov 3  ;;  %vm10_vm1 = vcmask 1045508   ;;  %vm14_vm2 = vcmask 1047558   ;;  %s214_s9 = smov 12  ;;  %vm16_vm3 = vcmask 64512   ;;  %s6167_s0 = inlined_call_operand.vmem [shape: f32[1,1024,8], index: 0, kind: input, shape index: {}]   ;;  %s6168_s1 = inlined_call_operand.vmem [shape: f32[64,128], index: 1, kind: output, shape index: {}]  }
   0x1   :  { %v2954_v0 = vld [vmem:[%s6167_s0 + $0x8f] ss:$16 sm:%s211_s6]   ;;  %s219_s10 = smov 48  ;;  %s224_s15 = smov 192  ;;  %vm185_vm4 = vcmask 1048512   ;;  %vm368_vm5 = vcmask 982912  }
   0x2   :  { %v2955_v1 = vld [vmem:[%s6167_s0 + $0x8f] ss:$16 sm:%s214_s9]   ;;  %s166_s16 = smov 3  ;;  %s169_s21 = smov 12  ;;  %vm551_vm6 = vcmask 917312   ;;  %vm734_vm7 = vcmask 851712  }
   0x3   :  { %v2956_v2 = vld [vmem:[%s6167_s0 + $0x8f] ss:$16 sm:%s219_s10]   ;;  %v217_v3 = vsel %vm6_vm0, %v2955_v1, %v2954_v0  ;;  %s174_s22 = smov 48  ;;  %s179_s27 = smov 192  ;;  %vm917_vm8 = vcmask 786112   ;;  %vm1100_vm9 = vcmask 720512  }
   0x4   :  { %v2957_v4 = vld [vmem:[%s6167_s0 + $0x8f] ss:$16 sm:%s224_s15]   ;;  %v222_v6 = vsel %vm10_vm1, %v2956_v2, %v217_v3  ;;  %s234_s28 = smov 3  ;;  %s237_s4 = smov 12  ;;  %vm1283_vm10 = vcmask 654912   ;;  %vm1466_vm11 = vcmask 589312  }
   0x5   :  { %v2945_v5 = vld [vmem:[%s6167_s0 + $0xf] ss:$16 sm:%s166_s16]   ;;  %v227_v9 = vsel %vm14_vm2, %v2957_v4, %v222_v6  ;;  %s242_s5 = smov 48  ;;  %s3545_s6 = smov 120   ;;  %vm1649_vm12 = vcmask 523712   ;;  %vm1832_vm13 = vcmask 458112  }
   0x6   :  { %v2946_v7 = vld [vmem:[%s6167_s0 + $0xf] ss:$16 sm:%s169_s21]   ;;  %228 = vrot.lane.b32.xlu1 %v227_v9, %s3545_s6  ;;  %s247_s9 = smov 192  ;;  %s188_s10 = smov 3  ;;  %vm2015_vm14 = vcmask 392512   ;;  %vm2198_vm15 = vcmask 326912  }
   0x7   :  { %v2947_v8 = vld [vmem:[%s6167_s0 + $0xf] ss:$16 sm:%s174_s22]   ;;  %v172_v10 = vsel %vm6_vm0, %v2946_v7, %v2945_v5  ;;  %s191_s15 = smov 12  ;;  %s196_s16 = smov 48 }
   0x8   :  { %v2948_v11 = vld [vmem:[%s6167_s0 + $0xf] ss:$16 sm:%s179_s27]   ;;  %v177_v13 = vsel %vm10_vm1, %v2947_v8, %v172_v10  ;;  %s201_s19 = smov 192  ;;  %s280_s20 = smov 3 }
   0x9   :  { %v2959_v12 = vld [vmem:[%s6167_s0 + $0x28f] ss:$16 sm:%s234_s28]   ;;  %v182_v15 = vsel %vm14_vm2, %v2948_v11, %v177_v13  ;;  %s283_s25 = smov 12  ;;  %s288_s26 = smov 48 }
   0xa   :  { %v2960_v14 = vld [vmem:[%s6167_s0 + $0x28f] ss:$16 sm:%s237_s4]   ;;  %183 = vrot.lane.b32.xlu0 %v182_v15, %s3545_s6  ;;  %s293_s29 = smov 192  ;;  %s257_s30 = smov 3 }
   0xb   :  { %v240_v16 = vsel %vm6_vm0, %v2960_v14, %v2959_v12  ;;  %v2961_v17 = vld [vmem:[%s6167_s0 + $0x28f] ss:$16 sm:%s242_s5]   ;;  %s260_s7 = smov 12  ;;  %s265_s8 = smov 48 }
   0xc   :  { %v2962_v18 = vld [vmem:[%s6167_s0 + $0x28f] ss:$16 sm:%s247_s9]   ;;  %v245_v19 = vsel %vm10_vm1, %v2961_v17, %v240_v16  ;;  %s270_s13 = smov 192  ;;  %s329_s17 = smov 12 }
   0xd   :  { %v2949_v20 = vld [vmem:[%s6167_s0 + $0x20f] ss:$16 sm:%s188_s10]   ;;  %v250_v21 = vsel %vm14_vm2, %v2962_v18, %v245_v19  ;;  %s334_s22 = smov 48  ;;  %s339_s23 = smov 192 }
   0xe   :  { %v2950_v22 = vld [vmem:[%s6167_s0 + $0x20f] ss:$16 sm:%s191_s15]   ;;  %251 = vrot.lane.b32.xlu1 %v250_v21, %s3545_s6  ;;  %s306_s2 = smov 12  ;;  %s311_s3 = smov 48 }
   0xf   :  { %v2951_v23 = vld [vmem:[%s6167_s0 + $0x20f] ss:$16 sm:%s196_s16]   ;;  %v194_v24 = vsel %vm6_vm0, %v2950_v22, %v2949_v20  ;;  %s326_s16 = smov 3  ;;  %s316_s9 = smov 192 }
  0x10   :  { %v2952_v25 = vld [vmem:[%s6167_s0 + $0x20f] ss:$16 sm:%s201_s19]   ;;  %v199_v26 = vsel %vm10_vm1, %v2951_v23, %v194_v24  ;;  %s371_s12 = smov 3  ;;  %s379_s18 = smov 48 }
  0x11   :  { %v2969_v27 = vld [vmem:[%s6167_s0 + $0x30f] ss:$16 sm:%s280_s20]   ;;  %v204_v29 = vsel %vm14_vm2, %v2952_v25, %v199_v26  ;;  %s384_s19 = smov 192  ;;  %v2988_v55 = vld [vmem:[%s6167_s0 + $0x20e] ss:$16 sm:%s371_s12]   ;;  %s352_s27 = smov 12 }
  0x12   :  { %v2970_v28 = vld [vmem:[%s6167_s0 + $0x30f] ss:$16 sm:%s283_s25]   ;;  %205 = vrot.lane.b32.xlu0 %v204_v29, %s3545_s6  ;;  %s357_s28 = smov 48  ;;  %s362_s4 = smov 192 }
  0x13   :  { %v286_v30 = vsel %vm6_vm0, %v2970_v28, %v2969_v27  ;;  %v2971_v31 = vld [vmem:[%s6167_s0 + $0x30f] ss:$16 sm:%s288_s26]   ;;  %s303_s26 = smov 3  ;;  %v2990_v59 = vld [vmem:[%s6167_s0 + $0x20e] ss:$16 sm:%s379_s18]   ;;  %s430_s14 = smov 192 }
  0x14   :  { %v2972_v32 = vld [vmem:[%s6167_s0 + $0x30f] ss:$16 sm:%s293_s29]   ;;  %v291_v33 = vsel %vm10_vm1, %v2971_v31, %v286_v30  ;;  %v2991_v60 = vld [vmem:[%s6167_s0 + $0x20e] ss:$16 sm:%s384_s19]   ;;  %s3546_s15 = smov 112   ;;  %s394_s18 = smov 3 }
  0x15   :  { %v2964_v34 = vld [vmem:[%s6167_s0 + $0x10f] ss:$16 sm:%s257_s30]   ;;  %v296_v35 = vsel %vm14_vm2, %v2972_v32, %v291_v33  ;;  %v2985_v0 = vld [vmem:[%s6167_s0 + $0xe] ss:$16 sm:%s352_s27]   ;;  %s402_s24 = smov 48  ;;  %s407_s29 = smov 192 }
  0x16   :  { %v2965_v36 = vld [vmem:[%s6167_s0 + $0x10f] ss:$16 sm:%s260_s7]   ;;  %297 = vrot.lane.b32.xlu1 %v296_v35, %s3545_s6  ;;  %s417_s7 = smov 3  ;;  %s476_s10 = smov 192 }
  0x17   :  { %v2966_v37 = vld [vmem:[%s6167_s0 + $0x10f] ss:$16 sm:%s265_s8]   ;;  %v263_v38 = vsel %vm6_vm0, %v2965_v36, %v2964_v34  ;;  %s420_s8 = smov 12  ;;  %v2986_v1 = vld [vmem:[%s6167_s0 + $0xe] ss:$16 sm:%s357_s28]   ;;  %s443_s19 = smov 12 }
  0x18   :  { %v2967_v39 = vld [vmem:[%s6167_s0 + $0x10f] ss:$16 sm:%s270_s13]   ;;  %v268_v40 = vsel %vm10_vm1, %v2966_v37, %v263_v38  ;;  %s374_s13 = smov 12  ;;  %v2987_v3 = vld [vmem:[%s6167_s0 + $0xe] ss:$16 sm:%s362_s4]   ;;  %s466_s4 = smov 12 }
  0x19   :  { %v2979_v41 = vld [vmem:[%s6167_s0 + $0x38f] ss:$16 sm:%s326_s16]   ;;  %v273_v43 = vsel %vm14_vm2, %v2967_v39, %v268_v40  ;;  %v2989_v56 = vld [vmem:[%s6167_s0 + $0x20e] ss:$16 sm:%s374_s13]   ;;  %s425_s13 = smov 48  ;;  %s448_s20 = smov 48 }
  0x1a   :  { %v2980_v42 = vld [vmem:[%s6167_s0 + $0x38f] ss:$16 sm:%s329_s17]   ;;  %274 = vrot.lane.b32.xlu0 %v273_v43, %s3545_s6  ;;  %v377_v58 = vsel %vm6_vm0, %v2989_v56, %v2988_v55  ;;  %s453_s25 = smov 192  ;;  %s509_s28 = smov 3 }
  0x1b   :  { %v332_v44 = vsel %vm6_vm0, %v2980_v42, %v2979_v41  ;;  %v2981_v45 = vld [vmem:[%s6167_s0 + $0x38f] ss:$16 sm:%s334_s22]   ;;  %s349_s22 = smov 3  ;;  %v382_v61 = vsel %vm10_vm1, %v2990_v59, %v377_v58  ;;  %v2998_v5 = vld [vmem:[%s6167_s0 + $0x28e] ss:$16 sm:%s417_s7]   ;;  %s522_s5 = smov 192 }
  0x1c   :  { %v2982_v46 = vld [vmem:[%s6167_s0 + $0x38f] ss:$16 sm:%s339_s23]   ;;  %v337_v47 = vsel %vm10_vm1, %v2981_v45, %v332_v44  ;;  %v2984_v62 = vld [vmem:[%s6167_s0 + $0xe] ss:$16 sm:%s349_s22]   ;;  %v387_v63 = vsel %vm14_vm2, %v2991_v60, %v382_v61  ;;  %s397_s23 = smov 12  ;;  %s494_s16 = smov 48 }
  0x1d   :  { %v2974_v48 = vld [vmem:[%s6167_s0 + $0x18f] ss:$16 sm:%s303_s26]   ;;  %v342_v49 = vsel %vm14_vm2, %v2982_v46, %v337_v47  ;;  %v355_v2 = vsel %vm6_vm0, %v2985_v0, %v2984_v62  ;;  %v2999_v6 = vld [vmem:[%s6167_s0 + $0x28e] ss:$16 sm:%s420_s8]   ;;  %s499_s21 = smov 192  ;;  %s562_s30 = smov 48 }
  0x1e   :  { %v2975_v50 = vld [vmem:[%s6167_s0 + $0x18f] ss:$16 sm:%s306_s2]   ;;  %343 = vrot.lane.b32.xlu1 %v342_v49, %s3545_s6  ;;  %v360_v4 = vsel %vm10_vm1, %v2986_v1, %v355_v2  ;;  %v423_v8 = vsel %vm6_vm0, %v2999_v6, %v2998_v5  ;;  %s567_s2 = smov 192  ;;  %s540_s11 = smov 48 }
  0x1f   :  { %v2976_v51 = vld [vmem:[%s6167_s0 + $0x18f] ss:$16 sm:%s311_s3]   ;;  %v309_v52 = vsel %vm6_vm0, %v2975_v50, %v2974_v48  ;;  %v365_v7 = vsel %vm14_vm2, %v2987_v3, %v360_v4  ;;  %v3000_v9 = vld [vmem:[%s6167_s0 + $0x28e] ss:$16 sm:%s425_s13]   ;;  %s463_s3 = smov 3  ;;  %s440_s13 = smov 3 }
  0x20   :  { %v2977_v53 = vld [vmem:[%s6167_s0 + $0x18f] ss:$16 sm:%s316_s9]   ;;  %v314_v54 = vsel %vm10_vm1, %v2976_v51, %v309_v52  ;;  %v3001_v10 = vld [vmem:[%s6167_s0 + $0x28e] ss:$16 sm:%s430_s14]   ;;  %v428_v11 = vsel %vm10_vm1, %v3000_v9, %v423_v8  ;;  %s471_s9 = smov 48  ;;  %s489_s14 = smov 12 }
  0x21   :  { %v319_v57 = vsel %vm14_vm2, %v2977_v53, %v314_v54  ;;  %v2993_v12 = vld [vmem:[%s6167_s0 + $0x8e] ss:$16 sm:%s394_s18]   ;;  %v433_v13 = vsel %vm14_vm2, %v3001_v10, %v428_v11  ;;  %v3029_v51 = vld [vmem:[%s6167_s0 + $0x20d] ss:$16 sm:%s562_s30]   ;;  %s545_s17 = smov 192  ;;  %s613_s26 = smov 192 }
  0x22   :  { %320 = vrot.lane.b32.xlu0 %v319_v57, %s3545_s6  ;;  %388 = vrot.lane.b32.xlu1 %v387_v63, %s3546_s15  ;;  %v2994_v14 = vld [vmem:[%s6167_s0 + $0x8e] ss:$16 sm:%s397_s23]   ;;  %s517_s6 = smov 48  ;;  %s3547_s27 = smov 104  }
  0x23   :  { %v2995_v15 = vld [vmem:[%s6167_s0 + $0x8e] ss:$16 sm:%s402_s24]   ;;  %v400_v16 = vsel %vm6_vm0, %v2994_v14, %v2993_v12  ;;  %s554_s24 = smov 3  ;;  %v3030_v52 = vld [vmem:[%s6167_s0 + $0x20d] ss:$16 sm:%s567_s2]   ;;  %s577_s30 = smov 3 }
  0x24   :  { %v2996_v17 = vld [vmem:[%s6167_s0 + $0x8e] ss:$16 sm:%s407_s29]   ;;  %v405_v18 = vsel %vm10_vm1, %v2995_v15, %v400_v16  ;;  %s512_s29 = smov 12  ;;  %v3027_v47 = vld [vmem:[%s6167_s0 + $0x20d] ss:$16 sm:%s554_s24]   ;;  %s585_s7 = smov 48 }
  0x25   :  { %v3008_v19 = vld [vmem:[%s6167_s0 + $0x30e] ss:$16 sm:%s463_s3]   ;;  %v410_v21 = vsel %vm14_vm2, %v2996_v17, %v405_v18  ;;  %v3025_v57 = vld [vmem:[%s6167_s0 + $0xd] ss:$16 sm:%s540_s11]   ;;  %s590_s12 = smov 192  ;;  %s659_s22 = smov 192 }
  0x26   :  { %366 = vrot.lane.b32.xlu0 %v365_v7, %s3546_s15  ;;  %434 = vrot.lane.b32.xlu1 %v433_v13, %s3546_s15  ;;  %v3009_v20 = vld [vmem:[%s6167_s0 + $0x30e] ss:$16 sm:%s466_s4]   ;;  %s626_s2 = smov 12  ;;  %s631_s3 = smov 48 }
  0x27   :  { %v469_v22 = vsel %vm6_vm0, %v3009_v20, %v3008_v19  ;;  %v3010_v23 = vld [vmem:[%s6167_s0 + $0x30e] ss:$16 sm:%s471_s9]   ;;  %s486_s9 = smov 3  ;;  %v3026_v59 = vld [vmem:[%s6167_s0 + $0xd] ss:$16 sm:%s545_s17]   ;;  %s649_s17 = smov 12 }
  0x28   :  { %v3011_v24 = vld [vmem:[%s6167_s0 + $0x30e] ss:$16 sm:%s476_s10]   ;;  %v474_v25 = vsel %vm10_vm1, %v3010_v23, %v469_v22  ;;  %s535_s10 = smov 12  ;;  %v3040_v2 = vld [vmem:[%s6167_s0 + $0x28d] ss:$16 sm:%s613_s26]   ;;  %s636_s8 = smov 192 }
  0x29   :  { %v3003_v26 = vld [vmem:[%s6167_s0 + $0x10e] ss:$16 sm:%s440_s13]   ;;  %v479_v27 = vsel %vm14_vm2, %v3011_v24, %v474_v25  ;;  %v3024_v56 = vld [vmem:[%s6167_s0 + $0xd] ss:$16 sm:%s535_s10]   ;;  %s692_s11 = smov 3  ;;  %s705_s18 = smov 192 }
  0x2a   :  { %411 = vrot.lane.b32.xlu0 %v410_v21, %s3546_s15  ;;  %v3004_v28 = vld [vmem:[%s6167_s0 + $0x10e] ss:$16 sm:%s443_s19]   ;;  %480 = vrot.lane.b32.xlu1 %v479_v27, %s3546_s15  ;;  %s600_s19 = smov 3  ;;  %s672_s26 = smov 12 }
  0x2b   :  { %v3005_v29 = vld [vmem:[%s6167_s0 + $0x10e] ss:$16 sm:%s448_s20]   ;;  %v446_v30 = vsel %vm6_vm0, %v3004_v28, %v3003_v26  ;;  %s603_s20 = smov 12  ;;  %v3037_v61 = vld [vmem:[%s6167_s0 + $0x28d] ss:$16 sm:%s600_s19]   ;;  %s682_s4 = smov 192 }
  0x2c   :  { %v3006_v31 = vld [vmem:[%s6167_s0 + $0x10e] ss:$16 sm:%s453_s25]   ;;  %v451_v32 = vsel %vm10_vm1, %v3005_v29, %v446_v30  ;;  %s557_s25 = smov 12  ;;  %v3038_v62 = vld [vmem:[%s6167_s0 + $0x28d] ss:$16 sm:%s603_s20]   ;;  %s745_s13 = smov 48 }
  0x2d   :  { %v3018_v33 = vld [vmem:[%s6167_s0 + $0x38e] ss:$16 sm:%s509_s28]   ;;  %v456_v35 = vsel %vm14_vm2, %v3006_v31, %v451_v32  ;;  %v3028_v48 = vld [vmem:[%s6167_s0 + $0x20d] ss:$16 sm:%s557_s25]   ;;  %s608_s25 = smov 48  ;;  %v606_v0 = vsel %vm6_vm0, %v3038_v62, %v3037_v61  ;;  %s677_s28 = smov 48 }
  0x2e   :  { %v3019_v34 = vld [vmem:[%s6167_s0 + $0x38e] ss:$16 sm:%s512_s29]   ;;  %457 = vrot.lane.b32.xlu0 %v456_v35, %s3546_s15  ;;  %v560_v50 = vsel %vm6_vm0, %v3028_v48, %v3027_v47  ;;  %s723_s23 = smov 48  ;;  %s728_s29 = smov 192 }
  0x2f   :  { %v515_v36 = vsel %vm6_vm0, %v3019_v34, %v3018_v33  ;;  %v3020_v37 = vld [vmem:[%s6167_s0 + $0x38e] ss:$16 sm:%s517_s6]   ;;  %s532_s6 = smov 3  ;;  %v565_v53 = vsel %vm10_vm1, %v3029_v51, %v560_v50  ;;  %v3039_v1 = vld [vmem:[%s6167_s0 + $0x28d] ss:$16 sm:%s608_s25]   ;;  %s623_s25 = smov 3 }
  0x30   :  { %v3021_v38 = vld [vmem:[%s6167_s0 + $0x38e] ss:$16 sm:%s522_s5]   ;;  %v520_v39 = vsel %vm10_vm1, %v3020_v37, %v515_v36  ;;  %v3023_v54 = vld [vmem:[%s6167_s0 + $0xd] ss:$16 sm:%s532_s6]   ;;  %v570_v55 = vsel %vm14_vm2, %v3030_v52, %v565_v53  ;;  %s580_s5 = smov 12  ;;  %v611_v3 = vsel %vm10_vm1, %v3039_v1, %v606_v0  ;;  %s3548_s10 = smov 96  }
  0x31   :  { %v3013_v40 = vld [vmem:[%s6167_s0 + $0x18e] ss:$16 sm:%s486_s9]   ;;  %v525_v41 = vsel %vm14_vm2, %v3021_v38, %v520_v39  ;;  %v538_v58 = vsel %vm6_vm0, %v3024_v56, %v3023_v54  ;;  %v3032_v4 = vld [vmem:[%s6167_s0 + $0x8d] ss:$16 sm:%s577_s30]   ;;  %v616_v5 = vsel %vm14_vm2, %v3040_v2, %v611_v3  ;;  %s796_s9 = smov 192  ;;  %s768_s19 = smov 48 }
  0x32   :  { %v3014_v42 = vld [vmem:[%s6167_s0 + $0x18e] ss:$16 sm:%s489_s14]   ;;  %526 = vrot.lane.b32.xlu1 %v525_v41, %s3546_s15  ;;  %v543_v60 = vsel %vm10_vm1, %v3025_v57, %v538_v58  ;;  %s750_s14 = smov 192  ;;  %s773_s24 = smov 192 }
  0x33   :  { %v3015_v43 = vld [vmem:[%s6167_s0 + $0x18e] ss:$16 sm:%s494_s16]   ;;  %v492_v44 = vsel %vm6_vm0, %v3014_v42, %v3013_v40  ;;  %v548_v63 = vsel %vm14_vm2, %v3026_v59, %v543_v60  ;;  %s646_s16 = smov 3  ;;  %v3033_v6 = vld [vmem:[%s6167_s0 + $0x8d] ss:$16 sm:%s580_s5]   ;;  %s842_s6 = smov 192 }
  0x34   :  { %v3016_v45 = vld [vmem:[%s6167_s0 + $0x18e] ss:$16 sm:%s499_s21]   ;;  %v497_v46 = vsel %vm10_vm1, %v3015_v43, %v492_v44  ;;  %v3034_v7 = vld [vmem:[%s6167_s0 + $0x8d] ss:$16 sm:%s585_s7]   ;;  %s654_s21 = smov 48  ;;  %v583_v8 = vsel %vm6_vm0, %v3033_v6, %v3032_v4  ;;  %s737_s7 = smov 3 }
  0x35   :  { %v502_v49 = vsel %vm14_vm2, %v3016_v45, %v497_v46  ;;  %v3035_v9 = vld [vmem:[%s6167_s0 + $0x8d] ss:$16 sm:%s590_s12]   ;;  %v588_v10 = vsel %vm10_vm1, %v3034_v7, %v583_v8  ;;  %s695_s12 = smov 12  ;;  %v3066_v39 = vld [vmem:[%s6167_s0 + $0x20c] ss:$16 sm:%s737_s7]   ;;  %s819_s20 = smov 192 }
  0x36   :  { %503 = vrot.lane.b32.xlu0 %v502_v49, %s3546_s15  ;;  %571 = vrot.lane.b32.xlu1 %v570_v55, %s3547_s27  ;;  %v3047_v11 = vld [vmem:[%s6167_s0 + $0x30d] ss:$16 sm:%s646_s16]   ;;  %v593_v13 = vsel %vm14_vm2, %v3035_v9, %v588_v10  ;;  %s700_s15 = smov 48  ;;  %s814_s16 = smov 48 }
  0x37   :  { %v3048_v12 = vld [vmem:[%s6167_s0 + $0x30d] ss:$16 sm:%s649_s17]   ;;  %v3068_v43 = vld [vmem:[%s6167_s0 + $0x20c] ss:$16 sm:%s745_s13]   ;;  %s760_s13 = smov 3  ;;  %s888_s30 = smov 192 }
  0x38   :  { %v652_v14 = vsel %vm6_vm0, %v3048_v12, %v3047_v11  ;;  %v3049_v15 = vld [vmem:[%s6167_s0 + $0x30d] ss:$16 sm:%s654_s21]   ;;  %s669_s21 = smov 3  ;;  %v3069_v44 = vld [vmem:[%s6167_s0 + $0x20c] ss:$16 sm:%s750_s14]   ;;  %s809_s14 = smov 12 }
  0x39   :  { %v3050_v16 = vld [vmem:[%s6167_s0 + $0x30d] ss:$16 sm:%s659_s22]   ;;  %v657_v17 = vsel %vm10_vm1, %v3049_v15, %v652_v14  ;;  %s718_s22 = smov 12  ;;  %v3064_v49 = vld [vmem:[%s6167_s0 + $0xc] ss:$16 sm:%s723_s23]   ;;  %s875_s23 = smov 3 }
  0x3a   :  { %549 = vrot.lane.b32.xlu0 %v548_v63, %s3547_s27  ;;  %617 = vrot.lane.b32.xlu1 %v616_v5, %s3547_s27  ;;  %v3042_v18 = vld [vmem:[%s6167_s0 + $0x10d] ss:$16 sm:%s623_s25]   ;;  %v662_v19 = vsel %vm14_vm2, %v3050_v16, %v657_v17  ;;  %s865_s17 = smov 192  ;;  %s928_s25 = smov 48 }
  0x3b   :  { %v3043_v20 = vld [vmem:[%s6167_s0 + $0x10d] ss:$16 sm:%s626_s2]   ;;  %s783_s2 = smov 3  ;;  %v3063_v48 = vld [vmem:[%s6167_s0 + $0xc] ss:$16 sm:%s718_s22]   ;;  %s906_s5 = smov 48 }
  0x3c   :  { %v3044_v21 = vld [vmem:[%s6167_s0 + $0x10d] ss:$16 sm:%s631_s3]   ;;  %v629_v22 = vsel %vm6_vm0, %v3043_v20, %v3042_v18  ;;  %s786_s3 = smov 12  ;;  %v3065_v51 = vld [vmem:[%s6167_s0 + $0xc] ss:$16 sm:%s728_s29]   ;;  %s832_s29 = smov 12 }
  0x3d   :  { %v3045_v23 = vld [vmem:[%s6167_s0 + $0x10d] ss:$16 sm:%s636_s8]   ;;  %v634_v24 = vsel %vm10_vm1, %v3044_v21, %v629_v22  ;;  %s740_s8 = smov 12  ;;  %v3076_v53 = vld [vmem:[%s6167_s0 + $0x28c] ss:$16 sm:%s783_s2]   ;;  %s3549_s22 = smov 88  }
  0x3e   :  { %594 = vrot.lane.b32.xlu0 %v593_v13, %s3547_s27  ;;  %663 = vrot.lane.b32.xlu1 %v662_v19, %s3547_s27  ;;  %v3057_v25 = vld [vmem:[%s6167_s0 + $0x38d] ss:$16 sm:%s692_s11]   ;;  %v639_v27 = vsel %vm14_vm2, %v3045_v23, %v634_v24  ;;  %s860_s11 = smov 48  ;;  %s951_s2 = smov 48 }
  0x3f   :  { %v3058_v26 = vld [vmem:[%s6167_s0 + $0x38d] ss:$16 sm:%s695_s12]   ;;  %v3067_v40 = vld [vmem:[%s6167_s0 + $0x20c] ss:$16 sm:%s740_s8]   ;;  %s791_s8 = smov 48  ;;  %s911_s12 = smov 192 }
  0x40   :  { %v698_v28 = vsel %vm6_vm0, %v3058_v26, %v3057_v25  ;;  %v3059_v29 = vld [vmem:[%s6167_s0 + $0x38d] ss:$16 sm:%s700_s15]   ;;  %s715_s15 = smov 3  ;;  %v743_v42 = vsel %vm6_vm0, %v3067_v40, %v3066_v39  ;;  %v3077_v54 = vld [vmem:[%s6167_s0 + $0x28c] ss:$16 sm:%s786_s3]   ;;  %s956_s7 = smov 192 }
  0x41   :  { %v3060_v30 = vld [vmem:[%s6167_s0 + $0x38d] ss:$16 sm:%s705_s18]   ;;  %v703_v31 = vsel %vm10_vm1, %v3059_v29, %v698_v28  ;;  %v748_v45 = vsel %vm10_vm1, %v3068_v43, %v743_v42  ;;  %v3062_v46 = vld [vmem:[%s6167_s0 + $0xc] ss:$16 sm:%s715_s15]   ;;  %s763_s18 = smov 12  ;;  %v789_v56 = vsel %vm6_vm0, %v3077_v54, %v3076_v53  ;;  %s1025_s15 = smov 192 }
  0x42   :  { %640 = vrot.lane.b32.xlu0 %v639_v27, %s3547_s27  ;;  %v3052_v32 = vld [vmem:[%s6167_s0 + $0x18d] ss:$16 sm:%s669_s21]   ;;  %v708_v33 = vsel %vm14_vm2, %v3060_v30, %v703_v31  ;;  %v753_v47 = vsel %vm14_vm2, %v3069_v44, %v748_v45  ;;  %v721_v50 = vsel %vm6_vm0, %v3063_v48, %v3062_v46  ;;  %s979_s21 = smov 192  ;;  %s1002_s3 = smov 192 }
  0x43   :  { %v3053_v34 = vld [vmem:[%s6167_s0 + $0x18d] ss:$16 sm:%s672_s26]   ;;  %709 = vrot.lane.b32.xlu1 %v708_v33, %s3547_s27  ;;  %v726_v52 = vsel %vm10_vm1, %v3064_v49, %v721_v50  ;;  %s933_s26 = smov 192 }
  0x44   :  { %v3054_v35 = vld [vmem:[%s6167_s0 + $0x18d] ss:$16 sm:%s677_s28]   ;;  %v675_v36 = vsel %vm6_vm0, %v3053_v34, %v3052_v32  ;;  %v731_v55 = vsel %vm14_vm2, %v3065_v51, %v726_v52  ;;  %v3078_v57 = vld [vmem:[%s6167_s0 + $0x28c] ss:$16 sm:%s791_s8]   ;;  %s829_s28 = smov 3  ;;  %s806_s8 = smov 3 }
  0x45   :  { %v3055_v37 = vld [vmem:[%s6167_s0 + $0x18d] ss:$16 sm:%s682_s4]   ;;  %v680_v38 = vsel %vm10_vm1, %v3054_v35, %v675_v36  ;;  %v3079_v58 = vld [vmem:[%s6167_s0 + $0x28c] ss:$16 sm:%s796_s9]   ;;  %v794_v59 = vsel %vm10_vm1, %v3078_v57, %v789_v56  ;;  %s837_s4 = smov 48  ;;  %s855_s9 = smov 12 }
  0x46   :  { %v685_v41 = vsel %vm14_vm2, %v3055_v37, %v680_v38  ;;  %v3071_v60 = vld [vmem:[%s6167_s0 + $0x8c] ss:$16 sm:%s760_s13]   ;;  %v799_v61 = vsel %vm14_vm2, %v3079_v58, %v794_v59  ;;  %v3107_v35 = vld [vmem:[%s6167_s0 + $0x20b] ss:$16 sm:%s928_s25]   ;;  %s943_s25 = smov 3  ;;  %s1071_s13 = smov 192 }
  0x47   :  { %686 = vrot.lane.b32.xlu0 %v685_v41, %s3547_s27  ;;  %754 = vrot.lane.b32.xlu1 %v753_v47, %s3548_s10  ;;  %v3072_v62 = vld [vmem:[%s6167_s0 + $0x8c] ss:$16 sm:%s763_s18]   ;;  %s883_s27 = smov 48  ;;  %s1089_s18 = smov 48 }
  0x48   :  { %v3073_v63 = vld [vmem:[%s6167_s0 + $0x8c] ss:$16 sm:%s768_s19]   ;;  %v766_v0 = vsel %vm6_vm0, %v3072_v62, %v3071_v60  ;;  %s920_s19 = smov 3  ;;  %v3108_v36 = vld [vmem:[%s6167_s0 + $0x20b] ss:$16 sm:%s933_s26]   ;;  %s992_s26 = smov 12 }
  0x49   :  { %v3074_v1 = vld [vmem:[%s6167_s0 + $0x8c] ss:$16 sm:%s773_s24]   ;;  %v771_v2 = vsel %vm10_vm1, %v3073_v63, %v766_v0  ;;  %s878_s24 = smov 12  ;;  %v3105_v31 = vld [vmem:[%s6167_s0 + $0x20b] ss:$16 sm:%s920_s19]   ;;  %s1139_s19 = smov 192 }
  0x4a   :  { %v3086_v3 = vld [vmem:[%s6167_s0 + $0x30c] ss:$16 sm:%s829_s28]   ;;  %v776_v5 = vsel %vm14_vm2, %v3074_v1, %v771_v2  ;;  %v3103_v41 = vld [vmem:[%s6167_s0 + $0xb] ss:$16 sm:%s906_s5]   ;;  %s997_s28 = smov 48  ;;  %s1058_s5 = smov 3 }
  0x4b   :  { %732 = vrot.lane.b32.xlu0 %v731_v55, %s3548_s10  ;;  %800 = vrot.lane.b32.xlu1 %v799_v61, %s3548_s10  ;;  %v3087_v4 = vld [vmem:[%s6167_s0 + $0x30c] ss:$16 sm:%s832_s29]   ;;  %s1048_s29 = smov 192 }
  0x4c   :  { %v835_v6 = vsel %vm6_vm0, %v3087_v4, %v3086_v3  ;;  %v3088_v7 = vld [vmem:[%s6167_s0 + $0x30c] ss:$16 sm:%s837_s4]   ;;  %s852_s4 = smov 3  ;;  %v3104_v43 = vld [vmem:[%s6167_s0 + $0xb] ss:$16 sm:%s911_s12]   ;;  %s1015_s12 = smov 12 }
  0x4d   :  { %v3089_v8 = vld [vmem:[%s6167_s0 + $0x30c] ss:$16 sm:%s842_s6]   ;;  %v840_v9 = vsel %vm10_vm1, %v3088_v7, %v835_v6  ;;  %s901_s6 = smov 12  ;;  %v3118_v50 = vld [vmem:[%s6167_s0 + $0x28b] ss:$16 sm:%s979_s21]   ;;  %s1038_s21 = smov 12 }
  0x4e   :  { %v3081_v10 = vld [vmem:[%s6167_s0 + $0x10c] ss:$16 sm:%s806_s8]   ;;  %v845_v11 = vsel %vm14_vm2, %v3089_v8, %v840_v9  ;;  %v3102_v40 = vld [vmem:[%s6167_s0 + $0xb] ss:$16 sm:%s901_s6]   ;;  %s1111_s8 = smov 48  ;;  %s3550_s6 = smov 80  }
  0x4f   :  { %777 = vrot.lane.b32.xlu0 %v776_v5, %s3548_s10  ;;  %v3082_v12 = vld [vmem:[%s6167_s0 + $0x10c] ss:$16 sm:%s809_s14]   ;;  %846 = vrot.lane.b32.xlu1 %v845_v11, %s3548_s10  ;;  %s966_s14 = smov 3 }
  0x50   :  { %v3083_v13 = vld [vmem:[%s6167_s0 + $0x10c] ss:$16 sm:%s814_s16]   ;;  %v812_v14 = vsel %vm6_vm0, %v3082_v12, %v3081_v10  ;;  %s969_s16 = smov 12  ;;  %v3115_v45 = vld [vmem:[%s6167_s0 + $0x28b] ss:$16 sm:%s966_s14]   ;;  %s1134_s14 = smov 48 }
  0x51   :  { %v3084_v15 = vld [vmem:[%s6167_s0 + $0x10c] ss:$16 sm:%s819_s20]   ;;  %v817_v16 = vsel %vm10_vm1, %v3083_v13, %v812_v14  ;;  %s923_s20 = smov 12  ;;  %v3116_v46 = vld [vmem:[%s6167_s0 + $0x28b] ss:$16 sm:%s969_s16]   ;;  %s1185_s16 = smov 192 }
  0x52   :  { %v3096_v17 = vld [vmem:[%s6167_s0 + $0x38c] ss:$16 sm:%s875_s23]   ;;  %v822_v19 = vsel %vm14_vm2, %v3084_v15, %v817_v16  ;;  %v3106_v32 = vld [vmem:[%s6167_s0 + $0x20b] ss:$16 sm:%s923_s20]   ;;  %s974_s20 = smov 48  ;;  %v972_v48 = vsel %vm6_vm0, %v3116_v46, %v3115_v45  ;;  %s1043_s23 = smov 48 }
  0x53   :  { %v3097_v18 = vld [vmem:[%s6167_s0 + $0x38c] ss:$16 sm:%s878_s24]   ;;  %823 = vrot.lane.b32.xlu0 %v822_v19, %s3548_s10  ;;  %v926_v34 = vsel %vm6_vm0, %v3106_v32, %v3105_v31  ;;  %s1094_s24 = smov 192 }
  0x54   :  { %v881_v20 = vsel %vm6_vm0, %v3097_v18, %v3096_v17  ;;  %v3098_v21 = vld [vmem:[%s6167_s0 + $0x38c] ss:$16 sm:%s883_s27]   ;;  %s898_s27 = smov 3  ;;  %v931_v37 = vsel %vm10_vm1, %v3107_v35, %v926_v34  ;;  %v3117_v49 = vld [vmem:[%s6167_s0 + $0x28b] ss:$16 sm:%s974_s20]   ;;  %s989_s20 = smov 3 }
  0x55   :  { %v3099_v22 = vld [vmem:[%s6167_s0 + $0x38c] ss:$16 sm:%s888_s30]   ;;  %v886_v23 = vsel %vm10_vm1, %v3098_v21, %v881_v20  ;;  %v3101_v38 = vld [vmem:[%s6167_s0 + $0xb] ss:$16 sm:%s898_s27]   ;;  %v936_v39 = vsel %vm14_vm2, %v3108_v36, %v931_v37  ;;  %s946_s30 = smov 12  ;;  %v977_v51 = vsel %vm10_vm1, %v3117_v49, %v972_v48  ;;  %s1208_s27 = smov 192 }
  0x56   :  { %v3091_v24 = vld [vmem:[%s6167_s0 + $0x18c] ss:$16 sm:%s852_s4]   ;;  %v891_v25 = vsel %vm14_vm2, %v3099_v22, %v886_v23  ;;  %v904_v42 = vsel %vm6_vm0, %v3102_v40, %v3101_v38  ;;  %v3110_v52 = vld [vmem:[%s6167_s0 + $0x8b] ss:$16 sm:%s943_s25]   ;;  %v982_v53 = vsel %vm14_vm2, %v3118_v50, %v977_v51  ;;  %s1162_s4 = smov 192  ;;  %s1254_s25 = smov 192 }
  0x57   :  { %v3092_v26 = vld [vmem:[%s6167_s0 + $0x18c] ss:$16 sm:%s855_s9]   ;;  %892 = vrot.lane.b32.xlu1 %v891_v25, %s3548_s10  ;;  %v909_v44 = vsel %vm10_vm1, %v3103_v41, %v904_v42  ;;  %s1116_s9 = smov 192 }
  0x58   :  { %v3093_v27 = vld [vmem:[%s6167_s0 + $0x18c] ss:$16 sm:%s860_s11]   ;;  %v858_v28 = vsel %vm6_vm0, %v3092_v26, %v3091_v24  ;;  %v914_v47 = vsel %vm14_vm2, %v3104_v43, %v909_v44  ;;  %s1012_s11 = smov 3  ;;  %v3111_v54 = vld [vmem:[%s6167_s0 + $0x8b] ss:$16 sm:%s946_s30]   ;;  %s1272_s30 = smov 48 }
  0x59   :  { %v3094_v29 = vld [vmem:[%s6167_s0 + $0x18c] ss:$16 sm:%s865_s17]   ;;  %v863_v30 = vsel %vm10_vm1, %v3093_v27, %v858_v28  ;;  %v3112_v55 = vld [vmem:[%s6167_s0 + $0x8b] ss:$16 sm:%s951_s2]   ;;  %s1020_s17 = smov 48  ;;  %v949_v56 = vsel %vm6_vm0, %v3111_v54, %v3110_v52  ;;  %s1103_s2 = smov 3 }
  0x5a   :  { %v868_v33 = vsel %vm14_vm2, %v3094_v29, %v863_v30  ;;  %v3113_v57 = vld [vmem:[%s6167_s0 + $0x8b] ss:$16 sm:%s956_s7]   ;;  %v954_v58 = vsel %vm10_vm1, %v3112_v55, %v949_v56  ;;  %s1061_s7 = smov 12  ;;  %v3144_v23 = vld [vmem:[%s6167_s0 + $0x20a] ss:$16 sm:%s1103_s2]   ;;  %s1322_s2 = smov 192 }
  0x5b   :  { %869 = vrot.lane.b32.xlu0 %v868_v33, %s3548_s10  ;;  %937 = vrot.lane.b32.xlu1 %v936_v39, %s3549_s22  ;;  %v3125_v59 = vld [vmem:[%s6167_s0 + $0x30b] ss:$16 sm:%s1012_s11]   ;;  %v959_v61 = vsel %vm14_vm2, %v3113_v57, %v954_v58  ;;  %s1066_s10 = smov 48  ;;  %s1180_s11 = smov 48 }
  0x5c   :  { %v3126_v60 = vld [vmem:[%s6167_s0 + $0x30b] ss:$16 sm:%s1015_s12]   ;;  %v3146_v27 = vld [vmem:[%s6167_s0 + $0x20a] ss:$16 sm:%s1111_s8]   ;;  %s1126_s8 = smov 3  ;;  %s1231_s12 = smov 192 }
  0x5d   :  { %v1018_v62 = vsel %vm6_vm0, %v3126_v60, %v3125_v59  ;;  %v3127_v63 = vld [vmem:[%s6167_s0 + $0x30b] ss:$16 sm:%s1020_s17]   ;;  %s1035_s17 = smov 3  ;;  %v3147_v28 = vld [vmem:[%s6167_s0 + $0x20a] ss:$16 sm:%s1116_s9]   ;;  %s1175_s9 = smov 12 }
  0x5e   :  { %v3128_v0 = vld [vmem:[%s6167_s0 + $0x30b] ss:$16 sm:%s1025_s15]   ;;  %v1023_v1 = vsel %vm10_vm1, %v3127_v63, %v1018_v62  ;;  %s1084_s15 = smov 12  ;;  %v3142_v33 = vld [vmem:[%s6167_s0 + $0xa] ss:$16 sm:%s1089_s18]   ;;  %s1241_s18 = smov 3 }
  0x5f   :  { %915 = vrot.lane.b32.xlu0 %v914_v47, %s3549_s22  ;;  %983 = vrot.lane.b32.xlu1 %v982_v53, %s3549_s22  ;;  %v3120_v2 = vld [vmem:[%s6167_s0 + $0x10b] ss:$16 sm:%s989_s20]   ;;  %v1028_v3 = vsel %vm14_vm2, %v3128_v0, %v1023_v1  ;;  %s1294_s20 = smov 48 }
  0x60   :  { %v3121_v4 = vld [vmem:[%s6167_s0 + $0x10b] ss:$16 sm:%s992_s26]   ;;  %s1149_s26 = smov 3  ;;  %v3141_v32 = vld [vmem:[%s6167_s0 + $0xa] ss:$16 sm:%s1084_s15]   ;;  %s3551_s15 = smov 72  }
  0x61   :  { %v3122_v5 = vld [vmem:[%s6167_s0 + $0x10b] ss:$16 sm:%s997_s28]   ;;  %v995_v6 = vsel %vm6_vm0, %v3121_v4, %v3120_v2  ;;  %s1152_s28 = smov 12  ;;  %v3143_v35 = vld [vmem:[%s6167_s0 + $0xa] ss:$16 sm:%s1094_s24]   ;;  %s1198_s24 = smov 12 }
  0x62   :  { %v3123_v7 = vld [vmem:[%s6167_s0 + $0x10b] ss:$16 sm:%s1002_s3]   ;;  %v1000_v8 = vsel %vm10_vm1, %v3122_v5, %v995_v6  ;;  %s1106_s3 = smov 12  ;;  %v3154_v37 = vld [vmem:[%s6167_s0 + $0x28a] ss:$16 sm:%s1149_s26]   ;;  %s1317_s26 = smov 48 }
  0x63   :  { %960 = vrot.lane.b32.xlu0 %v959_v61, %s3549_s22  ;;  %1029 = vrot.lane.b32.xlu1 %v1028_v3, %s3549_s22  ;;  %v3135_v9 = vld [vmem:[%s6167_s0 + $0x38b] ss:$16 sm:%s1058_s5]   ;;  %v1005_v11 = vsel %vm14_vm2, %v3123_v7, %v1000_v8  ;;  %s1226_s5 = smov 48 }
  0x64   :  { %v3136_v10 = vld [vmem:[%s6167_s0 + $0x38b] ss:$16 sm:%s1061_s7]   ;;  %v3145_v24 = vld [vmem:[%s6167_s0 + $0x20a] ss:$16 sm:%s1106_s3]   ;;  %s1157_s3 = smov 48  ;;  %s1277_s7 = smov 192 }
  0x65   :  { %v1064_v12 = vsel %vm6_vm0, %v3136_v10, %v3135_v9  ;;  %v3137_v13 = vld [vmem:[%s6167_s0 + $0x38b] ss:$16 sm:%s1066_s10]   ;;  %s1081_s10 = smov 3  ;;  %v1109_v26 = vsel %vm6_vm0, %v3145_v24, %v3144_v23  ;;  %v3155_v38 = vld [vmem:[%s6167_s0 + $0x28a] ss:$16 sm:%s1152_s28]   ;;  %s1368_s28 = smov 192 }
  0x66   :  { %v3138_v14 = vld [vmem:[%s6167_s0 + $0x38b] ss:$16 sm:%s1071_s13]   ;;  %v1069_v15 = vsel %vm10_vm1, %v3137_v13, %v1064_v12  ;;  %v1114_v29 = vsel %vm10_vm1, %v3146_v27, %v1109_v26  ;;  %v3140_v30 = vld [vmem:[%s6167_s0 + $0xa] ss:$16 sm:%s1081_s10]   ;;  %s1129_s13 = smov 12  ;;  %v1155_v40 = vsel %vm6_vm0, %v3155_v38, %v3154_v37  ;;  %s1391_s10 = smov 192 }
  0x67   :  { %1006 = vrot.lane.b32.xlu0 %v1005_v11, %s3549_s22  ;;  %v3130_v16 = vld [vmem:[%s6167_s0 + $0x18b] ss:$16 sm:%s1035_s17]   ;;  %v1074_v17 = vsel %vm14_vm2, %v3138_v14, %v1069_v15  ;;  %v1119_v31 = vsel %vm14_vm2, %v3147_v28, %v1114_v29  ;;  %v1087_v34 = vsel %vm6_vm0, %v3141_v32, %v3140_v30  ;;  %s1345_s17 = smov 192 }
  0x68   :  { %v3131_v18 = vld [vmem:[%s6167_s0 + $0x18b] ss:$16 sm:%s1038_s21]   ;;  %1075 = vrot.lane.b32.xlu1 %v1074_v17, %s3549_s22  ;;  %v1092_v36 = vsel %vm10_vm1, %v3142_v33, %v1087_v34  ;;  %s1299_s21 = smov 192 }
  0x69   :  { %v3132_v19 = vld [vmem:[%s6167_s0 + $0x18b] ss:$16 sm:%s1043_s23]   ;;  %v1041_v20 = vsel %vm6_vm0, %v3131_v18, %v3130_v16  ;;  %v1097_v39 = vsel %vm14_vm2, %v3143_v35, %v1092_v36  ;;  %v3156_v41 = vld [vmem:[%s6167_s0 + $0x28a] ss:$16 sm:%s1157_s3]   ;;  %s1195_s23 = smov 3  ;;  %s1172_s3 = smov 3 }
  0x6a   :  { %v3133_v21 = vld [vmem:[%s6167_s0 + $0x18b] ss:$16 sm:%s1048_s29]   ;;  %v1046_v22 = vsel %vm10_vm1, %v3132_v19, %v1041_v20  ;;  %v3157_v42 = vld [vmem:[%s6167_s0 + $0x28a] ss:$16 sm:%s1162_s4]   ;;  %v1160_v43 = vsel %vm10_vm1, %v3156_v41, %v1155_v40  ;;  %s1203_s29 = smov 48  ;;  %s1221_s4 = smov 12 }
  0x6b   :  { %v1051_v25 = vsel %vm14_vm2, %v3133_v21, %v1046_v22  ;;  %v3149_v44 = vld [vmem:[%s6167_s0 + $0x8a] ss:$16 sm:%s1126_s8]   ;;  %v1165_v45 = vsel %vm14_vm2, %v3157_v42, %v1160_v43  ;;  %v3185_v20 = vld [vmem:[%s6167_s0 + $0x209] ss:$16 sm:%s1294_s20]   ;;  %s1309_s20 = smov 3  ;;  %s1437_s8 = smov 192 }
  0x6c   :  { %1052 = vrot.lane.b32.xlu0 %v1051_v25, %s3549_s22  ;;  %1120 = vrot.lane.b32.xlu1 %v1119_v31, %s3550_s6  ;;  %v3150_v46 = vld [vmem:[%s6167_s0 + $0x8a] ss:$16 sm:%s1129_s13]   ;;  %s1249_s22 = smov 48  ;;  %s1455_s13 = smov 48 }
  0x6d   :  { %v3151_v47 = vld [vmem:[%s6167_s0 + $0x8a] ss:$16 sm:%s1134_s14]   ;;  %v1132_v48 = vsel %vm6_vm0, %v3150_v46, %v3149_v44  ;;  %s1286_s14 = smov 3  ;;  %v3186_v21 = vld [vmem:[%s6167_s0 + $0x209] ss:$16 sm:%s1299_s21]   ;;  %s1358_s21 = smov 12 }
  0x6e   :  { %v3152_v49 = vld [vmem:[%s6167_s0 + $0x8a] ss:$16 sm:%s1139_s19]   ;;  %v1137_v50 = vsel %vm10_vm1, %v3151_v47, %v1132_v48  ;;  %s1244_s19 = smov 12  ;;  %v3183_v16 = vld [vmem:[%s6167_s0 + $0x209] ss:$16 sm:%s1286_s14]   ;;  %s12_s14 = smov 192 }
  0x6f   :  { %v3164_v51 = vld [vmem:[%s6167_s0 + $0x30a] ss:$16 sm:%s1195_s23]   ;;  %v1142_v53 = vsel %vm14_vm2, %v3152_v49, %v1137_v50  ;;  %v3181_v27 = vld [vmem:[%s6167_s0 + $0x9] ss:$16 sm:%s1272_s30]   ;;  %s1363_s23 = smov 48  ;;  %s1424_s30 = smov 3 }
  0x70   :  { %1098 = vrot.lane.b32.xlu0 %v1097_v39, %s3550_s6  ;;  %1166 = vrot.lane.b32.xlu1 %v1165_v45, %s3550_s6  ;;  %v3165_v52 = vld [vmem:[%s6167_s0 + $0x30a] ss:$16 sm:%s1198_s24]   ;;  %s1414_s24 = smov 192 }
  0x71   :  { %v1201_v54 = vsel %vm6_vm0, %v3165_v52, %v3164_v51  ;;  %v3166_v55 = vld [vmem:[%s6167_s0 + $0x30a] ss:$16 sm:%s1203_s29]   ;;  %s1218_s29 = smov 3  ;;  %v3182_v30 = vld [vmem:[%s6167_s0 + $0x9] ss:$16 sm:%s1277_s7]   ;;  %s1381_s7 = smov 12 }
  0x72   :  { %v3167_v56 = vld [vmem:[%s6167_s0 + $0x30a] ss:$16 sm:%s1208_s27]   ;;  %v1206_v57 = vsel %vm10_vm1, %v3166_v55, %v1201_v54  ;;  %s1267_s27 = smov 12  ;;  %v3196_v37 = vld [vmem:[%s6167_s0 + $0x289] ss:$16 sm:%s1345_s17]   ;;  %s1404_s17 = smov 12 }
  0x73   :  { %v3159_v58 = vld [vmem:[%s6167_s0 + $0x10a] ss:$16 sm:%s1172_s3]   ;;  %v1211_v59 = vsel %vm14_vm2, %v3167_v56, %v1206_v57  ;;  %v3180_v26 = vld [vmem:[%s6167_s0 + $0x9] ss:$16 sm:%s1267_s27]   ;;  %s1477_s3 = smov 48  ;;  %s3552_s27 = smov 64  }
  0x74   :  { %1143 = vrot.lane.b32.xlu0 %v1142_v53, %s3550_s6  ;;  %v3160_v60 = vld [vmem:[%s6167_s0 + $0x10a] ss:$16 sm:%s1175_s9]   ;;  %1212 = vrot.lane.b32.xlu1 %v1211_v59, %s3550_s6  ;;  %s1332_s9 = smov 3 }
  0x75   :  { %v3161_v61 = vld [vmem:[%s6167_s0 + $0x10a] ss:$16 sm:%s1180_s11]   ;;  %v1178_v62 = vsel %vm6_vm0, %v3160_v60, %v3159_v58  ;;  %s1335_s11 = smov 12  ;;  %v3193_v32 = vld [vmem:[%s6167_s0 + $0x289] ss:$16 sm:%s1332_s9]   ;;  %s8_s9 = smov 48 }
  0x76   :  { %v3162_v63 = vld [vmem:[%s6167_s0 + $0x10a] ss:$16 sm:%s1185_s16]   ;;  %v1183_v0 = vsel %vm10_vm1, %v3161_v61, %v1178_v62  ;;  %s1289_s16 = smov 12  ;;  %v3194_v33 = vld [vmem:[%s6167_s0 + $0x289] ss:$16 sm:%s1335_s11]   ;;  %s85_s11 = smov 12 }
  0x77   :  { %v3174_v1 = vld [vmem:[%s6167_s0 + $0x38a] ss:$16 sm:%s1241_s18]   ;;  %v1188_v3 = vsel %vm14_vm2, %v3162_v63, %v1183_v0  ;;  %v3184_v17 = vld [vmem:[%s6167_s0 + $0x209] ss:$16 sm:%s1289_s16]   ;;  %s1340_s16 = smov 48  ;;  %v1338_v35 = vsel %vm6_vm0, %v3194_v33, %v3193_v32  ;;  %s1409_s18 = smov 48 }
  0x78   :  { %v3175_v2 = vld [vmem:[%s6167_s0 + $0x38a] ss:$16 sm:%s1244_s19]   ;;  %1189 = vrot.lane.b32.xlu0 %v1188_v3, %s3550_s6  ;;  %v4335_v14 = vpop.permute.xlu1 %228   ;;  %v1292_v19 = vsel %vm6_vm0, %v3184_v17, %v3183_v16  ;;  %s1460_s19 = smov 192 }
  0x79   :  { %v1247_v4 = vsel %vm6_vm0, %v3175_v2, %v3174_v1  ;;  %v3176_v5 = vld [vmem:[%s6167_s0 + $0x38a] ss:$16 sm:%s1249_s22]   ;;  %s1264_s22 = smov 3  ;;  %v1297_v23 = vsel %vm10_vm1, %v3185_v20, %v1292_v19  ;;  %v3195_v36 = vld [vmem:[%s6167_s0 + $0x289] ss:$16 sm:%s1340_s16]   ;;  %s1355_s16 = smov 3 }
  0x7a   :  { %v3177_v6 = vld [vmem:[%s6167_s0 + $0x38a] ss:$16 sm:%s1254_s25]   ;;  %v1252_v7 = vsel %vm10_vm1, %v3176_v5, %v1247_v4  ;;  %v3179_v24 = vld [vmem:[%s6167_s0 + $0x9] ss:$16 sm:%s1264_s22]   ;;  %v1302_v25 = vsel %vm14_vm2, %v3186_v21, %v1297_v23  ;;  %s1312_s25 = smov 12  ;;  %v1343_v39 = vsel %vm10_vm1, %v3195_v36, %v1338_v35  ;;  %s1528_s22 = smov 192 }
  0x7b   :  { %v3169_v8 = vld [vmem:[%s6167_s0 + $0x18a] ss:$16 sm:%s1218_s29]   ;;  %v1257_v9 = vsel %vm14_vm2, %v3177_v6, %v1252_v7  ;;  %v1270_v29 = vsel %vm6_vm0, %v3180_v26, %v3179_v24  ;;  %v3188_v40 = vld [vmem:[%s6167_s0 + $0x89] ss:$16 sm:%s1309_s20]   ;;  %v1348_v41 = vsel %vm14_vm2, %v3196_v37, %v1343_v39  ;;  %s32_s29 = smov 192  ;;  %s1630_s20 = smov 3 }
  0x7c   :  { %v3170_v10 = vld [vmem:[%s6167_s0 + $0x18a] ss:$16 sm:%s1221_s4]   ;;  %1258 = vrot.lane.b32.xlu1 %v1257_v9, %s3550_s6  ;;  %v4352_v22 = vpop.permute.xlu0 %183   ;;  %v1275_v31 = vsel %vm10_vm1, %v3181_v27, %v1270_v29  ;;  %s1482_s4 = smov 192 }
  0x7d   :  { %v3171_v11 = vld [vmem:[%s6167_s0 + $0x18a] ss:$16 sm:%s1226_s5]   ;;  %v1224_v12 = vsel %vm6_vm0, %v3170_v10, %v3169_v8  ;;  %v1280_v34 = vsel %vm14_vm2, %v3182_v30, %v1275_v31  ;;  %s1378_s5 = smov 3  ;;  %v3189_v42 = vld [vmem:[%s6167_s0 + $0x89] ss:$16 sm:%s1312_s25]   ;;  %s1492_s25 = smov 3 }
  0x7e   :  { %v3172_v13 = vld [vmem:[%s6167_s0 + $0x18a] ss:$16 sm:%s1231_s12]   ;;  %v1229_v15 = vsel %vm10_vm1, %v3171_v11, %v1224_v12  ;;  %v3190_v43 = vld [vmem:[%s6167_s0 + $0x89] ss:$16 sm:%s1317_s26]   ;;  %s1386_s12 = smov 48  ;;  %v1315_v45 = vsel %vm6_vm0, %v3189_v42, %v3188_v40  ;;  %s1469_s26 = smov 3 }
  0x7f   :  { %v1234_v18 = vsel %vm14_vm2, %v3172_v13, %v1229_v15  ;;  %v3191_v46 = vld [vmem:[%s6167_s0 + $0x89] ss:$16 sm:%s1322_s2]   ;;  %v1320_v47 = vsel %vm10_vm1, %v3190_v43, %v1315_v45  ;;  %s1427_s2 = smov 12  ;;  %v3222_v17 = vld [vmem:[%s6167_s0 + $0x208] ss:$16 sm:%s1469_s26]   ;;  %s2255_s26 = smov 48 }
  0x80   :  { %1235 = vrot.lane.b32.xlu0 %v1234_v18, %s3550_s6  ;;  %v4366_v28 = vpop.permute.xlu1 %251   ;;  %1303 = vrot.lane.b32.xlu1 %v1302_v25, %s3551_s15  ;;  %v3203_v48 = vld [vmem:[%s6167_s0 + $0x309] ss:$16 sm:%s1378_s5]   ;;  %v1325_v50 = vsel %vm14_vm2, %v3191_v46, %v1320_v47  ;;  %s1432_s6 = smov 48  ;;  %s1500_s5 = smov 48 }
  0x81   :  { %v3204_v49 = vld [vmem:[%s6167_s0 + $0x309] ss:$16 sm:%s1381_s7]   ;;  %v3224_v21 = vld [vmem:[%s6167_s0 + $0x208] ss:$16 sm:%s1477_s3]   ;;  %s2_s3 = smov 3  ;;  %s148_s7 = smov 12 }
  0x82   :  { %v1384_v51 = vsel %vm6_vm0, %v3204_v49, %v3203_v48  ;;  %v3205_v52 = vld [vmem:[%s6167_s0 + $0x309] ss:$16 sm:%s1386_s12]   ;;  %s1401_s12 = smov 3  ;;  %v3225_v23 = vld [vmem:[%s6167_s0 + $0x208] ss:$16 sm:%s1482_s4]   ;;  %s1495_s4 = smov 12 }
  0x83   :  { %v3206_v53 = vld [vmem:[%s6167_s0 + $0x309] ss:$16 sm:%s1391_s10]   ;;  %v1389_v55 = vsel %vm10_vm1, %v3205_v52, %v1384_v51  ;;  %s1450_s10 = smov 12  ;;  %v3220_v30 = vld [vmem:[%s6167_s0 + $0x8] ss:$16 sm:%s1455_s13]   ;;  %s103_s13 = smov 3 }
  0x84   :  { %v4388_v38 = vpop.permute.xlu0 %205   ;;  %1281 = vrot.lane.b32.xlu0 %v1280_v34, %s3551_s15  ;;  %1349 = vrot.lane.b32.xlu1 %v1348_v41, %s3551_s15  ;;  %v3198_v56 = vld [vmem:[%s6167_s0 + $0x109] ss:$16 sm:%s1355_s16]   ;;  %v1394_v57 = vsel %vm14_vm2, %v3206_v53, %v1389_v55  ;;  %s1515_s16 = smov 3 }
  0x85   :  { %v3199_v58 = vld [vmem:[%s6167_s0 + $0x109] ss:$16 sm:%s1358_s21]   ;;  %s19_s21 = smov 3  ;;  %v3219_v29 = vld [vmem:[%s6167_s0 + $0x8] ss:$16 sm:%s1450_s10]   ;;  %s1505_s10 = smov 192 }
  0x86   :  { %v3200_v59 = vld [vmem:[%s6167_s0 + $0x109] ss:$16 sm:%s1363_s23]   ;;  %v1361_v61 = vsel %vm6_vm0, %v3199_v58, %v3198_v56  ;;  %s22_s23 = smov 12  ;;  %v3221_v33 = vld [vmem:[%s6167_s0 + $0x8] ss:$16 sm:%s1460_s19]   ;;  %s1518_s19 = smov 12 }
  0x87   :  { %v3201_v62 = vld [vmem:[%s6167_s0 + $0x109] ss:$16 sm:%s1368_s28]   ;;  %v1366_v63 = vsel %vm10_vm1, %v3200_v59, %v1361_v61  ;;  %s1472_s28 = smov 12  ;;  %v2910_v35 = vld [vmem:[%s6167_s0 + $0x80] ss:$16 sm:%s19_s21]   ;;  %s1706_s21 = smov 48 }
  0x88   :  { %v4402_v44 = vpop.permute.xlu1 %297   ;;  %1326 = vrot.lane.b32.xlu0 %v1325_v50, %s3551_s15  ;;  %1395 = vrot.lane.b32.xlu1 %v1394_v57, %s3551_s15  ;;  %v3213_v0 = vld [vmem:[%s6167_s0 + $0x389] ss:$16 sm:%s1424_s30]   ;;  %v1371_v2 = vsel %vm14_vm2, %v3201_v62, %v1366_v63  ;;  %s1538_s30 = smov 3 }
  0x89   :  { %v3214_v1 = vld [vmem:[%s6167_s0 + $0x389] ss:$16 sm:%s1427_s2]   ;;  %v3223_v18 = vld [vmem:[%s6167_s0 + $0x208] ss:$16 sm:%s1472_s28]   ;;  %s27_s28 = smov 48  ;;  %s1757_s2 = smov 192 }
  0x8a   :  { %v1430_v3 = vsel %vm6_vm0, %v3214_v1, %v3213_v0  ;;  %v3215_v4 = vld [vmem:[%s6167_s0 + $0x389] ss:$16 sm:%s1432_s6]   ;;  %s1447_s6 = smov 3  ;;  %v1475_v20 = vsel %vm6_vm0, %v3223_v18, %v3222_v17  ;;  %v2911_v36 = vld [vmem:[%s6167_s0 + $0x80] ss:$16 sm:%s22_s23]   ;;  %s1564_s23 = smov 12 }
  0x8b   :  { %v3216_v5 = vld [vmem:[%s6167_s0 + $0x389] ss:$16 sm:%s1437_s8]   ;;  %v1435_v7 = vsel %vm10_vm1, %v3215_v4, %v1430_v3  ;;  %v1480_v25 = vsel %vm10_vm1, %v3224_v21, %v1475_v20  ;;  %v3218_v26 = vld [vmem:[%s6167_s0 + $0x8] ss:$16 sm:%s1447_s6]   ;;  %s4_s8 = smov 12  ;;  %v25_v39 = vsel %vm6_vm0, %v2911_v36, %v2910_v35  ;;  %s82_s6 = smov 3 }
  0x8c   :  { %v4424_v54 = vpop.permute.xlu0 %274   ;;  %1372 = vrot.lane.b32.xlu0 %v1371_v2, %s3551_s15  ;;  %v3208_v8 = vld [vmem:[%s6167_s0 + $0x189] ss:$16 sm:%s1401_s12]   ;;  %v1440_v9 = vsel %vm14_vm2, %v3216_v5, %v1435_v7  ;;  %v1485_v27 = vsel %vm14_vm2, %v3225_v23, %v1480_v25  ;;  %v1453_v32 = vsel %vm6_vm0, %v3219_v29, %v3218_v26  ;;  %s90_s12 = smov 48 }
  0x8d   :  { %v3209_v10 = vld [vmem:[%s6167_s0 + $0x189] ss:$16 sm:%s1404_s17]   ;;  %1441 = vrot.lane.b32.xlu1 %v1440_v9, %s3551_s15  ;;  %v1458_v34 = vsel %vm10_vm1, %v3220_v30, %v1453_v32  ;;  %s1551_s17 = smov 192 }
  0x8e   :  { %v3210_v11 = vld [vmem:[%s6167_s0 + $0x189] ss:$16 sm:%s1409_s18]   ;;  %v1407_v13 = vsel %vm6_vm0, %v3209_v10, %v3208_v8  ;;  %v1463_v37 = vsel %vm14_vm2, %v3221_v33, %v1458_v34  ;;  %v2912_v40 = vld [vmem:[%s6167_s0 + $0x80] ss:$16 sm:%s27_s28]   ;;  %s111_s28 = smov 48  ;;  %s124_s18 = smov 3 }
  0x8f   :  { %v3211_v15 = vld [vmem:[%s6167_s0 + $0x189] ss:$16 sm:%s1414_s24]   ;;  %v1412_v16 = vsel %vm10_vm1, %v3210_v11, %v1407_v13  ;;  %v2913_v41 = vld [vmem:[%s6167_s0 + $0x80] ss:$16 sm:%s32_s29]   ;;  %v30_v43 = vsel %vm10_vm1, %v2912_v40, %v25_v39  ;;  %s116_s29 = smov 192  ;;  %s1569_s24 = smov 48 }
  0x90   :  { %v4438_v60 = vpop.permute.xlu1 %343   ;;  %v1417_v19 = vsel %vm14_vm2, %v3211_v15, %v1412_v16  ;;  %v3_v45 = vld [vmem:[%s6167_s0] ss:$16 sm:%s2_s3]   ;;  %v35_v46 = vsel %vm14_vm2, %v2913_v41, %v30_v43  ;;  %v3232_v52 = vld [vmem:[%s6167_s0 + $0x288] ss:$16 sm:%s1515_s16]   ;;  %s132_s3 = smov 48  ;;  %s153_s16 = smov 48 }
  0x91   :  { %1418 = vrot.lane.b32.xlu0 %v1417_v19, %s3551_s15  ;;  %1486 = vrot.lane.b32.xlu1 %v1485_v27, %s3552_s27  ;;  %s1523_s15 = smov 48  ;;  %v5_v47 = vld [vmem:[%s6167_s0] ss:$16 sm:%s4_s8]   ;;  %s1541_s8 = smov 12 }
  0x92   :  { %v9_v48 = vld [vmem:[%s6167_s0] ss:$16 sm:%s8_s9]   ;;  %2914 = vst.msk [vmem:[%s6168_s1 + $0x8] sm:$0xff] %vm16_vm3, %v35_v46   ;;  %v7_v50 = vsel %vm6_vm0, %v5_v47, %v3_v45  ;;  %s1546_s9 = smov 48 }
  0x93   :  { %v13_v51 = vld [vmem:[%s6167_s0] ss:$16 sm:%s12_s14]   ;;  %2958 = vst.msk [vmem:[%s6168_s1 + $0x8] sm:$0xff] %vm185_vm4, %v4335_v14   ;;  %v11_v14 = vsel %vm10_vm1, %v9_v48, %v7_v50  ;;  %s1660_s14 = smov 48 }
  0x94   :  { %v4460_v6 = vpop.permute.xlu0 %320   ;;  %v4474_v12 = vpop.permute.xlu1 %388   ;;  %v3233_v53 = vld [vmem:[%s6167_s0 + $0x288] ss:$16 sm:%s1518_s19]   ;;  %v15_v56 = vsel %vm14_vm2, %v13_v51, %v11_v14  ;;  %s106_s19 = smov 12  ;;  %v2930_v3 = vld [vmem:[%s6167_s0 + $0x280] ss:$16 sm:%s103_s13]   ;;  %s1655_s13 = smov 12 }
  0x95   :  { %1464 = vrot.lane.b32.xlu0 %v1463_v37, %s3552_s27  ;;  %v3234_v55 = vld [vmem:[%s6167_s0 + $0x288] ss:$16 sm:%s1523_s15]   ;;  %v1521_v57 = vsel %vm6_vm0, %v3233_v53, %v3232_v52  ;;  %17 = vst.msk [vmem:[%s6168_s1] sm:$0xff] %vm16_vm3, %v15_v56   ;;  %s1561_s15 = smov 3 }
  0x96   :  { %v3235_v58 = vld [vmem:[%s6167_s0 + $0x288] ss:$16 sm:%s1528_s22]   ;;  %v1526_v62 = vsel %vm10_vm1, %v3234_v55, %v1521_v57  ;;  %186 = vst.msk [vmem:[%s6168_s1] sm:$0xff] %vm185_vm4, %v4352_v22   ;;  %s53_s22 = smov 192 }
  0x97   :  { %v3227_v59 = vld [vmem:[%s6167_s0 + $0x88] ss:$16 sm:%s1492_s25]   ;;  %v1531_v22 = vsel %vm14_vm2, %v3235_v58, %v1526_v62  ;;  %v2931_v7 = vld [vmem:[%s6167_s0 + $0x280] ss:$16 sm:%s106_s19]   ;;  %s95_s19 = smov 192  ;;  %s1607_s25 = smov 3 }
  0x98   :  { %v4496_v24 = vpop.permute.xlu0 %366   ;;  %v4510_v31 = vpop.permute.xlu1 %434   ;;  %v3228_v63 = vld [vmem:[%s6167_s0 + $0x88] ss:$16 sm:%s1495_s4]   ;;  %1532 = vrot.lane.b32.xlu1 %v1531_v22, %s3552_s27  ;;  %v109_v9 = vsel %vm6_vm0, %v2931_v7, %v2930_v3  ;;  %s137_s4 = smov 192 }
  0x99   :  { %v3229_v0 = vld [vmem:[%s6167_s0 + $0x88] ss:$16 sm:%s1500_s5]   ;;  %v1498_v1 = vsel %vm6_vm0, %v3228_v63, %v3227_v59  ;;  %369 = vst.msk [vmem:[%s6168_s1] sm:$0xff] %vm368_vm5, %v4496_v24   ;;  %s1615_s5 = smov 48 }
  0x9a   :  { %v3230_v2 = vld [vmem:[%s6167_s0 + $0x88] ss:$16 sm:%s1505_s10]   ;;  %v1503_v5 = vsel %vm10_vm1, %v3229_v0, %v1498_v1  ;;  %v2932_v10 = vld [vmem:[%s6167_s0 + $0x280] ss:$16 sm:%s111_s28]   ;;  %s1633_s28 = smov 12  ;;  %s1701_s10 = smov 12 }
  0x9b   :  { %v1508_v8 = vsel %vm14_vm2, %v3230_v2, %v1503_v5  ;;  %v2933_v11 = vld [vmem:[%s6167_s0 + $0x280] ss:$16 sm:%s116_s29]   ;;  %v114_v13 = vsel %vm10_vm1, %v2932_v10, %v109_v9  ;;  %s1574_s29 = smov 192  ;;  %v3242_v23 = vld [vmem:[%s6167_s0 + $0x308] ss:$16 sm:%s1561_s15]   ;;  %s1592_s15 = smov 48 }
  0x9c   :  { %v412_v42 = vpop.permute.xlu0 %411   ;;  %v4544_v49 = vpop.permute.xlu1 %480   ;;  %1509 = vrot.lane.b32.xlu0 %v1508_v8, %s3552_s27  ;;  %v2925_v15 = vld [vmem:[%s6167_s0 + $0x200] ss:$16 sm:%s82_s6]   ;;  %v119_v17 = vsel %vm14_vm2, %v2933_v11, %v114_v13  ;;  %s1643_s6 = smov 192 }
  0x9d   :  { %2997 = vst.msk [vmem:[%s6168_s1 + $0x8] sm:$0xff] %vm368_vm5, %v412_v42   ;;  %v2926_v18 = vld [vmem:[%s6167_s0 + $0x200] ss:$16 sm:%s85_s11]   ;;  %s1620_s11 = smov 192 }
  0x9e   :  { %v2927_v19 = vld [vmem:[%s6167_s0 + $0x200] ss:$16 sm:%s90_s12]   ;;  %2934 = vst.msk [vmem:[%s6168_s1 + $0x28] sm:$0xff] %vm16_vm3, %v119_v17   ;;  %v88_v20 = vsel %vm6_vm0, %v2926_v18, %v2925_v15  ;;  %s40_s12 = smov 3 }
  0x9f   :  { %v2928_v21 = vld [vmem:[%s6167_s0 + $0x200] ss:$16 sm:%s95_s19]   ;;  %2963 = vst.msk [vmem:[%s6168_s1 + $0x28] sm:$0xff] %vm185_vm4, %v4366_v28   ;;  %v93_v28 = vsel %vm10_vm1, %v2927_v19, %v88_v20  ;;  %s1587_s19 = smov 12 }
  0xa0   :  { %v4581_v61 = vpop.permute.xlu0 %457   ;;  %v3243_v25 = vld [vmem:[%s6167_s0 + $0x308] ss:$16 sm:%s1564_s23]   ;;  %v98_v27 = vsel %vm14_vm2, %v2928_v21, %v93_v28  ;;  %s127_s23 = smov 12  ;;  %3002 = vst.msk [vmem:[%s6168_s1 + $0x28] sm:$0xff] %vm368_vm5, %v4510_v31  }
  0xa1   :  { %v3244_v26 = vld [vmem:[%s6167_s0 + $0x308] ss:$16 sm:%s1569_s24]   ;;  %v1567_v29 = vsel %vm6_vm0, %v3243_v25, %v3242_v23  ;;  %2929 = vst.msk [vmem:[%s6168_s1 + $0x20] sm:$0xff] %vm16_vm3, %v98_v27   ;;  %s1744_s24 = smov 3 }
  0xa2   :  { %v3245_v30 = vld [vmem:[%s6167_s0 + $0x308] ss:$16 sm:%s1574_s29]   ;;  %v1572_v31 = vsel %vm10_vm1, %v3244_v26, %v1567_v29  ;;  %2953 = vst.msk [vmem:[%s6168_s1 + $0x20] sm:$0xff] %vm185_vm4, %v4388_v38   ;;  %s1597_s29 = smov 192 }
  0xa3   :  { %v3237_v32 = vld [vmem:[%s6167_s0 + $0x108] ss:$16 sm:%s1538_s30]   ;;  %v1577_v38 = vsel %vm14_vm2, %v3245_v30, %v1572_v31  ;;  %v2935_v39 = vld [vmem:[%s6167_s0 + $0x300] ss:$16 sm:%s124_s18]   ;;  %s48_s18 = smov 48  ;;  %s145_s30 = smov 3 }
  0xa4   :  { %v4607_v4 = vpop.permute.xlu1 %526   ;;  %v3238_v33 = vld [vmem:[%s6167_s0 + $0x108] ss:$16 sm:%s1541_s8]   ;;  %1578 = vrot.lane.b32.xlu1 %v1577_v38, %s3552_s27  ;;  %2992 = vst.msk [vmem:[%s6168_s1 + $0x20] sm:$0xff] %vm368_vm5, %v4474_v12   ;;  %s74_s8 = smov 192 }
  0xa5   :  { %v3239_v34 = vld [vmem:[%s6167_s0 + $0x108] ss:$16 sm:%s1546_s9]   ;;  %v1544_v36 = vsel %vm6_vm0, %v3238_v33, %v3237_v32  ;;  %v2936_v41 = vld [vmem:[%s6167_s0 + $0x300] ss:$16 sm:%s127_s23]   ;;  %s1652_s9 = smov 3  ;;  %s1711_s23 = smov 192 }
  0xa6   :  { %v3240_v37 = vld [vmem:[%s6167_s0 + $0x108] ss:$16 sm:%s1551_s17]   ;;  %v1549_v40 = vsel %vm10_vm1, %v3239_v34, %v1544_v36  ;;  %s43_s17 = smov 12  ;;  %v130_v43 = vsel %vm6_vm0, %v2936_v41, %v2935_v39  ;;  %v2937_v45 = vld [vmem:[%s6167_s0 + $0x300] ss:$16 sm:%s132_s3]   ;;  %s3555_s3 = smov 40  }
  0xa7   :  { %v1554_v42 = vsel %vm14_vm2, %v3240_v37, %v1549_v40  ;;  %v2938_v46 = vld [vmem:[%s6167_s0 + $0x300] ss:$16 sm:%s137_s4]   ;;  %v135_v47 = vsel %vm10_vm1, %v2937_v45, %v130_v43  ;;  %s1610_s4 = smov 12  ;;  %v3252_v56 = vld [vmem:[%s6167_s0 + $0x388] ss:$16 sm:%s1607_s25]   ;;  %s61_s25 = smov 3 }
  0xa8   :  { %v4632_v16 = vpop.permute.xlu0 %503   ;;  %v572_v24 = vpop.permute.xlu1 %571   ;;  %1555 = vrot.lane.b32.xlu0 %v1554_v42, %s3552_s27  ;;  %v2915_v48 = vld [vmem:[%s6167_s0 + $0x100] ss:$16 sm:%s40_s12]   ;;  %v140_v50 = vsel %vm14_vm2, %v2938_v46, %v135_v47  ;;  %s1584_s12 = smov 3 }
  0xa9   :  { %3031 = vst.msk [vmem:[%s6168_s1 + $0x20] sm:$0xff] %vm551_vm6, %v572_v24   ;;  %v2916_v51 = vld [vmem:[%s6167_s0 + $0x100] ss:$16 sm:%s43_s17]   ;;  %s158_s17 = smov 192 }
  0xaa   :  { %v2917_v52 = vld [vmem:[%s6167_s0 + $0x100] ss:$16 sm:%s48_s18]   ;;  %2939 = vst.msk [vmem:[%s6168_s1 + $0x30] sm:$0xff] %vm16_vm3, %v140_v50   ;;  %v46_v53 = vsel %vm6_vm0, %v2916_v51, %v2915_v48  ;;  %s2763_s18 = smov 192 }
  0xab   :  { %v2918_v55 = vld [vmem:[%s6167_s0 + $0x100] ss:$16 sm:%s53_s22]   ;;  %2973 = vst.msk [vmem:[%s6168_s1 + $0x30] sm:$0xff] %vm185_vm4, %v4402_v44   ;;  %v51_v44 = vsel %vm10_vm1, %v2917_v52, %v46_v53  ;;  %s1747_s22 = smov 12 }
  0xac   :  { %v550_v35 = vpop.permute.xlu0 %549   ;;  %v618_v12 = vpop.permute.xlu1 %617   ;;  %v3253_v57 = vld [vmem:[%s6167_s0 + $0x388] ss:$16 sm:%s1610_s4]   ;;  %v56_v62 = vsel %vm14_vm2, %v2918_v55, %v51_v44  ;;  %3012 = vst.msk [vmem:[%s6168_s1 + $0x30] sm:$0xff] %vm368_vm5, %v4544_v49   ;;  %s3554_s4 = smov 48  }
  0xad   :  { %552 = vst.msk [vmem:[%s6168_s1] sm:$0xff] %vm551_vm6, %v550_v35   ;;  %3041 = vst.msk [vmem:[%s6168_s1 + $0x28] sm:$0xff] %vm551_vm6, %v618_v12   ;;  %v3254_v58 = vld [vmem:[%s6167_s0 + $0x388] ss:$16 sm:%s1615_s5]   ;;  %v1613_v63 = vsel %vm6_vm0, %v3253_v57, %v3252_v56  ;;  %s1675_s5 = smov 3 }
  0xae   :  { %v3255_v0 = vld [vmem:[%s6167_s0 + $0x388] ss:$16 sm:%s1620_s11]   ;;  %2919 = vst.msk [vmem:[%s6168_s1 + $0x10] sm:$0xff] %vm16_vm3, %v56_v62   ;;  %v1618_v49 = vsel %vm10_vm1, %v3254_v58, %v1613_v63  ;;  %s1683_s11 = smov 48 }
  0xaf   :  { %v3247_v22 = vld [vmem:[%s6167_s0 + $0x188] ss:$16 sm:%s1584_s12]   ;;  %2968 = vst.msk [vmem:[%s6168_s1 + $0x10] sm:$0xff] %vm185_vm4, %v4424_v54   ;;  %v1623_v54 = vsel %vm14_vm2, %v3255_v0, %v1618_v49  ;;  %s2456_s12 = smov 12 }
  0xb0   :  { %v595_v14 = vpop.permute.xlu0 %594   ;;  %v664_v59 = vpop.permute.xlu1 %663   ;;  %v3248_v1 = vld [vmem:[%s6167_s0 + $0x188] ss:$16 sm:%s1587_s19]   ;;  %v2940_v7 = vld [vmem:[%s6167_s0 + $0x380] ss:$16 sm:%s145_s30]   ;;  %s69_s30 = smov 48  ;;  %s1734_s19 = smov 192 }
  0xb1   :  { %3036 = vst.msk [vmem:[%s6168_s1 + $0x8] sm:$0xff] %vm551_vm6, %v595_v14   ;;  %v3249_v2 = vld [vmem:[%s6167_s0 + $0x188] ss:$16 sm:%s1592_s15]   ;;  %3051 = vst.msk [vmem:[%s6168_s1 + $0x30] sm:$0xff] %vm551_vm6, %v664_v59   ;;  %v1590_v3 = vsel %vm6_vm0, %v3248_v1, %v3247_v22  ;;  %s1665_s15 = smov 192 }
  0xb2   :  { %v3250_v5 = vld [vmem:[%s6167_s0 + $0x188] ss:$16 sm:%s1597_s29]   ;;  %1624 = vrot.lane.b32.xlu1 %v1623_v54, %s3552_s27  ;;  %v1595_v9 = vsel %vm10_vm1, %v3249_v2, %v1590_v3  ;;  %s64_s29 = smov 12  ;;  %3007 = vst.msk [vmem:[%s6168_s1 + $0x10] sm:$0xff] %vm368_vm5, %v4581_v61  }
  0xb3   :  { %v2941_v10 = vld [vmem:[%s6167_s0 + $0x380] ss:$16 sm:%s148_s7]   ;;  %v1600_v61 = vsel %vm14_vm2, %v3250_v5, %v1595_v9  ;;  %v3261_v25 = vld [vmem:[%s6167_s0 + $0x207] ss:$16 sm:%s1652_s9]   ;;  %s3553_s7 = smov 56   ;;  %s1678_s9 = smov 12 }
  0xb4   :  { %v641_v8 = vpop.permute.xlu0 %640   ;;  %v151_v11 = vsel %vm6_vm0, %v2941_v10, %v2940_v7  ;;  %v2942_v13 = vld [vmem:[%s6167_s0 + $0x380] ss:$16 sm:%s153_s16]   ;;  %1601 = vrot.lane.b32.xlu0 %v1600_v61, %s3552_s27  ;;  %s2461_s27 = smov 48  ;;  %s2616_s16 = smov 12 }
  0xb5   :  { %v2943_v15 = vld [vmem:[%s6167_s0 + $0x380] ss:$16 sm:%s158_s17]   ;;  %3046 = vst.msk [vmem:[%s6168_s1 + $0x10] sm:$0xff] %vm551_vm6, %v641_v8   ;;  %v710_v17 = vpop.permute.xlu1 %709   ;;  %v156_v18 = vsel %vm10_vm1, %v2942_v13, %v151_v11  ;;  %s1688_s17 = smov 192 }
  0xb6   :  { %v2920_v19 = vld [vmem:[%s6167_s0 + $0x180] ss:$16 sm:%s61_s25]   ;;  %v161_v20 = vsel %vm14_vm2, %v2943_v15, %v156_v18  ;;  %v3262_v27 = vld [vmem:[%s6167_s0 + $0x207] ss:$16 sm:%s1655_s13]   ;;  %s1729_s13 = smov 48  ;;  %s2438_s25 = smov 48 }
  0xb7   :  { %v2921_v21 = vld [vmem:[%s6167_s0 + $0x180] ss:$16 sm:%s64_s29]   ;;  %2944 = vst.msk [vmem:[%s6168_s1 + $0x38] sm:$0xff] %vm16_vm3, %v161_v20   ;;  %s1638_s29 = smov 48  ;;  %v1658_v32 = vsel %vm6_vm0, %v3262_v27, %v3261_v25 }
  0xb8   :  { %v2922_v23 = vld [vmem:[%s6167_s0 + $0x180] ss:$16 sm:%s69_s30]   ;;  %v67_v24 = vsel %vm6_vm0, %v2921_v21, %v2920_v19  ;;  %2983 = vst.msk [vmem:[%s6168_s1 + $0x38] sm:$0xff] %vm185_vm4, %v4438_v60   ;;  %s1752_s30 = smov 48 }
  0xb9   :  { %v2923_v28 = vld [vmem:[%s6167_s0 + $0x180] ss:$16 sm:%s74_s8]   ;;  %v687_v26 = vpop.permute.xlu0 %686   ;;  %v72_v60 = vsel %vm10_vm1, %v2922_v23, %v67_v24  ;;  %v3263_v29 = vld [vmem:[%s6167_s0 + $0x207] ss:$16 sm:%s1660_s14]   ;;  %s1698_s8 = smov 3  ;;  %s2613_s14 = smov 3 }
  0xba   :  { %v77_v30 = vsel %vm14_vm2, %v2923_v28, %v72_v60  ;;  %v3264_v31 = vld [vmem:[%s6167_s0 + $0x207] ss:$16 sm:%s1665_s15]   ;;  %3022 = vst.msk [vmem:[%s6168_s1 + $0x38] sm:$0xff] %vm368_vm5, %v4607_v4   ;;  %v755_v4 = vpop.permute.xlu1 %754   ;;  %v1663_v34 = vsel %vm10_vm1, %v3263_v29, %v1658_v32  ;;  %s2522_s15 = smov 3 }
  0xbb   :  { %v3257_v33 = vld [vmem:[%s6167_s0 + $0x7] ss:$16 sm:%s1630_s20]   ;;  %2924 = vst.msk [vmem:[%s6168_s1 + $0x18] sm:$0xff] %vm16_vm3, %v77_v30   ;;  %s2525_s20 = smov 12 }
  0xbc   :  { %v3258_v35 = vld [vmem:[%s6167_s0 + $0x7] ss:$16 sm:%s1633_s28]   ;;  %3061 = vst.msk [vmem:[%s6168_s1 + $0x38] sm:$0xff] %vm551_vm6, %v710_v17   ;;  %s2072_s28 = smov 48 }
  0xbd   :  { %v3259_v38 = vld [vmem:[%s6167_s0 + $0x7] ss:$16 sm:%s1638_s29]   ;;  %3070 = vst.msk [vmem:[%s6168_s1 + $0x20] sm:$0xff] %vm734_vm7, %v755_v4   ;;  %v1636_v36 = vsel %vm6_vm0, %v3258_v35, %v3257_v33  ;;  %s1889_s29 = smov 48 }
  0xbe   :  { %2978 = vst.msk [vmem:[%s6168_s1 + $0x18] sm:$0xff] %vm185_vm4, %v4460_v6   ;;  %v1668_v6 = vsel %vm14_vm2, %v3264_v31, %v1663_v34  ;;  %v3260_v37 = vld [vmem:[%s6167_s0 + $0x7] ss:$16 sm:%s1643_s6]   ;;  %v1641_v40 = vsel %vm10_vm1, %v3259_v38, %v1636_v36  ;;  %v801_v48 = vpop.permute.xlu1 %800   ;;  %s2548_s6 = smov 12 }
  0xbf   :  { %v3271_v39 = vld [vmem:[%s6167_s0 + $0x287] ss:$16 sm:%s1698_s8]   ;;  %1669 = vrot.lane.b32.xlu1 %v1668_v6, %s3553_s7  ;;  %3017 = vst.msk [vmem:[%s6168_s1 + $0x18] sm:$0xff] %vm368_vm5, %v4632_v16   ;;  %v733_v16 = vpop.permute.xlu0 %732   ;;  %v1646_v12 = vsel %vm14_vm2, %v3260_v37, %v1641_v40  ;;  %s1721_s8 = smov 3 }
  0xc0   :  { %v3272_v41 = vld [vmem:[%s6167_s0 + $0x287] ss:$16 sm:%s1701_s10]   ;;  %3056 = vst.msk [vmem:[%s6168_s1 + $0x18] sm:$0xff] %vm551_vm6, %v687_v26   ;;  %1647 = vrot.lane.b32.xlu0 %v1646_v12, %s3553_s7  ;;  %s1724_s10 = smov 12 }
  0xc1   :  { %v1704_v42 = vsel %vm6_vm0, %v3272_v41, %v3271_v39  ;;  %v3273_v43 = vld [vmem:[%s6167_s0 + $0x287] ss:$16 sm:%s1706_s21]   ;;  %735 = vst.msk [vmem:[%s6168_s1] sm:$0xff] %vm734_vm7, %v733_v16   ;;  %3080 = vst.msk [vmem:[%s6168_s1 + $0x28] sm:$0xff] %vm734_vm7, %v801_v48   ;;  %s2064_s21 = smov 3 }
  0xc2   :  { %v3274_v45 = vld [vmem:[%s6167_s0 + $0x287] ss:$16 sm:%s1711_s23]   ;;  %v1709_v46 = vsel %vm10_vm1, %v3273_v43, %v1704_v42  ;;  %v847_v49 = vpop.permute.xlu1 %846   ;;  %s1881_s23 = smov 3  ;;  %v3312_v43 = vld [vmem:[%s6167_s0 + $0x286] ss:$16 sm:%s1889_s29]   ;;  %s1935_s29 = smov 48 }
  0xc3   :  { %v3266_v47 = vld [vmem:[%s6167_s0 + $0x87] ss:$16 sm:%s1675_s5]   ;;  %v1714_v50 = vsel %vm14_vm2, %v3274_v45, %v1709_v46  ;;  %v778_v57 = vpop.permute.xlu0 %777   ;;  %3090 = vst.msk [vmem:[%s6168_s1 + $0x30] sm:$0xff] %vm734_vm7, %v847_v49   ;;  %s2453_s5 = smov 3 }
  0xc4   :  { %v3267_v51 = vld [vmem:[%s6167_s0 + $0x87] ss:$16 sm:%s1678_s9]   ;;  %1715 = vrot.lane.b32.xlu1 %v1714_v50, %s3553_s7  ;;  %3075 = vst.msk [vmem:[%s6168_s1 + $0x8] sm:$0xff] %vm734_vm7, %v778_v57   ;;  %s2502_s9 = smov 12 }
  0xc5   :  { %v3268_v52 = vld [vmem:[%s6167_s0 + $0x87] ss:$16 sm:%s1683_s11]   ;;  %v1681_v14 = vsel %vm6_vm0, %v3267_v51, %v3266_v47  ;;  %v3310_v40 = vld [vmem:[%s6167_s0 + $0x286] ss:$16 sm:%s1881_s23]   ;;  %s1927_s23 = smov 3  ;;  %s2507_s11 = smov 48 }
  0xc6   :  { %v3269_v53 = vld [vmem:[%s6167_s0 + $0x87] ss:$16 sm:%s1688_s17]   ;;  %v1686_v55 = vsel %vm10_vm1, %v3268_v52, %v1681_v14  ;;  %s2466_s17 = smov 192 }
  0xc7   :  { %v3281_v56 = vld [vmem:[%s6167_s0 + $0x307] ss:$16 sm:%s1744_s24]   ;;  %v1691_v58 = vsel %vm14_vm2, %v3269_v53, %v1686_v55  ;;  %s1790_s24 = smov 3  ;;  %v824_v10 = vpop.permute.xlu0 %823  }
  0xc8   :  { %v3282_v44 = vld [vmem:[%s6167_s0 + $0x307] ss:$16 sm:%s1747_s22]   ;;  %1692 = vrot.lane.b32.xlu0 %v1691_v58, %s3553_s7  ;;  %s1793_s22 = smov 12  ;;  %3085 = vst.msk [vmem:[%s6168_s1 + $0x10] sm:$0xff] %vm734_vm7, %v824_v10  }
  0xc9   :  { %v1750_v59 = vsel %vm6_vm0, %v3282_v44, %v3281_v56  ;;  %v3283_v62 = vld [vmem:[%s6167_s0 + $0x307] ss:$16 sm:%s1752_s30]   ;;  %s1798_s30 = smov 48  ;;  %v893_v19 = vpop.permute.xlu1 %892   ;;  %v3320_v56 = vld [vmem:[%s6167_s0 + $0x306] ss:$16 sm:%s1927_s23]   ;;  %s1973_s23 = smov 3 }
  0xca   :  { %v3284_v63 = vld [vmem:[%s6167_s0 + $0x307] ss:$16 sm:%s1757_s2]   ;;  %v1755_v0 = vsel %vm10_vm1, %v3283_v62, %v1750_v59  ;;  %s1803_s2 = smov 192  ;;  %3100 = vst.msk [vmem:[%s6168_s1 + $0x38] sm:$0xff] %vm734_vm7, %v893_v19  }
  0xcb   :  { %v3276_v22 = vld [vmem:[%s6167_s0 + $0x107] ss:$16 sm:%s1721_s8]   ;;  %v1760_v1 = vsel %vm14_vm2, %v3284_v63, %v1755_v0  ;;  %s1767_s8 = smov 3  ;;  %v3322_v62 = vld [vmem:[%s6167_s0 + $0x306] ss:$16 sm:%s1935_s29]   ;;  %s1981_s29 = smov 48 }
  0xcc   :  { %v3277_v2 = vld [vmem:[%s6167_s0 + $0x107] ss:$16 sm:%s1724_s10]   ;;  %1761 = vrot.lane.b32.xlu1 %v1760_v1, %s3553_s7  ;;  %s1770_s10 = smov 12 }
  0xcd   :  { %v3278_v54 = vld [vmem:[%s6167_s0 + $0x107] ss:$16 sm:%s1729_s13]   ;;  %v1727_v3 = vsel %vm6_vm0, %v3277_v2, %v3276_v22  ;;  %s1775_s13 = smov 48  ;;  %v870_v27 = vpop.permute.xlu0 %869   ;;  %v938_v34 = vpop.permute.xlu1 %937  }
  0xce   :  { %v3279_v5 = vld [vmem:[%s6167_s0 + $0x107] ss:$16 sm:%s1734_s19]   ;;  %v1732_v7 = vsel %vm10_vm1, %v3278_v54, %v1727_v3  ;;  %s1780_s19 = smov 192  ;;  %3095 = vst.msk [vmem:[%s6168_s1 + $0x18] sm:$0xff] %vm734_vm7, %v870_v27  }
  0xcf   :  { %v3291_v8 = vld [vmem:[%s6167_s0 + $0x387] ss:$16 sm:%s1790_s24]   ;;  %v1737_v61 = vsel %vm14_vm2, %v3279_v5, %v1732_v7  ;;  %s1835_s24 = smov 3  ;;  %3109 = vst.msk [vmem:[%s6168_s1 + $0x20] sm:$0xff] %vm917_vm8, %v938_v34  }
  0xd0   :  { %v3292_v9 = vld [vmem:[%s6167_s0 + $0x387] ss:$16 sm:%s1793_s22]   ;;  %1738 = vrot.lane.b32.xlu0 %v1737_v61, %s3553_s7  ;;  %s1838_s22 = smov 12 }
  0xd1   :  { %v1796_v11 = vsel %vm6_vm0, %v3292_v9, %v3291_v8  ;;  %v3293_v13 = vld [vmem:[%s6167_s0 + $0x387] ss:$16 sm:%s1798_s30]   ;;  %s1843_s30 = smov 48  ;;  %v3300_v26 = vld [vmem:[%s6167_s0 + $0x206] ss:$16 sm:%s1835_s24]   ;;  %s1884_s24 = smov 12  ;;  %v916_v16 = vpop.permute.xlu0 %915   ;;  %v984_v48 = vpop.permute.xlu1 %983  }
  0xd2   :  { %v3294_v15 = vld [vmem:[%s6167_s0 + $0x387] ss:$16 sm:%s1803_s2]   ;;  %v1801_v17 = vsel %vm10_vm1, %v3293_v13, %v1796_v11  ;;  %s1848_s2 = smov 192  ;;  %v3301_v60 = vld [vmem:[%s6167_s0 + $0x206] ss:$16 sm:%s1838_s22]   ;;  %s2776_s22 = smov 12 }
  0xd3   :  { %v3286_v18 = vld [vmem:[%s6167_s0 + $0x187] ss:$16 sm:%s1767_s8]   ;;  %v1806_v20 = vsel %vm14_vm2, %v3294_v15, %v1801_v17  ;;  %s1813_s8 = smov 3  ;;  %v1841_v30 = vsel %vm6_vm0, %v3301_v60, %v3300_v26  ;;  %v3302_v32 = vld [vmem:[%s6167_s0 + $0x206] ss:$16 sm:%s1843_s30]   ;;  %s1894_s30 = smov 192 }
  0xd4   :  { %v3287_v21 = vld [vmem:[%s6167_s0 + $0x187] ss:$16 sm:%s1770_s10]   ;;  %1807 = vrot.lane.b32.xlu1 %v1806_v20, %s3553_s7  ;;  %s1816_s10 = smov 12  ;;  %v1846_v33 = vsel %vm10_vm1, %v3302_v32, %v1841_v30  ;;  %918 = vst.msk [vmem:[%s6168_s1] sm:$0xff] %vm917_vm8, %v916_v16  }
  0xd5   :  { %v3288_v23 = vld [vmem:[%s6167_s0 + $0x187] ss:$16 sm:%s1775_s13]   ;;  %v1773_v24 = vsel %vm6_vm0, %v3287_v21, %v3286_v18  ;;  %s1821_s13 = smov 48  ;;  %v3303_v31 = vld [vmem:[%s6167_s0 + $0x206] ss:$16 sm:%s1848_s2]   ;;  %v961_v57 = vpop.permute.xlu0 %960   ;;  %v1030_v49 = vpop.permute.xlu1 %1029   ;;  %s3556_s2 = smov 32  }
  0xd6   :  { %v3289_v28 = vld [vmem:[%s6167_s0 + $0x187] ss:$16 sm:%s1780_s19]   ;;  %v1778_v25 = vsel %vm10_vm1, %v3288_v23, %v1773_v24  ;;  %s1826_s19 = smov 192  ;;  %v3296_v4 = vld [vmem:[%s6167_s0 + $0x6] ss:$16 sm:%s1813_s8]   ;;  %v1851_v35 = vsel %vm14_vm2, %v3303_v31, %v1846_v33  ;;  %s1858_s8 = smov 3 }
  0xd7   :  { %v1783_v29 = vsel %vm14_vm2, %v3289_v28, %v1778_v25  ;;  %v3297_v38 = vld [vmem:[%s6167_s0 + $0x6] ss:$16 sm:%s1816_s10]   ;;  %s1861_s10 = smov 12  ;;  %3119 = vst.msk [vmem:[%s6168_s1 + $0x28] sm:$0xff] %vm917_vm8, %v984_v48   ;;  %3114 = vst.msk [vmem:[%s6168_s1 + $0x8] sm:$0xff] %vm917_vm8, %v961_v57  }
  0xd8   :  { %1784 = vrot.lane.b32.xlu0 %v1783_v29, %s3553_s7  ;;  %v3298_v6 = vld [vmem:[%s6167_s0 + $0x6] ss:$16 sm:%s1821_s13]   ;;  %1852 = vrot.lane.b32.xlu1 %v1851_v35, %s3554_s4  ;;  %v1819_v36 = vsel %vm6_vm0, %v3297_v38, %v3296_v4  ;;  %s1866_s13 = smov 48  ;;  %s2247_s7 = smov 3 }
  0xd9   :  { %v3299_v37 = vld [vmem:[%s6167_s0 + $0x6] ss:$16 sm:%s1826_s19]   ;;  %v1824_v39 = vsel %vm10_vm1, %v3298_v6, %v1819_v36  ;;  %s1871_s19 = smov 192  ;;  %3129 = vst.msk [vmem:[%s6168_s1 + $0x30] sm:$0xff] %vm917_vm8, %v1030_v49   ;;  %v1007_v10 = vpop.permute.xlu0 %1006  }
  0xda   :  { %v3311_v41 = vld [vmem:[%s6167_s0 + $0x286] ss:$16 sm:%s1884_s24]   ;;  %v1829_v12 = vsel %vm14_vm2, %v3299_v37, %v1824_v39  ;;  %s1930_s24 = smov 12  ;;  %3124 = vst.msk [vmem:[%s6168_s1 + $0x10] sm:$0xff] %vm917_vm8, %v1007_v10   ;;  %v1076_v19 = vpop.permute.xlu1 %1075  }
  0xdb   :  { %v1887_v42 = vsel %vm6_vm0, %v3311_v41, %v3310_v40  ;;  %v3313_v45 = vld [vmem:[%s6167_s0 + $0x286] ss:$16 sm:%s1894_s30]   ;;  %s1940_s30 = smov 192  ;;  %3139 = vst.msk [vmem:[%s6168_s1 + $0x38] sm:$0xff] %vm917_vm8, %v1076_v19  }
  0xdc   :  { %1830 = vrot.lane.b32.xlu0 %v1829_v12, %s3554_s4  ;;  %v1892_v46 = vsel %vm10_vm1, %v3312_v43, %v1887_v42  ;;  %v3305_v47 = vld [vmem:[%s6167_s0 + $0x86] ss:$16 sm:%s1858_s8]   ;;  %s1904_s8 = smov 3 }
  0xdd   :  { %v1897_v50 = vsel %vm14_vm2, %v3313_v45, %v1892_v46  ;;  %v3306_v51 = vld [vmem:[%s6167_s0 + $0x86] ss:$16 sm:%s1861_s10]   ;;  %s1907_s10 = smov 12  ;;  %v3349_v40 = vld [vmem:[%s6167_s0 + $0x285] ss:$16 sm:%s2064_s21]   ;;  %s2110_s21 = smov 3 }
  0xde   :  { %v3307_v52 = vld [vmem:[%s6167_s0 + $0x86] ss:$16 sm:%s1866_s13]   ;;  %1898 = vrot.lane.b32.xlu1 %v1897_v50, %s3554_s4  ;;  %v1864_v14 = vsel %vm6_vm0, %v3306_v51, %v3305_v47  ;;  %s1912_s13 = smov 48  ;;  %v1053_v27 = vpop.permute.xlu0 %1052   ;;  %v1121_v34 = vpop.permute.xlu1 %1120  }
  0xdf   :  { %v3308_v53 = vld [vmem:[%s6167_s0 + $0x86] ss:$16 sm:%s1871_s19]   ;;  %v1869_v55 = vsel %vm10_vm1, %v3307_v52, %v1864_v14  ;;  %s1917_s19 = smov 192  ;;  %3134 = vst.msk [vmem:[%s6168_s1 + $0x18] sm:$0xff] %vm917_vm8, %v1053_v27  }
  0xe0   :  { %v3321_v44 = vld [vmem:[%s6167_s0 + $0x306] ss:$16 sm:%s1930_s24]   ;;  %v1874_v58 = vsel %vm14_vm2, %v3308_v53, %v1869_v55  ;;  %s1976_s24 = smov 12  ;;  %3148 = vst.msk [vmem:[%s6168_s1 + $0x20] sm:$0xff] %vm1100_vm9, %v1121_v34  }
  0xe1   :  { %v1933_v59 = vsel %vm6_vm0, %v3321_v44, %v3320_v56  ;;  %v3323_v63 = vld [vmem:[%s6167_s0 + $0x306] ss:$16 sm:%s1940_s30]   ;;  %1875 = vrot.lane.b32.xlu0 %v1874_v58, %s3554_s4  ;;  %s1986_s30 = smov 192 }
  0xe2   :  { %v1938_v0 = vsel %vm10_vm1, %v3322_v62, %v1933_v59  ;;  %v3315_v22 = vld [vmem:[%s6167_s0 + $0x106] ss:$16 sm:%s1904_s8]   ;;  %s1950_s8 = smov 3  ;;  %v1099_v16 = vpop.permute.xlu0 %1098   ;;  %v3351_v43 = vld [vmem:[%s6167_s0 + $0x285] ss:$16 sm:%s2072_s28]   ;;  %v1167_v48 = vpop.permute.xlu1 %1166   ;;  %s2118_s28 = smov 48 }
  0xe3   :  { %v1943_v1 = vsel %vm14_vm2, %v3323_v63, %v1938_v0  ;;  %v3316_v2 = vld [vmem:[%s6167_s0 + $0x106] ss:$16 sm:%s1907_s10]   ;;  %s1953_s10 = smov 12  ;;  %1101 = vst.msk [vmem:[%s6168_s1] sm:$0xff] %vm1100_vm9, %v1099_v16   ;;  %3158 = vst.msk [vmem:[%s6168_s1 + $0x28] sm:$0xff] %vm1100_vm9, %v1167_v48  }
  0xe4   :  { %v3317_v54 = vld [vmem:[%s6167_s0 + $0x106] ss:$16 sm:%s1912_s13]   ;;  %1944 = vrot.lane.b32.xlu1 %v1943_v1, %s3554_s4  ;;  %v1910_v3 = vsel %vm6_vm0, %v3316_v2, %v3315_v22  ;;  %s1958_s13 = smov 48 }
  0xe5   :  { %v3318_v5 = vld [vmem:[%s6167_s0 + $0x106] ss:$16 sm:%s1917_s19]   ;;  %v1915_v7 = vsel %vm10_vm1, %v3317_v54, %v1910_v3  ;;  %s1963_s19 = smov 192  ;;  %v3359_v56 = vld [vmem:[%s6167_s0 + $0x305] ss:$16 sm:%s2110_s21]   ;;  %s2156_s21 = smov 3 }
  0xe6   :  { %v3330_v8 = vld [vmem:[%s6167_s0 + $0x386] ss:$16 sm:%s1973_s23]   ;;  %v1920_v61 = vsel %vm14_vm2, %v3318_v5, %v1915_v7  ;;  %s2018_s23 = smov 3  ;;  %v1144_v57 = vpop.permute.xlu0 %1143   ;;  %v3361_v62 = vld [vmem:[%s6167_s0 + $0x305] ss:$16 sm:%s2118_s28]   ;;  %v1213_v49 = vpop.permute.xlu1 %1212   ;;  %s2164_s28 = smov 48 }
  0xe7   :  { %v3331_v9 = vld [vmem:[%s6167_s0 + $0x386] ss:$16 sm:%s1976_s24]   ;;  %1921 = vrot.lane.b32.xlu0 %v1920_v61, %s3554_s4  ;;  %s2021_s24 = smov 12  ;;  %3153 = vst.msk [vmem:[%s6168_s1 + $0x8] sm:$0xff] %vm1100_vm9, %v1144_v57  }
  0xe8   :  { %v1979_v11 = vsel %vm6_vm0, %v3331_v9, %v3330_v8  ;;  %v3332_v13 = vld [vmem:[%s6167_s0 + $0x386] ss:$16 sm:%s1981_s29]   ;;  %s2026_s29 = smov 48  ;;  %v3339_v26 = vld [vmem:[%s6167_s0 + $0x205] ss:$16 sm:%s2018_s23]   ;;  %s2067_s23 = smov 12 }
  0xe9   :  { %v3333_v15 = vld [vmem:[%s6167_s0 + $0x386] ss:$16 sm:%s1986_s30]   ;;  %v1984_v17 = vsel %vm10_vm1, %v3332_v13, %v1979_v11  ;;  %s2031_s30 = smov 192  ;;  %v3340_v60 = vld [vmem:[%s6167_s0 + $0x205] ss:$16 sm:%s2021_s24]   ;;  %s2590_s24 = smov 3 }
  0xea   :  { %v3325_v18 = vld [vmem:[%s6167_s0 + $0x186] ss:$16 sm:%s1950_s8]   ;;  %v1989_v20 = vsel %vm14_vm2, %v3333_v15, %v1984_v17  ;;  %s1996_s8 = smov 3  ;;  %v2024_v30 = vsel %vm6_vm0, %v3340_v60, %v3339_v26  ;;  %v3341_v32 = vld [vmem:[%s6167_s0 + $0x205] ss:$16 sm:%s2026_s29]   ;;  %s2077_s29 = smov 192  ;;  %v1190_v10 = vpop.permute.xlu0 %1189  }
  0xeb   :  { %v3326_v21 = vld [vmem:[%s6167_s0 + $0x186] ss:$16 sm:%s1953_s10]   ;;  %1990 = vrot.lane.b32.xlu1 %v1989_v20, %s3554_s4  ;;  %s1999_s10 = smov 12  ;;  %v2029_v33 = vsel %vm10_vm1, %v3341_v32, %v2024_v30  ;;  %3168 = vst.msk [vmem:[%s6168_s1 + $0x30] sm:$0xff] %vm1100_vm9, %v1213_v49  }
  0xec   :  { %v3327_v23 = vld [vmem:[%s6167_s0 + $0x186] ss:$16 sm:%s1958_s13]   ;;  %v1956_v24 = vsel %vm6_vm0, %v3326_v21, %v3325_v18  ;;  %s2004_s13 = smov 48  ;;  %v3342_v31 = vld [vmem:[%s6167_s0 + $0x205] ss:$16 sm:%s2031_s30]   ;;  %s3557_s30 = smov 24  }
  0xed   :  { %v3328_v28 = vld [vmem:[%s6167_s0 + $0x186] ss:$16 sm:%s1963_s19]   ;;  %v1961_v25 = vsel %vm10_vm1, %v3327_v23, %v1956_v24  ;;  %s2009_s19 = smov 192  ;;  %v3335_v4 = vld [vmem:[%s6167_s0 + $0x5] ss:$16 sm:%s1996_s8]   ;;  %v2034_v35 = vsel %vm14_vm2, %v3342_v31, %v2029_v33  ;;  %s2041_s8 = smov 3 }
  0xee   :  { %v1966_v29 = vsel %vm14_vm2, %v3328_v28, %v1961_v25  ;;  %v3336_v38 = vld [vmem:[%s6167_s0 + $0x5] ss:$16 sm:%s1999_s10]   ;;  %s2044_s10 = smov 12  ;;  %3163 = vst.msk [vmem:[%s6168_s1 + $0x10] sm:$0xff] %vm1100_vm9, %v1190_v10   ;;  %v1259_v19 = vpop.permute.xlu1 %1258  }
  0xef   :  { %1967 = vrot.lane.b32.xlu0 %v1966_v29, %s3554_s4  ;;  %v3337_v6 = vld [vmem:[%s6167_s0 + $0x5] ss:$16 sm:%s2004_s13]   ;;  %2035 = vrot.lane.b32.xlu1 %v2034_v35, %s3555_s3  ;;  %v2002_v36 = vsel %vm6_vm0, %v3336_v38, %v3335_v4  ;;  %s2049_s13 = smov 48  ;;  %s2430_s4 = smov 3 }
  0xf0   :  { %v3338_v37 = vld [vmem:[%s6167_s0 + $0x5] ss:$16 sm:%s2009_s19]   ;;  %v2007_v39 = vsel %vm10_vm1, %v3337_v6, %v2002_v36  ;;  %s2054_s19 = smov 192  ;;  %3178 = vst.msk [vmem:[%s6168_s1 + $0x38] sm:$0xff] %vm1100_vm9, %v1259_v19  }
  0xf1   :  { %v3350_v41 = vld [vmem:[%s6167_s0 + $0x285] ss:$16 sm:%s2067_s23]   ;;  %v2012_v12 = vsel %vm14_vm2, %v3338_v37, %v2007_v39  ;;  %s2113_s23 = smov 12 }
  0xf2   :  { %v2070_v42 = vsel %vm6_vm0, %v3350_v41, %v3349_v40  ;;  %v3352_v45 = vld [vmem:[%s6167_s0 + $0x285] ss:$16 sm:%s2077_s29]   ;;  %s2123_s29 = smov 192  ;;  %v1236_v27 = vpop.permute.xlu0 %1235   ;;  %v1304_v34 = vpop.permute.xlu1 %1303   ;;  %v3388_v40 = vld [vmem:[%s6167_s0 + $0x284] ss:$16 sm:%s2247_s7]   ;;  %s2293_s7 = smov 3 }
  0xf3   :  { %2013 = vrot.lane.b32.xlu0 %v2012_v12, %s3555_s3  ;;  %v2075_v46 = vsel %vm10_vm1, %v3351_v43, %v2070_v42  ;;  %v3344_v47 = vld [vmem:[%s6167_s0 + $0x85] ss:$16 sm:%s2041_s8]   ;;  %s2087_s8 = smov 3  ;;  %3173 = vst.msk [vmem:[%s6168_s1 + $0x18] sm:$0xff] %vm1100_vm9, %v1236_v27  }
  0xf4   :  { %v2080_v50 = vsel %vm14_vm2, %v3352_v45, %v2075_v46  ;;  %v3345_v51 = vld [vmem:[%s6167_s0 + $0x85] ss:$16 sm:%s2044_s10]   ;;  %s2090_s10 = smov 12  ;;  %3187 = vst.msk [vmem:[%s6168_s1 + $0x20] sm:$0xff] %vm1283_vm10, %v1304_v34  }
  0xf5   :  { %v3346_v52 = vld [vmem:[%s6167_s0 + $0x85] ss:$16 sm:%s2049_s13]   ;;  %2081 = vrot.lane.b32.xlu1 %v2080_v50, %s3555_s3  ;;  %v2047_v14 = vsel %vm6_vm0, %v3345_v51, %v3344_v47  ;;  %s2095_s13 = smov 48 }
  0xf6   :  { %v3347_v53 = vld [vmem:[%s6167_s0 + $0x85] ss:$16 sm:%s2054_s19]   ;;  %v2052_v55 = vsel %vm10_vm1, %v3346_v52, %v2047_v14  ;;  %s2100_s19 = smov 192  ;;  %v1282_v16 = vpop.permute.xlu0 %1281   ;;  %v3390_v43 = vld [vmem:[%s6167_s0 + $0x284] ss:$16 sm:%s2255_s26]   ;;  %v1350_v48 = vpop.permute.xlu1 %1349   ;;  %s2301_s26 = smov 48 }
  0xf7   :  { %v3360_v44 = vld [vmem:[%s6167_s0 + $0x305] ss:$16 sm:%s2113_s23]   ;;  %v2057_v58 = vsel %vm14_vm2, %v3347_v53, %v2052_v55  ;;  %s2159_s23 = smov 12  ;;  %1284 = vst.msk [vmem:[%s6168_s1] sm:$0xff] %vm1283_vm10, %v1282_v16   ;;  %3197 = vst.msk [vmem:[%s6168_s1 + $0x28] sm:$0xff] %vm1283_vm10, %v1350_v48  }
  0xf8   :  { %v2116_v59 = vsel %vm6_vm0, %v3360_v44, %v3359_v56  ;;  %v3362_v63 = vld [vmem:[%s6167_s0 + $0x305] ss:$16 sm:%s2123_s29]   ;;  %2058 = vrot.lane.b32.xlu0 %v2057_v58, %s3555_s3  ;;  %s2169_s29 = smov 192 }
  0xf9   :  { %v2121_v0 = vsel %vm10_vm1, %v3361_v62, %v2116_v59  ;;  %v3354_v22 = vld [vmem:[%s6167_s0 + $0x105] ss:$16 sm:%s2087_s8]   ;;  %s2133_s8 = smov 3  ;;  %v3398_v56 = vld [vmem:[%s6167_s0 + $0x304] ss:$16 sm:%s2293_s7]   ;;  %s2339_s7 = smov 3 }
  0xfa   :  { %v2126_v1 = vsel %vm14_vm2, %v3362_v63, %v2121_v0  ;;  %v3355_v2 = vld [vmem:[%s6167_s0 + $0x105] ss:$16 sm:%s2090_s10]   ;;  %s2136_s10 = smov 12  ;;  %v1327_v57 = vpop.permute.xlu0 %1326   ;;  %v3400_v62 = vld [vmem:[%s6167_s0 + $0x304] ss:$16 sm:%s2301_s26]   ;;  %v1396_v49 = vpop.permute.xlu1 %1395   ;;  %s2347_s26 = smov 48 }
  0xfb   :  { %v3356_v54 = vld [vmem:[%s6167_s0 + $0x105] ss:$16 sm:%s2095_s13]   ;;  %2127 = vrot.lane.b32.xlu1 %v2126_v1, %s3555_s3  ;;  %v2093_v3 = vsel %vm6_vm0, %v3355_v2, %v3354_v22  ;;  %s2141_s13 = smov 48  ;;  %3192 = vst.msk [vmem:[%s6168_s1 + $0x8] sm:$0xff] %vm1283_vm10, %v1327_v57  }
  0xfc   :  { %v3357_v5 = vld [vmem:[%s6167_s0 + $0x105] ss:$16 sm:%s2100_s19]   ;;  %v2098_v7 = vsel %vm10_vm1, %v3356_v54, %v2093_v3  ;;  %s2146_s19 = smov 192  ;;  %3207 = vst.msk [vmem:[%s6168_s1 + $0x30] sm:$0xff] %vm1283_vm10, %v1396_v49  }
  0xfd   :  { %v3369_v8 = vld [vmem:[%s6167_s0 + $0x385] ss:$16 sm:%s2156_s21]   ;;  %v2103_v61 = vsel %vm14_vm2, %v3357_v5, %v2098_v7  ;;  %s2201_s21 = smov 3  ;;  %v3433_v49 = vld [vmem:[%s6167_s0 + $0x103] ss:$16 sm:%s2456_s12]  }
  0xfe   :  { %v3370_v9 = vld [vmem:[%s6167_s0 + $0x385] ss:$16 sm:%s2159_s23]   ;;  %2104 = vrot.lane.b32.xlu0 %v2103_v61, %s3555_s3  ;;  %s2204_s23 = smov 12  ;;  %v1373_v10 = vpop.permute.xlu0 %1372  }
  0xff   :  { %v2162_v11 = vsel %vm6_vm0, %v3370_v9, %v3369_v8  ;;  %v3371_v13 = vld [vmem:[%s6167_s0 + $0x385] ss:$16 sm:%s2164_s28]   ;;  %s2209_s28 = smov 48  ;;  %v3378_v26 = vld [vmem:[%s6167_s0 + $0x204] ss:$16 sm:%s2201_s21]   ;;  %s2250_s21 = smov 12  ;;  %v1442_v19 = vpop.permute.xlu1 %1441  }
 0x100   :  { %v3372_v15 = vld [vmem:[%s6167_s0 + $0x385] ss:$16 sm:%s2169_s29]   ;;  %v2167_v17 = vsel %vm10_vm1, %v3371_v13, %v2162_v11  ;;  %s2214_s29 = smov 192  ;;  %v3379_v60 = vld [vmem:[%s6167_s0 + $0x204] ss:$16 sm:%s2204_s23]   ;;  %s2535_s23 = smov 192 }
 0x101   :  { %v3364_v18 = vld [vmem:[%s6167_s0 + $0x185] ss:$16 sm:%s2133_s8]   ;;  %v2172_v20 = vsel %vm14_vm2, %v3372_v15, %v2167_v17  ;;  %s2179_s8 = smov 3  ;;  %v2207_v30 = vsel %vm6_vm0, %v3379_v60, %v3378_v26  ;;  %v3380_v32 = vld [vmem:[%s6167_s0 + $0x204] ss:$16 sm:%s2209_s28]   ;;  %s2260_s28 = smov 192 }
 0x102   :  { %v3365_v21 = vld [vmem:[%s6167_s0 + $0x185] ss:$16 sm:%s2136_s10]   ;;  %2173 = vrot.lane.b32.xlu1 %v2172_v20, %s3555_s3  ;;  %s2182_s10 = smov 12  ;;  %v2212_v33 = vsel %vm10_vm1, %v3380_v32, %v2207_v30  ;;  %3202 = vst.msk [vmem:[%s6168_s1 + $0x10] sm:$0xff] %vm1283_vm10, %v1373_v10  }
 0x103   :  { %v3366_v23 = vld [vmem:[%s6167_s0 + $0x185] ss:$16 sm:%s2141_s13]   ;;  %v2139_v24 = vsel %vm6_vm0, %v3365_v21, %v3364_v18  ;;  %s2187_s13 = smov 48  ;;  %v3381_v31 = vld [vmem:[%s6167_s0 + $0x204] ss:$16 sm:%s2214_s29]   ;;  %v1419_v27 = vpop.permute.xlu0 %1418   ;;  %v1487_v34 = vpop.permute.xlu1 %1486  }
 0x104   :  { %v3367_v28 = vld [vmem:[%s6167_s0 + $0x185] ss:$16 sm:%s2146_s19]   ;;  %v2144_v25 = vsel %vm10_vm1, %v3366_v23, %v2139_v24  ;;  %s2192_s19 = smov 192  ;;  %v3374_v4 = vld [vmem:[%s6167_s0 + $0x4] ss:$16 sm:%s2179_s8]   ;;  %v2217_v35 = vsel %vm14_vm2, %v3381_v31, %v2212_v33  ;;  %s2224_s8 = smov 3 }
 0x105   :  { %v2149_v29 = vsel %vm14_vm2, %v3367_v28, %v2144_v25  ;;  %v3375_v38 = vld [vmem:[%s6167_s0 + $0x4] ss:$16 sm:%s2182_s10]   ;;  %s2227_s10 = smov 12  ;;  %3217 = vst.msk [vmem:[%s6168_s1 + $0x38] sm:$0xff] %vm1283_vm10, %v1442_v19   ;;  %3212 = vst.msk [vmem:[%s6168_s1 + $0x18] sm:$0xff] %vm1283_vm10, %v1419_v27  }
 0x106   :  { %2150 = vrot.lane.b32.xlu0 %v2149_v29, %s3555_s3  ;;  %v3376_v6 = vld [vmem:[%s6167_s0 + $0x4] ss:$16 sm:%s2187_s13]   ;;  %2218 = vrot.lane.b32.xlu1 %v2217_v35, %s3556_s2  ;;  %v2185_v36 = vsel %vm6_vm0, %v3375_v38, %v3374_v4  ;;  %s2232_s13 = smov 48  ;;  %s2621_s3 = smov 48 }
 0x107   :  { %v3377_v37 = vld [vmem:[%s6167_s0 + $0x4] ss:$16 sm:%s2192_s19]   ;;  %v2190_v39 = vsel %vm10_vm1, %v3376_v6, %v2185_v36  ;;  %s2237_s19 = smov 192  ;;  %3226 = vst.msk [vmem:[%s6168_s1 + $0x20] sm:$0xff] %vm1466_vm11, %v1487_v34   ;;  %v1465_v16 = vpop.permute.xlu0 %1464  }
 0x108   :  { %v3389_v41 = vld [vmem:[%s6167_s0 + $0x284] ss:$16 sm:%s2250_s21]   ;;  %v2195_v12 = vsel %vm14_vm2, %v3377_v37, %v2190_v39  ;;  %s2296_s21 = smov 12  ;;  %1467 = vst.msk [vmem:[%s6168_s1] sm:$0xff] %vm1466_vm11, %v1465_v16  }
 0x109   :  { %v2253_v42 = vsel %vm6_vm0, %v3389_v41, %v3388_v40  ;;  %v3391_v45 = vld [vmem:[%s6167_s0 + $0x284] ss:$16 sm:%s2260_s28]   ;;  %s2306_s28 = smov 192  ;;  %v3427_v40 = vld [vmem:[%s6167_s0 + $0x283] ss:$16 sm:%s2430_s4]   ;;  %s2476_s4 = smov 3 }
 0x10a   :  { %2196 = vrot.lane.b32.xlu0 %v2195_v12, %s3556_s2  ;;  %v2258_v46 = vsel %vm10_vm1, %v3390_v43, %v2253_v42  ;;  %v3383_v47 = vld [vmem:[%s6167_s0 + $0x84] ss:$16 sm:%s2224_s8]   ;;  %s2270_s8 = smov 3 }
 0x10b   :  { %v2263_v50 = vsel %vm14_vm2, %v3391_v45, %v2258_v46  ;;  %v3384_v51 = vld [vmem:[%s6167_s0 + $0x84] ss:$16 sm:%s2227_s10]   ;;  %s2273_s10 = smov 12  ;;  %v3429_v43 = vld [vmem:[%s6167_s0 + $0x283] ss:$16 sm:%s2438_s25]   ;;  %s2484_s25 = smov 48 }
 0x10c   :  { %v3385_v52 = vld [vmem:[%s6167_s0 + $0x84] ss:$16 sm:%s2232_s13]   ;;  %2264 = vrot.lane.b32.xlu1 %v2263_v50, %s3556_s2  ;;  %v2230_v14 = vsel %vm6_vm0, %v3384_v51, %v3383_v47  ;;  %s2278_s13 = smov 48 }
 0x10d   :  { %v3386_v53 = vld [vmem:[%s6167_s0 + $0x84] ss:$16 sm:%s2237_s19]   ;;  %v2235_v55 = vsel %vm10_vm1, %v3385_v52, %v2230_v14  ;;  %s2283_s19 = smov 192  ;;  %v3444_v19 = vld [vmem:[%s6167_s0 + $0x183] ss:$16 sm:%s2507_s11]   ;;  %s2799_s11 = smov 12 }
 0x10e   :  { %v3399_v44 = vld [vmem:[%s6167_s0 + $0x304] ss:$16 sm:%s2296_s21]   ;;  %v2240_v58 = vsel %vm14_vm2, %v3386_v53, %v2235_v55  ;;  %s2342_s21 = smov 12  ;;  %v3437_v55 = vld [vmem:[%s6167_s0 + $0x303] ss:$16 sm:%s2476_s4]   ;;  %s2626_s4 = smov 192 }
 0x10f   :  { %v2299_v59 = vsel %vm6_vm0, %v3399_v44, %v3398_v56  ;;  %v3401_v63 = vld [vmem:[%s6167_s0 + $0x304] ss:$16 sm:%s2306_s28]   ;;  %2241 = vrot.lane.b32.xlu0 %v2240_v58, %s3556_s2  ;;  %s2352_s28 = smov 192 }
 0x110   :  { %v2304_v0 = vsel %vm10_vm1, %v3400_v62, %v2299_v59  ;;  %v3393_v22 = vld [vmem:[%s6167_s0 + $0x104] ss:$16 sm:%s2270_s8]   ;;  %s2316_s8 = smov 3  ;;  %v3439_v58 = vld [vmem:[%s6167_s0 + $0x303] ss:$16 sm:%s2484_s25]   ;;  %s2545_s25 = smov 3 }
 0x111   :  { %v2309_v1 = vsel %vm14_vm2, %v3401_v63, %v2304_v0  ;;  %v3394_v2 = vld [vmem:[%s6167_s0 + $0x104] ss:$16 sm:%s2273_s10]   ;;  %s2319_s10 = smov 12  ;;  %v3432_v63 = vld [vmem:[%s6167_s0 + $0x103] ss:$16 sm:%s2453_s5]   ;;  %v1533_v0 = vpop.permute.xlu1 %1532  }
 0x112   :  { %v3395_v54 = vld [vmem:[%s6167_s0 + $0x104] ss:$16 sm:%s2278_s13]   ;;  %2310 = vrot.lane.b32.xlu1 %v2309_v1, %s3556_s2  ;;  %v2276_v3 = vsel %vm6_vm0, %v3394_v2, %v3393_v22  ;;  %s2324_s13 = smov 48  ;;  %3236 = vst.msk [vmem:[%s6168_s1 + $0x28] sm:$0xff] %vm1466_vm11, %v1533_v0   ;;  %v2459_v2 = vsel %vm6_vm0, %v3433_v49, %v3432_v63 }
 0x113   :  { %v3396_v5 = vld [vmem:[%s6167_s0 + $0x104] ss:$16 sm:%s2283_s19]   ;;  %v2281_v7 = vsel %vm10_vm1, %v3395_v54, %v2276_v3  ;;  %s2329_s19 = smov 192  ;;  %v3434_v1 = vld [vmem:[%s6167_s0 + $0x103] ss:$16 sm:%s2461_s27]   ;;  %v1510_v3 = vpop.permute.xlu0 %1509   ;;  %s2750_s27 = smov 3 }
 0x114   :  { %v3408_v8 = vld [vmem:[%s6167_s0 + $0x384] ss:$16 sm:%s2339_s7]   ;;  %v2286_v61 = vsel %vm14_vm2, %v3396_v5, %v2281_v7  ;;  %s2384_s7 = smov 3  ;;  %v3435_v54 = vld [vmem:[%s6167_s0 + $0x103] ss:$16 sm:%s2466_s17]   ;;  %v2464_v5 = vsel %vm10_vm1, %v3434_v1, %v2459_v2  ;;  %s2512_s17 = smov 192 }
 0x115   :  { %v3409_v9 = vld [vmem:[%s6167_s0 + $0x384] ss:$16 sm:%s2342_s21]   ;;  %2287 = vrot.lane.b32.xlu0 %v2286_v61, %s3556_s2  ;;  %s2387_s21 = smov 12  ;;  %3231 = vst.msk [vmem:[%s6168_s1 + $0x8] sm:$0xff] %vm1466_vm11, %v1510_v3  }
 0x116   :  { %v2345_v11 = vsel %vm6_vm0, %v3409_v9, %v3408_v8  ;;  %v3410_v13 = vld [vmem:[%s6167_s0 + $0x384] ss:$16 sm:%s2347_s26]   ;;  %s2392_s26 = smov 48  ;;  %v3417_v26 = vld [vmem:[%s6167_s0 + $0x203] ss:$16 sm:%s2384_s7]   ;;  %s2433_s7 = smov 12  ;;  %v2469_v9 = vsel %vm14_vm2, %v3435_v54, %v2464_v5 }
 0x117   :  { %v3411_v15 = vld [vmem:[%s6167_s0 + $0x384] ss:$16 sm:%s2352_s28]   ;;  %v2350_v17 = vsel %vm10_vm1, %v3410_v13, %v2345_v11  ;;  %s2397_s28 = smov 192  ;;  %v3418_v60 = vld [vmem:[%s6167_s0 + $0x203] ss:$16 sm:%s2387_s21]   ;;  %s2530_s21 = smov 48 }
 0x118   :  { %v3403_v18 = vld [vmem:[%s6167_s0 + $0x184] ss:$16 sm:%s2316_s8]   ;;  %v2355_v20 = vsel %vm14_vm2, %v3411_v15, %v2350_v17  ;;  %s2362_s8 = smov 3  ;;  %v2390_v30 = vsel %vm6_vm0, %v3418_v60, %v3417_v26  ;;  %v3419_v32 = vld [vmem:[%s6167_s0 + $0x203] ss:$16 sm:%s2392_s26]   ;;  %s2443_s26 = smov 192 }
 0x119   :  { %v3404_v21 = vld [vmem:[%s6167_s0 + $0x184] ss:$16 sm:%s2319_s10]   ;;  %2356 = vrot.lane.b32.xlu1 %v2355_v20, %s3556_s2  ;;  %s2365_s10 = smov 12  ;;  %v2395_v33 = vsel %vm10_vm1, %v3419_v32, %v2390_v30 }
 0x11a   :  { %v3405_v23 = vld [vmem:[%s6167_s0 + $0x184] ss:$16 sm:%s2324_s13]   ;;  %v2322_v24 = vsel %vm6_vm0, %v3404_v21, %v3403_v18  ;;  %s2370_s13 = smov 48  ;;  %v3420_v31 = vld [vmem:[%s6167_s0 + $0x203] ss:$16 sm:%s2397_s28]   ;;  %s2499_s28 = smov 3  ;;  %v1556_v34 = vpop.permute.xlu0 %1555  }
 0x11b   :  { %v3406_v28 = vld [vmem:[%s6167_s0 + $0x184] ss:$16 sm:%s2329_s19]   ;;  %v2327_v25 = vsel %vm10_vm1, %v3405_v23, %v2322_v24  ;;  %s2375_s19 = smov 192  ;;  %v3413_v4 = vld [vmem:[%s6167_s0 + $0x3] ss:$16 sm:%s2362_s8]   ;;  %v2400_v35 = vsel %vm14_vm2, %v3420_v31, %v2395_v33  ;;  %s2407_s8 = smov 3 }
 0x11c   :  { %v2332_v29 = vsel %vm14_vm2, %v3406_v28, %v2327_v25  ;;  %v3414_v38 = vld [vmem:[%s6167_s0 + $0x3] ss:$16 sm:%s2365_s10]   ;;  %s2410_s10 = smov 12  ;;  %v3452_v32 = vld [vmem:[%s6167_s0 + $0x2] ss:$16 sm:%s2545_s25]   ;;  %s2781_s25 = smov 48 }
 0x11d   :  { %2333 = vrot.lane.b32.xlu0 %v2332_v29, %s3556_s2  ;;  %v3415_v6 = vld [vmem:[%s6167_s0 + $0x3] ss:$16 sm:%s2370_s13]   ;;  %2401 = vrot.lane.b32.xlu1 %v2400_v35, %s3557_s30  ;;  %v2368_v36 = vsel %vm6_vm0, %v3414_v38, %v3413_v4  ;;  %s2415_s13 = smov 48  ;;  %v1579_v29 = vpop.permute.xlu1 %1578   ;;  %s2672_s2 = smov 192 }
 0x11e   :  { %v3416_v37 = vld [vmem:[%s6167_s0 + $0x3] ss:$16 sm:%s2375_s19]   ;;  %v2373_v39 = vsel %vm10_vm1, %v3415_v6, %v2368_v36  ;;  %s2420_s19 = smov 192  ;;  %3246 = vst.msk [vmem:[%s6168_s1 + $0x30] sm:$0xff] %vm1466_vm11, %v1579_v29   ;;  %3241 = vst.msk [vmem:[%s6168_s1 + $0x10] sm:$0xff] %vm1466_vm11, %v1556_v34  }
 0x11f   :  { %v3428_v41 = vld [vmem:[%s6167_s0 + $0x283] ss:$16 sm:%s2433_s7]   ;;  %v2378_v12 = vsel %vm14_vm2, %v3416_v37, %v2373_v39  ;;  %s2479_s7 = smov 12  ;;  %v3453_v33 = vld [vmem:[%s6167_s0 + $0x2] ss:$16 sm:%s2548_s6]   ;;  %s2593_s6 = smov 12 }
 0x120   :  { %v2436_v42 = vsel %vm6_vm0, %v3428_v41, %v3427_v40  ;;  %v3430_v45 = vld [vmem:[%s6167_s0 + $0x283] ss:$16 sm:%s2443_s26]   ;;  %s2489_s26 = smov 192  ;;  %v2551_v35 = vsel %vm6_vm0, %v3453_v33, %v3452_v32  ;;  %v3466_v36 = vld [vmem:[%s6167_s0 + $0x282] ss:$16 sm:%s2613_s14]   ;;  %s2659_s14 = smov 3 }
 0x121   :  { %2379 = vrot.lane.b32.xlu0 %v2378_v12, %s3557_s30  ;;  %v2441_v46 = vsel %vm10_vm1, %v3429_v43, %v2436_v42  ;;  %v3422_v47 = vld [vmem:[%s6167_s0 + $0x83] ss:$16 sm:%s2407_s8]   ;;  %s2553_s8 = smov 48 }
 0x122   :  { %v2446_v48 = vsel %vm14_vm2, %v3430_v45, %v2441_v46  ;;  %v3423_v50 = vld [vmem:[%s6167_s0 + $0x83] ss:$16 sm:%s2410_s10]   ;;  %s2558_s10 = smov 192  ;;  %v3454_v4 = vld [vmem:[%s6167_s0 + $0x2] ss:$16 sm:%s2553_s8]   ;;  %s2598_s8 = smov 48 }
 0x123   :  { %v3424_v51 = vld [vmem:[%s6167_s0 + $0x83] ss:$16 sm:%s2415_s13]   ;;  %2447 = vrot.lane.b32.xlu1 %v2446_v48, %s3557_s30  ;;  %v2413_v52 = vsel %vm6_vm0, %v3423_v50, %v3422_v47  ;;  %v2556_v6 = vsel %vm10_vm1, %v3454_v4, %v2551_v35  ;;  %s2708_s13 = smov 12 }
 0x124   :  { %v3425_v14 = vld [vmem:[%s6167_s0 + $0x83] ss:$16 sm:%s2420_s19]   ;;  %v2418_v53 = vsel %vm10_vm1, %v3424_v51, %v2413_v52  ;;  %v3455_v38 = vld [vmem:[%s6167_s0 + $0x2] ss:$16 sm:%s2558_s10]   ;;  %s2603_s10 = smov 192  ;;  %s2713_s19 = smov 48 }
 0x125   :  { %v3438_v56 = vld [vmem:[%s6167_s0 + $0x303] ss:$16 sm:%s2479_s7]   ;;  %v2423_v44 = vsel %vm14_vm2, %v3425_v14, %v2418_v53  ;;  %s3558_s7 = smov 16   ;;  %v3467_v37 = vld [vmem:[%s6167_s0 + $0x282] ss:$16 sm:%s2616_s16]   ;;  %v2561_v39 = vsel %vm14_vm2, %v3455_v38, %v2556_v6  ;;  %s2662_s16 = smov 12  ;;  %v1625_v14 = vpop.permute.xlu1 %1624  }
 0x126   :  { %v2482_v57 = vsel %vm6_vm0, %v3438_v56, %v3437_v55  ;;  %v3440_v59 = vld [vmem:[%s6167_s0 + $0x303] ss:$16 sm:%s2489_s26]   ;;  %2424 = vrot.lane.b32.xlu0 %v2423_v44, %s3557_s30  ;;  %v2619_v40 = vsel %vm6_vm0, %v3467_v37, %v3466_v36  ;;  %s2639_s26 = smov 12  ;;  %3256 = vst.msk [vmem:[%s6168_s1 + $0x38] sm:$0xff] %vm1466_vm11, %v1625_v14  }
 0x127   :  { %v2487_v62 = vsel %vm10_vm1, %v3439_v58, %v2482_v57  ;;  %v3447_v7 = vld [vmem:[%s6167_s0 + $0x383] ss:$16 sm:%s2522_s15]   ;;  %s2567_s15 = smov 3  ;;  %v3468_v41 = vld [vmem:[%s6167_s0 + $0x282] ss:$16 sm:%s2621_s3]  }
 0x128   :  { %v2492_v22 = vsel %vm14_vm2, %v3440_v59, %v2487_v62  ;;  %v3448_v8 = vld [vmem:[%s6167_s0 + $0x383] ss:$16 sm:%s2525_s20]   ;;  %s2570_s20 = smov 12  ;;  %v3456_v24 = vld [vmem:[%s6167_s0 + $0x202] ss:$16 sm:%s2567_s15]   ;;  %v2624_v12 = vsel %vm10_vm1, %v3468_v41, %v2619_v40  ;;  %v1602_v59 = vpop.permute.xlu0 %1601   ;;  %s2718_s15 = smov 192 }
 0x129   :  { %2493 = vrot.lane.b32.xlu1 %v2492_v22, %s3557_s30  ;;  %v2528_v10 = vsel %vm6_vm0, %v3448_v8, %v3447_v7  ;;  %v3449_v61 = vld [vmem:[%s6167_s0 + $0x383] ss:$16 sm:%s2530_s21]   ;;  %s2575_s21 = smov 48  ;;  %3251 = vst.msk [vmem:[%s6168_s1 + $0x18] sm:$0xff] %vm1466_vm11, %v1602_v59  }
 0x12a   :  { %v3450_v11 = vld [vmem:[%s6167_s0 + $0x383] ss:$16 sm:%s2535_s23]   ;;  %2470 = vrot.lane.b32.xlu0 %v2469_v9, %s3557_s30  ;;  %v2533_v13 = vsel %vm10_vm1, %v3449_v61, %v2528_v10  ;;  %s2580_s23 = smov 192 }
 0x12b   :  { %v3442_v15 = vld [vmem:[%s6167_s0 + $0x183] ss:$16 sm:%s2499_s28]   ;;  %v2538_v17 = vsel %vm14_vm2, %v3450_v11, %v2533_v13  ;;  %v3457_v28 = vld [vmem:[%s6167_s0 + $0x202] ss:$16 sm:%s2570_s20]   ;;  %s2667_s20 = smov 48  ;;  %s2644_s28 = smov 48 }
 0x12c   :  { %v3443_v18 = vld [vmem:[%s6167_s0 + $0x183] ss:$16 sm:%s2502_s9]   ;;  %v2573_v26 = vsel %vm6_vm0, %v3457_v28, %v3456_v24  ;;  %v3458_v60 = vld [vmem:[%s6167_s0 + $0x202] ss:$16 sm:%s2575_s21]   ;;  %s2636_s21 = smov 3  ;;  %s2649_s9 = smov 192 }
 0x12d   :  { %2539 = vrot.lane.b32.xlu1 %v2538_v17, %s3557_s30  ;;  %v2505_v20 = vsel %vm6_vm0, %v3443_v18, %v3442_v15  ;;  %v3445_v21 = vld [vmem:[%s6167_s0 + $0x183] ss:$16 sm:%s2512_s17]   ;;  %v2578_v30 = vsel %vm10_vm1, %v3458_v60, %v2573_v26  ;;  %s2758_s17 = smov 48 }
 0x12e   :  { %v2510_v23 = vsel %vm10_vm1, %v3444_v19, %v2505_v20  ;;  %v3459_v27 = vld [vmem:[%s6167_s0 + $0x202] ss:$16 sm:%s2580_s23]   ;;  %v3495_v20 = vld [vmem:[%s6167_s0 + $0x201] ss:$16 sm:%s2750_s27]   ;;  %s2731_s23 = smov 12 }
 0x12f   :  { %v2515_v25 = vsel %vm14_vm2, %v3445_v21, %v2510_v23  ;;  %v2583_v31 = vsel %vm14_vm2, %v3459_v27, %v2578_v30  ;;  %v3469_v16 = vld [vmem:[%s6167_s0 + $0x282] ss:$16 sm:%s2626_s4]   ;;  %v3497_v28 = vld [vmem:[%s6167_s0 + $0x201] ss:$16 sm:%s2758_s17]   ;;  %s2809_s17 = smov 192 }
 0x130   :  { %2516 = vrot.lane.b32.xlu0 %v2515_v25, %s3557_s30  ;;  %v3461_v42 = vld [vmem:[%s6167_s0 + $0x82] ss:$16 sm:%s2590_s24]   ;;  %v2629_v43 = vsel %vm14_vm2, %v3469_v16, %v2624_v12  ;;  %s2705_s30 = smov 3  ;;  %s2736_s24 = smov 48 }
 0x131   :  { %2584 = vrot.lane.b32.xlu1 %v2583_v31, %s3558_s7  ;;  %v3462_v45 = vld [vmem:[%s6167_s0 + $0x82] ss:$16 sm:%s2593_s6]   ;;  %v1670_v18 = vpop.permute.xlu1 %1669   ;;  %s2741_s6 = smov 192 }
 0x132   :  { %v3463_v46 = vld [vmem:[%s6167_s0 + $0x82] ss:$16 sm:%s2598_s8]   ;;  %v2596_v47 = vsel %vm6_vm0, %v3462_v45, %v3461_v42  ;;  %3265 = vst.msk [vmem:[%s6168_s1 + $0x20] sm:$0xff] %vm1649_vm12, %v1670_v18   ;;  %v1648_v26 = vpop.permute.xlu0 %1647  }
 0x133   :  { %v3464_v48 = vld [vmem:[%s6167_s0 + $0x82] ss:$16 sm:%s2603_s10]   ;;  %v2601_v50 = vsel %vm10_vm1, %v3463_v46, %v2596_v47  ;;  %s2753_s10 = smov 12  ;;  %v3498_v25 = vld [vmem:[%s6167_s0 + $0x201] ss:$16 sm:%s2763_s18]   ;;  %s3559_s18 = smov 8  }
 0x134   :  { %2562 = vrot.lane.b32.xlu0 %v2561_v39, %s3558_s7  ;;  %v3476_v51 = vld [vmem:[%s6167_s0 + $0x302] ss:$16 sm:%s2659_s14]   ;;  %v2606_v53 = vsel %vm14_vm2, %v3464_v48, %v2601_v50  ;;  %1650 = vst.msk [vmem:[%s6168_s1] sm:$0xff] %vm1649_vm12, %v1648_v26  }
 0x135   :  { %2630 = vrot.lane.b32.xlu1 %v2629_v43, %s3558_s7  ;;  %v3477_v52 = vld [vmem:[%s6167_s0 + $0x302] ss:$16 sm:%s2662_s16]   ;;  %s2804_s16 = smov 48 }
 0x136   :  { %v2665_v55 = vsel %vm6_vm0, %v3477_v52, %v3476_v51  ;;  %v3478_v56 = vld [vmem:[%s6167_s0 + $0x302] ss:$16 sm:%s2667_s20]   ;;  %s2728_s20 = smov 3  ;;  %v3496_v21 = vld [vmem:[%s6167_s0 + $0x201] ss:$16 sm:%s2753_s10]   ;;  %v1716_v31 = vpop.permute.xlu1 %1715  }
 0x137   :  { %v3479_v44 = vld [vmem:[%s6167_s0 + $0x302] ss:$16 sm:%s2672_s2]   ;;  %v2670_v57 = vsel %vm10_vm1, %v3478_v56, %v2665_v55  ;;  %v2756_v24 = vsel %vm6_vm0, %v3496_v21, %v3495_v20  ;;  %v3491_v27 = vld [vmem:[%s6167_s0 + $0x1] ss:$16 sm:%s2728_s20]   ;;  %s2773_s20 = smov 3 }
 0x138   :  { %2607 = vrot.lane.b32.xlu0 %v2606_v53, %s3558_s7  ;;  %v3471_v58 = vld [vmem:[%s6167_s0 + $0x102] ss:$16 sm:%s2636_s21]   ;;  %v2675_v62 = vsel %vm14_vm2, %v3479_v44, %v2670_v57  ;;  %s2682_s21 = smov 3  ;;  %v2761_v60 = vsel %vm10_vm1, %v3497_v28, %v2756_v24  ;;  %3275 = vst.msk [vmem:[%s6168_s1 + $0x28] sm:$0xff] %vm1649_vm12, %v1716_v31  }
 0x139   :  { %v3472_v63 = vld [vmem:[%s6167_s0 + $0x102] ss:$16 sm:%s2639_s26]   ;;  %2676 = vrot.lane.b32.xlu1 %v2675_v62, %s3558_s7  ;;  %s2685_s26 = smov 12  ;;  %v2766_v29 = vsel %vm14_vm2, %v3498_v25, %v2761_v60 }
 0x13a   :  { %v3473_v0 = vld [vmem:[%s6167_s0 + $0x102] ss:$16 sm:%s2644_s28]   ;;  %v2642_v22 = vsel %vm6_vm0, %v3472_v63, %v3471_v58  ;;  %s2690_s28 = smov 48  ;;  %v3492_v30 = vld [vmem:[%s6167_s0 + $0x1] ss:$16 sm:%s2731_s23]   ;;  %v1693_v40 = vpop.permute.xlu0 %1692  }
 0x13b   :  { %v3474_v49 = vld [vmem:[%s6167_s0 + $0x102] ss:$16 sm:%s2649_s9]   ;;  %v2647_v1 = vsel %vm10_vm1, %v3473_v0, %v2642_v22  ;;  %s2695_s9 = smov 192  ;;  %v3493_v32 = vld [vmem:[%s6167_s0 + $0x1] ss:$16 sm:%s2736_s24]   ;;  %v2734_v33 = vsel %vm6_vm0, %v3492_v30, %v3491_v27 }
 0x13c   :  { %v3486_v2 = vld [vmem:[%s6167_s0 + $0x382] ss:$16 sm:%s2705_s30]   ;;  %v2652_v3 = vsel %vm14_vm2, %v3474_v49, %v2647_v1  ;;  %v3494_v4 = vld [vmem:[%s6167_s0 + $0x1] ss:$16 sm:%s2741_s6]   ;;  %v2739_v34 = vsel %vm10_vm1, %v3493_v32, %v2734_v33  ;;  %s2786_s6 = smov 192 }
 0x13d   :  { %v3487_v54 = vld [vmem:[%s6167_s0 + $0x382] ss:$16 sm:%s2708_s13]   ;;  %2653 = vrot.lane.b32.xlu0 %v2652_v3, %s3558_s7  ;;  %v2744_v6 = vsel %vm14_vm2, %v3494_v4, %v2739_v34  ;;  %3270 = vst.msk [vmem:[%s6168_s1 + $0x8] sm:$0xff] %vm1649_vm12, %v1693_v40  }
 0x13e   :  { %v2711_v5 = vsel %vm6_vm0, %v3487_v54, %v3486_v2  ;;  %v3488_v7 = vld [vmem:[%s6167_s0 + $0x382] ss:$16 sm:%s2713_s19]   ;;  %v3506_v38 = vld [vmem:[%s6167_s0 + $0x281] ss:$16 sm:%s2799_s11]   ;;  %s2845_s11 = smov 12  ;;  %v1762_v45 = vpop.permute.xlu1 %1761  }
 0x13f   :  { %v3489_v8 = vld [vmem:[%s6167_s0 + $0x382] ss:$16 sm:%s2718_s15]   ;;  %v2716_v9 = vsel %vm10_vm1, %v3488_v7, %v2711_v5  ;;  %v3507_v37 = vld [vmem:[%s6167_s0 + $0x281] ss:$16 sm:%s2804_s16]   ;;  %s2850_s16 = smov 48 }
 0x140   :  { %v3481_v10 = vld [vmem:[%s6167_s0 + $0x182] ss:$16 sm:%s2682_s21]   ;;  %v2721_v61 = vsel %vm14_vm2, %v3489_v8, %v2716_v9  ;;  %v3508_v39 = vld [vmem:[%s6167_s0 + $0x281] ss:$16 sm:%s2809_s17]   ;;  %s2855_s17 = smov 192 }
 0x141   :  { %v3482_v11 = vld [vmem:[%s6167_s0 + $0x182] ss:$16 sm:%s2685_s26]   ;;  %2722 = vrot.lane.b32.xlu1 %v2721_v61, %s3558_s7  ;;  %3285 = vst.msk [vmem:[%s6168_s1 + $0x30] sm:$0xff] %vm1649_vm12, %v1762_v45  }
 0x142   :  { %v3483_v13 = vld [vmem:[%s6167_s0 + $0x182] ss:$16 sm:%s2690_s28]   ;;  %v2688_v15 = vsel %vm6_vm0, %v3482_v11, %v3481_v10  ;;  %v3500_v16 = vld [vmem:[%s6167_s0 + $0x81] ss:$16 sm:%s2773_s20]   ;;  %s2819_s20 = smov 3  ;;  %v1739_v56 = vpop.permute.xlu0 %1738  }
 0x143   :  { %v3484_v17 = vld [vmem:[%s6167_s0 + $0x182] ss:$16 sm:%s2695_s9]   ;;  %v2693_v19 = vsel %vm10_vm1, %v3483_v13, %v2688_v15  ;;  %s2796_s9 = smov 3  ;;  %v3501_v42 = vld [vmem:[%s6167_s0 + $0x81] ss:$16 sm:%s2776_s22]   ;;  %s2822_s22 = smov 12 }
 0x144   :  { %v2698_v23 = vsel %vm14_vm2, %v3484_v17, %v2693_v19  ;;  %v3505_v35 = vld [vmem:[%s6167_s0 + $0x281] ss:$16 sm:%s2796_s9]   ;;  %s2842_s9 = smov 3  ;;  %v2779_v46 = vsel %vm6_vm0, %v3501_v42, %v3500_v16  ;;  %3280 = vst.msk [vmem:[%s6168_s1 + $0x10] sm:$0xff] %vm1649_vm12, %v1739_v56  }
 0x145   :  { %2699 = vrot.lane.b32.xlu0 %v2698_v23, %s3558_s7  ;;  %2767 = vrot.lane.b32.xlu1 %v2766_v29, %s3559_s18  ;;  %v2802_v36 = vsel %vm6_vm0, %v3506_v38, %v3505_v35  ;;  %v3502_v43 = vld [vmem:[%s6167_s0 + $0x81] ss:$16 sm:%s2781_s25]   ;;  %s2827_s25 = smov 48 }
 0x146   :  { %v2807_v41 = vsel %vm10_vm1, %v3507_v37, %v2802_v36  ;;  %v3503_v47 = vld [vmem:[%s6167_s0 + $0x81] ss:$16 sm:%s2786_s6]   ;;  %v2784_v48 = vsel %vm10_vm1, %v3502_v43, %v2779_v46  ;;  %s2832_s6 = smov 192  ;;  %v1808_v63 = vpop.permute.xlu1 %1807  }
 0x147   :  { %v2812_v12 = vsel %vm14_vm2, %v3508_v39, %v2807_v41  ;;  %v3515_v50 = vld [vmem:[%s6167_s0 + $0x301] ss:$16 sm:%s2842_s9]   ;;  %v2789_v52 = vsel %vm14_vm2, %v3503_v47, %v2784_v48  ;;  %s2888_s9 = smov 3  ;;  %3295 = vst.msk [vmem:[%s6168_s1 + $0x38] sm:$0xff] %vm1649_vm12, %v1808_v63  }
 0x148   :  { %v3516_v51 = vld [vmem:[%s6167_s0 + $0x301] ss:$16 sm:%s2845_s11]   ;;  %s2891_s11 = smov 12 }
 0x149   :  { %2745 = vrot.lane.b32.xlu0 %v2744_v6, %s3559_s18  ;;  %2813 = vrot.lane.b32.xlu1 %v2812_v12, %s3559_s18  ;;  %v2848_v14 = vsel %vm6_vm0, %v3516_v51, %v3515_v50  ;;  %v3517_v53 = vld [vmem:[%s6167_s0 + $0x301] ss:$16 sm:%s2850_s16]   ;;  %s2896_s16 = smov 48 }
 0x14a   :  { %v3518_v55 = vld [vmem:[%s6167_s0 + $0x301] ss:$16 sm:%s2855_s17]   ;;  %v2853_v44 = vsel %vm10_vm1, %v3517_v53, %v2848_v14  ;;  %s2901_s17 = smov 192  ;;  %v1785_v8 = vpop.permute.xlu0 %1784   ;;  %v1853_v15 = vpop.permute.xlu1 %1852  }
 0x14b   :  { %v3510_v57 = vld [vmem:[%s6167_s0 + $0x101] ss:$16 sm:%s2819_s20]   ;;  %v2858_v58 = vsel %vm14_vm2, %v3518_v55, %v2853_v44  ;;  %s2865_s20 = smov 3  ;;  %3290 = vst.msk [vmem:[%s6168_s1 + $0x18] sm:$0xff] %vm1649_vm12, %v1785_v8  }
 0x14c   :  { %v3511_v59 = vld [vmem:[%s6167_s0 + $0x101] ss:$16 sm:%s2822_s22]   ;;  %s2868_s22 = smov 12  ;;  %3304 = vst.msk [vmem:[%s6168_s1 + $0x20] sm:$0xff] %vm1832_vm13, %v1853_v15  }
 0x14d   :  { %2790 = vrot.lane.b32.xlu0 %v2789_v52, %s3559_s18  ;;  %v3512_v62 = vld [vmem:[%s6167_s0 + $0x101] ss:$16 sm:%s2827_s25]   ;;  %2859 = vrot.lane.b32.xlu1 %v2858_v58, %s3559_s18  ;;  %v2825_v0 = vsel %vm6_vm0, %v3511_v59, %v3510_v57  ;;  %s2873_s25 = smov 48 }
 0x14e   :  { %v3513_v22 = vld [vmem:[%s6167_s0 + $0x101] ss:$16 sm:%s2832_s6]   ;;  %v2830_v49 = vsel %vm10_vm1, %v3512_v62, %v2825_v0  ;;  %s2878_s6 = smov 192  ;;  %v1831_v21 = vpop.permute.xlu0 %1830  }
 0x14f   :  { %v3525_v1 = vld [vmem:[%s6167_s0 + $0x381] ss:$16 sm:%s2888_s9]   ;;  %v2835_v54 = vsel %vm14_vm2, %v3513_v22, %v2830_v49  ;;  %1833 = vst.msk [vmem:[%s6168_s1] sm:$0xff] %vm1832_vm13, %v1831_v21  }
 0x150   :  { %v3526_v2 = vld [vmem:[%s6167_s0 + $0x381] ss:$16 sm:%s2891_s11]   ;;  %v1899_v23 = vpop.permute.xlu1 %1898  }
 0x151   :  { %v2894_v3 = vsel %vm6_vm0, %v3526_v2, %v3525_v1  ;;  %v3527_v5 = vld [vmem:[%s6167_s0 + $0x381] ss:$16 sm:%s2896_s16]   ;;  %2836 = vrot.lane.b32.xlu0 %v2835_v54, %s3559_s18  ;;  %3314 = vst.msk [vmem:[%s6168_s1 + $0x28] sm:$0xff] %vm1832_vm13, %v1899_v23  }
 0x152   :  { %v3528_v7 = vld [vmem:[%s6167_s0 + $0x381] ss:$16 sm:%s2901_s17]   ;;  %v2899_v9 = vsel %vm10_vm1, %v3527_v5, %v2894_v3 }
 0x153   :  { %v3520_v10 = vld [vmem:[%s6167_s0 + $0x181] ss:$16 sm:%s2865_s20]   ;;  %v2904_v61 = vsel %vm14_vm2, %v3528_v7, %v2899_v9  ;;  %v1876_v24 = vpop.permute.xlu0 %1875  }
 0x154   :  { %v3521_v11 = vld [vmem:[%s6167_s0 + $0x181] ss:$16 sm:%s2868_s22]   ;;  %2905 = vrot.lane.b32.xlu1 %v2904_v61, %s3559_s18  ;;  %3309 = vst.msk [vmem:[%s6168_s1 + $0x8] sm:$0xff] %vm1832_vm13, %v1876_v24  }
 0x155   :  { %v3522_v13 = vld [vmem:[%s6167_s0 + $0x181] ss:$16 sm:%s2873_s25]   ;;  %v2871_v17 = vsel %vm6_vm0, %v3521_v11, %v3520_v10  ;;  %vm2381_vm0 = vcmask 261312  }
 0x156   :  { %v3523_v18 = vld [vmem:[%s6167_s0 + $0x181] ss:$16 sm:%s2878_s6]   ;;  %v2876_v19 = vsel %vm10_vm1, %v3522_v13, %v2871_v17  ;;  %v1945_v28 = vpop.permute.xlu1 %1944   ;;  %vm2564_vm1 = vcmask 195712  }
 0x157   :  { %v2881_v20 = vsel %vm14_vm2, %v3523_v18, %v2876_v19  ;;  %3324 = vst.msk [vmem:[%s6168_s1 + $0x30] sm:$0xff] %vm1832_vm13, %v1945_v28   ;;  %vm2747_vm2 = vcmask 130112  }
 0x158   :  { %2882 = vrot.lane.b32.xlu0 %v2881_v20, %s3559_s18 }
 0x159   :  { %v1922_v25 = vpop.permute.xlu0 %1921  }
 0x15a   :  { %3319 = vst.msk [vmem:[%s6168_s1 + $0x10] sm:$0xff] %vm1832_vm13, %v1922_v25  }
 0x15d   :  { %v1991_v26 = vpop.permute.xlu1 %1990  }
 0x15e   :  { %3334 = vst.msk [vmem:[%s6168_s1 + $0x38] sm:$0xff] %vm1832_vm13, %v1991_v26  }
 0x161   :  { %v1968_v60 = vpop.permute.xlu0 %1967   ;;  %v2036_v27 = vpop.permute.xlu1 %2035  }
 0x162   :  { %3329 = vst.msk [vmem:[%s6168_s1 + $0x18] sm:$0xff] %vm1832_vm13, %v1968_v60  }
 0x163   :  { %3343 = vst.msk [vmem:[%s6168_s1 + $0x20] sm:$0xff] %vm2015_vm14, %v2036_v27  }
 0x165   :  { %v2014_v29 = vpop.permute.xlu0 %2013  }
 0x166   :  { %2016 = vst.msk [vmem:[%s6168_s1] sm:$0xff] %vm2015_vm14, %v2014_v29  }
 0x167   :  { %v2082_v30 = vpop.permute.xlu1 %2081  }
 0x168   :  { %3353 = vst.msk [vmem:[%s6168_s1 + $0x28] sm:$0xff] %vm2015_vm14, %v2082_v30  }
 0x16a   :  { %v2059_v32 = vpop.permute.xlu0 %2058  }
 0x16b   :  { %3348 = vst.msk [vmem:[%s6168_s1 + $0x8] sm:$0xff] %vm2015_vm14, %v2059_v32  }
 0x16d   :  { %v2128_v31 = vpop.permute.xlu1 %2127  }
 0x16e   :  { %3363 = vst.msk [vmem:[%s6168_s1 + $0x30] sm:$0xff] %vm2015_vm14, %v2128_v31  }
 0x170   :  { %v2105_v33 = vpop.permute.xlu0 %2104  }
 0x171   :  { %3358 = vst.msk [vmem:[%s6168_s1 + $0x10] sm:$0xff] %vm2015_vm14, %v2105_v33  }
 0x174   :  { %v2174_v4 = vpop.permute.xlu1 %2173  }
 0x175   :  { %3373 = vst.msk [vmem:[%s6168_s1 + $0x38] sm:$0xff] %vm2015_vm14, %v2174_v4  }
 0x178   :  { %v2151_v34 = vpop.permute.xlu0 %2150   ;;  %v2219_v35 = vpop.permute.xlu1 %2218  }
 0x179   :  { %3368 = vst.msk [vmem:[%s6168_s1 + $0x18] sm:$0xff] %vm2015_vm14, %v2151_v34  }
 0x17a   :  { %3382 = vst.msk [vmem:[%s6168_s1 + $0x20] sm:$0xff] %vm2198_vm15, %v2219_v35  }
 0x17c   :  { %v2197_v38 = vpop.permute.xlu0 %2196  }
 0x17d   :  { %2199 = vst.msk [vmem:[%s6168_s1] sm:$0xff] %vm2198_vm15, %v2197_v38  }
 0x17e   :  { %v2265_v6 = vpop.permute.xlu1 %2264  }
 0x17f   :  { %3392 = vst.msk [vmem:[%s6168_s1 + $0x28] sm:$0xff] %vm2198_vm15, %v2265_v6  }
 0x181   :  { %v2242_v36 = vpop.permute.xlu0 %2241  }
 0x182   :  { %3387 = vst.msk [vmem:[%s6168_s1 + $0x8] sm:$0xff] %vm2198_vm15, %v2242_v36  }
 0x184   :  { %v2311_v37 = vpop.permute.xlu1 %2310  }
 0x185   :  { %3402 = vst.msk [vmem:[%s6168_s1 + $0x30] sm:$0xff] %vm2198_vm15, %v2311_v37  }
 0x187   :  { %v2288_v39 = vpop.permute.xlu0 %2287  }
 0x188   :  { %3397 = vst.msk [vmem:[%s6168_s1 + $0x10] sm:$0xff] %vm2198_vm15, %v2288_v39  }
 0x18b   :  { %v2357_v40 = vpop.permute.xlu1 %2356  }
 0x18c   :  { %3412 = vst.msk [vmem:[%s6168_s1 + $0x38] sm:$0xff] %vm2198_vm15, %v2357_v40  }
 0x18f   :  { %v2334_v41 = vpop.permute.xlu0 %2333   ;;  %v2402_v16 = vpop.permute.xlu1 %2401  }
 0x190   :  { %3407 = vst.msk [vmem:[%s6168_s1 + $0x18] sm:$0xff] %vm2198_vm15, %v2334_v41  }
 0x191   :  { %3421 = vst.msk [vmem:[%s6168_s1 + $0x20] sm:$0xff] %vm2381_vm0, %v2402_v16  }
 0x193   :  { %v2380_v12 = vpop.permute.xlu0 %2379  }
 0x194   :  { %2382 = vst.msk [vmem:[%s6168_s1] sm:$0xff] %vm2381_vm0, %v2380_v12  }
 0x195   :  { %v2448_v42 = vpop.permute.xlu1 %2447  }
 0x196   :  { %3431 = vst.msk [vmem:[%s6168_s1 + $0x28] sm:$0xff] %vm2381_vm0, %v2448_v42  }
 0x198   :  { %v2425_v43 = vpop.permute.xlu0 %2424  }
 0x199   :  { %3426 = vst.msk [vmem:[%s6168_s1 + $0x8] sm:$0xff] %vm2381_vm0, %v2425_v43  }
 0x19b   :  { %v2494_v45 = vpop.permute.xlu1 %2493  }
 0x19c   :  { %3441 = vst.msk [vmem:[%s6168_s1 + $0x30] sm:$0xff] %vm2381_vm0, %v2494_v45   ;;  %v2471_v46 = vpop.permute.xlu0 %2470  }
 0x19d   :  { %3436 = vst.msk [vmem:[%s6168_s1 + $0x10] sm:$0xff] %vm2381_vm0, %v2471_v46  }
 0x19f   :  { %v2540_v47 = vpop.permute.xlu1 %2539  }
 0x1a0   :  { %3451 = vst.msk [vmem:[%s6168_s1 + $0x38] sm:$0xff] %vm2381_vm0, %v2540_v47  }
 0x1a2   :  { %v2517_v48 = vpop.permute.xlu0 %2516  }
 0x1a3   :  { %3446 = vst.msk [vmem:[%s6168_s1 + $0x18] sm:$0xff] %vm2381_vm0, %v2517_v48   ;;  %v2585_v50 = vpop.permute.xlu1 %2584  }
 0x1a4   :  { %3460 = vst.msk [vmem:[%s6168_s1 + $0x20] sm:$0xff] %vm2564_vm1, %v2585_v50  }
 0x1a6   :  { %v2563_v51 = vpop.permute.xlu0 %2562  }
 0x1a7   :  { %2565 = vst.msk [vmem:[%s6168_s1] sm:$0xff] %vm2564_vm1, %v2563_v51   ;;  %v2631_v52 = vpop.permute.xlu1 %2630  }
 0x1a8   :  { %3470 = vst.msk [vmem:[%s6168_s1 + $0x28] sm:$0xff] %vm2564_vm1, %v2631_v52  }
 0x1aa   :  { %v2608_v14 = vpop.permute.xlu0 %2607  }
 0x1ab   :  { %3465 = vst.msk [vmem:[%s6168_s1 + $0x8] sm:$0xff] %vm2564_vm1, %v2608_v14   ;;  %v2677_v53 = vpop.permute.xlu1 %2676  }
 0x1ac   :  { %3480 = vst.msk [vmem:[%s6168_s1 + $0x30] sm:$0xff] %vm2564_vm1, %v2677_v53  }
 0x1af   :  { %v2654_v55 = vpop.permute.xlu0 %2653  }
 0x1b0   :  { %3475 = vst.msk [vmem:[%s6168_s1 + $0x10] sm:$0xff] %vm2564_vm1, %v2654_v55  }
 0x1b3   :  { %v2723_v56 = vpop.permute.xlu1 %2722  }
 0x1b4   :  { %3490 = vst.msk [vmem:[%s6168_s1 + $0x38] sm:$0xff] %vm2564_vm1, %v2723_v56  }
 0x1b7   :  { %v2700_v44 = vpop.permute.xlu0 %2699   ;;  %v2768_v57 = vpop.permute.xlu1 %2767  }
 0x1b8   :  { %3485 = vst.msk [vmem:[%s6168_s1 + $0x18] sm:$0xff] %vm2564_vm1, %v2700_v44  }
 0x1b9   :  { %3499 = vst.msk [vmem:[%s6168_s1 + $0x20] sm:$0xff] %vm2747_vm2, %v2768_v57  }
 0x1bb   :  { %v2746_v58 = vpop.permute.xlu0 %2745   ;;  %v2814_v59 = vpop.permute.xlu1 %2813  }
 0x1bc   :  { %2748 = vst.msk [vmem:[%s6168_s1] sm:$0xff] %vm2747_vm2, %v2746_v58   ;;  %3509 = vst.msk [vmem:[%s6168_s1 + $0x28] sm:$0xff] %vm2747_vm2, %v2814_v59  }
 0x1bf   :  { %v2791_v62 = vpop.permute.xlu0 %2790   ;;  %v2860_v63 = vpop.permute.xlu1 %2859  }
 0x1c0   :  { %3504 = vst.msk [vmem:[%s6168_s1 + $0x8] sm:$0xff] %vm2747_vm2, %v2791_v62   ;;  %3519 = vst.msk [vmem:[%s6168_s1 + $0x30] sm:$0xff] %vm2747_vm2, %v2860_v63  }
 0x1c3   :  { %v2837_v0 = vpop.permute.xlu0 %2836  }
 0x1c4   :  { %3514 = vst.msk [vmem:[%s6168_s1 + $0x10] sm:$0xff] %vm2747_vm2, %v2837_v0  }
 0x1c6   :  { %v2906_v22 = vpop.permute.xlu1 %2905  }
 0x1c7   :  { %3529 = vst.msk [vmem:[%s6168_s1 + $0x38] sm:$0xff] %vm2747_vm2, %v2906_v22  }
 0x1ca   :  { %v2883_v49 = vpop.permute.xlu0 %2882  }
 0x1cb   :  { %3524 = vst.msk [vmem:[%s6168_s1 + $0x18] sm:$0xff] %vm2747_vm2, %v2883_v49  }

// kernel: forward.26
= control target key start
LH: loop header
LB: loop body
LE: loop exit
PB: predicated region body
PF: predicated region fallthrough
CT: control target
= control target key end

     0   :  { %s3084_s9 = smov 0   ;;  %s3086_s10 = smov 0   ;;  %s3464_s0 = inlined_call_operand.vmem [shape: bf16[1,8192,256], index: 0, kind: input, shape index: {}]   ;;  %s3465_s1 = inlined_call_operand.vmem [shape: bf16[1,256,128], index: 1, kind: input, shape index: {}]   ;;  %s3466_s2 = inlined_call_operand.vmem [shape: f32[1,8192,128], index: 2, kind: output, shape index: {}]  }
   0x1   :  { %s3088_s11 = smov 0  }
   0x2 LB: > { %s34_s12 = sadd.s32 1, %s3062_s10  ;;  %p2626_p0 = scmp.ge.s32.totalorder %s3066_s11, 1  ;;  %s3066_s11 = sphi %s3088_s11, %s12_s11   ;;  %s3062_s10 = sphi %s3086_s10, %s3468_s10   ;;  %s3058_s9 = sphi %s3084_s9, %s3467_s9  }
   0x3   : > { %p36_p1 = scmp.ge.s32.totalorder %s34_s12, 8  ;;  %p179_p2 = scmp.lt.s32.totalorder %s3066_s11, 9 }
   0x5   : > { %s3470_s12 = smov (%p36_p1, %s34_s12), 0  ;;  %p180_p3 = pnand %p2626_p0, %p179_p2 }
   0x6   : > { %v2836_v0 = vld [vmem:[%s3465_s1] sm:$0xff] (!%p180_p3)   ;;  %v3068_v1 = vmov (!%p180_p3), 0   ;;  %s2627_s15 = sshll.u32 (!%p180_p3), %s3058_s9, 7  ;;  %v2837_v2 = vld [vmem:[%s3465_s1 + $0x8] sm:$0xff] (!%p180_p3)   ;;  %v2838_v3 = vld [vmem:[%s3465_s1 + $0x10] sm:$0xff] (!%p180_p3)  }
   0x7   : > { %183 = sbr.rel (%p180_p3) target bundleno = 534 (0x216), region = 28  ;;  %1428 = vmatprep.subr.bf16.mxu0 (!%p180_p3), %v3068_v1  ;;  %2779 = vmatprep.subr.bf16.mxu1 (!%p180_p3), %v3068_v1  ;;  %p233_p4 = scmp.lt.s32.totalorder (!%p180_p3), %s2627_s15, 1023  ;;  %v2839_v4 = vld [vmem:[%s3465_s1 + $0x18] sm:$0xff] (!%p180_p3)   ;;  %v2840_v5 = vld [vmem:[%s3465_s1 + $0x20] sm:$0xff] (!%p180_p3)   ;;  %v2841_v7 = vld [vmem:[%s3465_s1 + $0x28] sm:$0xff] (!%p180_p3)  }
   0x8   : > { %1429 = vmatpush1.bf16.msra.mxu0 (!%p180_p3), %v2836_v0  ;;  %2795 = vmatpush1.bf16.msra.mxu1 (!%p180_p3), %v2836_v0  ;;  %v2842_v9 = vld [vmem:[%s3465_s1 + $0x30] sm:$0xff] (!%p180_p3)   ;;  %v2843_v10 = vld [vmem:[%s3465_s1 + $0x38] sm:$0xff] (!%p180_p3)   ;;  %v2844_v11 = vld [vmem:[%s3465_s1 + $0x40] sm:$0xff] (!%p180_p3)  }
   0x9   : > { %1430 = vmatprep.subr.bf16.mxu0 (!%p180_p3), %v3068_v1  ;;  %2780 = vmatprep.subr.bf16.mxu1 (!%p180_p3), %v3068_v1  ;;  %v2845_v12 = vld [vmem:[%s3465_s1 + $0x48] sm:$0xff] (!%p180_p3)   ;;  %v2846_v13 = vld [vmem:[%s3465_s1 + $0x50] sm:$0xff] (!%p180_p3)   ;;  %v2847_v14 = vld [vmem:[%s3465_s1 + $0x58] sm:$0xff] (!%p180_p3)  }
   0xa   : > { %v2848_v15 = vld [vmem:[%s3465_s1 + $0x60] sm:$0xff] (!%p180_p3)   ;;  %v2849_v16 = vld [vmem:[%s3465_s1 + $0x68] sm:$0xff] (!%p180_p3)   ;;  %v2850_v17 = vld [vmem:[%s3465_s1 + $0x70] sm:$0xff] (!%p180_p3)  }
   0xb   : > { %v2851_v18 = vld [vmem:[%s3465_s1 + $0x78] sm:$0xff] (!%p180_p3)  }
   0xc   : > { %1431 = vmatpush1.bf16.msra.mxu0 (!%p180_p3), %v2837_v2  ;;  %2796 = vmatpush1.bf16.msra.mxu1 (!%p180_p3), %v2837_v2 }
   0xd   : > { %1432 = vmatprep.subr.bf16.mxu0 (!%p180_p3), %v3068_v1  ;;  %2781 = vmatprep.subr.bf16.mxu1 (!%p180_p3), %v3068_v1 }
   0xe   : > { %s3472_s15 = smov (!%p233_p4, %s2627_s15), 1023 }
   0xf   : > { %s2778_s22 = sshll.u32 %s3472_s15, 3 }
  0x10   : > { %1433 = vmatpush1.bf16.msra.mxu0 %v2838_v3  ;;  %2797 = vmatpush1.bf16.msra.mxu1 %v2838_v3  ;;  %s3133_s27 = scalar_lea.vmem %s3464_s0, %s2778_s22  ;;  %s3307_s30 = scalar_lea.vmem %s3466_s2, %s2778_s22 }
  0x11   : > { %1434 = vmatprep.subr.bf16.mxu0 %v3068_v1  ;;  %2782 = vmatprep.subr.bf16.mxu1 %v3068_v1  ;;  %v2854_v6 = vld [vmem:[%s3133_s27 + $0x4] ss:$8 sps:$4 sm:$0xff]   ;;  %v2852_v19 = vld [vmem:[%s3133_s27] ss:$8 sps:$4 sm:$0xff]   ;;  %v2858_v21 = vld [vmem:[%s3133_s27 + $0x14] ss:$8 sps:$4 sm:$0xff]  }
  0x12   : > { %v2857_v8 = vld [vmem:[%s3133_s27 + $0x204] ss:$8 sps:$4 sm:$0xff]   ;;  %1460 = vmatprep.mubr.bf16.mxu0 %v2854_v6  ;;  %v2855_v20 = vld [vmem:[%s3133_s27 + $0x200] ss:$8 sps:$4 sm:$0xff]   ;;  %v2860_v22 = vld [vmem:[%s3133_s27 + $0x214] ss:$8 sps:$4 sm:$0xff]  }
  0x13   : > { %1716 = vmatprep.mubr.bf16.mxu1 %v2857_v8  ;;  %v2862_v23 = vld [vmem:[%s3133_s27 + $0x10] ss:$8 sps:$4 sm:$0xff]   ;;  %v2864_v25 = vld [vmem:[%s3133_s27 + $0x24] ss:$8 sps:$4 sm:$0xff]   ;;  %v2868_v27 = vld [vmem:[%s3133_s27 + $0x20] ss:$8 sps:$4 sm:$0xff]  }
  0x14   : > { %1435 = vmatpush1.bf16.msra.mxu0 %v2839_v4  ;;  %2798 = vmatpush1.bf16.msra.mxu1 %v2839_v4  ;;  %v2863_v24 = vld [vmem:[%s3133_s27 + $0x210] ss:$8 sps:$4 sm:$0xff]   ;;  %v2866_v26 = vld [vmem:[%s3133_s27 + $0x224] ss:$8 sps:$4 sm:$0xff]   ;;  %v2869_v28 = vld [vmem:[%s3133_s27 + $0x220] ss:$8 sps:$4 sm:$0xff]  }
  0x15   : > { %1436 = vmatprep.subr.bf16.mxu0 %v3068_v1  ;;  %2783 = vmatprep.subr.bf16.mxu1 %v3068_v1  ;;  %v2870_v29 = vld [vmem:[%s3133_s27 + $0x34] ss:$8 sps:$4 sm:$0xff]   ;;  %v2874_v31 = vld [vmem:[%s3133_s27 + $0x30] ss:$8 sps:$4 sm:$0xff]   ;;  %v2876_v33 = vld [vmem:[%s3133_s27 + $0x44] ss:$8 sps:$4 sm:$0xff]  }
  0x16   : > { %v2872_v30 = vld [vmem:[%s3133_s27 + $0x234] ss:$8 sps:$4 sm:$0xff]   ;;  %v2875_v32 = vld [vmem:[%s3133_s27 + $0x230] ss:$8 sps:$4 sm:$0xff]   ;;  %v2878_v34 = vld [vmem:[%s3133_s27 + $0x244] ss:$8 sps:$4 sm:$0xff]  }
  0x17   : > { %v2880_v35 = vld [vmem:[%s3133_s27 + $0x40] ss:$8 sps:$4 sm:$0xff]   ;;  %v2882_v37 = vld [vmem:[%s3133_s27 + $0x54] ss:$8 sps:$4 sm:$0xff]   ;;  %v2886_v39 = vld [vmem:[%s3133_s27 + $0x50] ss:$8 sps:$4 sm:$0xff]  }
  0x18   : > { %1437 = vmatpush1.bf16.msra.mxu0 %v2840_v5  ;;  %2799 = vmatpush1.bf16.msra.mxu1 %v2840_v5  ;;  %v2881_v36 = vld [vmem:[%s3133_s27 + $0x240] ss:$8 sps:$4 sm:$0xff]   ;;  %v2884_v38 = vld [vmem:[%s3133_s27 + $0x254] ss:$8 sps:$4 sm:$0xff]   ;;  %v2887_v40 = vld [vmem:[%s3133_s27 + $0x250] ss:$8 sps:$4 sm:$0xff]  }
  0x19   : > { %1438 = vmatprep.subr.bf16.mxu0 %v3068_v1  ;;  %2784 = vmatprep.subr.bf16.mxu1 %v3068_v1  ;;  %v2888_v41 = vld [vmem:[%s3133_s27 + $0x64] ss:$8 sps:$4 sm:$0xff]   ;;  %v2892_v43 = vld [vmem:[%s3133_s27 + $0x60] ss:$8 sps:$4 sm:$0xff]   ;;  %v2894_v45 = vld [vmem:[%s3133_s27 + $0x74] ss:$8 sps:$4 sm:$0xff]  }
  0x1a   : > { %v2890_v42 = vld [vmem:[%s3133_s27 + $0x264] ss:$8 sps:$4 sm:$0xff]   ;;  %v2893_v44 = vld [vmem:[%s3133_s27 + $0x260] ss:$8 sps:$4 sm:$0xff]   ;;  %v2896_v46 = vld [vmem:[%s3133_s27 + $0x274] ss:$8 sps:$4 sm:$0xff]  }
  0x1b   : > { %v2898_v47 = vld [vmem:[%s3133_s27 + $0x70] ss:$8 sps:$4 sm:$0xff]   ;;  %v2900_v49 = vld [vmem:[%s3133_s27 + $0x84] ss:$8 sps:$4 sm:$0xff]   ;;  %v2904_v51 = vld [vmem:[%s3133_s27 + $0x80] ss:$8 sps:$4 sm:$0xff]  }
  0x1c   : > { %1439 = vmatpush1.bf16.msra.mxu0 %v2841_v7  ;;  %2800 = vmatpush1.bf16.msra.mxu1 %v2841_v7  ;;  %v2899_v48 = vld [vmem:[%s3133_s27 + $0x270] ss:$8 sps:$4 sm:$0xff]   ;;  %v2902_v50 = vld [vmem:[%s3133_s27 + $0x284] ss:$8 sps:$4 sm:$0xff]   ;;  %v2905_v52 = vld [vmem:[%s3133_s27 + $0x280] ss:$8 sps:$4 sm:$0xff]  }
  0x1d   : > { %1440 = vmatprep.subr.bf16.mxu0 %v3068_v1  ;;  %2785 = vmatprep.subr.bf16.mxu1 %v3068_v1  ;;  %v2906_v53 = vld [vmem:[%s3133_s27 + $0x94] ss:$8 sps:$4 sm:$0xff]   ;;  %v2910_v55 = vld [vmem:[%s3133_s27 + $0x90] ss:$8 sps:$4 sm:$0xff]   ;;  %v2912_v57 = vld [vmem:[%s3133_s27 + $0xa4] ss:$8 sps:$4 sm:$0xff]  }
  0x1e   : > { %v2908_v54 = vld [vmem:[%s3133_s27 + $0x294] ss:$8 sps:$4 sm:$0xff]   ;;  %v2911_v56 = vld [vmem:[%s3133_s27 + $0x290] ss:$8 sps:$4 sm:$0xff]   ;;  %v2914_v58 = vld [vmem:[%s3133_s27 + $0x2a4] ss:$8 sps:$4 sm:$0xff]  }
  0x1f   : > { %v2916_v59 = vld [vmem:[%s3133_s27 + $0xa0] ss:$8 sps:$4 sm:$0xff]   ;;  %v2918_v61 = vld [vmem:[%s3133_s27 + $0xb4] ss:$8 sps:$4 sm:$0xff]   ;;  %v2922_v63 = vld [vmem:[%s3133_s27 + $0xb0] ss:$8 sps:$4 sm:$0xff]  }
  0x20   : > { %1441 = vmatpush1.bf16.msra.mxu0 %v2842_v9  ;;  %2801 = vmatpush1.bf16.msra.mxu1 %v2842_v9  ;;  %v2917_v60 = vld [vmem:[%s3133_s27 + $0x2a0] ss:$8 sps:$4 sm:$0xff]   ;;  %v2920_v62 = vld [vmem:[%s3133_s27 + $0x2b4] ss:$8 sps:$4 sm:$0xff]   ;;  %v2923_v0 = vld [vmem:[%s3133_s27 + $0x2b0] ss:$8 sps:$4 sm:$0xff]  }
  0x21   : > { %1442 = vmatprep.subr.bf16.mxu0 %v3068_v1  ;;  %2786 = vmatprep.subr.bf16.mxu1 %v3068_v1  ;;  %v2926_v2 = vld [vmem:[%s3133_s27 + $0x2c4] ss:$8 sps:$4 sm:$0xff]   ;;  %v2928_v3 = vld [vmem:[%s3133_s27 + $0xc0] ss:$8 sps:$4 sm:$0xff]   ;;  %v2930_v5 = vld [vmem:[%s3133_s27 + $0xd4] ss:$8 sps:$4 sm:$0xff]  }
  0x22   : > { %v2929_v4 = vld [vmem:[%s3133_s27 + $0x2c0] ss:$8 sps:$4 sm:$0xff]   ;;  %v2932_v6 = vld [vmem:[%s3133_s27 + $0x2d4] ss:$8 sps:$4 sm:$0xff]   ;;  %v2934_v7 = vld [vmem:[%s3133_s27 + $0xd0] ss:$8 sps:$4 sm:$0xff]  }
  0x23   : > { %v2935_v8 = vld [vmem:[%s3133_s27 + $0x2d0] ss:$8 sps:$4 sm:$0xff]   ;;  %v2936_v9 = vld [vmem:[%s3133_s27 + $0xe4] ss:$8 sps:$4 sm:$0xff]  }
  0x24   : > { %1443 = vmatpush1.bf16.msra.mxu0 %v2843_v10  ;;  %2802 = vmatpush1.bf16.msra.mxu1 %v2843_v10  ;;  %v2938_v10 = vld [vmem:[%s3133_s27 + $0x2e4] ss:$8 sps:$4 sm:$0xff]  }
  0x25   : > { %1444 = vmatprep.subr.bf16.mxu0 %v3068_v1  ;;  %2787 = vmatprep.subr.bf16.mxu1 %v3068_v1 }
  0x28   : > { %1445 = vmatpush1.bf16.msra.mxu0 %v2844_v11  ;;  %2803 = vmatpush1.bf16.msra.mxu1 %v2844_v11  ;;  %v2940_v11 = vld [vmem:[%s3133_s27 + $0xe0] ss:$8 sps:$4 sm:$0xff]  }
  0x29   : > { %1446 = vmatprep.subr.bf16.mxu0 %v3068_v1  ;;  %2788 = vmatprep.subr.bf16.mxu1 %v3068_v1 }
  0x2c   : > { %1447 = vmatpush1.bf16.msra.mxu0 %v2845_v12  ;;  %2804 = vmatpush1.bf16.msra.mxu1 %v2845_v12  ;;  %v2941_v12 = vld [vmem:[%s3133_s27 + $0x2e0] ss:$8 sps:$4 sm:$0xff]  }
  0x2d   : > { %1448 = vmatprep.subr.bf16.mxu0 %v3068_v1  ;;  %2789 = vmatprep.subr.bf16.mxu1 %v3068_v1 }
  0x30   : > { %1449 = vmatpush1.bf16.msra.mxu0 %v2846_v13  ;;  %2805 = vmatpush1.bf16.msra.mxu1 %v2846_v13  ;;  %v2942_v13 = vld [vmem:[%s3133_s27 + $0xf4] ss:$8 sps:$4 sm:$0xff]  }
  0x31   : > { %1450 = vmatprep.subr.bf16.mxu0 %v3068_v1  ;;  %2790 = vmatprep.subr.bf16.mxu1 %v3068_v1 }
  0x34   : > { %1451 = vmatpush1.bf16.msra.mxu0 %v2847_v14  ;;  %2806 = vmatpush1.bf16.msra.mxu1 %v2847_v14  ;;  %v2944_v14 = vld [vmem:[%s3133_s27 + $0x2f4] ss:$8 sps:$4 sm:$0xff]  }
  0x35   : > { %1452 = vmatprep.subr.bf16.mxu0 %v3068_v1  ;;  %2791 = vmatprep.subr.bf16.mxu1 %v3068_v1 }
  0x38   : > { %1453 = vmatpush1.bf16.msra.mxu0 %v2848_v15  ;;  %2807 = vmatpush1.bf16.msra.mxu1 %v2848_v15  ;;  %v2946_v15 = vld [vmem:[%s3133_s27 + $0xf0] ss:$8 sps:$4 sm:$0xff]  }
  0x39   : > { %1454 = vmatprep.subr.bf16.mxu0 %v3068_v1  ;;  %2792 = vmatprep.subr.bf16.mxu1 %v3068_v1 }
  0x3c   : > { %1455 = vmatpush1.bf16.msra.mxu0 %v2849_v16  ;;  %2808 = vmatpush1.bf16.msra.mxu1 %v2849_v16  ;;  %v2947_v16 = vld [vmem:[%s3133_s27 + $0x2f0] ss:$8 sps:$4 sm:$0xff]  }
  0x3d   : > { %1456 = vmatprep.subr.bf16.mxu0 %v3068_v1  ;;  %2793 = vmatprep.subr.bf16.mxu1 %v3068_v1 }
  0x40   : > { %1457 = vmatpush1.bf16.msra.mxu0 %v2850_v17  ;;  %2809 = vmatpush1.bf16.msra.mxu1 %v2850_v17  ;;  %v2948_v17 = vld [vmem:[%s3133_s27 + $0x104] ss:$8 sps:$4 sm:$0xff]  }
  0x41   : > { %1458 = vmatprep.subr.bf16.mxu0 %v3068_v1  ;;  %2794 = vmatprep.subr.bf16.mxu1 %v3068_v1  ;;  %v2924_v1 = vld [vmem:[%s3133_s27 + $0xc4] ss:$8 sps:$4 sm:$0xff]  }
  0x44   : > { %1459 = vmatpush1.bf16.msra.mxu0 %v2851_v18  ;;  %2810 = vmatpush1.bf16.msra.mxu1 %v2851_v18  ;;  %v2950_v18 = vld [vmem:[%s3133_s27 + $0x304] ss:$8 sps:$4 sm:$0xff]  }
  0x47   : > { %1461 = vmatmul.mubr.bf16.vlgmr.msra.gmra.mrb[0].mxu0 %v2852_v19  ;;  %1717 = vmatmul.mubr.bf16.vlgmr.msra.gmra.mrb[0].mxu1 %v2855_v20  ;;  %v2952_v19 = vld [vmem:[%s3133_s27 + $0x100] ss:$8 sps:$4 sm:$0xff]  }
  0x48   : > { %1468 = vmatprep.mubr.bf16.mxu0 %v2858_v21  ;;  %1724 = vmatprep.mubr.bf16.mxu1 %v2860_v22  ;;  %v2953_v20 = vld [vmem:[%s3133_s27 + $0x300] ss:$8 sps:$4 sm:$0xff]   ;;  %v2954_v21 = vld [vmem:[%s3133_s27 + $0x114] ss:$8 sps:$4 sm:$0xff]  }
  0x49   : > { %v2956_v22 = vld [vmem:[%s3133_s27 + $0x314] ss:$8 sps:$4 sm:$0xff]  }
  0x4f   : > { %1469 = vmatmul.mubr.bf16.gmra.mrb[4].mxu0 %v2862_v23  ;;  %1725 = vmatmul.mubr.bf16.gmra.mrb[4].mxu1 %v2863_v24  ;;  %v2958_v23 = vld [vmem:[%s3133_s27 + $0x110] ss:$8 sps:$4 sm:$0xff]  }
  0x50   : > { %1476 = vmatprep.mubr.bf16.mxu0 %v2864_v25  ;;  %1732 = vmatprep.mubr.bf16.mxu1 %v2866_v26  ;;  %v2959_v24 = vld [vmem:[%s3133_s27 + $0x310] ss:$8 sps:$4 sm:$0xff]   ;;  %v2960_v25 = vld [vmem:[%s3133_s27 + $0x124] ss:$8 sps:$4 sm:$0xff]  }
  0x51   : > { %v2962_v26 = vld [vmem:[%s3133_s27 + $0x324] ss:$8 sps:$4 sm:$0xff]  }
  0x57   : > { %1477 = vmatmul.mubr.bf16.gmra.mrb[8].mxu0 %v2868_v27  ;;  %1733 = vmatmul.mubr.bf16.gmra.mrb[8].mxu1 %v2869_v28  ;;  %v2964_v27 = vld [vmem:[%s3133_s27 + $0x120] ss:$8 sps:$4 sm:$0xff]  }
  0x58   : > { %1484 = vmatprep.mubr.bf16.mxu0 %v2870_v29  ;;  %1740 = vmatprep.mubr.bf16.mxu1 %v2872_v30  ;;  %v2965_v28 = vld [vmem:[%s3133_s27 + $0x320] ss:$8 sps:$4 sm:$0xff]   ;;  %v2966_v29 = vld [vmem:[%s3133_s27 + $0x134] ss:$8 sps:$4 sm:$0xff]  }
  0x59   : > { %v2968_v30 = vld [vmem:[%s3133_s27 + $0x334] ss:$8 sps:$4 sm:$0xff]  }
  0x5f   : > { %1485 = vmatmul.mubr.bf16.gmra.mrb[12].mxu0 %v2874_v31  ;;  %1741 = vmatmul.mubr.bf16.gmra.mrb[12].mxu1 %v2875_v32  ;;  %v2970_v31 = vld [vmem:[%s3133_s27 + $0x130] ss:$8 sps:$4 sm:$0xff]  }
  0x60   : > { %1492 = vmatprep.mubr.bf16.mxu0 %v2876_v33  ;;  %1748 = vmatprep.mubr.bf16.mxu1 %v2878_v34  ;;  %v2971_v32 = vld [vmem:[%s3133_s27 + $0x330] ss:$8 sps:$4 sm:$0xff]   ;;  %v2972_v33 = vld [vmem:[%s3133_s27 + $0x144] ss:$8 sps:$4 sm:$0xff]  }
  0x61   : > { %v2974_v34 = vld [vmem:[%s3133_s27 + $0x344] ss:$8 sps:$4 sm:$0xff]  }
  0x67   : > { %1493 = vmatmul.mubr.bf16.gmra.mrb[16].mxu0 %v2880_v35  ;;  %1749 = vmatmul.mubr.bf16.gmra.mrb[16].mxu1 %v2881_v36  ;;  %v2976_v35 = vld [vmem:[%s3133_s27 + $0x140] ss:$8 sps:$4 sm:$0xff]  }
  0x68   : > { %1500 = vmatprep.mubr.bf16.mxu0 %v2882_v37  ;;  %1756 = vmatprep.mubr.bf16.mxu1 %v2884_v38  ;;  %v2977_v36 = vld [vmem:[%s3133_s27 + $0x340] ss:$8 sps:$4 sm:$0xff]   ;;  %v2978_v37 = vld [vmem:[%s3133_s27 + $0x154] ss:$8 sps:$4 sm:$0xff]  }
  0x69   : > { %v2980_v38 = vld [vmem:[%s3133_s27 + $0x354] ss:$8 sps:$4 sm:$0xff]  }
  0x6f   : > { %1501 = vmatmul.mubr.bf16.gmra.mrb[20].mxu0 %v2886_v39  ;;  %1757 = vmatmul.mubr.bf16.gmra.mrb[20].mxu1 %v2887_v40  ;;  %v2982_v39 = vld [vmem:[%s3133_s27 + $0x150] ss:$8 sps:$4 sm:$0xff]  }
  0x70   : > { %1508 = vmatprep.mubr.bf16.mxu0 %v2888_v41  ;;  %1764 = vmatprep.mubr.bf16.mxu1 %v2890_v42  ;;  %v2983_v40 = vld [vmem:[%s3133_s27 + $0x350] ss:$8 sps:$4 sm:$0xff]   ;;  %v2984_v41 = vld [vmem:[%s3133_s27 + $0x164] ss:$8 sps:$4 sm:$0xff]  }
  0x71   : > { %v2986_v42 = vld [vmem:[%s3133_s27 + $0x364] ss:$8 sps:$4 sm:$0xff]  }
  0x77   : > { %1509 = vmatmul.mubr.bf16.gmra.mrb[24].mxu0 %v2892_v43  ;;  %1765 = vmatmul.mubr.bf16.gmra.mrb[24].mxu1 %v2893_v44  ;;  %v2988_v43 = vld [vmem:[%s3133_s27 + $0x160] ss:$8 sps:$4 sm:$0xff]  }
  0x78   : > { %1516 = vmatprep.mubr.bf16.mxu0 %v2894_v45  ;;  %1772 = vmatprep.mubr.bf16.mxu1 %v2896_v46  ;;  %v2989_v44 = vld [vmem:[%s3133_s27 + $0x360] ss:$8 sps:$4 sm:$0xff]   ;;  %v2990_v45 = vld [vmem:[%s3133_s27 + $0x174] ss:$8 sps:$4 sm:$0xff]  }
  0x79   : > { %v2992_v46 = vld [vmem:[%s3133_s27 + $0x374] ss:$8 sps:$4 sm:$0xff]  }
  0x7f   : > { %1517 = vmatmul.mubr.bf16.gmra.mrb[28].mxu0 %v2898_v47  ;;  %1773 = vmatmul.mubr.bf16.gmra.mrb[28].mxu1 %v2899_v48  ;;  %v2994_v47 = vld [vmem:[%s3133_s27 + $0x170] ss:$8 sps:$4 sm:$0xff]  }
  0x80   : > { %1524 = vmatprep.mubr.bf16.mxu0 %v2900_v49  ;;  %1780 = vmatprep.mubr.bf16.mxu1 %v2902_v50  ;;  %v2995_v48 = vld [vmem:[%s3133_s27 + $0x370] ss:$8 sps:$4 sm:$0xff]   ;;  %v2996_v49 = vld [vmem:[%s3133_s27 + $0x184] ss:$8 sps:$4 sm:$0xff]  }
  0x81   : > { %v2998_v50 = vld [vmem:[%s3133_s27 + $0x384] ss:$8 sps:$4 sm:$0xff]  }
  0x87   : > { %1525 = vmatmul.mubr.bf16.gmra.mrb[32].mxu0 %v2904_v51  ;;  %1781 = vmatmul.mubr.bf16.gmra.mrb[32].mxu1 %v2905_v52  ;;  %v3000_v51 = vld [vmem:[%s3133_s27 + $0x180] ss:$8 sps:$4 sm:$0xff]  }
  0x88   : > { %1532 = vmatprep.mubr.bf16.mxu0 %v2906_v53  ;;  %1788 = vmatprep.mubr.bf16.mxu1 %v2908_v54  ;;  %v3001_v52 = vld [vmem:[%s3133_s27 + $0x380] ss:$8 sps:$4 sm:$0xff]   ;;  %v3002_v53 = vld [vmem:[%s3133_s27 + $0x194] ss:$8 sps:$4 sm:$0xff]  }
  0x89   : > { %v3004_v54 = vld [vmem:[%s3133_s27 + $0x394] ss:$8 sps:$4 sm:$0xff]  }
  0x8f   : > { %1533 = vmatmul.mubr.bf16.gmra.mrb[36].mxu0 %v2910_v55  ;;  %1789 = vmatmul.mubr.bf16.gmra.mrb[36].mxu1 %v2911_v56  ;;  %v3006_v55 = vld [vmem:[%s3133_s27 + $0x190] ss:$8 sps:$4 sm:$0xff]  }
  0x90   : > { %1540 = vmatprep.mubr.bf16.mxu0 %v2912_v57  ;;  %1796 = vmatprep.mubr.bf16.mxu1 %v2914_v58  ;;  %v3007_v56 = vld [vmem:[%s3133_s27 + $0x390] ss:$8 sps:$4 sm:$0xff]   ;;  %v3008_v57 = vld [vmem:[%s3133_s27 + $0x1a4] ss:$8 sps:$4 sm:$0xff]  }
  0x91   : > { %v3010_v58 = vld [vmem:[%s3133_s27 + $0x3a4] ss:$8 sps:$4 sm:$0xff]  }
  0x97   : > { %1541 = vmatmul.mubr.bf16.gmra.mrb[40].mxu0 %v2916_v59  ;;  %1797 = vmatmul.mubr.bf16.gmra.mrb[40].mxu1 %v2917_v60  ;;  %v3012_v59 = vld [vmem:[%s3133_s27 + $0x1a0] ss:$8 sps:$4 sm:$0xff]  }
  0x98   : > { %1548 = vmatprep.mubr.bf16.mxu0 %v2918_v61  ;;  %1804 = vmatprep.mubr.bf16.mxu1 %v2920_v62  ;;  %v3013_v60 = vld [vmem:[%s3133_s27 + $0x3a0] ss:$8 sps:$4 sm:$0xff]   ;;  %v3014_v61 = vld [vmem:[%s3133_s27 + $0x1b4] ss:$8 sps:$4 sm:$0xff]  }
  0x99   : > { %v3016_v62 = vld [vmem:[%s3133_s27 + $0x3b4] ss:$8 sps:$4 sm:$0xff]  }
  0x9f   : > { %1549 = vmatmul.mubr.bf16.gmra.mrb[44].mxu0 %v2922_v63  ;;  %1805 = vmatmul.mubr.bf16.gmra.mrb[44].mxu1 %v2923_v0 }
  0xa0   : > { %1556 = vmatprep.mubr.bf16.mxu0 %v2924_v1  ;;  %1812 = vmatprep.mubr.bf16.mxu1 %v2926_v2 }
  0xa7   : > { %1557 = vmatmul.mubr.bf16.gmra.mrb[48].mxu0 %v2928_v3  ;;  %1813 = vmatmul.mubr.bf16.gmra.mrb[48].mxu1 %v2929_v4  ;;  %v3018_v3 = vld [vmem:[%s3133_s27 + $0x1b0] ss:$8 sps:$4 sm:$0xff]  }
  0xa8   : > { %1564 = vmatprep.mubr.bf16.mxu0 %v2930_v5  ;;  %1820 = vmatprep.mubr.bf16.mxu1 %v2932_v6  ;;  %v3019_v4 = vld [vmem:[%s3133_s27 + $0x3b0] ss:$8 sps:$4 sm:$0xff]  }
  0xaf   : > { %1565 = vmatmul.mubr.bf16.gmra.mrb[52].mxu0 %v2934_v7  ;;  %1821 = vmatmul.mubr.bf16.gmra.mrb[52].mxu1 %v2935_v8  ;;  %v3020_v7 = vld [vmem:[%s3133_s27 + $0x1c4] ss:$8 sps:$4 sm:$0xff]  }
  0xb0   : > { %1572 = vmatprep.mubr.bf16.mxu0 %v2936_v9  ;;  %1828 = vmatprep.mubr.bf16.mxu1 %v2938_v10  ;;  %v3022_v8 = vld [vmem:[%s3133_s27 + $0x3c4] ss:$8 sps:$4 sm:$0xff]  }
  0xb7   : > { %1573 = vmatmul.mubr.bf16.gmra.mrb[56].mxu0 %v2940_v11  ;;  %1829 = vmatmul.mubr.bf16.gmra.mrb[56].mxu1 %v2941_v12 }
  0xb8   : > { %1580 = vmatprep.mubr.bf16.mxu0 %v2942_v13  ;;  %1836 = vmatprep.mubr.bf16.mxu1 %v2944_v14 }
  0xbf   : > { %1581 = vmatmul.mubr.bf16.gmra.mrb[60].mxu0 %v2946_v15  ;;  %1837 = vmatmul.mubr.bf16.gmra.mrb[60].mxu1 %v2947_v16  ;;  %v3024_v15 = vld [vmem:[%s3133_s27 + $0x1c0] ss:$8 sps:$4 sm:$0xff]  }
  0xc0   : > { %1588 = vmatprep.mubr.bf16.mxu0 %v2948_v17  ;;  %1844 = vmatprep.mubr.bf16.mxu1 %v2950_v18  ;;  %v3025_v16 = vld [vmem:[%s3133_s27 + $0x3c0] ss:$8 sps:$4 sm:$0xff]  }
  0xc7   : > { %1589 = vmatmul.mubr.bf16.gmra.mrb[64].mxu0 %v2952_v19  ;;  %1845 = vmatmul.mubr.bf16.gmra.mrb[64].mxu1 %v2953_v20  ;;  %v3026_v19 = vld [vmem:[%s3133_s27 + $0x1d4] ss:$8 sps:$4 sm:$0xff]  }
  0xc8   : > { %1596 = vmatprep.mubr.bf16.mxu0 %v2954_v21  ;;  %1852 = vmatprep.mubr.bf16.mxu1 %v2956_v22  ;;  %v3028_v20 = vld [vmem:[%s3133_s27 + $0x3d4] ss:$8 sps:$4 sm:$0xff]  }
  0xcf   : > { %1597 = vmatmul.mubr.bf16.gmra.mrb[68].mxu0 %v2958_v23  ;;  %1853 = vmatmul.mubr.bf16.gmra.mrb[68].mxu1 %v2959_v24 }
  0xd0   : > { %1604 = vmatprep.mubr.bf16.mxu0 %v2960_v25  ;;  %1860 = vmatprep.mubr.bf16.mxu1 %v2962_v26 }
  0xd7   : > { %1605 = vmatmul.mubr.bf16.gmra.mrb[72].mxu0 %v2964_v27  ;;  %1861 = vmatmul.mubr.bf16.gmra.mrb[72].mxu1 %v2965_v28  ;;  %v3030_v27 = vld [vmem:[%s3133_s27 + $0x1d0] ss:$8 sps:$4 sm:$0xff]  }
  0xd8   : > { %1612 = vmatprep.mubr.bf16.mxu0 %v2966_v29  ;;  %1868 = vmatprep.mubr.bf16.mxu1 %v2968_v30  ;;  %v3031_v28 = vld [vmem:[%s3133_s27 + $0x3d0] ss:$8 sps:$4 sm:$0xff]  }
  0xdf   : > { %1613 = vmatmul.mubr.bf16.gmra.mrb[76].mxu0 %v2970_v31  ;;  %1869 = vmatmul.mubr.bf16.gmra.mrb[76].mxu1 %v2971_v32  ;;  %v3032_v31 = vld [vmem:[%s3133_s27 + $0x1e4] ss:$8 sps:$4 sm:$0xff]  }
  0xe0   : > { %1620 = vmatprep.mubr.bf16.mxu0 %v2972_v33  ;;  %1876 = vmatprep.mubr.bf16.mxu1 %v2974_v34  ;;  %v3034_v32 = vld [vmem:[%s3133_s27 + $0x3e4] ss:$8 sps:$4 sm:$0xff]  }
  0xe7   : > { %1621 = vmatmul.mubr.bf16.gmra.mrb[80].mxu0 %v2976_v35  ;;  %1877 = vmatmul.mubr.bf16.gmra.mrb[80].mxu1 %v2977_v36 }
  0xe8   : > { %1628 = vmatprep.mubr.bf16.mxu0 %v2978_v37  ;;  %1884 = vmatprep.mubr.bf16.mxu1 %v2980_v38 }
  0xef   : > { %1629 = vmatmul.mubr.bf16.gmra.mrb[84].mxu0 %v2982_v39  ;;  %1885 = vmatmul.mubr.bf16.gmra.mrb[84].mxu1 %v2983_v40  ;;  %v3036_v39 = vld [vmem:[%s3133_s27 + $0x1e0] ss:$8 sps:$4 sm:$0xff]  }
  0xf0   : > { %1636 = vmatprep.mubr.bf16.mxu0 %v2984_v41  ;;  %1892 = vmatprep.mubr.bf16.mxu1 %v2986_v42  ;;  %v3037_v40 = vld [vmem:[%s3133_s27 + $0x3e0] ss:$8 sps:$4 sm:$0xff]  }
  0xf7   : > { %1637 = vmatmul.mubr.bf16.gmra.mrb[88].mxu0 %v2988_v43  ;;  %1893 = vmatmul.mubr.bf16.gmra.mrb[88].mxu1 %v2989_v44  ;;  %v3038_v43 = vld [vmem:[%s3133_s27 + $0x1f4] ss:$8 sps:$4 sm:$0xff]  }
  0xf8   : > { %1644 = vmatprep.mubr.bf16.mxu0 %v2990_v45  ;;  %1900 = vmatprep.mubr.bf16.mxu1 %v2992_v46  ;;  %v3040_v44 = vld [vmem:[%s3133_s27 + $0x3f4] ss:$8 sps:$4 sm:$0xff]  }
  0xff   : > { %1645 = vmatmul.mubr.bf16.gmra.mrb[92].mxu0 %v2994_v47  ;;  %1901 = vmatmul.mubr.bf16.gmra.mrb[92].mxu1 %v2995_v48 }
 0x100   : > { %1652 = vmatprep.mubr.bf16.mxu0 %v2996_v49  ;;  %1908 = vmatprep.mubr.bf16.mxu1 %v2998_v50 }
 0x107   : > { %1653 = vmatmul.mubr.bf16.gmra.mrb[96].mxu0 %v3000_v51  ;;  %1909 = vmatmul.mubr.bf16.gmra.mrb[96].mxu1 %v3001_v52  ;;  %v3042_v51 = vld [vmem:[%s3133_s27 + $0x1f0] ss:$8 sps:$4 sm:$0xff]  }
 0x108   : > { %1660 = vmatprep.mubr.bf16.mxu0 %v3002_v53  ;;  %1916 = vmatprep.mubr.bf16.mxu1 %v3004_v54  ;;  %v3043_v52 = vld [vmem:[%s3133_s27 + $0x3f0] ss:$8 sps:$4 sm:$0xff]  }
 0x10f   : > { %1661 = vmatmul.mubr.bf16.gmra.mrb[100].mxu0 %v3006_v55  ;;  %1917 = vmatmul.mubr.bf16.gmra.mrb[100].mxu1 %v3007_v56 }
 0x110   : > { %1668 = vmatprep.mubr.bf16.mxu0 %v3008_v57  ;;  %1924 = vmatprep.mubr.bf16.mxu1 %v3010_v58 }
 0x117   : > { %1669 = vmatmul.mubr.bf16.gmra.mrb[104].mxu0 %v3012_v59  ;;  %1925 = vmatmul.mubr.bf16.gmra.mrb[104].mxu1 %v3013_v60 }
 0x118   : > { %1676 = vmatprep.mubr.bf16.mxu0 %v3014_v61  ;;  %1932 = vmatprep.mubr.bf16.mxu1 %v3016_v62 }
 0x11a   : > { %v1462_v63 = vpop.f32.mrb[0].mxu0  ;;  %v1718_v0 = vpop.f32.mrb[0].mxu1 }
 0x11b   : > { %2360 = vst [vmem:[%s3307_s30] sm:$0xff] %v1462_v63  ;;  %2424 = vst [vmem:[%s3307_s30 + $0x200] sm:$0xff] %v1718_v0  ;;  %v1464_v1 = vpop.f32.mrb[1].mxu0  ;;  %v1720_v2 = vpop.f32.mrb[1].mxu1 }
 0x11c   : > { %v1465_v5 = vpop.f32.mrb[2].mxu0  ;;  %v1721_v6 = vpop.f32.mrb[2].mxu1 }
 0x11d   : > { %2361 = vst [vmem:[%s3307_s30 + $0x8] sm:$0xff] %v1465_v5  ;;  %2425 = vst [vmem:[%s3307_s30 + $0x208] sm:$0xff] %v1721_v6  ;;  %v1467_v9 = vpop.f32.mrb[3].mxu0  ;;  %v1723_v10 = vpop.f32.mrb[3].mxu1 }
 0x11f   : > { %1677 = vmatmul.mubr.bf16.gmra.mrb[108].mxu0 %v3018_v3  ;;  %1933 = vmatmul.mubr.bf16.gmra.mrb[108].mxu1 %v3019_v4 }
 0x120   : > { %1684 = vmatprep.mubr.bf16.mxu0 %v3020_v7  ;;  %1940 = vmatprep.mubr.bf16.mxu1 %v3022_v8 }
 0x122   : > { %v1470_v11 = vpop.f32.mrb[4].mxu0  ;;  %v1726_v12 = vpop.f32.mrb[4].mxu1 }
 0x123   : > { %2362 = vst [vmem:[%s3307_s30 + $0x10] sm:$0xff] %v1470_v11  ;;  %2426 = vst [vmem:[%s3307_s30 + $0x210] sm:$0xff] %v1726_v12  ;;  %v1472_v13 = vpop.f32.mrb[5].mxu0  ;;  %v1728_v14 = vpop.f32.mrb[5].mxu1 }
 0x124   : > { %v1473_v17 = vpop.f32.mrb[6].mxu0  ;;  %v1729_v18 = vpop.f32.mrb[6].mxu1 }
 0x125   : > { %2363 = vst [vmem:[%s3307_s30 + $0x18] sm:$0xff] %v1473_v17  ;;  %2427 = vst [vmem:[%s3307_s30 + $0x218] sm:$0xff] %v1729_v18  ;;  %v1475_v21 = vpop.f32.mrb[7].mxu0  ;;  %v1731_v22 = vpop.f32.mrb[7].mxu1 }
 0x127   : > { %1685 = vmatmul.mubr.bf16.gmra.mrb[112].mxu0 %v3024_v15  ;;  %1941 = vmatmul.mubr.bf16.gmra.mrb[112].mxu1 %v3025_v16 }
 0x128   : > { %1692 = vmatprep.mubr.bf16.mxu0 %v3026_v19  ;;  %1948 = vmatprep.mubr.bf16.mxu1 %v3028_v20 }
 0x12a   : > { %v1478_v23 = vpop.f32.mrb[8].mxu0  ;;  %v1734_v24 = vpop.f32.mrb[8].mxu1 }
 0x12b   : > { %2364 = vst [vmem:[%s3307_s30 + $0x20] sm:$0xff] %v1478_v23  ;;  %2428 = vst [vmem:[%s3307_s30 + $0x220] sm:$0xff] %v1734_v24  ;;  %v1480_v25 = vpop.f32.mrb[9].mxu0  ;;  %v1736_v26 = vpop.f32.mrb[9].mxu1 }
 0x12c   : > { %v1481_v29 = vpop.f32.mrb[10].mxu0  ;;  %v1737_v30 = vpop.f32.mrb[10].mxu1 }
 0x12d   : > { %2365 = vst [vmem:[%s3307_s30 + $0x28] sm:$0xff] %v1481_v29  ;;  %2429 = vst [vmem:[%s3307_s30 + $0x228] sm:$0xff] %v1737_v30  ;;  %v1483_v33 = vpop.f32.mrb[11].mxu0  ;;  %v1739_v34 = vpop.f32.mrb[11].mxu1 }
 0x12f   : > { %1693 = vmatmul.mubr.bf16.gmra.mrb[116].mxu0 %v3030_v27  ;;  %1949 = vmatmul.mubr.bf16.gmra.mrb[116].mxu1 %v3031_v28 }
 0x130   : > { %1700 = vmatprep.mubr.bf16.mxu0 %v3032_v31  ;;  %1956 = vmatprep.mubr.bf16.mxu1 %v3034_v32 }
 0x132   : > { %v1486_v35 = vpop.f32.mrb[12].mxu0  ;;  %v1742_v36 = vpop.f32.mrb[12].mxu1 }
 0x133   : > { %2366 = vst [vmem:[%s3307_s30 + $0x30] sm:$0xff] %v1486_v35  ;;  %2430 = vst [vmem:[%s3307_s30 + $0x230] sm:$0xff] %v1742_v36  ;;  %v1488_v37 = vpop.f32.mrb[13].mxu0  ;;  %v1744_v38 = vpop.f32.mrb[13].mxu1 }
 0x134   : > { %v1489_v41 = vpop.f32.mrb[14].mxu0  ;;  %v1745_v42 = vpop.f32.mrb[14].mxu1 }
 0x135   : > { %2367 = vst [vmem:[%s3307_s30 + $0x38] sm:$0xff] %v1489_v41  ;;  %2431 = vst [vmem:[%s3307_s30 + $0x238] sm:$0xff] %v1745_v42  ;;  %v1491_v45 = vpop.f32.mrb[15].mxu0  ;;  %v1747_v46 = vpop.f32.mrb[15].mxu1 }
 0x137   : > { %1701 = vmatmul.mubr.bf16.gmra.mrb[120].mxu0 %v3036_v39  ;;  %1957 = vmatmul.mubr.bf16.gmra.mrb[120].mxu1 %v3037_v40 }
 0x138   : > { %1708 = vmatprep.mubr.bf16.mxu0 %v3038_v43  ;;  %1964 = vmatprep.mubr.bf16.mxu1 %v3040_v44 }
 0x13a   : > { %v1494_v47 = vpop.f32.mrb[16].mxu0  ;;  %v1750_v48 = vpop.f32.mrb[16].mxu1 }
 0x13b   : > { %2368 = vst [vmem:[%s3307_s30 + $0x40] sm:$0xff] %v1494_v47  ;;  %2432 = vst [vmem:[%s3307_s30 + $0x240] sm:$0xff] %v1750_v48  ;;  %v1496_v49 = vpop.f32.mrb[17].mxu0  ;;  %v1752_v50 = vpop.f32.mrb[17].mxu1 }
 0x13c   : > { %v1497_v53 = vpop.f32.mrb[18].mxu0  ;;  %v1753_v54 = vpop.f32.mrb[18].mxu1 }
 0x13d   : > { %2369 = vst [vmem:[%s3307_s30 + $0x48] sm:$0xff] %v1497_v53  ;;  %2433 = vst [vmem:[%s3307_s30 + $0x248] sm:$0xff] %v1753_v54  ;;  %v1499_v55 = vpop.f32.mrb[19].mxu0  ;;  %v1755_v56 = vpop.f32.mrb[19].mxu1 }
 0x13f   : > { %1709 = vmatmul.mubr.bf16.gmra.mrb[124].mxu0 %v3042_v51  ;;  %1965 = vmatmul.mubr.bf16.gmra.mrb[124].mxu1 %v3043_v52 }
 0x142   : > { %v1502_v57 = vpop.f32.mrb[20].mxu0  ;;  %v1758_v58 = vpop.f32.mrb[20].mxu1 }
 0x143   : > { %2370 = vst [vmem:[%s3307_s30 + $0x50] sm:$0xff] %v1502_v57  ;;  %2434 = vst [vmem:[%s3307_s30 + $0x250] sm:$0xff] %v1758_v58  ;;  %v1504_v59 = vpop.f32.mrb[21].mxu0  ;;  %v1760_v60 = vpop.f32.mrb[21].mxu1 }
 0x144   : > { %v1505_v61 = vpop.f32.mrb[22].mxu0  ;;  %v1761_v62 = vpop.f32.mrb[22].mxu1 }
 0x145   : > { %2371 = vst [vmem:[%s3307_s30 + $0x58] sm:$0xff] %v1505_v61  ;;  %2435 = vst [vmem:[%s3307_s30 + $0x258] sm:$0xff] %v1761_v62  ;;  %v1507_v63 = vpop.f32.mrb[23].mxu0  ;;  %v1763_v0 = vpop.f32.mrb[23].mxu1 }
 0x14a   : > { %v1510_v1 = vpop.f32.mrb[24].mxu0  ;;  %v1766_v2 = vpop.f32.mrb[24].mxu1 }
 0x14b   : > { %2372 = vst [vmem:[%s3307_s30 + $0x60] sm:$0xff] %v1510_v1  ;;  %2436 = vst [vmem:[%s3307_s30 + $0x260] sm:$0xff] %v1766_v2  ;;  %v1512_v3 = vpop.f32.mrb[25].mxu0  ;;  %v1768_v4 = vpop.f32.mrb[25].mxu1 }
 0x14c   : > { %v1513_v5 = vpop.f32.mrb[26].mxu0  ;;  %v1769_v6 = vpop.f32.mrb[26].mxu1 }
 0x14d   : > { %2373 = vst [vmem:[%s3307_s30 + $0x68] sm:$0xff] %v1513_v5  ;;  %2437 = vst [vmem:[%s3307_s30 + $0x268] sm:$0xff] %v1769_v6  ;;  %v1515_v7 = vpop.f32.mrb[27].mxu0  ;;  %v1771_v8 = vpop.f32.mrb[27].mxu1 }
 0x152   : > { %v1518_v9 = vpop.f32.mrb[28].mxu0  ;;  %v1774_v10 = vpop.f32.mrb[28].mxu1 }
 0x153   : > { %2374 = vst [vmem:[%s3307_s30 + $0x70] sm:$0xff] %v1518_v9  ;;  %2438 = vst [vmem:[%s3307_s30 + $0x270] sm:$0xff] %v1774_v10  ;;  %v1520_v11 = vpop.f32.mrb[29].mxu0  ;;  %v1776_v12 = vpop.f32.mrb[29].mxu1 }
 0x154   : > { %v1521_v13 = vpop.f32.mrb[30].mxu0  ;;  %v1777_v14 = vpop.f32.mrb[30].mxu1 }
 0x155   : > { %2375 = vst [vmem:[%s3307_s30 + $0x78] sm:$0xff] %v1521_v13  ;;  %2439 = vst [vmem:[%s3307_s30 + $0x278] sm:$0xff] %v1777_v14  ;;  %v1523_v15 = vpop.f32.mrb[31].mxu0  ;;  %v1779_v16 = vpop.f32.mrb[31].mxu1 }
 0x15a   : > { %v1526_v17 = vpop.f32.mrb[32].mxu0  ;;  %v1782_v18 = vpop.f32.mrb[32].mxu1 }
 0x15b   : > { %2376 = vst [vmem:[%s3307_s30 + $0x80] sm:$0xff] %v1526_v17  ;;  %2440 = vst [vmem:[%s3307_s30 + $0x280] sm:$0xff] %v1782_v18  ;;  %v1528_v19 = vpop.f32.mrb[33].mxu0  ;;  %v1784_v20 = vpop.f32.mrb[33].mxu1 }
 0x15c   : > { %v1529_v21 = vpop.f32.mrb[34].mxu0  ;;  %v1785_v22 = vpop.f32.mrb[34].mxu1 }
 0x15d   : > { %2377 = vst [vmem:[%s3307_s30 + $0x88] sm:$0xff] %v1529_v21  ;;  %2441 = vst [vmem:[%s3307_s30 + $0x288] sm:$0xff] %v1785_v22  ;;  %v1531_v23 = vpop.f32.mrb[35].mxu0  ;;  %v1787_v24 = vpop.f32.mrb[35].mxu1 }
 0x162   : > { %v1534_v25 = vpop.f32.mrb[36].mxu0  ;;  %v1790_v26 = vpop.f32.mrb[36].mxu1 }
 0x163   : > { %2378 = vst [vmem:[%s3307_s30 + $0x90] sm:$0xff] %v1534_v25  ;;  %2442 = vst [vmem:[%s3307_s30 + $0x290] sm:$0xff] %v1790_v26  ;;  %v1536_v27 = vpop.f32.mrb[37].mxu0  ;;  %v1792_v28 = vpop.f32.mrb[37].mxu1 }
 0x164   : > { %v1537_v29 = vpop.f32.mrb[38].mxu0  ;;  %v1793_v30 = vpop.f32.mrb[38].mxu1 }
 0x165   : > { %2379 = vst [vmem:[%s3307_s30 + $0x98] sm:$0xff] %v1537_v29  ;;  %2443 = vst [vmem:[%s3307_s30 + $0x298] sm:$0xff] %v1793_v30  ;;  %v1539_v31 = vpop.f32.mrb[39].mxu0  ;;  %v1795_v32 = vpop.f32.mrb[39].mxu1 }
 0x16a   : > { %v1542_v33 = vpop.f32.mrb[40].mxu0  ;;  %v1798_v34 = vpop.f32.mrb[40].mxu1 }
 0x16b   : > { %2380 = vst [vmem:[%s3307_s30 + $0xa0] sm:$0xff] %v1542_v33  ;;  %2444 = vst [vmem:[%s3307_s30 + $0x2a0] sm:$0xff] %v1798_v34  ;;  %v1544_v35 = vpop.f32.mrb[41].mxu0  ;;  %v1800_v36 = vpop.f32.mrb[41].mxu1 }
 0x16c   : > { %v1545_v37 = vpop.f32.mrb[42].mxu0  ;;  %v1801_v38 = vpop.f32.mrb[42].mxu1 }
 0x16d   : > { %2381 = vst [vmem:[%s3307_s30 + $0xa8] sm:$0xff] %v1545_v37  ;;  %2445 = vst [vmem:[%s3307_s30 + $0x2a8] sm:$0xff] %v1801_v38  ;;  %v1547_v39 = vpop.f32.mrb[43].mxu0  ;;  %v1803_v40 = vpop.f32.mrb[43].mxu1 }
 0x172   : > { %v1550_v41 = vpop.f32.mrb[44].mxu0  ;;  %v1806_v42 = vpop.f32.mrb[44].mxu1 }
 0x173   : > { %2382 = vst [vmem:[%s3307_s30 + $0xb0] sm:$0xff] %v1550_v41  ;;  %2446 = vst [vmem:[%s3307_s30 + $0x2b0] sm:$0xff] %v1806_v42  ;;  %v1552_v43 = vpop.f32.mrb[45].mxu0  ;;  %v1808_v44 = vpop.f32.mrb[45].mxu1 }
 0x174   : > { %v1553_v45 = vpop.f32.mrb[46].mxu0  ;;  %v1809_v46 = vpop.f32.mrb[46].mxu1 }
 0x175   : > { %2383 = vst [vmem:[%s3307_s30 + $0xb8] sm:$0xff] %v1553_v45  ;;  %2447 = vst [vmem:[%s3307_s30 + $0x2b8] sm:$0xff] %v1809_v46  ;;  %v1555_v47 = vpop.f32.mrb[47].mxu0  ;;  %v1811_v48 = vpop.f32.mrb[47].mxu1 }
 0x17a   : > { %v1558_v49 = vpop.f32.mrb[48].mxu0  ;;  %v1814_v50 = vpop.f32.mrb[48].mxu1 }
 0x17b   : > { %2384 = vst [vmem:[%s3307_s30 + $0xc0] sm:$0xff] %v1558_v49  ;;  %2448 = vst [vmem:[%s3307_s30 + $0x2c0] sm:$0xff] %v1814_v50  ;;  %v1560_v51 = vpop.f32.mrb[49].mxu0  ;;  %v1816_v52 = vpop.f32.mrb[49].mxu1 }
 0x17c   : > { %v1561_v53 = vpop.f32.mrb[50].mxu0  ;;  %v1817_v54 = vpop.f32.mrb[50].mxu1 }
 0x17d   : > { %2385 = vst [vmem:[%s3307_s30 + $0xc8] sm:$0xff] %v1561_v53  ;;  %2449 = vst [vmem:[%s3307_s30 + $0x2c8] sm:$0xff] %v1817_v54  ;;  %v1563_v55 = vpop.f32.mrb[51].mxu0  ;;  %v1819_v56 = vpop.f32.mrb[51].mxu1 }
 0x182   : > { %v1566_v57 = vpop.f32.mrb[52].mxu0  ;;  %v1822_v58 = vpop.f32.mrb[52].mxu1 }
 0x183   : > { %2386 = vst [vmem:[%s3307_s30 + $0xd0] sm:$0xff] %v1566_v57  ;;  %2450 = vst [vmem:[%s3307_s30 + $0x2d0] sm:$0xff] %v1822_v58  ;;  %v1568_v59 = vpop.f32.mrb[53].mxu0  ;;  %v1824_v60 = vpop.f32.mrb[53].mxu1 }
 0x184   : > { %v1569_v61 = vpop.f32.mrb[54].mxu0  ;;  %v1825_v62 = vpop.f32.mrb[54].mxu1 }
 0x185   : > { %2387 = vst [vmem:[%s3307_s30 + $0xd8] sm:$0xff] %v1569_v61  ;;  %2451 = vst [vmem:[%s3307_s30 + $0x2d8] sm:$0xff] %v1825_v62  ;;  %v1571_v63 = vpop.f32.mrb[55].mxu0  ;;  %v1827_v0 = vpop.f32.mrb[55].mxu1 }
 0x18a   : > { %v1574_v1 = vpop.f32.mrb[56].mxu0  ;;  %v1830_v2 = vpop.f32.mrb[56].mxu1 }
 0x18b   : > { %2388 = vst [vmem:[%s3307_s30 + $0xe0] sm:$0xff] %v1574_v1  ;;  %2452 = vst [vmem:[%s3307_s30 + $0x2e0] sm:$0xff] %v1830_v2  ;;  %v1576_v3 = vpop.f32.mrb[57].mxu0  ;;  %v1832_v4 = vpop.f32.mrb[57].mxu1 }
 0x18c   : > { %v1577_v5 = vpop.f32.mrb[58].mxu0  ;;  %v1833_v6 = vpop.f32.mrb[58].mxu1 }
 0x18d   : > { %2389 = vst [vmem:[%s3307_s30 + $0xe8] sm:$0xff] %v1577_v5  ;;  %2453 = vst [vmem:[%s3307_s30 + $0x2e8] sm:$0xff] %v1833_v6  ;;  %v1579_v7 = vpop.f32.mrb[59].mxu0  ;;  %v1835_v8 = vpop.f32.mrb[59].mxu1 }
 0x192   : > { %v1582_v9 = vpop.f32.mrb[60].mxu0  ;;  %v1838_v10 = vpop.f32.mrb[60].mxu1 }
 0x193   : > { %2390 = vst [vmem:[%s3307_s30 + $0xf0] sm:$0xff] %v1582_v9  ;;  %2454 = vst [vmem:[%s3307_s30 + $0x2f0] sm:$0xff] %v1838_v10  ;;  %v1584_v11 = vpop.f32.mrb[61].mxu0  ;;  %v1840_v12 = vpop.f32.mrb[61].mxu1 }
 0x194   : > { %v1585_v13 = vpop.f32.mrb[62].mxu0  ;;  %v1841_v14 = vpop.f32.mrb[62].mxu1 }
 0x195   : > { %2391 = vst [vmem:[%s3307_s30 + $0xf8] sm:$0xff] %v1585_v13  ;;  %2455 = vst [vmem:[%s3307_s30 + $0x2f8] sm:$0xff] %v1841_v14  ;;  %v1587_v15 = vpop.f32.mrb[63].mxu0  ;;  %v1843_v16 = vpop.f32.mrb[63].mxu1 }
 0x19a   : > { %v1590_v17 = vpop.f32.mrb[64].mxu0  ;;  %v1846_v18 = vpop.f32.mrb[64].mxu1 }
 0x19b   : > { %2392 = vst [vmem:[%s3307_s30 + $0x100] sm:$0xff] %v1590_v17  ;;  %2456 = vst [vmem:[%s3307_s30 + $0x300] sm:$0xff] %v1846_v18  ;;  %v1592_v19 = vpop.f32.mrb[65].mxu0  ;;  %v1848_v20 = vpop.f32.mrb[65].mxu1 }
 0x19c   : > { %v1593_v21 = vpop.f32.mrb[66].mxu0  ;;  %v1849_v22 = vpop.f32.mrb[66].mxu1 }
 0x19d   : > { %2393 = vst [vmem:[%s3307_s30 + $0x108] sm:$0xff] %v1593_v21  ;;  %2457 = vst [vmem:[%s3307_s30 + $0x308] sm:$0xff] %v1849_v22  ;;  %v1595_v23 = vpop.f32.mrb[67].mxu0  ;;  %v1851_v24 = vpop.f32.mrb[67].mxu1 }
 0x1a2   : > { %v1598_v25 = vpop.f32.mrb[68].mxu0  ;;  %v1854_v26 = vpop.f32.mrb[68].mxu1 }
 0x1a3   : > { %2394 = vst [vmem:[%s3307_s30 + $0x110] sm:$0xff] %v1598_v25  ;;  %2458 = vst [vmem:[%s3307_s30 + $0x310] sm:$0xff] %v1854_v26  ;;  %v1600_v27 = vpop.f32.mrb[69].mxu0  ;;  %v1856_v28 = vpop.f32.mrb[69].mxu1 }
 0x1a4   : > { %v1601_v29 = vpop.f32.mrb[70].mxu0  ;;  %v1857_v30 = vpop.f32.mrb[70].mxu1 }
 0x1a5   : > { %2395 = vst [vmem:[%s3307_s30 + $0x118] sm:$0xff] %v1601_v29  ;;  %2459 = vst [vmem:[%s3307_s30 + $0x318] sm:$0xff] %v1857_v30  ;;  %v1603_v31 = vpop.f32.mrb[71].mxu0  ;;  %v1859_v32 = vpop.f32.mrb[71].mxu1 }
 0x1aa   : > { %v1606_v33 = vpop.f32.mrb[72].mxu0  ;;  %v1862_v34 = vpop.f32.mrb[72].mxu1 }
 0x1ab   : > { %2396 = vst [vmem:[%s3307_s30 + $0x120] sm:$0xff] %v1606_v33  ;;  %2460 = vst [vmem:[%s3307_s30 + $0x320] sm:$0xff] %v1862_v34  ;;  %v1608_v35 = vpop.f32.mrb[73].mxu0  ;;  %v1864_v36 = vpop.f32.mrb[73].mxu1 }
 0x1ac   : > { %v1609_v37 = vpop.f32.mrb[74].mxu0  ;;  %v1865_v38 = vpop.f32.mrb[74].mxu1 }
 0x1ad   : > { %2397 = vst [vmem:[%s3307_s30 + $0x128] sm:$0xff] %v1609_v37  ;;  %2461 = vst [vmem:[%s3307_s30 + $0x328] sm:$0xff] %v1865_v38  ;;  %v1611_v39 = vpop.f32.mrb[75].mxu0  ;;  %v1867_v40 = vpop.f32.mrb[75].mxu1 }
 0x1b2   : > { %v1614_v41 = vpop.f32.mrb[76].mxu0  ;;  %v1870_v42 = vpop.f32.mrb[76].mxu1 }
 0x1b3   : > { %2398 = vst [vmem:[%s3307_s30 + $0x130] sm:$0xff] %v1614_v41  ;;  %2462 = vst [vmem:[%s3307_s30 + $0x330] sm:$0xff] %v1870_v42  ;;  %v1616_v43 = vpop.f32.mrb[77].mxu0  ;;  %v1872_v44 = vpop.f32.mrb[77].mxu1 }
 0x1b4   : > { %v1617_v45 = vpop.f32.mrb[78].mxu0  ;;  %v1873_v46 = vpop.f32.mrb[78].mxu1 }
 0x1b5   : > { %2399 = vst [vmem:[%s3307_s30 + $0x138] sm:$0xff] %v1617_v45  ;;  %2463 = vst [vmem:[%s3307_s30 + $0x338] sm:$0xff] %v1873_v46  ;;  %v1619_v47 = vpop.f32.mrb[79].mxu0  ;;  %v1875_v48 = vpop.f32.mrb[79].mxu1 }
 0x1ba   : > { %v1622_v49 = vpop.f32.mrb[80].mxu0  ;;  %v1878_v50 = vpop.f32.mrb[80].mxu1 }
 0x1bb   : > { %2400 = vst [vmem:[%s3307_s30 + $0x140] sm:$0xff] %v1622_v49  ;;  %2464 = vst [vmem:[%s3307_s30 + $0x340] sm:$0xff] %v1878_v50  ;;  %v1624_v51 = vpop.f32.mrb[81].mxu0  ;;  %v1880_v52 = vpop.f32.mrb[81].mxu1 }
 0x1bc   : > { %v1625_v53 = vpop.f32.mrb[82].mxu0  ;;  %v1881_v54 = vpop.f32.mrb[82].mxu1 }
 0x1bd   : > { %2401 = vst [vmem:[%s3307_s30 + $0x148] sm:$0xff] %v1625_v53  ;;  %2465 = vst [vmem:[%s3307_s30 + $0x348] sm:$0xff] %v1881_v54  ;;  %v1627_v55 = vpop.f32.mrb[83].mxu0  ;;  %v1883_v56 = vpop.f32.mrb[83].mxu1 }
 0x1c2   : > { %v1630_v57 = vpop.f32.mrb[84].mxu0  ;;  %v1886_v58 = vpop.f32.mrb[84].mxu1 }
 0x1c3   : > { %2402 = vst [vmem:[%s3307_s30 + $0x150] sm:$0xff] %v1630_v57  ;;  %2466 = vst [vmem:[%s3307_s30 + $0x350] sm:$0xff] %v1886_v58  ;;  %v1632_v59 = vpop.f32.mrb[85].mxu0  ;;  %v1888_v60 = vpop.f32.mrb[85].mxu1 }
 0x1c4   : > { %v1633_v61 = vpop.f32.mrb[86].mxu0  ;;  %v1889_v62 = vpop.f32.mrb[86].mxu1 }
 0x1c5   : > { %2403 = vst [vmem:[%s3307_s30 + $0x158] sm:$0xff] %v1633_v61  ;;  %2467 = vst [vmem:[%s3307_s30 + $0x358] sm:$0xff] %v1889_v62  ;;  %v1635_v63 = vpop.f32.mrb[87].mxu0  ;;  %v1891_v0 = vpop.f32.mrb[87].mxu1 }
 0x1ca   : > { %v1638_v1 = vpop.f32.mrb[88].mxu0  ;;  %v1894_v2 = vpop.f32.mrb[88].mxu1 }
 0x1cb   : > { %2404 = vst [vmem:[%s3307_s30 + $0x160] sm:$0xff] %v1638_v1  ;;  %2468 = vst [vmem:[%s3307_s30 + $0x360] sm:$0xff] %v1894_v2  ;;  %v1640_v3 = vpop.f32.mrb[89].mxu0  ;;  %v1896_v4 = vpop.f32.mrb[89].mxu1 }
 0x1cc   : > { %v1641_v5 = vpop.f32.mrb[90].mxu0  ;;  %v1897_v6 = vpop.f32.mrb[90].mxu1 }
 0x1cd   : > { %2405 = vst [vmem:[%s3307_s30 + $0x168] sm:$0xff] %v1641_v5  ;;  %2469 = vst [vmem:[%s3307_s30 + $0x368] sm:$0xff] %v1897_v6  ;;  %v1643_v7 = vpop.f32.mrb[91].mxu0  ;;  %v1899_v8 = vpop.f32.mrb[91].mxu1 }
 0x1d2   : > { %v1646_v9 = vpop.f32.mrb[92].mxu0  ;;  %v1902_v10 = vpop.f32.mrb[92].mxu1 }
 0x1d3   : > { %2406 = vst [vmem:[%s3307_s30 + $0x170] sm:$0xff] %v1646_v9  ;;  %2470 = vst [vmem:[%s3307_s30 + $0x370] sm:$0xff] %v1902_v10  ;;  %v1648_v11 = vpop.f32.mrb[93].mxu0  ;;  %v1904_v12 = vpop.f32.mrb[93].mxu1 }
 0x1d4   : > { %v1649_v13 = vpop.f32.mrb[94].mxu0  ;;  %v1905_v14 = vpop.f32.mrb[94].mxu1 }
 0x1d5   : > { %2407 = vst [vmem:[%s3307_s30 + $0x178] sm:$0xff] %v1649_v13  ;;  %2471 = vst [vmem:[%s3307_s30 + $0x378] sm:$0xff] %v1905_v14  ;;  %v1651_v15 = vpop.f32.mrb[95].mxu0  ;;  %v1907_v16 = vpop.f32.mrb[95].mxu1 }
 0x1da   : > { %v1654_v17 = vpop.f32.mrb[96].mxu0  ;;  %v1910_v18 = vpop.f32.mrb[96].mxu1 }
 0x1db   : > { %2408 = vst [vmem:[%s3307_s30 + $0x180] sm:$0xff] %v1654_v17  ;;  %2472 = vst [vmem:[%s3307_s30 + $0x380] sm:$0xff] %v1910_v18  ;;  %v1656_v19 = vpop.f32.mrb[97].mxu0  ;;  %v1912_v20 = vpop.f32.mrb[97].mxu1 }
 0x1dc   : > { %v1657_v21 = vpop.f32.mrb[98].mxu0  ;;  %v1913_v22 = vpop.f32.mrb[98].mxu1 }
 0x1dd   : > { %2409 = vst [vmem:[%s3307_s30 + $0x188] sm:$0xff] %v1657_v21  ;;  %2473 = vst [vmem:[%s3307_s30 + $0x388] sm:$0xff] %v1913_v22  ;;  %v1659_v23 = vpop.f32.mrb[99].mxu0  ;;  %v1915_v24 = vpop.f32.mrb[99].mxu1 }
 0x1e2   : > { %v1662_v25 = vpop.f32.mrb[100].mxu0  ;;  %v1918_v26 = vpop.f32.mrb[100].mxu1 }
 0x1e3   : > { %2410 = vst [vmem:[%s3307_s30 + $0x190] sm:$0xff] %v1662_v25  ;;  %2474 = vst [vmem:[%s3307_s30 + $0x390] sm:$0xff] %v1918_v26  ;;  %v1664_v27 = vpop.f32.mrb[101].mxu0  ;;  %v1920_v28 = vpop.f32.mrb[101].mxu1 }
 0x1e4   : > { %v1665_v29 = vpop.f32.mrb[102].mxu0  ;;  %v1921_v30 = vpop.f32.mrb[102].mxu1 }
 0x1e5   : > { %2411 = vst [vmem:[%s3307_s30 + $0x198] sm:$0xff] %v1665_v29  ;;  %2475 = vst [vmem:[%s3307_s30 + $0x398] sm:$0xff] %v1921_v30  ;;  %v1667_v31 = vpop.f32.mrb[103].mxu0  ;;  %v1923_v32 = vpop.f32.mrb[103].mxu1 }
 0x1ea   : > { %v1670_v33 = vpop.f32.mrb[104].mxu0  ;;  %v1926_v34 = vpop.f32.mrb[104].mxu1 }
 0x1eb   : > { %2412 = vst [vmem:[%s3307_s30 + $0x1a0] sm:$0xff] %v1670_v33  ;;  %2476 = vst [vmem:[%s3307_s30 + $0x3a0] sm:$0xff] %v1926_v34  ;;  %v1672_v35 = vpop.f32.mrb[105].mxu0  ;;  %v1928_v36 = vpop.f32.mrb[105].mxu1 }
 0x1ec   : > { %v1673_v37 = vpop.f32.mrb[106].mxu0  ;;  %v1929_v38 = vpop.f32.mrb[106].mxu1 }
 0x1ed   : > { %2413 = vst [vmem:[%s3307_s30 + $0x1a8] sm:$0xff] %v1673_v37  ;;  %2477 = vst [vmem:[%s3307_s30 + $0x3a8] sm:$0xff] %v1929_v38  ;;  %v1675_v39 = vpop.f32.mrb[107].mxu0  ;;  %v1931_v40 = vpop.f32.mrb[107].mxu1 }
 0x1f2   : > { %v1678_v41 = vpop.f32.mrb[108].mxu0  ;;  %v1934_v42 = vpop.f32.mrb[108].mxu1 }
 0x1f3   : > { %2414 = vst [vmem:[%s3307_s30 + $0x1b0] sm:$0xff] %v1678_v41  ;;  %2478 = vst [vmem:[%s3307_s30 + $0x3b0] sm:$0xff] %v1934_v42  ;;  %v1680_v43 = vpop.f32.mrb[109].mxu0  ;;  %v1936_v44 = vpop.f32.mrb[109].mxu1 }
 0x1f4   : > { %v1681_v45 = vpop.f32.mrb[110].mxu0  ;;  %v1937_v46 = vpop.f32.mrb[110].mxu1 }
 0x1f5   : > { %2415 = vst [vmem:[%s3307_s30 + $0x1b8] sm:$0xff] %v1681_v45  ;;  %2479 = vst [vmem:[%s3307_s30 + $0x3b8] sm:$0xff] %v1937_v46  ;;  %v1683_v47 = vpop.f32.mrb[111].mxu0  ;;  %v1939_v48 = vpop.f32.mrb[111].mxu1 }
 0x1fa   : > { %v1686_v49 = vpop.f32.mrb[112].mxu0  ;;  %v1942_v50 = vpop.f32.mrb[112].mxu1 }
 0x1fb   : > { %2416 = vst [vmem:[%s3307_s30 + $0x1c0] sm:$0xff] %v1686_v49  ;;  %2480 = vst [vmem:[%s3307_s30 + $0x3c0] sm:$0xff] %v1942_v50  ;;  %v1688_v51 = vpop.f32.mrb[113].mxu0  ;;  %v1944_v52 = vpop.f32.mrb[113].mxu1 }
 0x1fc   : > { %v1689_v53 = vpop.f32.mrb[114].mxu0  ;;  %v1945_v54 = vpop.f32.mrb[114].mxu1 }
 0x1fd   : > { %2417 = vst [vmem:[%s3307_s30 + $0x1c8] sm:$0xff] %v1689_v53  ;;  %2481 = vst [vmem:[%s3307_s30 + $0x3c8] sm:$0xff] %v1945_v54  ;;  %v1691_v55 = vpop.f32.mrb[115].mxu0  ;;  %v1947_v56 = vpop.f32.mrb[115].mxu1 }
 0x202   : > { %v1694_v57 = vpop.f32.mrb[116].mxu0  ;;  %v1950_v58 = vpop.f32.mrb[116].mxu1 }
 0x203   : > { %2418 = vst [vmem:[%s3307_s30 + $0x1d0] sm:$0xff] %v1694_v57  ;;  %2482 = vst [vmem:[%s3307_s30 + $0x3d0] sm:$0xff] %v1950_v58  ;;  %v1696_v59 = vpop.f32.mrb[117].mxu0  ;;  %v1952_v60 = vpop.f32.mrb[117].mxu1 }
 0x204   : > { %v1697_v61 = vpop.f32.mrb[118].mxu0  ;;  %v1953_v62 = vpop.f32.mrb[118].mxu1 }
 0x205   : > { %2419 = vst [vmem:[%s3307_s30 + $0x1d8] sm:$0xff] %v1697_v61  ;;  %2483 = vst [vmem:[%s3307_s30 + $0x3d8] sm:$0xff] %v1953_v62  ;;  %v1699_v63 = vpop.f32.mrb[119].mxu0  ;;  %v1955_v0 = vpop.f32.mrb[119].mxu1 }
 0x20a   : > { %v1702_v1 = vpop.f32.mrb[120].mxu0  ;;  %v1958_v2 = vpop.f32.mrb[120].mxu1 }
 0x20b   : > { %2420 = vst [vmem:[%s3307_s30 + $0x1e0] sm:$0xff] %v1702_v1  ;;  %2484 = vst [vmem:[%s3307_s30 + $0x3e0] sm:$0xff] %v1958_v2  ;;  %v1704_v3 = vpop.f32.mrb[121].mxu0  ;;  %v1960_v4 = vpop.f32.mrb[121].mxu1 }
 0x20c   : > { %v1705_v5 = vpop.f32.mrb[122].mxu0  ;;  %v1961_v6 = vpop.f32.mrb[122].mxu1 }
 0x20d   : > { %2421 = vst [vmem:[%s3307_s30 + $0x1e8] sm:$0xff] %v1705_v5  ;;  %2485 = vst [vmem:[%s3307_s30 + $0x3e8] sm:$0xff] %v1961_v6  ;;  %v1707_v7 = vpop.f32.mrb[123].mxu0  ;;  %v1963_v8 = vpop.f32.mrb[123].mxu1 }
 0x212   : > { %v1710_v9 = vpop.f32.mrb[124].mxu0  ;;  %v1966_v10 = vpop.f32.mrb[124].mxu1 }
 0x213   : > { %2422 = vst [vmem:[%s3307_s30 + $0x1f0] sm:$0xff] %v1710_v9  ;;  %2486 = vst [vmem:[%s3307_s30 + $0x3f0] sm:$0xff] %v1966_v10  ;;  %v1712_v11 = vpop.f32.mrb[125].mxu0  ;;  %v1968_v12 = vpop.f32.mrb[125].mxu1 }
 0x214   : > { %v1713_v13 = vpop.f32.mrb[126].mxu0  ;;  %v1969_v14 = vpop.f32.mrb[126].mxu1 }
 0x215   : > { %2423 = vst [vmem:[%s3307_s30 + $0x1f8] sm:$0xff] %v1713_v13  ;;  %2487 = vst [vmem:[%s3307_s30 + $0x3f8] sm:$0xff] %v1969_v14  ;;  %v1715_v15 = vpop.f32.mrb[127].mxu0  ;;  %v1971_v16 = vpop.f32.mrb[127].mxu1 }
 0x216 PF: > { %s12_s11 = sadd.s32 1, %s3066_s11   ;;  %s3467_s9 = smov %s3062_s10 }
 0x217   : > { %p9_p5 = scmp.ge.s32.totalorder %s12_s11, 10   ;;  %s3468_s10 = smov %s3470_s12 }
 0x219   :  { %11 = sbr.rel (!%p9_p5) target bundleno = 2 (0x2), region = 69 }

// kernel: tile.62
= control target key start
LH: loop header
LB: loop body
LE: loop exit
PB: predicated region body
PF: predicated region fallthrough
CT: control target
= control target key end

     0   :  { %s20_s0 = inlined_call_operand.<no memory space> [shape: f32[], index: 0, kind: input, shape index: {}]   ;;  %s21_s1 = inlined_call_operand.vmem [shape: f32[1,128], index: 1, kind: output, shape index: {}]  }
   0x1   :  { %v2_v0 = vstv %s20_s0 }
   0x2   :  { %3 = vst [vmem:[%s21_s1] sm:$0x1] %v2_v0 }

// kernel: forward.27
= control target key start
LH: loop header
LB: loop body
LE: loop exit
PB: predicated region body
PF: predicated region fallthrough
CT: control target
= control target key end

     0   :  { %s220_s0 = inlined_call_operand.vmem [shape: f32[64,128], index: 0, kind: input, shape index: {}]   ;;  %s221_s1 = inlined_call_operand.vmem [shape: f32[1,128], index: 1, kind: input, shape index: {}]   ;;  %s222_s2 = inlined_call_operand.vmem [shape: f32[1,128], index: 2, kind: input, shape index: {}]   ;;  %s223_s3 = inlined_call_operand.vmem [shape: f32[64,128], index: 3, kind: output, shape index: {}]  }
   0x1   :  { %v14_v0 = vld [vmem:[%s220_s0] sm:$0xff]  ;;  %v15_v4 = vld [vmem:[%s220_s0 + $0x8] sm:$0xff]  ;;  %v16_v5 = vld [vmem:[%s220_s0 + $0x10] sm:$0xff] }
   0x2   :  { %v112_v1 = vld [vmem:[%s221_s1] ss:$0 sm:$0xff]  ;;  %v17_v6 = vld [vmem:[%s220_s0 + $0x18] sm:$0xff]  ;;  %v19_v11 = vld [vmem:[%s220_s0 + $0x28] sm:$0xff] }
   0x3   :  { %v113_v2 = vld [vmem:[%s222_s2] ss:$0 sm:$0xff]  ;;  %v29_v3 = vmul.f32 %v112_v1, %v14_v0  ;;  %v30_v7 = vmul.f32 %v112_v1, %v15_v4  ;;  %v31_v8 = vmul.f32 %v112_v1, %v16_v5  ;;  %v32_v9 = vmul.f32 %v112_v1, %v17_v6  ;;  %v20_v12 = vld [vmem:[%s220_s0 + $0x30] sm:$0xff]  ;;  %v21_v17 = vld [vmem:[%s220_s0 + $0x38] sm:$0xff] }
   0x4   :  { %v18_v10 = vld [vmem:[%s220_s0 + $0x20] sm:$0xff]  ;;  %v34_v15 = vmul.f32 %v112_v1, %v19_v11  ;;  %v35_v16 = vmul.f32 %v112_v1, %v20_v12  ;;  %v36_v21 = vmul.f32 %v112_v1, %v21_v17 }
   0x5   :  { %v44_v13 = vadd.f32 %v113_v2, %v29_v3  ;;  %v33_v14 = vmul.f32 %v112_v1, %v18_v10  ;;  %v45_v18 = vadd.f32 %v113_v2, %v30_v7  ;;  %v46_v19 = vadd.f32 %v113_v2, %v31_v8 }
   0x6   :  { %v47_v20 = vadd.f32 %v113_v2, %v32_v9  ;;  %v49_v24 = vadd.f32 %v113_v2, %v34_v15  ;;  %v50_v25 = vadd.f32 %v113_v2, %v35_v16  ;;  %v51_v29 = vadd.f32 %v113_v2, %v36_v21 }
   0x7   :  { %v52_v22 = vsub.f32 0.0, %v44_v13  ;;  %v48_v23 = vadd.f32 %v113_v2, %v33_v14  ;;  %v53_v26 = vsub.f32 0.0, %v45_v18  ;;  %v54_v27 = vsub.f32 0.0, %v46_v19 }
   0x8   :  { %v55_v28 = vsub.f32 0.0, %v47_v20  ;;  %v57_v32 = vsub.f32 0.0, %v49_v24  ;;  %v58_v33 = vsub.f32 0.0, %v50_v25  ;;  %v59_v39 = vsub.f32 0.0, %v51_v29 }
   0x9   :  { %v60_v30 = vmul.f32 1.442695, %v52_v22  ;;  %v56_v31 = vsub.f32 0.0, %v48_v23  ;;  %v62_v34 = vmul.f32 1.442695, %v53_v26 }
   0xa   :  { %v64_v35 = vmul.f32 1.442695, %v54_v27  ;;  %v66_v36 = vmul.f32 1.442695, %v55_v28  ;;  %v70_v38 = vmul.f32 1.442695, %v57_v32 }
   0xb   :  { %114 = vpow2.f32 %v60_v30  ;;  %v68_v37 = vmul.f32 1.442695, %v56_v31  ;;  %v72_v40 = vmul.f32 1.442695, %v58_v33  ;;  %v74_v41 = vmul.f32 1.442695, %v59_v39 }
   0xc   :  { %116 = vpow2.f32 %v62_v34 }
   0xd   :  { %118 = vpow2.f32 %v64_v35 }
   0xe   :  { %120 = vpow2.f32 %v66_v36 }
   0xf   :  { %122 = vpow2.f32 %v68_v37 }
  0x10   :  { %124 = vpow2.f32 %v70_v38 }
  0x11   :  { %126 = vpow2.f32 %v72_v40 }
  0x12   :  { %128 = vpow2.f32 %v74_v41 }
  0x15   :  { %v115_v42 = vpop.eup %114 }
  0x16   :  { %v117_v43 = vpop.eup %116  ;;  %v76_v44 = vadd.f32 1.0, %v115_v42 }
  0x17   :  { %v119_v45 = vpop.eup %118  ;;  %v77_v46 = vadd.f32 1.0, %v117_v43 }
  0x18   :  { %v121_v47 = vpop.eup %120  ;;  %130 = vrcp.f32 %v76_v44  ;;  %v78_v48 = vadd.f32 1.0, %v119_v45 }
  0x19   :  { %v123_v49 = vpop.eup %122  ;;  %132 = vrcp.f32 %v77_v46  ;;  %v79_v50 = vadd.f32 1.0, %v121_v47 }
  0x1a   :  { %v125_v51 = vpop.eup %124  ;;  %134 = vrcp.f32 %v78_v48  ;;  %v80_v52 = vadd.f32 1.0, %v123_v49 }
  0x1b   :  { %v127_v53 = vpop.eup %126  ;;  %136 = vrcp.f32 %v79_v50  ;;  %v81_v54 = vadd.f32 1.0, %v125_v51 }
  0x1c   :  { %v129_v55 = vpop.eup %128  ;;  %138 = vrcp.f32 %v80_v52  ;;  %v82_v56 = vadd.f32 1.0, %v127_v53 }
  0x1d   :  { %140 = vrcp.f32 %v81_v54  ;;  %v83_v57 = vadd.f32 1.0, %v129_v55 }
  0x1e   :  { %142 = vrcp.f32 %v82_v56 }
  0x1f   :  { %144 = vrcp.f32 %v83_v57 }
  0x22   :  { %v131_v58 = vpop.eup %130 }
  0x23   :  { %v133_v59 = vpop.eup %132  ;;  %100 = vst [vmem:[%s223_s3] sm:$0xff] %v131_v58 }
  0x24   :  { %v135_v60 = vpop.eup %134  ;;  %101 = vst [vmem:[%s223_s3 + $0x8] sm:$0xff] %v133_v59 }
  0x25   :  { %v137_v61 = vpop.eup %136  ;;  %102 = vst [vmem:[%s223_s3 + $0x10] sm:$0xff] %v135_v60 }
  0x26   :  { %v139_v62 = vpop.eup %138  ;;  %103 = vst [vmem:[%s223_s3 + $0x18] sm:$0xff] %v137_v61 }
  0x27   :  { %v141_v63 = vpop.eup %140  ;;  %104 = vst [vmem:[%s223_s3 + $0x20] sm:$0xff] %v139_v62 }
  0x28   :  { %v143_v0 = vpop.eup %142  ;;  %105 = vst [vmem:[%s223_s3 + $0x28] sm:$0xff] %v141_v63 }
  0x29   :  { %v145_v1 = vpop.eup %144  ;;  %106 = vst [vmem:[%s223_s3 + $0x30] sm:$0xff] %v143_v0 }
  0x2a   :  { %107 = vst [vmem:[%s223_s3 + $0x38] sm:$0xff] %v145_v1 }

</bundles_post_ra>
